<compile_context>
chip_gen: v6e
topology: v6e:2x2x1
jax: 0.10.0
libtpu: 0.0.40
codegen_flags: <defaults>
</compile_context>

<pallas_src>
import functools

import jax
import jax.numpy as jnp
from jax.experimental import pallas as pl
from jax.experimental.pallas import tpu as pltpu

BN_EPS = 1e-5
# (Cin, Cout, stride) for the six ConvBNReLU stages (32x32 CIFAR input).
CONV_CFG = [(3, 16, 2), (16, 16, 1), (16, 32, 2), (32, 32, 1), (32, 64, 2), (64, 64, 1)]

VMEM_LIMIT_BYTES = 32 * 1024 * 1024   # >= every generation's scoped default, <= v7x physical
STEP_ACT_BUDGET = 4 * 1024 * 1024     # x + z bytes per grid step, before double buffering
IMAGES_CAP = 256


def _round_up(x, m):
    return (x + m - 1) // m * m


def _pick_images_per_step(batch, per_image_bytes):
    """Images per grid step: VMEM-budgeted, >=2 steps for batches > 8, 16-aligned blocks."""
    limit = int(min(IMAGES_CAP, max(16, STEP_ACT_BUDGET // max(per_image_bytes, 1))))
    if batch > 8:
        limit = min(limit, max(8, batch // 2))      # keep >= 2 grid steps (v7x megacore)
    if batch <= limit:
        return batch                                 # single step: full-dim row block, always legal
    limit16 = max(16, (limit // 16) * 16)            # sublane/packing-aligned row blocks
    nsteps = -(-batch // limit16)
    return _round_up(-(-batch // nsteps), 16)        # minimize batch padding


# ---------------------------------------------------------------------------
# Pallas kernels
# ---------------------------------------------------------------------------
def _conv_stage_kernel(x_ref, w_ref, z_ref, stats_ref, *,
                       rz, rx, hin_eff, hout, ntaps, rows_real):
    """One grid step of a ConvBNReLU stage (conv + BN batch statistics).

    x_ref:    (rx, K)        bf16  flat padded rows, row = b*hin_eff + h
    w_ref:    (ntaps, K, N)  bf16  block-banded tap weights, N = Wout*Cout (lane-dense)
    z_ref:    (rx, N)        bf16  raw conv output rows (last ntaps-1 rows are padding)
    stats_ref:(1, 2, N)      f32   [sum; sum of squares] over valid output rows
    """
    acc = jnp.dot(x_ref[0:rz, :], w_ref[0], preferred_element_type=jnp.float32)
    for t in range(1, ntaps):
        acc = acc + jnp.dot(x_ref[t:t + rz, :], w_ref[t],
                            preferred_element_type=jnp.float32)
    z_ref[0:rz, :] = acc.astype(z_ref.dtype)
    z_ref[rz:rx, :] = jnp.zeros((rx - rz, z_ref.shape[1]), z_ref.dtype)

    row = jax.lax.broadcasted_iota(jnp.int32, (rz, 1), 0)
    valid = (row % hin_eff) < hout                                    # inter-image garbage rows
    valid = jnp.logical_and(valid, row + pl.program_id(0) * rx < rows_real)  # batch padding
    zm = acc * valid.astype(jnp.float32)
    stats_ref[0, 0:1, :] = jnp.sum(zm, axis=0, keepdims=True)
    stats_ref[0, 1:2, :] = jnp.sum(zm * acc, axis=0, keepdims=True)


def _head_kernel(x_ref, w_ref, b_ref, o_ref):
    """Fused (Linear(1024,2), Linear(1024,10)) head; output padded to 128 lanes."""
    o_ref[...] = (jnp.dot(x_ref[...], w_ref[...], preferred_element_type=jnp.float32)
                  + b_ref[...])


# ---------------------------------------------------------------------------
# XLA glue: layout prep + banded weights + BN epilogue
# ---------------------------------------------------------------------------
def _prep_rows(a, stride):
    """[B, H, W, C] f32 -> (bf16 [B*hin_eff, K], hin_eff).

    Pads H and W by 1, flattens (width, channel) into lanes; for stride 2 also
    folds even/odd rows into the lane dim (equivalent 2-tap stride-1 conv)."""
    b, h, w, c = a.shape
    apad = jnp.pad(a, ((0, 0), (1, 1), (1, 1), (0, 0))).reshape(b, h + 2, (w + 2) * c)
    if stride == 1:
        x, hin_eff = apad, h + 2
    else:
        x = jnp.concatenate([apad[:, 0::2, :], apad[:, 1::2, :]], axis=-1)
        hin_eff = h // 2 + 1
    return x.reshape(b * hin_eff, x.shape[-1]).astype(jnp.bfloat16), hin_eff


def _band_weights(w, win, stride):
    """torch conv weight [Cout, Cin, 3, 3] -> banded tap weights [ntaps, K, Wout*Cout].

    The kw / channel mixing is folded into the banded matrix; only kh taps remain
    as row shifts.  stride 1: 3 taps, K = (Win+2)*Cin.  stride 2: 2 taps on the
    even/odd-folded rows, K = 2*(Win+2)*Cin (second half of tap 1 is zero)."""
    cout, cin = w.shape[0], w.shape[1]
    wout = win // stride
    wp = win + 2

    def band(kh):
        cols = jnp.arange(wout) * stride
        t = jnp.zeros((wp * cin, wout * cout), jnp.float32)
        for kw in range(3):
            ind = (jnp.arange(wp)[:, None] == (cols[None, :] + kw)).astype(jnp.float32)
            t = t + jnp.kron(ind, w[:, :, kh, kw].T.astype(jnp.float32))
        return t

    if stride == 1:
        taps = jnp.stack([band(0), band(1), band(2)], axis=0)
    else:
        zero = jnp.zeros((wp * cin, wout * cout), jnp.float32)
        taps = jnp.stack([jnp.concatenate([band(0), band(1)], axis=0),
                          jnp.concatenate([band(2), zero], axis=0)], axis=0)
    return taps.astype(jnp.bfloat16)


def conv_bn_relu_stage(a, w, gamma, beta, stride):
    """One ConvBNReLU stage. a: [B, H, W, Cin] f32 (NHWC) -> [B, H/s, W/s, Cout] f32."""
    batch, hin, win, _cin = a.shape
    hout, wout = hin // stride, win // stride
    cout = w.shape[0]
    ntaps = 3 if stride == 1 else 2
    nlan = wout * cout                               # 256 for every stage -> lane-dense

    x_rows, hin_eff = _prep_rows(a, stride)
    taps = _band_weights(w, win, stride)
    k = x_rows.shape[1]

    per_img = hin_eff * (k + nlan) * 2               # bf16 x + z bytes per image
    images = _pick_images_per_step(batch, per_img)
    bpad = _round_up(batch, images)
    if bpad != batch:                                # padded images are masked out of the stats
        x_rows = jnp.pad(x_rows, ((0, (bpad - batch) * hin_eff), (0, 0)))
    nblk = bpad // images
    rx = images * hin_eff
    rz = rx - (ntaps - 1)

    kernel = functools.partial(_conv_stage_kernel, rz=rz, rx=rx, hin_eff=hin_eff,
                               hout=hout, ntaps=ntaps, rows_real=batch * hin_eff)
    z_rows, stats = pl.pallas_call(
        kernel,
        grid=(nblk,),
        out_shape=(
            jax.ShapeDtypeStruct((bpad * hin_eff, nlan), jnp.bfloat16),
            jax.ShapeDtypeStruct((nblk, 2, nlan), jnp.float32),
        ),
        in_specs=[
            pl.BlockSpec((rx, k), lambda g: (g, 0)),
            pl.BlockSpec((ntaps, k, nlan), lambda g: (0, 0, 0)),
        ],
        out_specs=(
            pl.BlockSpec((rx, nlan), lambda g: (g, 0)),
            pl.BlockSpec((1, 2, nlan), lambda g: (g, 0, 0)),
        ),
        compiler_params=pltpu.CompilerParams(
            dimension_semantics=("parallel",),
            vmem_limit_bytes=VMEM_LIMIT_BYTES),
    )(x_rows, taps)

    # BatchNorm2d (training-mode batch statistics, biased variance) + ReLU, fused by XLA
    # with the garbage-row slice and with the next stage's pad / fold / bf16 cast.
    n = batch * hout * wout
    st = jnp.sum(stats, axis=0).reshape(2, wout, cout).sum(axis=1)    # [2, Cout]
    mean = st[0] / n
    var = jnp.maximum(st[1] / n - mean * mean, 0.0)
    scale = gamma * jax.lax.rsqrt(var + BN_EPS)
    shift = beta - mean * scale
    z = z_rows.reshape(bpad, hin_eff, wout, cout)[:batch, :hout]
    return jnp.maximum(z.astype(jnp.float32) * scale + shift, 0.0)


def head(feat_nhwc, w1, b1, w2, b2):
    """feat_nhwc: [B, 4, 4, 64] -> (y [B,10], h [B,2]).

    Reproduces torch's Flatten (CHW order) -> Linear(1024,2) -> Linear(2,10)
    with one lane-dense fused bf16 matmul (w12 = w1 @ w2)."""
    batch, h4, w4, c = feat_nhwc.shape
    flat = feat_nhwc.reshape(batch, h4 * w4 * c)                  # NHWC flatten
    # Permute fc1 rows from torch's CHW-flatten order to our NHWC-flatten order.
    perm = jnp.arange(c * h4 * w4).reshape(c, h4, w4).transpose(1, 2, 0).reshape(-1)
    w1p = w1[perm, :]                                             # [1024, 2]
    w12 = w1p @ w2                                                # [1024, 10]
    b12 = b1 @ w2 + b2                                            # [10]
    wh = jnp.concatenate([w1p, w12], axis=1)                      # [1024, 12]
    bh = jnp.concatenate([b1, b12], axis=0)                       # [12]
    npad = 128                                                    # lane-dense output
    wh = jnp.pad(wh, ((0, 0), (0, npad - wh.shape[1]))).astype(jnp.bfloat16)
    bh = jnp.pad(bh, (0, npad - bh.shape[0]))[None, :].astype(jnp.float32)

    d = flat.shape[1]
    tb = 128 if batch > 128 else _round_up(batch, 8)
    bp = _round_up(batch, tb)
    flat_p = jnp.pad(flat, ((0, bp - batch), (0, 0))).astype(jnp.bfloat16)

    out = pl.pallas_call(
        _head_kernel,
        grid=(bp // tb,),
        out_shape=jax.ShapeDtypeStruct((bp, npad), jnp.float32),
        in_specs=[
            pl.BlockSpec((tb, d), lambda g: (g, 0)),
            pl.BlockSpec((d, npad), lambda g: (0, 0)),
            pl.BlockSpec((1, npad), lambda g: (0, 0)),
        ],
        out_specs=pl.BlockSpec((tb, npad), lambda g: (g, 0)),
        compiler_params=pltpu.CompilerParams(dimension_semantics=("parallel",)),
    )(flat_p, wh, bh)
    h_out = out[:batch, 0:2]
    y_out = out[:batch, 2:12]
    return y_out, h_out


# ---------------------------------------------------------------------------
# Parameters and full forward
# ---------------------------------------------------------------------------
def init_params(key):
    params = {"conv": []}
    keys = jax.random.split(key, len(CONV_CFG) + 2)
    for i, (cin, cout, _stride) in enumerate(CONV_CFG):
        fan_in = cin * 9
        w = jax.random.normal(keys[i], (cout, cin, 3, 3), jnp.float32) / jnp.sqrt(fan_in)
        gamma = jnp.ones((cout,), jnp.float32)
        beta = jnp.zeros((cout,), jnp.float32)
        # NOTE: the Conv2d bias is omitted on purpose -- training-mode BatchNorm with
        # batch statistics immediately follows each conv and exactly cancels it.
        params["conv"].append((w, gamma, beta))
    k1a, k1b = jax.random.split(keys[-2])
    # fc1 rows are indexed in torch's CHW flatten order (c*16 + h*4 + w).
    params["fc1_w"] = jax.random.normal(k1a, (4 * 4 * 64, 2), jnp.float32) / jnp.sqrt(1024.0)
    params["fc1_b"] = jax.random.normal(k1b, (2,), jnp.float32) * 0.01
    k2a, k2b = jax.random.split(keys[-1])
    params["fc2_w"] = jax.random.normal(k2a, (2, 10), jnp.float32) / jnp.sqrt(2.0)
    params["fc2_b"] = jax.random.normal(k2b, (10,), jnp.float32) * 0.01
    return params


def image_classify_forward(params, x):
    """x: [B, 3, 32, 32] float32 (NCHW, as in the torch module). Returns (y [B,10], h [B,2])."""
    a = jnp.transpose(x, (0, 2, 3, 1))          # single NCHW->NHWC permute, then stay channel-minor
    for (w, gamma, beta), (_cin, _cout, stride) in zip(params["conv"], CONV_CFG):
        a = conv_bn_relu_stage(a, w, gamma, beta, stride)
    return head(a, params["fc1_w"], params["fc1_b"], params["fc2_w"], params["fc2_b"])


if __name__ == "__main__":
    key = jax.random.PRNGKey(0)
    k_param, k_x = jax.random.split(key)
    params = init_params(k_param)
    # CIFAR-shaped input: the Linear(4*4*64, 2) head requires 32x32 spatial.
    x = jax.random.normal(k_x, (2, 3, 32, 32), jnp.float32)

    fwd = jax.jit(image_classify_forward)
    y, h = fwd(params, x)
    y = jax.block_until_ready(y)
    h = jax.block_until_ready(h)

    assert y.shape == (2, 10) and h.shape == (2, 2)
    assert y.dtype == jnp.float32 and h.dtype == jnp.float32
    assert bool(jnp.all(jnp.isfinite(y))) and bool(jnp.all(jnp.isfinite(h)))
    print("KERNEL_OK")
</pallas_src>

<mosaic_0001>
module attributes {stable_mosaic.version = 11 : i64} {
  func.func @_conv_stage_kernel(%arg0: i32, %arg1: memref<34x204xbf16, #tpu.memory_space<vmem>>, %arg2: memref<2x204x256xbf16, #tpu.memory_space<vmem>>, %arg3: memref<34x256xbf16, #tpu.memory_space<vmem>>, %arg4: memref<1x2x256xf32, #tpu.memory_space<vmem>>) attributes {dimension_semantics = [#tpu.dimension_semantics<parallel>], iteration_bounds = array<i64: 1>, scalar_prefetch = 0 : i64, scratch_operands = 0 : i64, tpu.core_type = #tpu.core_type<tc>, window_params = [{transform_indices = @transform_0, window_bounds = array<i64: 34, 204>}, {pipeline_mode = #tpu.pipeline_mode<synchronous>, transform_indices = @transform_1, window_bounds = array<i64: 2, 204, 256>}, {transform_indices = @transform_2, window_bounds = array<i64: 34, 256>}, {transform_indices = @transform_3, window_bounds = array<i64: 1, 2, 256>}]} {
    %c0 = arith.constant 0 : index
    %c0_0 = arith.constant 0 : index
    %0 = vector.load %arg1[%c0, %c0_0] : memref<34x204xbf16, #tpu.memory_space<vmem>>, vector<33x204xbf16>
    %c0_1 = arith.constant 0 : index
    %c0_2 = arith.constant 0 : index
    %c0_3 = arith.constant 0 : index
    %1 = vector.load %arg2[%c0_1, %c0_2, %c0_3] : memref<2x204x256xbf16, #tpu.memory_space<vmem>>, vector<1x204x256xbf16>
    %2 = vector.shape_cast %1 : vector<1x204x256xbf16> to vector<204x256xbf16>
    %cst = arith.constant dense<0.000000e+00> : vector<33x256xf32>
    %3 = tpu.matmul %0, %2, %cst {dimension_numbers = #tpu.dot_dimension_numbers<[1], [0], [0], [1], [0, 0, 1, 1], [], []>} : vector<33x204xbf16>, vector<204x256xbf16>, vector<33x256xf32> -> vector<33x256xf32>
    %c1 = arith.constant 1 : index
    %c0_4 = arith.constant 0 : index
    %4 = vector.load %arg1[%c1, %c0_4] : memref<34x204xbf16, #tpu.memory_space<vmem>>, vector<33x204xbf16>
    %c1_5 = arith.constant 1 : index
    %c0_6 = arith.constant 0 : index
    %c0_7 = arith.constant 0 : index
    %5 = vector.load %arg2[%c1_5, %c0_6, %c0_7] : memref<2x204x256xbf16, #tpu.memory_space<vmem>>, vector<1x204x256xbf16>
    %6 = vector.shape_cast %5 : vector<1x204x256xbf16> to vector<204x256xbf16>
    %cst_8 = arith.constant dense<0.000000e+00> : vector<33x256xf32>
    %7 = tpu.matmul %4, %6, %cst_8 {dimension_numbers = #tpu.dot_dimension_numbers<[1], [0], [0], [1], [0, 0, 1, 1], [], []>} : vector<33x204xbf16>, vector<204x256xbf16>, vector<33x256xf32> -> vector<33x256xf32>
    %8 = arith.addf %3, %7 : vector<33x256xf32>
    %9 = arith.truncf %8 : vector<33x256xf32> to vector<33x256xbf16>
    %c0_9 = arith.constant 0 : index
    %c0_10 = arith.constant 0 : index
    %10 = vector.load %arg3[%c0_9, %c0_10] : memref<34x256xbf16, #tpu.memory_space<vmem>>, vector<33x256xbf16>
    tpu.vector_store %arg3[%c0_9, %c0_10], %9 {strides = array<i32>} : memref<34x256xbf16, #tpu.memory_space<vmem>>, vector<33x256xbf16>,
    %cst_11 = arith.constant 0.000000e+00 : bf16
    %11 = vector.broadcast %cst_11 : bf16 to vector<1x256xbf16>
    %c33 = arith.constant 33 : index
    %c0_12 = arith.constant 0 : index
    %12 = vector.load %arg3[%c33, %c0_12] : memref<34x256xbf16, #tpu.memory_space<vmem>>, vector<1x256xbf16>
    tpu.vector_store %arg3[%c33, %c0_12], %11 {strides = array<i32>} : memref<34x256xbf16, #tpu.memory_space<vmem>>, vector<1x256xbf16>,
    %13 = tpu.iota {dimensions = array<i32: 0>} : vector<33x1xi32>
    %c17_i32 = arith.constant 17 : i32
    %c0_i32 = arith.constant 0 : i32
    %14 = arith.cmpi eq, %c17_i32, %c0_i32 : i32
    %c1_i32 = arith.constant 1 : i32
    %15 = arith.select %14, %c1_i32, %c17_i32 : i32
    %16 = vector.broadcast %15 : i32 to vector<33x1xi32>
    %17 = arith.remsi %13, %16 : vector<33x1xi32>
    %c0_i32_13 = arith.constant 0 : i32
    %18 = vector.broadcast %c0_i32_13 : i32 to vector<33x1xi32>
    %19 = arith.cmpi ne, %17, %18 : vector<33x1xi32>
    %c0_i32_14 = arith.constant 0 : i32
    %20 = vector.broadcast %c0_i32_14 : i32 to vector<33x1xi32>
    %21 = arith.cmpi slt, %17, %20 : vector<33x1xi32>
    %c0_i32_15 = arith.constant 0 : i32
    %22 = arith.cmpi slt, %15, %c0_i32_15 : i32
    %23 = vector.broadcast %22 : i1 to vector<33x1xi1>
    %24 = vector.broadcast %23 : vector<33x1xi1> to vector<33x1xi1>
    %25 = arith.xori %21, %24 : vector<33x1xi1>
    %26 = arith.andi %25, %19 : vector<33x1xi1>
    %27 = vector.broadcast %15 : i32 to vector<33x1xi32>
    %28 = arith.addi %17, %27 : vector<33x1xi32>
    %29 = arith.select %26, %28, %17 : vector<33x1xi1>, vector<33x1xi32>
    %c16_i32 = arith.constant 16 : i32
    %30 = vector.broadcast %c16_i32 : i32 to vector<33x1xi32>
    %31 = arith.cmpi slt, %29, %30 : vector<33x1xi32>
    %c34_i32 = arith.constant 34 : i32
    %32 = arith.muli %arg0, %c34_i32 : i32
    %33 = vector.broadcast %32 : i32 to vector<33x1xi32>
    %34 = arith.addi %13, %33 : vector<33x1xi32>
    %c34_i32_16 = arith.constant 34 : i32
    %35 = vector.broadcast %c34_i32_16 : i32 to vector<33x1xi32>
    %36 = arith.cmpi slt, %34, %35 : vector<33x1xi32>
    %37 = arith.andi %31, %36 : vector<33x1xi1>
    %38 = arith.extui %37 : vector<33x1xi1> to vector<33x1xi32>
    %39 = arith.sitofp %38 : vector<33x1xi32> to vector<33x1xf32>
    %40 = vector.broadcast %39 : vector<33x1xf32> to vector<33x256xf32>
    %41 = arith.mulf %8, %40 : vector<33x256xf32>
    %cst_17 = arith.constant dense<0.000000e+00> : vector<256xf32>
    %42 = vector.multi_reduction <add>, %41, %cst_17 [0] : vector<33x256xf32> to vector<256xf32>
    %43 = vector.shape_cast %42 : vector<256xf32> to vector<1x256xf32>
    %c0_18 = arith.constant 0 : index
    %c0_19 = arith.constant 0 : index
    %c0_20 = arith.constant 0 : index
    %44 = vector.load %arg4[%c0_18, %c0_19, %c0_20] : memref<1x2x256xf32, #tpu.memory_space<vmem>>, vector<1x1x256xf32>
    %45 = vector.shape_cast %44 : vector<1x1x256xf32> to vector<1x256xf32>
    %46 = vector.shape_cast %43 : vector<1x256xf32> to vector<1x1x256xf32>
    tpu.vector_store %arg4[%c0_18, %c0_19, %c0_20], %46 {strides = array<i32>} : memref<1x2x256xf32, #tpu.memory_space<vmem>>, vector<1x1x256xf32>,
    %47 = arith.mulf %41, %8 : vector<33x256xf32>
    %cst_21 = arith.constant dense<0.000000e+00> : vector<256xf32>
    %48 = vector.multi_reduction <add>, %47, %cst_21 [0] : vector<33x256xf32> to vector<256xf32>
    %49 = vector.shape_cast %48 : vector<256xf32> to vector<1x256xf32>
    %c0_22 = arith.constant 0 : index
    %c1_23 = arith.constant 1 : index
    %c0_24 = arith.constant 0 : index
    %50 = vector.load %arg4[%c0_22, %c1_23, %c0_24] : memref<1x2x256xf32, #tpu.memory_space<vmem>>, vector<1x1x256xf32>
    %51 = vector.shape_cast %50 : vector<1x1x256xf32> to vector<1x256xf32>
    %52 = vector.shape_cast %49 : vector<1x256xf32> to vector<1x1x256xf32>
    tpu.vector_store %arg4[%c0_22, %c1_23, %c0_24], %52 {strides = array<i32>} : memref<1x2x256xf32, #tpu.memory_space<vmem>>, vector<1x1x256xf32>,
    return
  }
  func.func @transform_0(%arg0: i32) -> (i32, i32) {
    %c0_i32 = arith.constant 0 : i32
    %c0_i32_0 = arith.constant 0 : i32
    return %arg0, %c0_i32 : i32, i32
  }
  func.func @transform_1(%arg0: i32) -> (i32, i32, i32) {
    %c0_i32 = arith.constant 0 : i32
    %c0_i32_0 = arith.constant 0 : i32
    %c0_i32_1 = arith.constant 0 : i32
    %c0_i32_2 = arith.constant 0 : i32
    return %c0_i32, %c0_i32_0, %c0_i32_1 : i32, i32, i32
  }
  func.func @transform_2(%arg0: i32) -> (i32, i32) {
    %c0_i32 = arith.constant 0 : i32
    %c0_i32_0 = arith.constant 0 : i32
    return %arg0, %c0_i32 : i32, i32
  }
  func.func @transform_3(%arg0: i32) -> (i32, i32, i32) {
    %c0_i32 = arith.constant 0 : i32
    %c0_i32_0 = arith.constant 0 : i32
    %c0_i32_1 = arith.constant 0 : i32
    return %arg0, %c0_i32, %c0_i32_0 : i32, i32, i32
  }
}

module attributes {stable_mosaic.version = 11 : i64} {
  func.func @_conv_stage_kernel(%arg0: i32, %arg1: memref<36x288xbf16, #tpu.memory_space<vmem>>, %arg2: memref<3x288x256xbf16, #tpu.memory_space<vmem>>, %arg3: memref<36x256xbf16, #tpu.memory_space<vmem>>, %arg4: memref<1x2x256xf32, #tpu.memory_space<vmem>>) attributes {dimension_semantics = [#tpu.dimension_semantics<parallel>], iteration_bounds = array<i64: 1>, scalar_prefetch = 0 : i64, scratch_operands = 0 : i64, tpu.core_type = #tpu.core_type<tc>, window_params = [{transform_indices = @transform_0, window_bounds = array<i64: 36, 288>}, {pipeline_mode = #tpu.pipeline_mode<synchronous>, transform_indices = @transform_1, window_bounds = array<i64: 3, 288, 256>}, {transform_indices = @transform_2, window_bounds = array<i64: 36, 256>}, {transform_indices = @transform_3, window_bounds = array<i64: 1, 2, 256>}]} {
    %c0 = arith.constant 0 : index
    %c0_0 = arith.constant 0 : index
    %0 = vector.load %arg1[%c0, %c0_0] : memref<36x288xbf16, #tpu.memory_space<vmem>>, vector<34x288xbf16>
    %c0_1 = arith.constant 0 : index
    %c0_2 = arith.constant 0 : index
    %c0_3 = arith.constant 0 : index
    %1 = vector.load %arg2[%c0_1, %c0_2, %c0_3] : memref<3x288x256xbf16, #tpu.memory_space<vmem>>, vector<1x288x256xbf16>
    %2 = vector.shape_cast %1 : vector<1x288x256xbf16> to vector<288x256xbf16>
    %cst = arith.constant dense<0.000000e+00> : vector<34x256xf32>
    %3 = tpu.matmul %0, %2, %cst {dimension_numbers = #tpu.dot_dimension_numbers<[1], [0], [0], [1], [0, 0, 1, 1], [], []>} : vector<34x288xbf16>, vector<288x256xbf16>, vector<34x256xf32> -> vector<34x256xf32>
    %c1 = arith.constant 1 : index
    %c0_4 = arith.constant 0 : index
    %4 = vector.load %arg1[%c1, %c0_4] : memref<36x288xbf16, #tpu.memory_space<vmem>>, vector<34x288xbf16>
    %c1_5 = arith.constant 1 : index
    %c0_6 = arith.constant 0 : index
    %c0_7 = arith.constant 0 : index
    %5 = vector.load %arg2[%c1_5, %c0_6, %c0_7] : memref<3x288x256xbf16, #tpu.memory_space<vmem>>, vector<1x288x256xbf16>
    %6 = vector.shape_cast %5 : vector<1x288x256xbf16> to vector<288x256xbf16>
    %cst_8 = arith.constant dense<0.000000e+00> : vector<34x256xf32>
    %7 = tpu.matmul %4, %6, %cst_8 {dimension_numbers = #tpu.dot_dimension_numbers<[1], [0], [0], [1], [0, 0, 1, 1], [], []>} : vector<34x288xbf16>, vector<288x256xbf16>, vector<34x256xf32> -> vector<34x256xf32>
    %8 = arith.addf %3, %7 : vector<34x256xf32>
    %c2 = arith.constant 2 : index
    %c0_9 = arith.constant 0 : index
    %9 = vector.load %arg1[%c2, %c0_9] : memref<36x288xbf16, #tpu.memory_space<vmem>>, vector<34x288xbf16>
    %c2_10 = arith.constant 2 : index
    %c0_11 = arith.constant 0 : index
    %c0_12 = arith.constant 0 : index
    %10 = vector.load %arg2[%c2_10, %c0_11, %c0_12] : memref<3x288x256xbf16, #tpu.memory_space<vmem>>, vector<1x288x256xbf16>
    %11 = vector.shape_cast %10 : vector<1x288x256xbf16> to vector<288x256xbf16>
    %cst_13 = arith.constant dense<0.000000e+00> : vector<34x256xf32>
    %12 = tpu.matmul %9, %11, %cst_13 {dimension_numbers = #tpu.dot_dimension_numbers<[1], [0], [0], [1], [0, 0, 1, 1], [], []>} : vector<34x288xbf16>, vector<288x256xbf16>, vector<34x256xf32> -> vector<34x256xf32>
    %13 = arith.addf %8, %12 : vector<34x256xf32>
    %14 = arith.truncf %13 : vector<34x256xf32> to vector<34x256xbf16>
    %c0_14 = arith.constant 0 : index
    %c0_15 = arith.constant 0 : index
    %15 = vector.load %arg3[%c0_14, %c0_15] : memref<36x256xbf16, #tpu.memory_space<vmem>>, vector<34x256xbf16>
    tpu.vector_store %arg3[%c0_14, %c0_15], %14 {strides = array<i32>} : memref<36x256xbf16, #tpu.memory_space<vmem>>, vector<34x256xbf16>,
    %cst_16 = arith.constant 0.000000e+00 : bf16
    %16 = vector.broadcast %cst_16 : bf16 to vector<2x256xbf16>
    %c34 = arith.constant 34 : index
    %c0_17 = arith.constant 0 : index
    %17 = vector.load %arg3[%c34, %c0_17] : memref<36x256xbf16, #tpu.memory_space<vmem>>, vector<2x256xbf16>
    tpu.vector_store %arg3[%c34, %c0_17], %16 {strides = array<i32>} : memref<36x256xbf16, #tpu.memory_space<vmem>>, vector<2x256xbf16>,
    %18 = tpu.iota {dimensions = array<i32: 0>} : vector<34x1xi32>
    %c18_i32 = arith.constant 18 : i32
    %c0_i32 = arith.constant 0 : i32
    %19 = arith.cmpi eq, %c18_i32, %c0_i32 : i32
    %c1_i32 = arith.constant 1 : i32
    %20 = arith.select %19, %c1_i32, %c18_i32 : i32
    %21 = vector.broadcast %20 : i32 to vector<34x1xi32>
    %22 = arith.remsi %18, %21 : vector<34x1xi32>
    %c0_i32_18 = arith.constant 0 : i32
    %23 = vector.broadcast %c0_i32_18 : i32 to vector<34x1xi32>
    %24 = arith.cmpi ne, %22, %23 : vector<34x1xi32>
    %c0_i32_19 = arith.constant 0 : i32
    %25 = vector.broadcast %c0_i32_19 : i32 to vector<34x1xi32>
    %26 = arith.cmpi slt, %22, %25 : vector<34x1xi32>
    %c0_i32_20 = arith.constant 0 : i32
    %27 = arith.cmpi slt, %20, %c0_i32_20 : i32
    %28 = vector.broadcast %27 : i1 to vector<34x1xi1>
    %29 = vector.broadcast %28 : vector<34x1xi1> to vector<34x1xi1>
    %30 = arith.xori %26, %29 : vector<34x1xi1>
    %31 = arith.andi %30, %24 : vector<34x1xi1>
    %32 = vector.broadcast %20 : i32 to vector<34x1xi32>
    %33 = arith.addi %22, %32 : vector<34x1xi32>
    %34 = arith.select %31, %33, %22 : vector<34x1xi1>, vector<34x1xi32>
    %c16_i32 = arith.constant 16 : i32
    %35 = vector.broadcast %c16_i32 : i32 to vector<34x1xi32>
    %36 = arith.cmpi slt, %34, %35 : vector<34x1xi32>
    %c36_i32 = arith.constant 36 : i32
    %37 = arith.muli %arg0, %c36_i32 : i32
    %38 = vector.broadcast %37 : i32 to vector<34x1xi32>
    %39 = arith.addi %18, %38 : vector<34x1xi32>
    %c36_i32_21 = arith.constant 36 : i32
    %40 = vector.broadcast %c36_i32_21 : i32 to vector<34x1xi32>
    %41 = arith.cmpi slt, %39, %40 : vector<34x1xi32>
    %42 = arith.andi %36, %41 : vector<34x1xi1>
    %43 = arith.extui %42 : vector<34x1xi1> to vector<34x1xi32>
    %44 = arith.sitofp %43 : vector<34x1xi32> to vector<34x1xf32>
    %45 = vector.broadcast %44 : vector<34x1xf32> to vector<34x256xf32>
    %46 = arith.mulf %13, %45 : vector<34x256xf32>
    %cst_22 = arith.constant dense<0.000000e+00> : vector<256xf32>
    %47 = vector.multi_reduction <add>, %46, %cst_22 [0] : vector<34x256xf32> to vector<256xf32>
    %48 = vector.shape_cast %47 : vector<256xf32> to vector<1x256xf32>
    %c0_23 = arith.constant 0 : index
    %c0_24 = arith.constant 0 : index
    %c0_25 = arith.constant 0 : index
    %49 = vector.load %arg4[%c0_23, %c0_24, %c0_25] : memref<1x2x256xf32, #tpu.memory_space<vmem>>, vector<1x1x256xf32>
    %50 = vector.shape_cast %49 : vector<1x1x256xf32> to vector<1x256xf32>
    %51 = vector.shape_cast %48 : vector<1x256xf32> to vector<1x1x256xf32>
    tpu.vector_store %arg4[%c0_23, %c0_24, %c0_25], %51 {strides = array<i32>} : memref<1x2x256xf32, #tpu.memory_space<vmem>>, vector<1x1x256xf32>,
    %52 = arith.mulf %46, %13 : vector<34x256xf32>
    %cst_26 = arith.constant dense<0.000000e+00> : vector<256xf32>
    %53 = vector.multi_reduction <add>, %52, %cst_26 [0] : vector<34x256xf32> to vector<256xf32>
    %54 = vector.shape_cast %53 : vector<256xf32> to vector<1x256xf32>
    %c0_27 = arith.constant 0 : index
    %c1_28 = arith.constant 1 : index
    %c0_29 = arith.constant 0 : index
    %55 = vector.load %arg4[%c0_27, %c1_28, %c0_29] : memref<1x2x256xf32, #tpu.memory_space<vmem>>, vector<1x1x256xf32>
    %56 = vector.shape_cast %55 : vector<1x1x256xf32> to vector<1x256xf32>
    %57 = vector.shape_cast %54 : vector<1x256xf32> to vector<1x1x256xf32>
    tpu.vector_store %arg4[%c0_27, %c1_28, %c0_29], %57 {strides = array<i32>} : memref<1x2x256xf32, #tpu.memory_space<vmem>>, vector<1x1x256xf32>,
    return
  }
  func.func @transform_0(%arg0: i32) -> (i32, i32) {
    %c0_i32 = arith.constant 0 : i32
    %c0_i32_0 = arith.constant 0 : i32
    return %arg0, %c0_i32 : i32, i32
  }
  func.func @transform_1(%arg0: i32) -> (i32, i32, i32) {
    %c0_i32 = arith.constant 0 : i32
    %c0_i32_0 = arith.constant 0 : i32
    %c0_i32_1 = arith.constant 0 : i32
    %c0_i32_2 = arith.constant 0 : i32
    return %c0_i32, %c0_i32_0, %c0_i32_1 : i32, i32, i32
  }
  func.func @transform_2(%arg0: i32) -> (i32, i32) {
    %c0_i32 = arith.constant 0 : i32
    %c0_i32_0 = arith.constant 0 : i32
    return %arg0, %c0_i32 : i32, i32
  }
  func.func @transform_3(%arg0: i32) -> (i32, i32, i32) {
    %c0_i32 = arith.constant 0 : i32
    %c0_i32_0 = arith.constant 0 : i32
    %c0_i32_1 = arith.constant 0 : i32
    return %arg0, %c0_i32, %c0_i32_0 : i32, i32, i32
  }
}

module attributes {stable_mosaic.version = 11 : i64} {
  func.func @_conv_stage_kernel(%arg0: i32, %arg1: memref<18x576xbf16, #tpu.memory_space<vmem>>, %arg2: memref<2x576x256xbf16, #tpu.memory_space<vmem>>, %arg3: memref<18x256xbf16, #tpu.memory_space<vmem>>, %arg4: memref<1x2x256xf32, #tpu.memory_space<vmem>>) attributes {dimension_semantics = [#tpu.dimension_semantics<parallel>], iteration_bounds = array<i64: 1>, scalar_prefetch = 0 : i64, scratch_operands = 0 : i64, tpu.core_type = #tpu.core_type<tc>, window_params = [{transform_indices = @transform_0, window_bounds = array<i64: 18, 576>}, {pipeline_mode = #tpu.pipeline_mode<synchronous>, transform_indices = @transform_1, window_bounds = array<i64: 2, 576, 256>}, {transform_indices = @transform_2, window_bounds = array<i64: 18, 256>}, {transform_indices = @transform_3, window_bounds = array<i64: 1, 2, 256>}]} {
    %c0 = arith.constant 0 : index
    %c0_0 = arith.constant 0 : index
    %0 = vector.load %arg1[%c0, %c0_0] : memref<18x576xbf16, #tpu.memory_space<vmem>>, vector<17x576xbf16>
    %c0_1 = arith.constant 0 : index
    %c0_2 = arith.constant 0 : index
    %c0_3 = arith.constant 0 : index
    %1 = vector.load %arg2[%c0_1, %c0_2, %c0_3] : memref<2x576x256xbf16, #tpu.memory_space<vmem>>, vector<1x576x256xbf16>
    %2 = vector.shape_cast %1 : vector<1x576x256xbf16> to vector<576x256xbf16>
    %cst = arith.constant dense<0.000000e+00> : vector<17x256xf32>
    %3 = tpu.matmul %0, %2, %cst {dimension_numbers = #tpu.dot_dimension_numbers<[1], [0], [0], [1], [0, 0, 1, 1], [], []>} : vector<17x576xbf16>, vector<576x256xbf16>, vector<17x256xf32> -> vector<17x256xf32>
    %c1 = arith.constant 1 : index
    %c0_4 = arith.constant 0 : index
    %4 = vector.load %arg1[%c1, %c0_4] : memref<18x576xbf16, #tpu.memory_space<vmem>>, vector<17x576xbf16>
    %c1_5 = arith.constant 1 : index
    %c0_6 = arith.constant 0 : index
    %c0_7 = arith.constant 0 : index
    %5 = vector.load %arg2[%c1_5, %c0_6, %c0_7] : memref<2x576x256xbf16, #tpu.memory_space<vmem>>, vector<1x576x256xbf16>
    %6 = vector.shape_cast %5 : vector<1x576x256xbf16> to vector<576x256xbf16>
    %cst_8 = arith.constant dense<0.000000e+00> : vector<17x256xf32>
    %7 = tpu.matmul %4, %6, %cst_8 {dimension_numbers = #tpu.dot_dimension_numbers<[1], [0], [0], [1], [0, 0, 1, 1], [], []>} : vector<17x576xbf16>, vector<576x256xbf16>, vector<17x256xf32> -> vector<17x256xf32>
    %8 = arith.addf %3, %7 : vector<17x256xf32>
    %9 = arith.truncf %8 : vector<17x256xf32> to vector<17x256xbf16>
    %c0_9 = arith.constant 0 : index
    %c0_10 = arith.constant 0 : index
    %10 = vector.load %arg3[%c0_9, %c0_10] : memref<18x256xbf16, #tpu.memory_space<vmem>>, vector<17x256xbf16>
    tpu.vector_store %arg3[%c0_9, %c0_10], %9 {strides = array<i32>} : memref<18x256xbf16, #tpu.memory_space<vmem>>, vector<17x256xbf16>,
    %cst_11 = arith.constant 0.000000e+00 : bf16
    %11 = vector.broadcast %cst_11 : bf16 to vector<1x256xbf16>
    %c17 = arith.constant 17 : index
    %c0_12 = arith.constant 0 : index
    %12 = vector.load %arg3[%c17, %c0_12] : memref<18x256xbf16, #tpu.memory_space<vmem>>, vector<1x256xbf16>
    tpu.vector_store %arg3[%c17, %c0_12], %11 {strides = array<i32>} : memref<18x256xbf16, #tpu.memory_space<vmem>>, vector<1x256xbf16>,
    %13 = tpu.iota {dimensions = array<i32: 0>} : vector<17x1xi32>
    %c9_i32 = arith.constant 9 : i32
    %c0_i32 = arith.constant 0 : i32
    %14 = arith.cmpi eq, %c9_i32, %c0_i32 : i32
    %c1_i32 = arith.constant 1 : i32
    %15 = arith.select %14, %c1_i32, %c9_i32 : i32
    %16 = vector.broadcast %15 : i32 to vector<17x1xi32>
    %17 = arith.remsi %13, %16 : vector<17x1xi32>
    %c0_i32_13 = arith.constant 0 : i32
    %18 = vector.broadcast %c0_i32_13 : i32 to vector<17x1xi32>
    %19 = arith.cmpi ne, %17, %18 : vector<17x1xi32>
    %c0_i32_14 = arith.constant 0 : i32
    %20 = vector.broadcast %c0_i32_14 : i32 to vector<17x1xi32>
    %21 = arith.cmpi slt, %17, %20 : vector<17x1xi32>
    %c0_i32_15 = arith.constant 0 : i32
    %22 = arith.cmpi slt, %15, %c0_i32_15 : i32
    %23 = vector.broadcast %22 : i1 to vector<17x1xi1>
    %24 = vector.broadcast %23 : vector<17x1xi1> to vector<17x1xi1>
    %25 = arith.xori %21, %24 : vector<17x1xi1>
    %26 = arith.andi %25, %19 : vector<17x1xi1>
    %27 = vector.broadcast %15 : i32 to vector<17x1xi32>
    %28 = arith.addi %17, %27 : vector<17x1xi32>
    %29 = arith.select %26, %28, %17 : vector<17x1xi1>, vector<17x1xi32>
    %c8_i32 = arith.constant 8 : i32
    %30 = vector.broadcast %c8_i32 : i32 to vector<17x1xi32>
    %31 = arith.cmpi slt, %29, %30 : vector<17x1xi32>
    %c18_i32 = arith.constant 18 : i32
    %32 = arith.muli %arg0, %c18_i32 : i32
    %33 = vector.broadcast %32 : i32 to vector<17x1xi32>
    %34 = arith.addi %13, %33 : vector<17x1xi32>
    %c18_i32_16 = arith.constant 18 : i32
    %35 = vector.broadcast %c18_i32_16 : i32 to vector<17x1xi32>
    %36 = arith.cmpi slt, %34, %35 : vector<17x1xi32>
    %37 = arith.andi %31, %36 : vector<17x1xi1>
    %38 = arith.extui %37 : vector<17x1xi1> to vector<17x1xi32>
    %39 = arith.sitofp %38 : vector<17x1xi32> to vector<17x1xf32>
    %40 = vector.broadcast %39 : vector<17x1xf32> to vector<17x256xf32>
    %41 = arith.mulf %8, %40 : vector<17x256xf32>
    %cst_17 = arith.constant dense<0.000000e+00> : vector<256xf32>
    %42 = vector.multi_reduction <add>, %41, %cst_17 [0] : vector<17x256xf32> to vector<256xf32>
    %43 = vector.shape_cast %42 : vector<256xf32> to vector<1x256xf32>
    %c0_18 = arith.constant 0 : index
    %c0_19 = arith.constant 0 : index
    %c0_20 = arith.constant 0 : index
    %44 = vector.load %arg4[%c0_18, %c0_19, %c0_20] : memref<1x2x256xf32, #tpu.memory_space<vmem>>, vector<1x1x256xf32>
    %45 = vector.shape_cast %44 : vector<1x1x256xf32> to vector<1x256xf32>
    %46 = vector.shape_cast %43 : vector<1x256xf32> to vector<1x1x256xf32>
    tpu.vector_store %arg4[%c0_18, %c0_19, %c0_20], %46 {strides = array<i32>} : memref<1x2x256xf32, #tpu.memory_space<vmem>>, vector<1x1x256xf32>,
    %47 = arith.mulf %41, %8 : vector<17x256xf32>
    %cst_21 = arith.constant dense<0.000000e+00> : vector<256xf32>
    %48 = vector.multi_reduction <add>, %47, %cst_21 [0] : vector<17x256xf32> to vector<256xf32>
    %49 = vector.shape_cast %48 : vector<256xf32> to vector<1x256xf32>
    %c0_22 = arith.constant 0 : index
    %c1_23 = arith.constant 1 : index
    %c0_24 = arith.constant 0 : index
    %50 = vector.load %arg4[%c0_22, %c1_23, %c0_24] : memref<1x2x256xf32, #tpu.memory_space<vmem>>, vector<1x1x256xf32>
    %51 = vector.shape_cast %50 : vector<1x1x256xf32> to vector<1x256xf32>
    %52 = vector.shape_cast %49 : vector<1x256xf32> to vector<1x1x256xf32>
    tpu.vector_store %arg4[%c0_22, %c1_23, %c0_24], %52 {strides = array<i32>} : memref<1x2x256xf32, #tpu.memory_space<vmem>>, vector<1x1x256xf32>,
    return
  }
  func.func @transform_0(%arg0: i32) -> (i32, i32) {
    %c0_i32 = arith.constant 0 : i32
    %c0_i32_0 = arith.constant 0 : i32
    return %arg0, %c0_i32 : i32, i32
  }
  func.func @transform_1(%arg0: i32) -> (i32, i32, i32) {
    %c0_i32 = arith.constant 0 : i32
    %c0_i32_0 = arith.constant 0 : i32
    %c0_i32_1 = arith.constant 0 : i32
    %c0_i32_2 = arith.constant 0 : i32
    return %c0_i32, %c0_i32_0, %c0_i32_1 : i32, i32, i32
  }
  func.func @transform_2(%arg0: i32) -> (i32, i32) {
    %c0_i32 = arith.constant 0 : i32
    %c0_i32_0 = arith.constant 0 : i32
    return %arg0, %c0_i32 : i32, i32
  }
  func.func @transform_3(%arg0: i32) -> (i32, i32, i32) {
    %c0_i32 = arith.constant 0 : i32
    %c0_i32_0 = arith.constant 0 : i32
    %c0_i32_1 = arith.constant 0 : i32
    return %arg0, %c0_i32, %c0_i32_0 : i32, i32, i32
  }
}

module attributes {stable_mosaic.version = 11 : i64} {
  func.func @_conv_stage_kernel(%arg0: i32, %arg1: memref<20x320xbf16, #tpu.memory_space<vmem>>, %arg2: memref<3x320x256xbf16, #tpu.memory_space<vmem>>, %arg3: memref<20x256xbf16, #tpu.memory_space<vmem>>, %arg4: memref<1x2x256xf32, #tpu.memory_space<vmem>>) attributes {dimension_semantics = [#tpu.dimension_semantics<parallel>], iteration_bounds = array<i64: 1>, scalar_prefetch = 0 : i64, scratch_operands = 0 : i64, tpu.core_type = #tpu.core_type<tc>, window_params = [{transform_indices = @transform_0, window_bounds = array<i64: 20, 320>}, {pipeline_mode = #tpu.pipeline_mode<synchronous>, transform_indices = @transform_1, window_bounds = array<i64: 3, 320, 256>}, {transform_indices = @transform_2, window_bounds = array<i64: 20, 256>}, {transform_indices = @transform_3, window_bounds = array<i64: 1, 2, 256>}]} {
    %c0 = arith.constant 0 : index
    %c0_0 = arith.constant 0 : index
    %0 = vector.load %arg1[%c0, %c0_0] : memref<20x320xbf16, #tpu.memory_space<vmem>>, vector<18x320xbf16>
    %c0_1 = arith.constant 0 : index
    %c0_2 = arith.constant 0 : index
    %c0_3 = arith.constant 0 : index
    %1 = vector.load %arg2[%c0_1, %c0_2, %c0_3] : memref<3x320x256xbf16, #tpu.memory_space<vmem>>, vector<1x320x256xbf16>
    %2 = vector.shape_cast %1 : vector<1x320x256xbf16> to vector<320x256xbf16>
    %cst = arith.constant dense<0.000000e+00> : vector<18x256xf32>
    %3 = tpu.matmul %0, %2, %cst {dimension_numbers = #tpu.dot_dimension_numbers<[1], [0], [0], [1], [0, 0, 1, 1], [], []>} : vector<18x320xbf16>, vector<320x256xbf16>, vector<18x256xf32> -> vector<18x256xf32>
    %c1 = arith.constant 1 : index
    %c0_4 = arith.constant 0 : index
    %4 = vector.load %arg1[%c1, %c0_4] : memref<20x320xbf16, #tpu.memory_space<vmem>>, vector<18x320xbf16>
    %c1_5 = arith.constant 1 : index
    %c0_6 = arith.constant 0 : index
    %c0_7 = arith.constant 0 : index
    %5 = vector.load %arg2[%c1_5, %c0_6, %c0_7] : memref<3x320x256xbf16, #tpu.memory_space<vmem>>, vector<1x320x256xbf16>
    %6 = vector.shape_cast %5 : vector<1x320x256xbf16> to vector<320x256xbf16>
    %cst_8 = arith.constant dense<0.000000e+00> : vector<18x256xf32>
    %7 = tpu.matmul %4, %6, %cst_8 {dimension_numbers = #tpu.dot_dimension_numbers<[1], [0], [0], [1], [0, 0, 1, 1], [], []>} : vector<18x320xbf16>, vector<320x256xbf16>, vector<18x256xf32> -> vector<18x256xf32>
    %8 = arith.addf %3, %7 : vector<18x256xf32>
    %c2 = arith.constant 2 : index
    %c0_9 = arith.constant 0 : index
    %9 = vector.load %arg1[%c2, %c0_9] : memref<20x320xbf16, #tpu.memory_space<vmem>>, vector<18x320xbf16>
    %c2_10 = arith.constant 2 : index
    %c0_11 = arith.constant 0 : index
    %c0_12 = arith.constant 0 : index
    %10 = vector.load %arg2[%c2_10, %c0_11, %c0_12] : memref<3x320x256xbf16, #tpu.memory_space<vmem>>, vector<1x320x256xbf16>
    %11 = vector.shape_cast %10 : vector<1x320x256xbf16> to vector<320x256xbf16>
    %cst_13 = arith.constant dense<0.000000e+00> : vector<18x256xf32>
    %12 = tpu.matmul %9, %11, %cst_13 {dimension_numbers = #tpu.dot_dimension_numbers<[1], [0], [0], [1], [0, 0, 1, 1], [], []>} : vector<18x320xbf16>, vector<320x256xbf16>, vector<18x256xf32> -> vector<18x256xf32>
    %13 = arith.addf %8, %12 : vector<18x256xf32>
    %14 = arith.truncf %13 : vector<18x256xf32> to vector<18x256xbf16>
    %c0_14 = arith.constant 0 : index
    %c0_15 = arith.constant 0 : index
    %15 = vector.load %arg3[%c0_14, %c0_15] : memref<20x256xbf16, #tpu.memory_space<vmem>>, vector<18x256xbf16>
    tpu.vector_store %arg3[%c0_14, %c0_15], %14 {strides = array<i32>} : memref<20x256xbf16, #tpu.memory_space<vmem>>, vector<18x256xbf16>,
    %cst_16 = arith.constant 0.000000e+00 : bf16
    %16 = vector.broadcast %cst_16 : bf16 to vector<2x256xbf16>
    %c18 = arith.constant 18 : index
    %c0_17 = arith.constant 0 : index
    %17 = vector.load %arg3[%c18, %c0_17] : memref<20x256xbf16, #tpu.memory_space<vmem>>, vector<2x256xbf16>
    tpu.vector_store %arg3[%c18, %c0_17], %16 {strides = array<i32>} : memref<20x256xbf16, #tpu.memory_space<vmem>>, vector<2x256xbf16>,
    %18 = tpu.iota {dimensions = array<i32: 0>} : vector<18x1xi32>
    %c10_i32 = arith.constant 10 : i32
    %c0_i32 = arith.constant 0 : i32
    %19 = arith.cmpi eq, %c10_i32, %c0_i32 : i32
    %c1_i32 = arith.constant 1 : i32
    %20 = arith.select %19, %c1_i32, %c10_i32 : i32
    %21 = vector.broadcast %20 : i32 to vector<18x1xi32>
    %22 = arith.remsi %18, %21 : vector<18x1xi32>
    %c0_i32_18 = arith.constant 0 : i32
    %23 = vector.broadcast %c0_i32_18 : i32 to vector<18x1xi32>
    %24 = arith.cmpi ne, %22, %23 : vector<18x1xi32>
    %c0_i32_19 = arith.constant 0 : i32
    %25 = vector.broadcast %c0_i32_19 : i32 to vector<18x1xi32>
    %26 = arith.cmpi slt, %22, %25 : vector<18x1xi32>
    %c0_i32_20 = arith.constant 0 : i32
    %27 = arith.cmpi slt, %20, %c0_i32_20 : i32
    %28 = vector.broadcast %27 : i1 to vector<18x1xi1>
    %29 = vector.broadcast %28 : vector<18x1xi1> to vector<18x1xi1>
    %30 = arith.xori %26, %29 : vector<18x1xi1>
    %31 = arith.andi %30, %24 : vector<18x1xi1>
    %32 = vector.broadcast %20 : i32 to vector<18x1xi32>
    %33 = arith.addi %22, %32 : vector<18x1xi32>
    %34 = arith.select %31, %33, %22 : vector<18x1xi1>, vector<18x1xi32>
    %c8_i32 = arith.constant 8 : i32
    %35 = vector.broadcast %c8_i32 : i32 to vector<18x1xi32>
    %36 = arith.cmpi slt, %34, %35 : vector<18x1xi32>
    %c20_i32 = arith.constant 20 : i32
    %37 = arith.muli %arg0, %c20_i32 : i32
    %38 = vector.broadcast %37 : i32 to vector<18x1xi32>
    %39 = arith.addi %18, %38 : vector<18x1xi32>
    %c20_i32_21 = arith.constant 20 : i32
    %40 = vector.broadcast %c20_i32_21 : i32 to vector<18x1xi32>
    %41 = arith.cmpi slt, %39, %40 : vector<18x1xi32>
    %42 = arith.andi %36, %41 : vector<18x1xi1>
    %43 = arith.extui %42 : vector<18x1xi1> to vector<18x1xi32>
    %44 = arith.sitofp %43 : vector<18x1xi32> to vector<18x1xf32>
    %45 = vector.broadcast %44 : vector<18x1xf32> to vector<18x256xf32>
    %46 = arith.mulf %13, %45 : vector<18x256xf32>
    %cst_22 = arith.constant dense<0.000000e+00> : vector<256xf32>
    %47 = vector.multi_reduction <add>, %46, %cst_22 [0] : vector<18x256xf32> to vector<256xf32>
    %48 = vector.shape_cast %47 : vector<256xf32> to vector<1x256xf32>
    %c0_23 = arith.constant 0 : index
    %c0_24 = arith.constant 0 : index
    %c0_25 = arith.constant 0 : index
    %49 = vector.load %arg4[%c0_23, %c0_24, %c0_25] : memref<1x2x256xf32, #tpu.memory_space<vmem>>, vector<1x1x256xf32>
    %50 = vector.shape_cast %49 : vector<1x1x256xf32> to vector<1x256xf32>
    %51 = vector.shape_cast %48 : vector<1x256xf32> to vector<1x1x256xf32>
    tpu.vector_store %arg4[%c0_23, %c0_24, %c0_25], %51 {strides = array<i32>} : memref<1x2x256xf32, #tpu.memory_space<vmem>>, vector<1x1x256xf32>,
    %52 = arith.mulf %46, %13 : vector<18x256xf32>
    %cst_26 = arith.constant dense<0.000000e+00> : vector<256xf32>
    %53 = vector.multi_reduction <add>, %52, %cst_26 [0] : vector<18x256xf32> to vector<256xf32>
    %54 = vector.shape_cast %53 : vector<256xf32> to vector<1x256xf32>
    %c0_27 = arith.constant 0 : index
    %c1_28 = arith.constant 1 : index
    %c0_29 = arith.constant 0 : index
    %55 = vector.load %arg4[%c0_27, %c1_28, %c0_29] : memref<1x2x256xf32, #tpu.memory_space<vmem>>, vector<1x1x256xf32>
    %56 = vector.shape_cast %55 : vector<1x1x256xf32> to vector<1x256xf32>
    %57 = vector.shape_cast %54 : vector<1x256xf32> to vector<1x1x256xf32>
    tpu.vector_store %arg4[%c0_27, %c1_28, %c0_29], %57 {strides = array<i32>} : memref<1x2x256xf32, #tpu.memory_space<vmem>>, vector<1x1x256xf32>,
    return
  }
  func.func @transform_0(%arg0: i32) -> (i32, i32) {
    %c0_i32 = arith.constant 0 : i32
    %c0_i32_0 = arith.constant 0 : i32
    return %arg0, %c0_i32 : i32, i32
  }
  func.func @transform_1(%arg0: i32) -> (i32, i32, i32) {
    %c0_i32 = arith.constant 0 : i32
    %c0_i32_0 = arith.constant 0 : i32
    %c0_i32_1 = arith.constant 0 : i32
    %c0_i32_2 = arith.constant 0 : i32
    return %c0_i32, %c0_i32_0, %c0_i32_1 : i32, i32, i32
  }
  func.func @transform_2(%arg0: i32) -> (i32, i32) {
    %c0_i32 = arith.constant 0 : i32
    %c0_i32_0 = arith.constant 0 : i32
    return %arg0, %c0_i32 : i32, i32
  }
  func.func @transform_3(%arg0: i32) -> (i32, i32, i32) {
    %c0_i32 = arith.constant 0 : i32
    %c0_i32_0 = arith.constant 0 : i32
    %c0_i32_1 = arith.constant 0 : i32
    return %arg0, %c0_i32, %c0_i32_0 : i32, i32, i32
  }
}

module attributes {stable_mosaic.version = 11 : i64} {
  func.func @_conv_stage_kernel(%arg0: i32, %arg1: memref<10x640xbf16, #tpu.memory_space<vmem>>, %arg2: memref<2x640x256xbf16, #tpu.memory_space<vmem>>, %arg3: memref<10x256xbf16, #tpu.memory_space<vmem>>, %arg4: memref<1x2x256xf32, #tpu.memory_space<vmem>>) attributes {dimension_semantics = [#tpu.dimension_semantics<parallel>], iteration_bounds = array<i64: 1>, scalar_prefetch = 0 : i64, scratch_operands = 0 : i64, tpu.core_type = #tpu.core_type<tc>, window_params = [{transform_indices = @transform_0, window_bounds = array<i64: 10, 640>}, {pipeline_mode = #tpu.pipeline_mode<synchronous>, transform_indices = @transform_1, window_bounds = array<i64: 2, 640, 256>}, {transform_indices = @transform_2, window_bounds = array<i64: 10, 256>}, {transform_indices = @transform_3, window_bounds = array<i64: 1, 2, 256>}]} {
    %c0 = arith.constant 0 : index
    %c0_0 = arith.constant 0 : index
    %0 = vector.load %arg1[%c0, %c0_0] : memref<10x640xbf16, #tpu.memory_space<vmem>>, vector<9x640xbf16>
    %c0_1 = arith.constant 0 : index
    %c0_2 = arith.constant 0 : index
    %c0_3 = arith.constant 0 : index
    %1 = vector.load %arg2[%c0_1, %c0_2, %c0_3] : memref<2x640x256xbf16, #tpu.memory_space<vmem>>, vector<1x640x256xbf16>
    %2 = vector.shape_cast %1 : vector<1x640x256xbf16> to vector<640x256xbf16>
    %cst = arith.constant dense<0.000000e+00> : vector<9x256xf32>
    %3 = tpu.matmul %0, %2, %cst {dimension_numbers = #tpu.dot_dimension_numbers<[1], [0], [0], [1], [0, 0, 1, 1], [], []>} : vector<9x640xbf16>, vector<640x256xbf16>, vector<9x256xf32> -> vector<9x256xf32>
    %c1 = arith.constant 1 : index
    %c0_4 = arith.constant 0 : index
    %4 = vector.load %arg1[%c1, %c0_4] : memref<10x640xbf16, #tpu.memory_space<vmem>>, vector<9x640xbf16>
    %c1_5 = arith.constant 1 : index
    %c0_6 = arith.constant 0 : index
    %c0_7 = arith.constant 0 : index
    %5 = vector.load %arg2[%c1_5, %c0_6, %c0_7] : memref<2x640x256xbf16, #tpu.memory_space<vmem>>, vector<1x640x256xbf16>
    %6 = vector.shape_cast %5 : vector<1x640x256xbf16> to vector<640x256xbf16>
    %cst_8 = arith.constant dense<0.000000e+00> : vector<9x256xf32>
    %7 = tpu.matmul %4, %6, %cst_8 {dimension_numbers = #tpu.dot_dimension_numbers<[1], [0], [0], [1], [0, 0, 1, 1], [], []>} : vector<9x640xbf16>, vector<640x256xbf16>, vector<9x256xf32> -> vector<9x256xf32>
    %8 = arith.addf %3, %7 : vector<9x256xf32>
    %9 = arith.truncf %8 : vector<9x256xf32> to vector<9x256xbf16>
    %c0_9 = arith.constant 0 : index
    %c0_10 = arith.constant 0 : index
    %10 = vector.load %arg3[%c0_9, %c0_10] : memref<10x256xbf16, #tpu.memory_space<vmem>>, vector<9x256xbf16>
    tpu.vector_store %arg3[%c0_9, %c0_10], %9 {strides = array<i32>} : memref<10x256xbf16, #tpu.memory_space<vmem>>, vector<9x256xbf16>,
    %cst_11 = arith.constant 0.000000e+00 : bf16
    %11 = vector.broadcast %cst_11 : bf16 to vector<1x256xbf16>
    %c9 = arith.constant 9 : index
    %c0_12 = arith.constant 0 : index
    %12 = vector.load %arg3[%c9, %c0_12] : memref<10x256xbf16, #tpu.memory_space<vmem>>, vector<1x256xbf16>
    tpu.vector_store %arg3[%c9, %c0_12], %11 {strides = array<i32>} : memref<10x256xbf16, #tpu.memory_space<vmem>>, vector<1x256xbf16>,
    %13 = tpu.iota {dimensions = array<i32: 0>} : vector<9x1xi32>
    %c5_i32 = arith.constant 5 : i32
    %c0_i32 = arith.constant 0 : i32
    %14 = arith.cmpi eq, %c5_i32, %c0_i32 : i32
    %c1_i32 = arith.constant 1 : i32
    %15 = arith.select %14, %c1_i32, %c5_i32 : i32
    %16 = vector.broadcast %15 : i32 to vector<9x1xi32>
    %17 = arith.remsi %13, %16 : vector<9x1xi32>
    %c0_i32_13 = arith.constant 0 : i32
    %18 = vector.broadcast %c0_i32_13 : i32 to vector<9x1xi32>
    %19 = arith.cmpi ne, %17, %18 : vector<9x1xi32>
    %c0_i32_14 = arith.constant 0 : i32
    %20 = vector.broadcast %c0_i32_14 : i32 to vector<9x1xi32>
    %21 = arith.cmpi slt, %17, %20 : vector<9x1xi32>
    %c0_i32_15 = arith.constant 0 : i32
    %22 = arith.cmpi slt, %15, %c0_i32_15 : i32
    %23 = vector.broadcast %22 : i1 to vector<9x1xi1>
    %24 = vector.broadcast %23 : vector<9x1xi1> to vector<9x1xi1>
    %25 = arith.xori %21, %24 : vector<9x1xi1>
    %26 = arith.andi %25, %19 : vector<9x1xi1>
    %27 = vector.broadcast %15 : i32 to vector<9x1xi32>
    %28 = arith.addi %17, %27 : vector<9x1xi32>
    %29 = arith.select %26, %28, %17 : vector<9x1xi1>, vector<9x1xi32>
    %c4_i32 = arith.constant 4 : i32
    %30 = vector.broadcast %c4_i32 : i32 to vector<9x1xi32>
    %31 = arith.cmpi slt, %29, %30 : vector<9x1xi32>
    %c10_i32 = arith.constant 10 : i32
    %32 = arith.muli %arg0, %c10_i32 : i32
    %33 = vector.broadcast %32 : i32 to vector<9x1xi32>
    %34 = arith.addi %13, %33 : vector<9x1xi32>
    %c10_i32_16 = arith.constant 10 : i32
    %35 = vector.broadcast %c10_i32_16 : i32 to vector<9x1xi32>
    %36 = arith.cmpi slt, %34, %35 : vector<9x1xi32>
    %37 = arith.andi %31, %36 : vector<9x1xi1>
    %38 = arith.extui %37 : vector<9x1xi1> to vector<9x1xi32>
    %39 = arith.sitofp %38 : vector<9x1xi32> to vector<9x1xf32>
    %40 = vector.broadcast %39 : vector<9x1xf32> to vector<9x256xf32>
    %41 = arith.mulf %8, %40 : vector<9x256xf32>
    %cst_17 = arith.constant dense<0.000000e+00> : vector<256xf32>
    %42 = vector.multi_reduction <add>, %41, %cst_17 [0] : vector<9x256xf32> to vector<256xf32>
    %43 = vector.shape_cast %42 : vector<256xf32> to vector<1x256xf32>
    %c0_18 = arith.constant 0 : index
    %c0_19 = arith.constant 0 : index
    %c0_20 = arith.constant 0 : index
    %44 = vector.load %arg4[%c0_18, %c0_19, %c0_20] : memref<1x2x256xf32, #tpu.memory_space<vmem>>, vector<1x1x256xf32>
    %45 = vector.shape_cast %44 : vector<1x1x256xf32> to vector<1x256xf32>
    %46 = vector.shape_cast %43 : vector<1x256xf32> to vector<1x1x256xf32>
    tpu.vector_store %arg4[%c0_18, %c0_19, %c0_20], %46 {strides = array<i32>} : memref<1x2x256xf32, #tpu.memory_space<vmem>>, vector<1x1x256xf32>,
    %47 = arith.mulf %41, %8 : vector<9x256xf32>
    %cst_21 = arith.constant dense<0.000000e+00> : vector<256xf32>
    %48 = vector.multi_reduction <add>, %47, %cst_21 [0] : vector<9x256xf32> to vector<256xf32>
    %49 = vector.shape_cast %48 : vector<256xf32> to vector<1x256xf32>
    %c0_22 = arith.constant 0 : index
    %c1_23 = arith.constant 1 : index
    %c0_24 = arith.constant 0 : index
    %50 = vector.load %arg4[%c0_22, %c1_23, %c0_24] : memref<1x2x256xf32, #tpu.memory_space<vmem>>, vector<1x1x256xf32>
    %51 = vector.shape_cast %50 : vector<1x1x256xf32> to vector<1x256xf32>
    %52 = vector.shape_cast %49 : vector<1x256xf32> to vector<1x1x256xf32>
    tpu.vector_store %arg4[%c0_22, %c1_23, %c0_24], %52 {strides = array<i32>} : memref<1x2x256xf32, #tpu.memory_space<vmem>>, vector<1x1x256xf32>,
    return
  }
  func.func @transform_0(%arg0: i32) -> (i32, i32) {
    %c0_i32 = arith.constant 0 : i32
    %c0_i32_0 = arith.constant 0 : i32
    return %arg0, %c0_i32 : i32, i32
  }
  func.func @transform_1(%arg0: i32) -> (i32, i32, i32) {
    %c0_i32 = arith.constant 0 : i32
    %c0_i32_0 = arith.constant 0 : i32
    %c0_i32_1 = arith.constant 0 : i32
    %c0_i32_2 = arith.constant 0 : i32
    return %c0_i32, %c0_i32_0, %c0_i32_1 : i32, i32, i32
  }
  func.func @transform_2(%arg0: i32) -> (i32, i32) {
    %c0_i32 = arith.constant 0 : i32
    %c0_i32_0 = arith.constant 0 : i32
    return %arg0, %c0_i32 : i32, i32
  }
  func.func @transform_3(%arg0: i32) -> (i32, i32, i32) {
    %c0_i32 = arith.constant 0 : i32
    %c0_i32_0 = arith.constant 0 : i32
    %c0_i32_1 = arith.constant 0 : i32
    return %arg0, %c0_i32, %c0_i32_0 : i32, i32, i32
  }
}

module attributes {stable_mosaic.version = 11 : i64} {
  func.func @_conv_stage_kernel(%arg0: i32, %arg1: memref<12x384xbf16, #tpu.memory_space<vmem>>, %arg2: memref<3x384x256xbf16, #tpu.memory_space<vmem>>, %arg3: memref<12x256xbf16, #tpu.memory_space<vmem>>, %arg4: memref<1x2x256xf32, #tpu.memory_space<vmem>>) attributes {dimension_semantics = [#tpu.dimension_semantics<parallel>], iteration_bounds = array<i64: 1>, scalar_prefetch = 0 : i64, scratch_operands = 0 : i64, tpu.core_type = #tpu.core_type<tc>, window_params = [{transform_indices = @transform_0, window_bounds = array<i64: 12, 384>}, {pipeline_mode = #tpu.pipeline_mode<synchronous>, transform_indices = @transform_1, window_bounds = array<i64: 3, 384, 256>}, {transform_indices = @transform_2, window_bounds = array<i64: 12, 256>}, {transform_indices = @transform_3, window_bounds = array<i64: 1, 2, 256>}]} {
    %c0 = arith.constant 0 : index
    %c0_0 = arith.constant 0 : index
    %0 = vector.load %arg1[%c0, %c0_0] : memref<12x384xbf16, #tpu.memory_space<vmem>>, vector<10x384xbf16>
    %c0_1 = arith.constant 0 : index
    %c0_2 = arith.constant 0 : index
    %c0_3 = arith.constant 0 : index
    %1 = vector.load %arg2[%c0_1, %c0_2, %c0_3] : memref<3x384x256xbf16, #tpu.memory_space<vmem>>, vector<1x384x256xbf16>
    %2 = vector.shape_cast %1 : vector<1x384x256xbf16> to vector<384x256xbf16>
    %cst = arith.constant dense<0.000000e+00> : vector<10x256xf32>
    %3 = tpu.matmul %0, %2, %cst {dimension_numbers = #tpu.dot_dimension_numbers<[1], [0], [0], [1], [0, 0, 1, 1], [], []>} : vector<10x384xbf16>, vector<384x256xbf16>, vector<10x256xf32> -> vector<10x256xf32>
    %c1 = arith.constant 1 : index
    %c0_4 = arith.constant 0 : index
    %4 = vector.load %arg1[%c1, %c0_4] : memref<12x384xbf16, #tpu.memory_space<vmem>>, vector<10x384xbf16>
    %c1_5 = arith.constant 1 : index
    %c0_6 = arith.constant 0 : index
    %c0_7 = arith.constant 0 : index
    %5 = vector.load %arg2[%c1_5, %c0_6, %c0_7] : memref<3x384x256xbf16, #tpu.memory_space<vmem>>, vector<1x384x256xbf16>
    %6 = vector.shape_cast %5 : vector<1x384x256xbf16> to vector<384x256xbf16>
    %cst_8 = arith.constant dense<0.000000e+00> : vector<10x256xf32>
    %7 = tpu.matmul %4, %6, %cst_8 {dimension_numbers = #tpu.dot_dimension_numbers<[1], [0], [0], [1], [0, 0, 1, 1], [], []>} : vector<10x384xbf16>, vector<384x256xbf16>, vector<10x256xf32> -> vector<10x256xf32>
    %8 = arith.addf %3, %7 : vector<10x256xf32>
    %c2 = arith.constant 2 : index
    %c0_9 = arith.constant 0 : index
    %9 = vector.load %arg1[%c2, %c0_9] : memref<12x384xbf16, #tpu.memory_space<vmem>>, vector<10x384xbf16>
    %c2_10 = arith.constant 2 : index
    %c0_11 = arith.constant 0 : index
    %c0_12 = arith.constant 0 : index
    %10 = vector.load %arg2[%c2_10, %c0_11, %c0_12] : memref<3x384x256xbf16, #tpu.memory_space<vmem>>, vector<1x384x256xbf16>
    %11 = vector.shape_cast %10 : vector<1x384x256xbf16> to vector<384x256xbf16>
    %cst_13 = arith.constant dense<0.000000e+00> : vector<10x256xf32>
    %12 = tpu.matmul %9, %11, %cst_13 {dimension_numbers = #tpu.dot_dimension_numbers<[1], [0], [0], [1], [0, 0, 1, 1], [], []>} : vector<10x384xbf16>, vector<384x256xbf16>, vector<10x256xf32> -> vector<10x256xf32>
    %13 = arith.addf %8, %12 : vector<10x256xf32>
    %14 = arith.truncf %13 : vector<10x256xf32> to vector<10x256xbf16>
    %c0_14 = arith.constant 0 : index
    %c0_15 = arith.constant 0 : index
    %15 = vector.load %arg3[%c0_14, %c0_15] : memref<12x256xbf16, #tpu.memory_space<vmem>>, vector<10x256xbf16>
    tpu.vector_store %arg3[%c0_14, %c0_15], %14 {strides = array<i32>} : memref<12x256xbf16, #tpu.memory_space<vmem>>, vector<10x256xbf16>,
    %cst_16 = arith.constant 0.000000e+00 : bf16
    %16 = vector.broadcast %cst_16 : bf16 to vector<2x256xbf16>
    %c10 = arith.constant 10 : index
    %c0_17 = arith.constant 0 : index
    %17 = vector.load %arg3[%c10, %c0_17] : memref<12x256xbf16, #tpu.memory_space<vmem>>, vector<2x256xbf16>
    tpu.vector_store %arg3[%c10, %c0_17], %16 {strides = array<i32>} : memref<12x256xbf16, #tpu.memory_space<vmem>>, vector<2x256xbf16>,
    %18 = tpu.iota {dimensions = array<i32: 0>} : vector<10x1xi32>
    %c6_i32 = arith.constant 6 : i32
    %c0_i32 = arith.constant 0 : i32
    %19 = arith.cmpi eq, %c6_i32, %c0_i32 : i32
    %c1_i32 = arith.constant 1 : i32
    %20 = arith.select %19, %c1_i32, %c6_i32 : i32
    %21 = vector.broadcast %20 : i32 to vector<10x1xi32>
    %22 = arith.remsi %18, %21 : vector<10x1xi32>
    %c0_i32_18 = arith.constant 0 : i32
    %23 = vector.broadcast %c0_i32_18 : i32 to vector<10x1xi32>
    %24 = arith.cmpi ne, %22, %23 : vector<10x1xi32>
    %c0_i32_19 = arith.constant 0 : i32
    %25 = vector.broadcast %c0_i32_19 : i32 to vector<10x1xi32>
    %26 = arith.cmpi slt, %22, %25 : vector<10x1xi32>
    %c0_i32_20 = arith.constant 0 : i32
    %27 = arith.cmpi slt, %20, %c0_i32_20 : i32
    %28 = vector.broadcast %27 : i1 to vector<10x1xi1>
    %29 = vector.broadcast %28 : vector<10x1xi1> to vector<10x1xi1>
    %30 = arith.xori %26, %29 : vector<10x1xi1>
    %31 = arith.andi %30, %24 : vector<10x1xi1>
    %32 = vector.broadcast %20 : i32 to vector<10x1xi32>
    %33 = arith.addi %22, %32 : vector<10x1xi32>
    %34 = arith.select %31, %33, %22 : vector<10x1xi1>, vector<10x1xi32>
    %c4_i32 = arith.constant 4 : i32
    %35 = vector.broadcast %c4_i32 : i32 to vector<10x1xi32>
    %36 = arith.cmpi slt, %34, %35 : vector<10x1xi32>
    %c12_i32 = arith.constant 12 : i32
    %37 = arith.muli %arg0, %c12_i32 : i32
    %38 = vector.broadcast %37 : i32 to vector<10x1xi32>
    %39 = arith.addi %18, %38 : vector<10x1xi32>
    %c12_i32_21 = arith.constant 12 : i32
    %40 = vector.broadcast %c12_i32_21 : i32 to vector<10x1xi32>
    %41 = arith.cmpi slt, %39, %40 : vector<10x1xi32>
    %42 = arith.andi %36, %41 : vector<10x1xi1>
    %43 = arith.extui %42 : vector<10x1xi1> to vector<10x1xi32>
    %44 = arith.sitofp %43 : vector<10x1xi32> to vector<10x1xf32>
    %45 = vector.broadcast %44 : vector<10x1xf32> to vector<10x256xf32>
    %46 = arith.mulf %13, %45 : vector<10x256xf32>
    %cst_22 = arith.constant dense<0.000000e+00> : vector<256xf32>
    %47 = vector.multi_reduction <add>, %46, %cst_22 [0] : vector<10x256xf32> to vector<256xf32>
    %48 = vector.shape_cast %47 : vector<256xf32> to vector<1x256xf32>
    %c0_23 = arith.constant 0 : index
    %c0_24 = arith.constant 0 : index
    %c0_25 = arith.constant 0 : index
    %49 = vector.load %arg4[%c0_23, %c0_24, %c0_25] : memref<1x2x256xf32, #tpu.memory_space<vmem>>, vector<1x1x256xf32>
    %50 = vector.shape_cast %49 : vector<1x1x256xf32> to vector<1x256xf32>
    %51 = vector.shape_cast %48 : vector<1x256xf32> to vector<1x1x256xf32>
    tpu.vector_store %arg4[%c0_23, %c0_24, %c0_25], %51 {strides = array<i32>} : memref<1x2x256xf32, #tpu.memory_space<vmem>>, vector<1x1x256xf32>,
    %52 = arith.mulf %46, %13 : vector<10x256xf32>
    %cst_26 = arith.constant dense<0.000000e+00> : vector<256xf32>
    %53 = vector.multi_reduction <add>, %52, %cst_26 [0] : vector<10x256xf32> to vector<256xf32>
    %54 = vector.shape_cast %53 : vector<256xf32> to vector<1x256xf32>
    %c0_27 = arith.constant 0 : index
    %c1_28 = arith.constant 1 : index
    %c0_29 = arith.constant 0 : index
    %55 = vector.load %arg4[%c0_27, %c1_28, %c0_29] : memref<1x2x256xf32, #tpu.memory_space<vmem>>, vector<1x1x256xf32>
    %56 = vector.shape_cast %55 : vector<1x1x256xf32> to vector<1x256xf32>
    %57 = vector.shape_cast %54 : vector<1x256xf32> to vector<1x1x256xf32>
    tpu.vector_store %arg4[%c0_27, %c1_28, %c0_29], %57 {strides = array<i32>} : memref<1x2x256xf32, #tpu.memory_space<vmem>>, vector<1x1x256xf32>,
    return
  }
  func.func @transform_0(%arg0: i32) -> (i32, i32) {
    %c0_i32 = arith.constant 0 : i32
    %c0_i32_0 = arith.constant 0 : i32
    return %arg0, %c0_i32 : i32, i32
  }
  func.func @transform_1(%arg0: i32) -> (i32, i32, i32) {
    %c0_i32 = arith.constant 0 : i32
    %c0_i32_0 = arith.constant 0 : i32
    %c0_i32_1 = arith.constant 0 : i32
    %c0_i32_2 = arith.constant 0 : i32
    return %c0_i32, %c0_i32_0, %c0_i32_1 : i32, i32, i32
  }
  func.func @transform_2(%arg0: i32) -> (i32, i32) {
    %c0_i32 = arith.constant 0 : i32
    %c0_i32_0 = arith.constant 0 : i32
    return %arg0, %c0_i32 : i32, i32
  }
  func.func @transform_3(%arg0: i32) -> (i32, i32, i32) {
    %c0_i32 = arith.constant 0 : i32
    %c0_i32_0 = arith.constant 0 : i32
    %c0_i32_1 = arith.constant 0 : i32
    return %arg0, %c0_i32, %c0_i32_0 : i32, i32, i32
  }
}

module attributes {stable_mosaic.version = 11 : i64} {
  func.func @_head_kernel(%arg0: i32, %arg1: memref<8x1024xbf16, #tpu.memory_space<vmem>>, %arg2: memref<1024x128xbf16, #tpu.memory_space<vmem>>, %arg3: memref<1x128xf32, #tpu.memory_space<vmem>>, %arg4: memref<8x128xf32, #tpu.memory_space<vmem>>) attributes {dimension_semantics = [#tpu.dimension_semantics<parallel>], iteration_bounds = array<i64: 1>, scalar_prefetch = 0 : i64, scratch_operands = 0 : i64, tpu.core_type = #tpu.core_type<tc>, window_params = [{transform_indices = @transform_0, window_bounds = array<i64: 8, 1024>}, {pipeline_mode = #tpu.pipeline_mode<synchronous>, transform_indices = @transform_1, window_bounds = array<i64: 1024, 128>}, {pipeline_mode = #tpu.pipeline_mode<synchronous>, transform_indices = @transform_2, window_bounds = array<i64: 1, 128>}, {transform_indices = @transform_3, window_bounds = array<i64: 8, 128>}]} {
    %c0 = arith.constant 0 : index
    %c0_0 = arith.constant 0 : index
    %0 = vector.load %arg1[%c0, %c0_0] : memref<8x1024xbf16, #tpu.memory_space<vmem>>, vector<8x1024xbf16>
    %c0_1 = arith.constant 0 : index
    %c0_2 = arith.constant 0 : index
    %1 = vector.load %arg2[%c0_1, %c0_2] : memref<1024x128xbf16, #tpu.memory_space<vmem>>, vector<1024x128xbf16>
    %cst = arith.constant dense<0.000000e+00> : vector<8x128xf32>
    %2 = tpu.matmul %0, %1, %cst {dimension_numbers = #tpu.dot_dimension_numbers<[1], [0], [0], [1], [0, 0, 1, 1], [], []>} : vector<8x1024xbf16>, vector<1024x128xbf16>, vector<8x128xf32> -> vector<8x128xf32>
    %c0_3 = arith.constant 0 : index
    %c0_4 = arith.constant 0 : index
    %3 = vector.load %arg3[%c0_3, %c0_4] : memref<1x128xf32, #tpu.memory_space<vmem>>, vector<1x128xf32>
    %4 = vector.broadcast %3 : vector<1x128xf32> to vector<8x128xf32>
    %5 = arith.addf %2, %4 : vector<8x128xf32>
    %c0_5 = arith.constant 0 : index
    %c0_6 = arith.constant 0 : index
    %6 = vector.load %arg4[%c0_5, %c0_6] : memref<8x128xf32, #tpu.memory_space<vmem>>, vector<8x128xf32>
    tpu.vector_store %arg4[%c0_5, %c0_6], %5 {strides = array<i32>} : memref<8x128xf32, #tpu.memory_space<vmem>>, vector<8x128xf32>,
    return
  }
  func.func @transform_0(%arg0: i32) -> (i32, i32) {
    %c0_i32 = arith.constant 0 : i32
    %c0_i32_0 = arith.constant 0 : i32
    return %arg0, %c0_i32 : i32, i32
  }
  func.func @transform_1(%arg0: i32) -> (i32, i32) {
    %c0_i32 = arith.constant 0 : i32
    %c0_i32_0 = arith.constant 0 : i32
    %c0_i32_1 = arith.constant 0 : i32
    return %c0_i32, %c0_i32_0 : i32, i32
  }
  func.func @transform_2(%arg0: i32) -> (i32, i32) {
    %c0_i32 = arith.constant 0 : i32
    %c0_i32_0 = arith.constant 0 : i32
    %c0_i32_1 = arith.constant 0 : i32
    return %c0_i32, %c0_i32_0 : i32, i32
  }
  func.func @transform_3(%arg0: i32) -> (i32, i32) {
    %c0_i32 = arith.constant 0 : i32
    %c0_i32_0 = arith.constant 0 : i32
    return %arg0, %c0_i32 : i32, i32
  }
}

</mosaic_0001>

<bundles_post_ra>
// kernel: image_classify_forward.7
= control target key start
LH: loop header
LB: loop body
LE: loop exit
PB: predicated region body
PF: predicated region fallthrough
CT: control target
= control target key end

     0   :  { %vm279_vm0 = vcmask 1045504   ;;  %vm269_vm1 = vcmask 621568   ;;  %vm93_vm2 = vsmask.f32 7424  ;;  %s1394_s1 = inlined_call_operand.vmem [shape: bf16[2,204,256], index: 1, kind: input, shape index: {}]   ;;  %s1395_s0 = inlined_call_operand.vmem [shape: bf16[34,204], index: 0, kind: input, shape index: {}]   ;;  %s1396_s2 = inlined_call_operand.vmem [shape: bf16[34,256], index: 2, kind: output, shape index: {0}]   ;;  %s1397_s3 = inlined_call_operand.vmem [shape: f32[1,2,256], index: 3, kind: output, shape index: {1}]  }
   0x1   :  { %v959_v0 = vld [vmem:[%s1394_s1 + $0x144] ss:$8 sps:$4 sm:$0xff]   ;;  %v961_v1 = vld [vmem:[%s1394_s1 + $0x74] ss:$8 sps:$4 sm:$0xff]   ;;  %v963_v2 = vld [vmem:[%s1394_s1 + $0x140] ss:$8 sps:$4 sm:$0xff]  }
   0x2   :  { %286 = vmatprep.subr.bf16.mxu0 %v959_v0  ;;  %v964_v3 = vld [vmem:[%s1394_s1 + $0x70] ss:$8 sps:$4 sm:$0xff]   ;;  %490 = vmatprep.subr.bf16.mxu1 %v961_v1  ;;  %v965_v4 = vld [vmem:[%s1394_s1 + $0x134] ss:$8 sps:$4 sm:$0xff]   ;;  %v967_v5 = vld [vmem:[%s1394_s1 + $0x64] ss:$8 sps:$4 sm:$0xff]  }
   0x3   :  { %287 = vmatpush1.bf16.msra.mxu0 %v963_v2  ;;  %491 = vmatpush1.bf16.msra.mxu1 %v964_v3  ;;  %v969_v6 = vld [vmem:[%s1394_s1 + $0x130] ss:$8 sps:$4 sm:$0xff]   ;;  %v970_v7 = vld [vmem:[%s1394_s1 + $0x60] ss:$8 sps:$4 sm:$0xff]   ;;  %v971_v8 = vld [vmem:[%s1394_s1 + $0x124] ss:$8 sps:$4 sm:$0xff]  }
   0x4   :  { %288 = vmatprep.subr.bf16.mxu0 %v965_v4  ;;  %492 = vmatprep.subr.bf16.mxu1 %v967_v5  ;;  %v973_v9 = vld [vmem:[%s1394_s1 + $0x54] ss:$8 sps:$4 sm:$0xff]   ;;  %v975_v10 = vld [vmem:[%s1394_s1 + $0x120] ss:$8 sps:$4 sm:$0xff]   ;;  %v976_v11 = vld [vmem:[%s1394_s1 + $0x50] ss:$8 sps:$4 sm:$0xff]  }
   0x5   :  { %v977_v12 = vld [vmem:[%s1394_s1 + $0x114] ss:$8 sps:$4 sm:$0xff]   ;;  %v979_v13 = vld [vmem:[%s1394_s1 + $0x44] ss:$8 sps:$4 sm:$0xff]   ;;  %v981_v14 = vld [vmem:[%s1394_s1 + $0x110] ss:$8 sps:$4 sm:$0xff]  }
   0x6   :  { %v982_v15 = vld [vmem:[%s1394_s1 + $0x40] ss:$8 sps:$4 sm:$0xff]   ;;  %v983_v16 = vld [vmem:[%s1394_s1 + $0x104] ss:$8 sps:$4 sm:$0xff]   ;;  %v985_v17 = vld [vmem:[%s1394_s1 + $0x34] ss:$8 sps:$4 sm:$0xff]  }
   0x7   :  { %289 = vmatpush1.bf16.msra.mxu0 %v969_v6  ;;  %493 = vmatpush1.bf16.msra.mxu1 %v970_v7  ;;  %v987_v18 = vld [vmem:[%s1394_s1 + $0x100] ss:$8 sps:$4 sm:$0xff]   ;;  %v988_v19 = vld [vmem:[%s1394_s1 + $0x30] ss:$8 sps:$4 sm:$0xff]   ;;  %v989_v20 = vld [vmem:[%s1394_s1 + $0xf4] ss:$8 sps:$4 sm:$0xff]  }
   0x8   :  { %290 = vmatprep.subr.bf16.mxu0 %v971_v8  ;;  %494 = vmatprep.subr.bf16.mxu1 %v973_v9  ;;  %v991_v21 = vld [vmem:[%s1394_s1 + $0x24] ss:$8 sps:$4 sm:$0xff]   ;;  %v993_v22 = vld [vmem:[%s1394_s1 + $0xf0] ss:$8 sps:$4 sm:$0xff]   ;;  %v994_v23 = vld [vmem:[%s1394_s1 + $0x20] ss:$8 sps:$4 sm:$0xff]  }
   0x9   :  { %v995_v24 = vld [vmem:[%s1394_s1 + $0xe4] ss:$8 sps:$4 sm:$0xff]   ;;  %v997_v25 = vld [vmem:[%s1394_s1 + $0x14] ss:$8 sps:$4 sm:$0xff]   ;;  %v999_v26 = vld [vmem:[%s1394_s1 + $0xe0] ss:$8 sps:$4 sm:$0xff]  }
   0xa   :  { %v1000_v27 = vld [vmem:[%s1394_s1 + $0x10] ss:$8 sps:$4 sm:$0xff]   ;;  %v1001_v28 = vld [vmem:[%s1394_s1 + $0xd4] ss:$8 sps:$4 sm:$0xff]   ;;  %v1003_v29 = vld [vmem:[%s1394_s1 + $0x4] ss:$8 sps:$4 sm:$0xff]  }
   0xb   :  { %291 = vmatpush1.bf16.msra.mxu0 %v975_v10  ;;  %495 = vmatpush1.bf16.msra.mxu1 %v976_v11  ;;  %v1005_v30 = vld [vmem:[%s1394_s1 + $0xd0] ss:$8 sps:$4 sm:$0xff]   ;;  %v1006_v31 = vld [vmem:[%s1394_s1] ss:$8 sps:$4 sm:$0xff]   ;;  %v1013_v36 = vld [vmem:[%s1394_s1 + $0x184] ss:$8 sps:$4 sm:$0xff]  }
   0xc   :  { %292 = vmatprep.subr.bf16.mxu0 %v977_v12  ;;  %496 = vmatprep.subr.bf16.mxu1 %v979_v13  ;;  %v1007_v32 = vld [vmem:[%s1394_s1 + $0x194] ss:$8 sps:$4 sm:$0x3f]   ;;  %v1009_v33 = vld [vmem:[%s1394_s1 + $0xc4] ss:$8 sps:$4 sm:$0x3f]  }
   0xd   :  { %v1011_v34 = vld [vmem:[%s1394_s1 + $0x190] ss:$8 sps:$4 sm:$0x3f]   ;;  %v1012_v35 = vld [vmem:[%s1394_s1 + $0xc0] ss:$8 sps:$4 sm:$0x3f]  }
   0xe   :  { %v281_v37 = vsel %vm279_vm0, %v1011_v34, 0  ;;  %v485_v38 = vsel %vm279_vm0, %v1012_v35, 0  ;;  %v1015_v39 = vld [vmem:[%s1394_s1 + $0xb4] ss:$8 sps:$4 sm:$0xff]   ;;  %v1017_v40 = vld [vmem:[%s1394_s1 + $0x180] ss:$8 sps:$4 sm:$0xff]  }
   0xf   :  { %293 = vmatpush1.bf16.msra.mxu0 %v981_v14  ;;  %497 = vmatpush1.bf16.msra.mxu1 %v982_v15  ;;  %v1018_v41 = vld [vmem:[%s1394_s1 + $0xb0] ss:$8 sps:$4 sm:$0xff]   ;;  %v1037_v42 = vld [vmem:[%s1395_s0 + $0x4] ss:$8 sps:$4 sm:$0xff]   ;;  %v1039_v43 = vld [vmem:[%s1395_s0 + $0x14] ss:$8 sps:$4 sm:$0xff]  }
  0x10   :  { %294 = vmatprep.subr.bf16.mxu0 %v983_v16  ;;  %498 = vmatprep.subr.bf16.mxu1 %v985_v17  ;;  %v1019_v44 = vld [vmem:[%s1394_s1 + $0x174] ss:$8 sps:$4 sm:$0xff]   ;;  %v1021_v45 = vld [vmem:[%s1394_s1 + $0xa4] ss:$8 sps:$4 sm:$0xff]   ;;  %v1041_v46 = vld [vmem:[%s1395_s0] ss:$8 sps:$4 sm:$0xff]  }
  0x11   :  { %v107_v47 = vshrl.u32 %v1037_v42, 16  ;;  %v109_v48 = vshll.u32 %v1037_v42, 16  ;;  %v114_v49 = vshll.u32 %v1039_v43, 16  ;;  %928 = vmatprep.mubr.msk.bf16.mxu1 %vm269_vm1, %v1037_v42  ;;  %v18_v50 = vld [vmem:[%s1395_s0 + $0x20] sm:$0x11]  ;;  %v97_v56 = vshll.u32 %v1041_v46, 16 }
  0x12   :  { %v1023_v51 = vld [vmem:[%s1394_s1 + $0x170] ss:$8 sps:$4 sm:$0xff]   ;;  %v1024_v52 = vld [vmem:[%s1394_s1 + $0xa0] ss:$8 sps:$4 sm:$0xff]   ;;  %v1025_v57 = vld [vmem:[%s1394_s1 + $0x164] ss:$8 sps:$4 sm:$0xff]   ;;  %v870_v59 = vcombine.high %v18_v50, %v18_v50  ;;  %v869_v11 = vcombine.low %v18_v50, %v18_v50 }
  0x13   :  { %295 = vmatpush1.bf16.msra.mxu0 %v987_v18  ;;  %499 = vmatpush1.bf16.msra.mxu1 %v988_v19  ;;  %v111_v53 = vrot.slane %v109_v48, 1  ;;  %v116_v54 = vrot.slane %v114_v49, 1  ;;  %v1042_v55 = vld [vmem:[%s1395_s0 + $0x10] ss:$8 sps:$4 sm:$0xff]   ;;  %v1027_v58 = vld [vmem:[%s1394_s1 + $0x94] ss:$8 sps:$4 sm:$0xff]  }
  0x14   :  { %296 = vmatprep.subr.bf16.mxu0 %v989_v20  ;;  %500 = vmatprep.subr.bf16.mxu1 %v991_v21  ;;  %v1029_v61 = vld [vmem:[%s1394_s1 + $0x160] ss:$8 sps:$4 sm:$0xff]   ;;  %v1030_v62 = vld [vmem:[%s1394_s1 + $0x90] ss:$8 sps:$4 sm:$0xff]   ;;  %v95_v0 = vshrl.u32 %v1041_v46, 16  ;;  %v99_v1 = vrot.slane %v97_v56, 1 }
  0x15   :  { %v112_v60 = vor.u32 %v111_v53, %v107_v47  ;;  %v102_v2 = vshll.u32 %v1042_v55, 16  ;;  %v1031_v3 = vld [vmem:[%s1394_s1 + $0x154] ss:$8 sps:$4 sm:$0xff]   ;;  %v1033_v4 = vld [vmem:[%s1394_s1 + $0x84] ss:$8 sps:$4 sm:$0xff]   ;;  %v126_v5 = vshrl.u32 %v1039_v43, 16 }
  0x16   :  { %v130_v6 = vshll.u32 %v870_v59, 16  ;;  %v1035_v7 = vld [vmem:[%s1394_s1 + $0x150] ss:$8 sps:$4 sm:$0xff]   ;;  %v1036_v8 = vld [vmem:[%s1394_s1 + $0x80] ss:$8 sps:$4 sm:$0xff]   ;;  %v100_v9 = vor.u32 %v99_v1, %v95_v0  ;;  %v118_v15 = vshrl.u32 %v1042_v55, 16 }
  0x17   :  { %297 = vmatpush1.bf16.msra.mxu0 %v993_v22  ;;  %501 = vmatpush1.bf16.msra.mxu1 %v994_v23  ;;  %v117_v63 = vsel %vm93_vm2, %v112_v60, %v116_v54  ;;  %v104_v10 = vrot.slane %v102_v2, 1  ;;  %v128_v12 = vor.u32 %v126_v5, %v116_v54  ;;  %v122_v16 = vshll.u32 %v869_v11, 16 }
  0x18   :  { %298 = vmatprep.subr.bf16.mxu0 %v995_v24  ;;  %502 = vmatprep.subr.bf16.mxu1 %v997_v25  ;;  %v132_v13 = vrot.slane %v130_v6, 1  ;;  %v136_v21 = vshrl.u32 %v870_v59, 16  ;;  %v134_v22 = vshrl.u32 %v869_v11, 16  ;;  %v605_v23 = vlaneseq }
  0x19   :  { %898 = vmatprep.mubr.msk.bf16.mxu0 %vm269_vm1, %v117_v63  ;;  %v105_v14 = vsel %vm93_vm2, %v100_v9, %v104_v10  ;;  %v120_v18 = vor.u32 %v118_v15, %v104_v10  ;;  %v124_v19 = vrot.slane %v122_v16, 1  ;;  %v1045_v15 = vmov 0.0  }
  0x1a   :  { %v133_v17 = vsel %vm93_vm2, %v128_v12, %v132_v13  ;;  %v1249_v24 = vshrl.u32 %v605_v23, 7 }
  0x1b   :  { %299 = vmatpush1.bf16.msra.mxu0 %v999_v26  ;;  %503 = vmatpush1.bf16.msra.mxu1 %v1000_v27  ;;  %v125_v20 = vsel %vm93_vm2, %v120_v18, %v124_v19 }
  0x1c   :  { %300 = vmatprep.subr.bf16.mxu0 %v1001_v28  ;;  %504 = vmatprep.subr.bf16.mxu1 %v1003_v29  ;;  %v607_v25 = vadd.s32 8, %v1249_v24  ;;  %v608_v28 = vadd.s32 16, %v1249_v24  ;;  %v1265_v34 = vadd.s32 32, %v1249_v24 }
  0x1e   :  { %v1252_v26 = vmul.u32.u64.low 4042322161, %v607_v25  ;;  %v1253_v27 = vmul.u32.u64.high 4042322161, %v607_v25, %v1252_v26 }
  0x1f   :  { %301 = vmatpush1.bf16.msra.mxu0 %v1005_v30  ;;  %505 = vmatpush1.bf16.msra.mxu1 %v1006_v31  ;;  %v1257_v29 = vmul.u32.u64.low 4042322161, %v1249_v24  ;;  %v1258_v30 = vmul.u32.u64.high 4042322161, %v1249_v24, %v1257_v29  ;;  %v609_v31 = vadd.s32 24, %v1249_v24 }
  0x20   :  { %897 = vmatprep.subr.msk.bf16.mxu0 %vm279_vm0, %v1007_v32  ;;  %927 = vmatprep.subr.msk.bf16.mxu1 %vm279_vm0, %v1009_v33  ;;  %v1261_v32 = vmul.u32.u64.low 4042322161, %v608_v28  ;;  %v1262_v33 = vmul.u32.u64.high 4042322161, %v608_v28, %v1261_v32 }
  0x22   :  { %v639_v42 = vshrl.u32 %v1262_v33, 4 }
  0x23   :  { %309 = vmatpush2.bf16.msra.mxu0 %v281_v37  ;;  %513 = vmatpush2.bf16.msra.mxu1 %v485_v38  ;;  %v628_v37 = vshrl.u32 %v1253_v27, 4 }
  0x24   :  { %310 = vmatprep.subr.bf16.mxu0 %v1013_v36  ;;  %514 = vmatprep.subr.bf16.mxu1 %v1015_v39  ;;  %v1267_v35 = vmul.u32.u64.low 4042322161, %v609_v31  ;;  %v1268_v36 = vmul.u32.u64.high 4042322161, %v609_v31, %v1267_v35  ;;  %v1272_v38 = vmul.u32.u64.low 4042322161, %v1265_v34  ;;  %v1273_v39 = vmul.u32.u64.high 4042322161, %v1265_v34, %v1272_v38 }
  0x26   :  { %v661_v47 = vshrl.u32 %v1273_v39, 4 }
  0x27   :  { %311 = vmatpush2.bf16.msra.mxu0 %v1017_v40  ;;  %515 = vmatpush2.bf16.msra.mxu1 %v1018_v41  ;;  %v617_v40 = vshrl.u32 %v1258_v30, 4  ;;  %v629_v41 = vmul.u32 17, %v628_v37 }
  0x28   :  { %312 = vmatprep.subr.bf16.mxu0 %v1019_v44  ;;  %516 = vmatprep.subr.bf16.mxu1 %v1021_v45  ;;  %v650_v44 = vshrl.u32 %v1268_v36, 4 }
  0x29   :  { %v630_v45 = vsub.s32 %v607_v25, %v629_v41 }
  0x2a   :  { %v651_v49 = vmul.u32 17, %v650_v44 }
  0x2b   :  { %313 = vmatpush2.bf16.msra.mxu0 %v1023_v51  ;;  %517 = vmatpush2.bf16.msra.mxu1 %v1024_v52  ;;  %vm667_vm3 = vcmp.ne.s32.totalorder %v630_v45, 0  ;;  %vm672_vm4 = vcmp.lt.s32.totalorder %v630_v45, 0  ;;  %v662_v51 = vmul.u32 17, %v661_v47  ;;  %v682_v52 = vadd.s32 17, %v630_v45 }
  0x2c   :  { %314 = vmatprep.subr.bf16.mxu0 %v1025_v57  ;;  %518 = vmatprep.subr.bf16.mxu1 %v1027_v58  ;;  %v652_v53 = vsub.s32 %v609_v31, %v651_v49  ;;  %vm1280_vm7 = vmand %vm672_vm4, %vm667_vm3 }
  0x2d   :  { %v663_v56 = vsub.s32 %v1265_v34, %v662_v51  ;;  %v687_v58 = vsel %vm1280_vm7, %v682_v52, %v630_v45  ;;  %vm707_vm7 = vcmp.lt.s32.totalorder %v1265_v34, 34 }
  0x2e   :  { %vm669_vm11 = vcmp.ne.s32.totalorder %v652_v53, 0  ;;  %vm674_vm12 = vcmp.lt.s32.totalorder %v652_v53, 0  ;;  %v684_v0 = vadd.s32 17, %v652_v53  ;;  %vm692_vm0 = vcmp.lt.s32.totalorder %v687_v58, 16 }
  0x2f   :  { %315 = vmatpush2.bf16.msra.mxu0 %v1029_v61  ;;  %519 = vmatpush2.bf16.msra.mxu1 %v1030_v62  ;;  %vm670_vm14 = vcmp.ne.s32.totalorder %v663_v56, 0  ;;  %vm675_vm15 = vcmp.lt.s32.totalorder %v663_v56, 0  ;;  %v937_v16 = vsel %vm692_vm0, 1.0, %v1045_v15  ;;  %vm599_vm0 = vsmask.f32 7954 }
  0x30   :  { %316 = vmatprep.subr.bf16.mxu0 %v1031_v3  ;;  %520 = vmatprep.subr.bf16.mxu1 %v1033_v4  ;;  %vm1307_vm3 = vmand %vm675_vm15, %vm670_vm14  ;;  %vm597_vm14 = vsmask.f32 7938 }
  0x33   :  { %317 = vmatpush2.bf16.msra.mxu0 %v1035_v7  ;;  %521 = vmatpush2.bf16.msra.mxu1 %v1036_v8  ;;  %v685_v7 = vadd.s32 17, %v663_v56 }
  0x36   :  { %319 = vmatmul.mubr.bf16.vlgmr.msra.gmra.mxu0 %v105_v14  ;;  %523 = vmatmul.mubr.bf16.vlgmr.msra.gmra.mxu1 %v1041_v46  ;;  %v640_v46 = vmul.u32 17, %v639_v42 }
  0x37   :  { %899 = vmatprep.mubr.msk.bf16.mxu0 %vm269_vm1, %v133_v17  ;;  %929 = vmatprep.mubr.msk.bf16.mxu1 %vm269_vm1, %v1039_v43  ;;  %v618_v43 = vmul.u32 17, %v617_v40 }
  0x38   :  { %v641_v50 = vsub.s32 %v608_v28, %v640_v46 }
  0x39   :  { %v619_v48 = vsub.s32 %v1249_v24, %v618_v43 }
  0x3a   :  { %vm668_vm8 = vcmp.ne.s32.totalorder %v641_v50, 0  ;;  %vm673_vm9 = vcmp.lt.s32.totalorder %v641_v50, 0 }
  0x3b   :  { %vm666_vm5 = vcmp.ne.s32.totalorder %v619_v48, 0  ;;  %vm671_vm6 = vcmp.lt.s32.totalorder %v619_v48, 0  ;;  %vm1291_vm13 = vmand %vm673_vm9, %vm668_vm8  ;;  %vm587_vm8 = vcmask 1040384   ;;  %vm588_vm9 = vsmask.f32 256 }
  0x3c   :  { %vm1285_vm10 = vmand %vm671_vm6, %vm666_vm5 }
  0x3e   :  { %329 = vmatmul.mubr.bf16.gmra.mxu0 %v125_v20  ;;  %533 = vmatmul.mubr.bf16.gmra.mxu1 %v1042_v55  ;;  %v681_v55 = vadd.s32 17, %v619_v48  ;;  %v690_v20 = vsel %vm1307_vm3, %v685_v7, %v663_v56 }
  0x3f   :  { %900 = vmatprep.mubr.msk.bf16.mxu0 %vm269_vm1, %v136_v21  ;;  %930 = vmatprep.mubr.msk.bf16.mxu1 %vm269_vm1, %v870_v59  ;;  %v683_v59 = vadd.s32 17, %v641_v50  ;;  %vm1297_vm1 = vmand %vm674_vm12, %vm669_vm11  ;;  %vm1320_vm6 = vcmp.lt.s32.totalorder %v690_v20, 16  ;;  %vm590_vm11 = vcmask 1044484   ;;  %vm591_vm12 = vsmask.f32 4352 }
  0x40   :  { %v686_v63 = vsel %vm1285_vm10, %v681_v55, %v619_v48  ;;  %v689_v14 = vsel %vm1297_vm1, %v684_v0, %v652_v53  ;;  %vm712_vm10 = vmand %vm1320_vm6, %vm707_vm7 }
  0x41   :  { %v688_v6 = vsel %vm1291_vm13, %v683_v59, %v641_v50  ;;  %vm1303_vm2 = vcmp.lt.s32.totalorder %v686_v63, 16  ;;  %vm694_vm5 = vcmp.lt.s32.totalorder %v689_v14, 16  ;;  %v940_v34 = vsel %vm712_vm10, 1.0, %v1045_v15  ;;  %vm1337_vm13 = vmand %vm587_vm8, %vm588_vm9 }
  0x42   :  { %vm693_vm4 = vcmp.lt.s32.totalorder %v688_v6, 16  ;;  %v936_v21 = vsel %vm1303_vm2, 1.0, %v1045_v15  ;;  %v939_v37 = vsel %vm694_vm5, 1.0, %v1045_v15  ;;  %vm1343_vm15 = vmand %vm590_vm11, %vm591_vm12  ;;  %vm776_vm5 = vcmp.lt.s32.totalorder %v605_v23, 256 }
  0x43   :  { %v938_v28 = vsel %vm693_vm4, 1.0, %v1045_v15  ;;  %vm593_vm1 = vmor %vm1343_vm15, %vm1337_vm13 }
  0x44   :  { %vm1365_vm2 = vmand %vm587_vm8, %vm597_vm14 }
  0x45   :  { %vm1372_vm3 = vmand %vm590_vm11, %vm599_vm0 }
  0x46   :  { %339 = vmatmul.mubr.bf16.gmra.mxu0 %v134_v22  ;;  %543 = vmatmul.mubr.bf16.gmra.mxu1 %v869_v11  ;;  %v594_v11 = vld [vmem:[%s1396_s2 + $0x20] sm:$0x11]  ;;  %vm601_vm4 = vmor %vm1372_vm3, %vm1365_vm2 }
  0xf6   :  { %v320_v60 = vpop.f32.mrf.mxu0  ;;  %v524_v61 = vpop.f32.mrf.mxu1 }
  0xf7   :  { %v525_v4 = vadd.f32 %v524_v61, %v320_v60 }
  0xf8   :  { %v322_v1 = vpop.f32.mrf.mxu0  ;;  %v526_v2 = vpop.f32.mrf.mxu1 }
  0xf9   :  { %v527_v5 = vadd.f32 %v526_v2, %v322_v1  ;;  %v723_v33 = vmul.f32 %v936_v21, %v525_v4 }
  0xfa   :  { %v324_v9 = vpop.f32.mrf.mxu0  ;;  %v528_v10 = vpop.f32.mrf.mxu1 }
  0xfb   :  { %v942_v12 = vpack.c.bf16 %v527_v5, %v525_v4  ;;  %v529_v13 = vadd.f32 %v528_v10, %v324_v9  ;;  %v724_v38 = vmul.f32 %v936_v21, %v527_v5  ;;  %v779_v48 = vmul.f32 %v723_v33, %v525_v4 }
  0xfc   :  { %v326_v17 = vpop.f32.mrf.mxu0  ;;  %v530_v18 = vpop.f32.mrf.mxu1 }
  0xfd   :  { %583 = vst [vmem:[%s1396_s2] sm:$0xff] %v942_v12  ;;  %v531_v19 = vadd.f32 %v530_v18, %v326_v17  ;;  %v725_v26 = vmul.f32 %v937_v16, %v529_v13  ;;  %v780_v52 = vmul.f32 %v724_v38, %v527_v5 }
  0xfe   :  { %v330_v22 = vpop.f32.mrf.mxu0  ;;  %v534_v25 = vpop.f32.mrf.mxu1 }
  0xff   :  { %v943_v27 = vpack.c.bf16 %v531_v19, %v529_v13  ;;  %v535_v29 = vadd.f32 %v534_v25, %v330_v22  ;;  %v726_v35 = vmul.f32 %v937_v16, %v531_v19  ;;  %v781_v42 = vmul.f32 %v725_v26, %v529_v13 }
 0x100   :  { %v332_v30 = vpop.f32.mrf.mxu0  ;;  %v536_v31 = vpop.f32.mrf.mxu1  ;;  %v733_v57 = vadd.f32 %v725_v26, %v723_v33 }
 0x101   :  { %584 = vst [vmem:[%s1396_s2 + $0x8] sm:$0xff] %v943_v27  ;;  %v537_v36 = vadd.f32 %v536_v31, %v332_v30  ;;  %v727_v39 = vmul.f32 %v938_v28, %v535_v29  ;;  %v782_v49 = vmul.f32 %v726_v35, %v531_v19  ;;  %v789_v58 = vadd.f32 %v781_v42, %v779_v48 }
 0x102   :  { %v334_v40 = vpop.f32.mrf.mxu0  ;;  %v538_v41 = vpop.f32.mrf.mxu1  ;;  %v745_v62 = vadd.f32 %v726_v35, %v724_v38 }
 0x103   :  { %v944_v43 = vpack.c.bf16 %v537_v36, %v535_v29  ;;  %v728_v44 = vmul.f32 %v938_v28, %v537_v36  ;;  %v539_v45 = vadd.f32 %v538_v41, %v334_v40  ;;  %v783_v53 = vmul.f32 %v727_v39, %v535_v29 }
 0x104   :  { %v336_v46 = vpop.f32.mrf.mxu0  ;;  %v540_v47 = vpop.f32.mrf.mxu1  ;;  %v800_v4 = vadd.f32 %v782_v49, %v780_v52  ;;  %v734_v5 = vadd.f32 %v733_v57, %v727_v39 }
 0x105   :  { %585 = vst [vmem:[%s1396_s2 + $0x10] sm:$0xff] %v944_v43  ;;  %v729_v50 = vmul.f32 %v939_v37, %v539_v45  ;;  %v541_v51 = vadd.f32 %v540_v47, %v336_v46  ;;  %v784_v59 = vmul.f32 %v728_v44, %v537_v36  ;;  %v790_v7 = vadd.f32 %v789_v58, %v783_v53 }
 0x106   :  { %v340_v54 = vpop.f32.mrf.mxu0  ;;  %v544_v55 = vpop.f32.mrf.mxu1  ;;  %v746_v8 = vadd.f32 %v745_v62, %v728_v44  ;;  %v1046_v44 = vmov 1966171168  }
 0x107   :  { %v945_v60 = vpack.c.bf16 %v541_v51, %v539_v45  ;;  %v785_v63 = vmul.f32 %v729_v50, %v539_v45  ;;  %v730_v0 = vmul.f32 %v939_v37, %v541_v51  ;;  %v545_v1 = vadd.f32 %v544_v55, %v340_v54 }
 0x108   :  { %v342_v2 = vpop.f32.mrf.mxu0  ;;  %v546_v3 = vpop.f32.mrf.mxu1  ;;  %v801_v14 = vadd.f32 %v800_v4, %v784_v59  ;;  %v735_v15 = vadd.f32 %v734_v5, %v729_v50  ;;  %v760_v45 = vunpack.c.l.s4 %v1046_v44 }
 0x109   :  { %586 = vst [vmem:[%s1396_s2 + $0x18] sm:$0xff] %v945_v60  ;;  %v547_v6 = vadd.f32 %v546_v3, %v342_v2  ;;  %v786_v9 = vmul.f32 %v730_v0, %v541_v51  ;;  %v731_v10 = vmul.f32 %v940_v34, %v545_v1  ;;  %v791_v18 = vadd.f32 %v790_v7, %v785_v63 }
 0x10a   :  { %v344_v12 = vpop.f32.mrf.mxu0  ;;  %v548_v13 = vpop.f32.mrf.mxu1  ;;  %v747_v19 = vadd.f32 %v746_v8, %v730_v0 }
 0x10b   :  { %v946_v16 = vpack.c.bf16 %v547_v6, %v545_v1  ;;  %v732_v17 = vmul.f32 %v940_v34, %v547_v6  ;;  %v737_v20 = vsel %vm587_vm8, %v731_v10, 0.0  ;;  %v787_v21 = vmul.f32 %v731_v10, %v545_v1 }
 0x10c   :  { %v345_v22 = vpop.f32.mrf.mxu0  ;;  %v549_v25 = vpop.f32.mrf.mxu1  ;;  %v738_v26 = vadd.f32 %v737_v20, %v735_v15  ;;  %v802_v30 = vadd.f32 %v801_v14, %v786_v9  ;;  %v761_v34 = vunpack.c.0.s8 %v760_v45 }
 0x10d   :  { %v595_v27 = vsel %vm593_vm1, %v946_v16, %v594_v11  ;;  %v748_v28 = vsel %vm587_vm8, %v732_v17, 0.0  ;;  %v788_v29 = vmul.f32 %v732_v17, %v547_v6  ;;  %v792_v31 = vsel %vm587_vm8, %v787_v21, 0.0 }
 0x10e   :  { %596 = vst [vmem:[%s1396_s2 + $0x20] sm:$0x11] %v595_v27  ;;  %v749_v32 = vadd.f32 %v748_v28, %v747_v19  ;;  %v739_v33 = vrot.slane %v738_v26, 4  ;;  %v793_v35 = vadd.f32 %v792_v31, %v791_v18  ;;  %v764_v0 = vsub.s32 %v761_v34, %v1249_v24 }
 0x10f   :  { %v803_v37 = vsel %vm587_vm8, %v788_v29, 0.0 }
 0x110   :  { %v750_v39 = vrot.slane %v749_v32, 4  ;;  %v804_v40 = vadd.f32 %v803_v37, %v802_v30  ;;  %v740_v41 = vadd.f32 %v739_v33, %v738_v26  ;;  %v794_v42 = vrot.slane %v793_v35, 4 }
 0x112   :  { %v751_v43 = vadd.f32 %v750_v39, %v749_v32  ;;  %v805_v46 = vrot.slane %v804_v40, 4  ;;  %v741_v47 = vrot.slane %v740_v41, 2  ;;  %v795_v48 = vadd.f32 %v794_v42, %v793_v35 }
 0x114   :  { %v752_v49 = vrot.slane %v751_v43, 2  ;;  %v806_v50 = vadd.f32 %v805_v46, %v804_v40  ;;  %v742_v51 = vadd.f32 %v741_v47, %v740_v41  ;;  %v796_v52 = vrot.slane %v795_v48, 2 }
 0x115   :  { %v602_v53 = vld [vmem:[%s1396_s2 + $0x20] sm:$0x11] }
 0x116   :  { %v603_v54 = vsel %vm601_vm4, 0, %v602_v53  ;;  %v753_v55 = vadd.f32 %v752_v49, %v751_v43  ;;  %v807_v56 = vrot.slane %v806_v50, 2  ;;  %v743_v57 = vrot.slane %v742_v51, 1 }
 0x117   :  { %v797_v58 = vadd.f32 %v796_v52, %v795_v48  ;;  %604 = vst [vmem:[%s1396_s2 + $0x20] sm:$0x11] %v603_v54 }
 0x118   :  { %v754_v59 = vrot.slane %v753_v55, 1  ;;  %v808_v60 = vadd.f32 %v807_v56, %v806_v50  ;;  %v744_v62 = vadd.f32 %v743_v57, %v742_v51 }
 0x119   :  { %v798_v61 = vrot.slane %v797_v58, 1 }
 0x11a   :  { %v755_v63 = vadd.f32 %v754_v59, %v753_v55  ;;  %v809_v1 = vrot.slane %v808_v60, 1 }
 0x11b   :  { %v799_v2 = vadd.f32 %v798_v61, %v797_v58 }
 0x11c   :  { %v758_v3 = vcombine.low %v744_v62, %v755_v63  ;;  %v810_v4 = vadd.f32 %v809_v1, %v808_v60 }
 0x11e   :  { %v765_v5 = vrot.slane %v758_v3, %v764_v0  ;;  %v813_v6 = vcombine.low %v799_v2, %v810_v4 }
 0x120   :  { %v772_v7 = vrot.slane %v765_v5, %v764_v0  ;;  %v820_v8 = vrot.slane %v813_v6, %v764_v0 }
 0x122   :  { %778 = vst.msk [vmem:[%s1397_s3] ss:$2 sm:$0x3] %vm776_vm5, %v772_v7  ;;  %v827_v9 = vrot.slane %v820_v8, %v764_v0 }
 0x124   :  { %941 = vst.msk [vmem:[%s1397_s3 + $0x1] ss:$2 sm:$0x3] %vm776_vm5, %v827_v9 }

// kernel: image_classify_forward.8
= control target key start
LH: loop header
LB: loop body
LE: loop exit
PB: predicated region body
PF: predicated region fallthrough
CT: control target
= control target key end

     0   :  { %v1917_v1 = vmov 0   ;;  %vm133_vm0 = vsmask.f32 7424  ;;  %vm389_vm1 = vcmask 261120   ;;  %vm891_vm2 = vcmask 1046528   ;;  %s2625_s1 = inlined_call_operand.vmem [shape: bf16[3,288,256], index: 1, kind: input, shape index: {}]   ;;  %s2626_s0 = inlined_call_operand.vmem [shape: bf16[36,288], index: 0, kind: input, shape index: {}]   ;;  %s2627_s2 = inlined_call_operand.vmem [shape: bf16[36,256], index: 2, kind: output, shape index: {0}]   ;;  %s2628_s3 = inlined_call_operand.vmem [shape: f32[1,2,256], index: 3, kind: output, shape index: {1}]  }
   0x1   :  { %v1739_v0 = vld [vmem:[%s2625_s1 + $0x194] ss:$8 sps:$4 sm:$0xff]   ;;  %492 = vmatprep.mubr.bf16.mxu1 %v1917_v1  ;;  %v1743_v3 = vld [vmem:[%s2625_s1 + $0x190] ss:$8 sps:$4 sm:$0xff]   ;;  %v1745_v5 = vld [vmem:[%s2625_s1 + $0x184] ss:$8 sps:$4 sm:$0xff]  }
   0x2   :  { %v1741_v2 = vld [vmem:[%s2625_s1 + $0x234] ss:$8 sps:$4 sm:$0xff]   ;;  %399 = vmatprep.subr.bf16.mxu0 %v1739_v0  ;;  %v1744_v4 = vld [vmem:[%s2625_s1 + $0x230] ss:$8 sps:$4 sm:$0xff]   ;;  %v1747_v6 = vld [vmem:[%s2625_s1 + $0x224] ss:$8 sps:$4 sm:$0xff]  }
   0x3   :  { %472 = vmatprep.subr.bf16.mxu1 %v1741_v2  ;;  %400 = vmatpush1.bf16.msra.mxu0 %v1743_v3  ;;  %v1749_v7 = vld [vmem:[%s2625_s1 + $0x180] ss:$8 sps:$4 sm:$0xff]   ;;  %v1751_v9 = vld [vmem:[%s2625_s1 + $0x174] ss:$8 sps:$4 sm:$0xff]   ;;  %v1758_v18 = vld [vmem:[%s2625_s1 + $0x170] ss:$8 sps:$4 sm:$0xff]  }
   0x4   :  { %473 = vmatpush1.bf16.msra.mxu1 %v1744_v4  ;;  %401 = vmatprep.subr.bf16.mxu0 %v1745_v5  ;;  %v1750_v8 = vld [vmem:[%s2625_s1 + $0x220] ss:$8 sps:$4 sm:$0xff]   ;;  %v1974_v11 = vld [vmem:[%s2626_s0 + $0x14] sm:$0xf]  ;;  %v1759_v19 = vld [vmem:[%s2625_s1 + $0x164] ss:$8 sps:$4 sm:$0xff]  }
   0x5   :  { %474 = vmatprep.subr.bf16.mxu1 %v1747_v6  ;;  %v15_v10 = vld [vmem:[%s2626_s0 + $0x8] sm:$0xf]  ;;  %v1982_v13 = vld [vmem:[%s2626_s0 + $0x20] ss:$12 sps:$4 sm:$0xff]   ;;  %v1757_v17 = vld [vmem:[%s2625_s1 + $0x74] ss:$8 sps:$4 sm:$0xff]  }
   0x6   :  { %v1977_v12 = vcombine.low %v15_v10, %v1974_v11  ;;  %v166_v16 = vshll.u32 %v1982_v13, 16  ;;  %v1755_v22 = vld [vmem:[%s2625_s1 + $0x70] ss:$8 sps:$4 sm:$0xff]   ;;  %v1764_v23 = vld [vmem:[%s2625_s1 + $0x160] ss:$8 sps:$4 sm:$0xff]   ;;  %v186_v49 = vshrl.u32 %v1982_v13, 16 }
   0x7   :  { %402 = vmatpush1.bf16.msra.mxu0 %v1749_v7  ;;  %v1765_v25 = vld [vmem:[%s2625_s1 + $0x154] ss:$8 sps:$4 sm:$0xff]   ;;  %v1763_v26 = vld [vmem:[%s2625_s1 + $0x64] ss:$8 sps:$4 sm:$0xff]   ;;  %v1770_v28 = vld [vmem:[%s2625_s1 + $0x150] ss:$8 sps:$4 sm:$0xff]  }
   0x8   :  { %475 = vmatpush1.bf16.msra.mxu1 %v1750_v8  ;;  %403 = vmatprep.subr.bf16.mxu0 %v1751_v9  ;;  %v159_v14 = vshrl.u32 %v1977_v12, 16  ;;  %v161_v15 = vshll.u32 %v1977_v12, 16  ;;  %v1996_v21 = vrot.slane %v166_v16, 1  ;;  %v1761_v29 = vld [vmem:[%s2625_s1 + $0x60] ss:$8 sps:$4 sm:$0xff]   ;;  %v2127_v5 = vld [vmem:[%s2626_s0 + $0xc] sm:$0xff] }
   0x9   :  { %722 = vmatprep.subr.bf16.mxu1 %v1757_v17  ;;  %v1771_v30 = vld [vmem:[%s2625_s1 + $0x144] ss:$8 sps:$4 sm:$0xff]   ;;  %v1769_v31 = vld [vmem:[%s2625_s1 + $0x54] ss:$8 sps:$4 sm:$0xff]   ;;  %v1767_v32 = vld [vmem:[%s2625_s1 + $0x50] ss:$8 sps:$4 sm:$0xff]  }
   0xa   :  { %v163_v20 = vrot.slane %v161_v15, 1  ;;  %v1776_v33 = vld [vmem:[%s2625_s1 + $0x140] ss:$8 sps:$4 sm:$0xff]   ;;  %v1777_v34 = vld [vmem:[%s2625_s1 + $0x134] ss:$8 sps:$4 sm:$0xff]   ;;  %v188_v54 = vor.u32 %v186_v49, %v1996_v21 }
   0xb   :  { %404 = vmatpush1.bf16.msra.mxu0 %v1758_v18  ;;  %v1775_v35 = vld [vmem:[%s2625_s1 + $0x44] ss:$8 sps:$4 sm:$0xff]   ;;  %v1782_v36 = vld [vmem:[%s2625_s1 + $0x130] ss:$8 sps:$4 sm:$0xff]   ;;  %v1773_v37 = vld [vmem:[%s2625_s1 + $0x40] ss:$8 sps:$4 sm:$0xff]  }
   0xc   :  { %v164_v24 = vor.u32 %v163_v20, %v159_v14  ;;  %405 = vmatprep.subr.bf16.mxu0 %v1759_v19  ;;  %v1783_v38 = vld [vmem:[%s2625_s1 + $0x124] ss:$8 sps:$4 sm:$0xff]   ;;  %v1781_v39 = vld [vmem:[%s2625_s1 + $0x34] ss:$8 sps:$4 sm:$0xff]   ;;  %v1779_v40 = vld [vmem:[%s2625_s1 + $0x30] ss:$8 sps:$4 sm:$0xff]  }
   0xd   :  { %v1788_v41 = vld [vmem:[%s2625_s1 + $0x120] ss:$8 sps:$4 sm:$0xff]   ;;  %v1789_v42 = vld [vmem:[%s2625_s1 + $0x214] ss:$8 sps:$4 sm:$0xff]   ;;  %v1787_v43 = vld [vmem:[%s2625_s1 + $0x24] ss:$8 sps:$4 sm:$0xff]  }
   0xe   :  { %v169_v27 = vsel %vm133_vm0, %v164_v24, %v1996_v21  ;;  %v1794_v44 = vld [vmem:[%s2625_s1 + $0x210] ss:$8 sps:$4 sm:$0xff]   ;;  %v1785_v45 = vld [vmem:[%s2625_s1 + $0x20] ss:$8 sps:$4 sm:$0xff]   ;;  %v1795_v46 = vld [vmem:[%s2625_s1 + $0x204] ss:$8 sps:$4 sm:$0xff]  }
   0xf   :  { %1587 = vmatmul.mubr.msk.bf16.vlgmr.msra.gmra.mxu1 %vm389_vm1, %v169_v27  ;;  %406 = vmatpush1.bf16.msra.mxu0 %v1764_v23  ;;  %v1793_v47 = vld [vmem:[%s2625_s1 + $0x14] ss:$8 sps:$4 sm:$0xff]   ;;  %v1791_v48 = vld [vmem:[%s2625_s1 + $0x10] ss:$8 sps:$4 sm:$0xff]   ;;  %v1800_v50 = vld [vmem:[%s2625_s1 + $0x200] ss:$8 sps:$4 sm:$0xff]  }
  0x10   :  { %723 = vmatpush1.bf16.msra.mxu1 %v1755_v22  ;;  %407 = vmatprep.subr.bf16.mxu0 %v1765_v25  ;;  %v1801_v51 = vld [vmem:[%s2625_s1 + $0x1f4] ss:$8 sps:$4 sm:$0xff]   ;;  %v2087_v52 = vld [vmem:[%s2626_s0 + $0x38] ss:$0 sps:$4 sm:$0x33]   ;;  %v14_v4 = vld [vmem:[%s2626_s0] sm:$0xff] }
  0x11   :  { %724 = vmatprep.subr.bf16.mxu1 %v1763_v26  ;;  %502 = vmatprep.mubr.bf16.mxu1 %v1917_v1  ;;  %v1799_v53 = vld [vmem:[%s2625_s1 + $0x4] ss:$8 sps:$4 sm:$0xff]   ;;  %v190_v55 = vshll.u32 %v2087_v52, 16  ;;  %v1797_v56 = vld [vmem:[%s2625_s1] ss:$8 sps:$4 sm:$0xff]   ;;  %v200_v63 = vshrl.u32 %v2087_v52, 16  ;;  %v1543_v6 = vcombine.high %v14_v4, %v2127_v5  ;;  %v2144_v17 = vcombine.low %v14_v4, %v2127_v5 }
  0x12   :  { %v1806_v57 = vld [vmem:[%s2625_s1 + $0x1f0] ss:$8 sps:$4 sm:$0xff]   ;;  %v1807_v58 = vld [vmem:[%s2625_s1 + $0x1e4] ss:$8 sps:$4 sm:$0xff]   ;;  %v1805_v60 = vld [vmem:[%s2625_s1 + $0xf4] ss:$8 sps:$4 sm:$0xff]  }
  0x13   :  { %408 = vmatpush1.bf16.msra.mxu0 %v1770_v28  ;;  %v192_v59 = vrot.slane %v190_v55, 1  ;;  %v1803_v61 = vld [vmem:[%s2625_s1 + $0xf0] ss:$8 sps:$4 sm:$0xff]   ;;  %v1811_v0 = vld [vmem:[%s2625_s1 + $0xe4] ss:$8 sps:$4 sm:$0xff]   ;;  %v147_v14 = vshrl.u32 %v1543_v6, 16 }
  0x14   :  { %725 = vmatpush1.bf16.msra.mxu1 %v1761_v29  ;;  %409 = vmatprep.subr.bf16.mxu0 %v1771_v30  ;;  %v1812_v2 = vld [vmem:[%s2625_s1 + $0x1e0] ss:$8 sps:$4 sm:$0xff]   ;;  %v1813_v3 = vld [vmem:[%s2625_s1 + $0x1d4] ss:$8 sps:$4 sm:$0xff]   ;;  %v1818_v10 = vld [vmem:[%s2625_s1 + $0x1d0] ss:$8 sps:$4 sm:$0xff]  }
  0x15   :  { %726 = vmatprep.subr.bf16.mxu1 %v1769_v31  ;;  %v193_v62 = vsel %vm133_vm0, %v188_v54, %v192_v59  ;;  %v2134_v7 = vld [vmem:[%s2626_s0 + $0x1c] ss:$12 sps:$4 sm:$0xff]   ;;  %v202_v9 = vor.u32 %v200_v63, %v192_v59  ;;  %v149_v15 = vshll.u32 %v1543_v6, 16  ;;  %v1820_v18 = vld [vmem:[%s2625_s1 + $0x1c4] ss:$8 sps:$4 sm:$0xff]   ;;  %v137_v27 = vshll.u32 %v2144_v17, 16 }
  0x16   :  { %v1809_v8 = vld [vmem:[%s2625_s1 + $0xe0] ss:$8 sps:$4 sm:$0xff]   ;;  %v154_v16 = vshll.u32 %v2134_v7, 16  ;;  %v1817_v19 = vld [vmem:[%s2625_s1 + $0xd4] ss:$8 sps:$4 sm:$0xff]  }
  0x17   :  { %410 = vmatpush1.bf16.msra.mxu0 %v1776_v33  ;;  %1588 = vmatmul.mubr.msk.bf16.gmra.mxu1 %vm389_vm1, %v193_v62  ;;  %v151_v20 = vrot.slane %v149_v15, 1  ;;  %v1815_v22 = vld [vmem:[%s2625_s1 + $0xd0] ss:$8 sps:$4 sm:$0xff]   ;;  %v1825_v23 = vld [vmem:[%s2625_s1 + $0x1c0] ss:$8 sps:$4 sm:$0xff]  }
  0x18   :  { %727 = vmatpush1.bf16.msra.mxu1 %v1767_v32  ;;  %411 = vmatprep.subr.bf16.mxu0 %v1777_v34  ;;  %v156_v21 = vrot.slane %v154_v16, 1  ;;  %v60_v24 = vld [vmem:[%s2626_s0 + $0x30] sm:$0x33]  ;;  %v2165_v26 = vld [vmem:[%s2626_s0 + $0x18] ss:$12 sps:$4 sm:$0xff]   ;;  %v135_v34 = vshrl.u32 %v2144_v17, 16 }
  0x19   :  { %728 = vmatprep.subr.bf16.mxu1 %v1775_v35  ;;  %512 = vmatprep.mubr.bf16.mxu1 %v1917_v1  ;;  %v152_v25 = vor.u32 %v151_v20, %v147_v14  ;;  %v1826_v28 = vld [vmem:[%s2625_s1 + $0x1b4] ss:$8 sps:$4 sm:$0xff]   ;;  %v2171_v29 = vcombine.high %v60_v24, %v60_v24  ;;  %v1824_v30 = vld [vmem:[%s2625_s1 + $0xc4] ss:$8 sps:$4 sm:$0xff]   ;;  %v1822_v32 = vld [vmem:[%s2625_s1 + $0xc0] ss:$8 sps:$4 sm:$0xff]  }
  0x1a   :  { %v1831_v33 = vld [vmem:[%s2625_s1 + $0x1b0] ss:$8 sps:$4 sm:$0xff]   ;;  %v139_v35 = vrot.slane %v137_v27, 1  ;;  %v170_v55 = vshrl.u32 %v2165_v26, 16  ;;  %v1848_v4 = vld [vmem:[%s2625_s1 + $0x84] ss:$8 sps:$4 sm:$0xff]  }
  0x1b   :  { %412 = vmatpush1.bf16.msra.mxu0 %v1782_v36  ;;  %v157_v31 = vsel %vm133_vm0, %v152_v25, %v156_v21  ;;  %v142_v36 = vshll.u32 %v2165_v26, 16  ;;  %v1853_v14 = vld [vmem:[%s2625_s1 + $0x2b4] ss:$8 sps:$4 sm:$0xff]   ;;  %v1851_v16 = vld [vmem:[%s2625_s1 + $0x2b0] ss:$8 sps:$4 sm:$0xff]  }
  0x1c   :  { %729 = vmatpush1.bf16.msra.mxu1 %v1773_v37  ;;  %413 = vmatprep.subr.bf16.mxu0 %v1783_v38  ;;  %v1832_v37 = vld [vmem:[%s2625_s1 + $0x1a4] ss:$8 sps:$4 sm:$0xff]   ;;  %v178_v38 = vshrl.u32 %v2134_v7, 16  ;;  %v1860_v25 = vld [vmem:[%s2625_s1 + $0x290] ss:$8 sps:$4 sm:$0xff]  }
  0x1d   :  { %730 = vmatprep.subr.bf16.mxu1 %v1781_v39  ;;  %431 = vmatprep.mubr.bf16.mxu0 %v157_v31  ;;  %v182_v39 = vshll.u32 %v2171_v29, 16  ;;  %v844_v20 = vld [vmem:[%s2626_s0] sm:$0xee]  ;;  %1271 = vst [vmem:[%s2627_s2 + $0x20] sm:$0x22] %v1917_v1 }
  0x1e   :  { %v1669_v31 = vcombine.high %v844_v20, %v2127_v5 }
  0x1f   :  { %414 = vmatpush1.bf16.msra.mxu0 %v1788_v41  ;;  %1589 = vmatmul.mubr.msk.bf16.gmra.mxu1 %vm389_vm1, %v202_v9  ;;  %v1830_v41 = vld [vmem:[%s2625_s1 + $0xb4] ss:$8 sps:$4 sm:$0xff]   ;;  %v184_v49 = vrot.slane %v182_v39, 1  ;;  %v1876_v39 = vld [vmem:[%s2625_s1 + $0x264] ss:$8 sps:$4 sm:$0xff]  }
  0x20   :  { %731 = vmatpush1.bf16.msra.mxu1 %v1779_v40  ;;  %415 = vmatprep.subr.bf16.mxu0 %v1789_v42  ;;  %v2190_v40 = vcombine.low %v60_v24, %v60_v24  ;;  %v893_v42 = vrot.slane %v2165_v26, 1 }
  0x21   :  { %732 = vmatprep.subr.bf16.mxu1 %v1787_v43  ;;  %754 = vmatprep.mubr.bf16.mxu1 %v1543_v6  ;;  %v1892_v6 = vld [vmem:[%s2625_s1 + $0x354] ss:$8 sps:$4 sm:$0xff]  }
  0x22   :  { %v901_v43 = vrot.slane %v2190_v40, 1  ;;  %v194_v15 = vshrl.u32 %v2190_v40, 16 }
  0x23   :  { %416 = vmatpush2.bf16.msra.mxu0 %v1794_v44  ;;  %v1837_v44 = vld [vmem:[%s2625_s1 + $0x1a0] ss:$8 sps:$4 sm:$0xff]  }
  0x24   :  { %733 = vmatpush1.bf16.msra.mxu1 %v1785_v45  ;;  %417 = vmatprep.subr.bf16.mxu0 %v1795_v46  ;;  %v140_v45 = vor.u32 %v139_v35, %v135_v34  ;;  %v144_v46 = vrot.slane %v142_v36, 1  ;;  %v1904_v34 = vld [vmem:[%s2625_s1 + $0x344] ss:$8 sps:$4 sm:$0xff]   ;;  %v896_v35 = vrot.slane %v2134_v7, 1 }
  0x25   :  { %734 = vmatprep.subr.bf16.mxu1 %v1793_v47  ;;  %v1828_v47 = vld [vmem:[%s2625_s1 + $0xb0] ss:$8 sps:$4 sm:$0xff]  }
  0x26   :  { %v145_v54 = vsel %vm133_vm0, %v140_v45, %v144_v46  ;;  %v172_v62 = vor.u32 %v170_v55, %v144_v46  ;;  %v845_v45 = vld [vmem:[%s2626_s0 + $0x8] sm:$0xe]  ;;  %v1882_v46 = vld [vmem:[%s2625_s1 + $0x244] ss:$8 sps:$4 sm:$0xff]  }
  0x27   :  { %418 = vmatpush2.bf16.msra.mxu0 %v1800_v50  ;;  %v1859_v50 = vld [vmem:[%s2625_s1 + $0x114] ss:$8 sps:$4 sm:$0xff]   ;;  %v1889_v55 = vld [vmem:[%s2625_s1 + $0x324] ss:$8 sps:$4 sm:$0xff]  }
  0x28   :  { %735 = vmatpush1.bf16.msra.mxu1 %v1791_v48  ;;  %419 = vmatprep.subr.bf16.mxu0 %v1801_v51  ;;  %v180_v48 = vor.u32 %v178_v38, %v156_v21  ;;  %v2211_v51 = vsel %vm891_vm2, %v893_v42, %v901_v43  ;;  %v1854_v21 = vld [vmem:[%s2625_s1 + $0x2a0] ss:$8 sps:$4 sm:$0xff]   ;;  %v1871_v38 = vld [vmem:[%s2625_s1 + $0x270] ss:$8 sps:$4 sm:$0xff]  }
  0x29   :  { %736 = vmatprep.subr.bf16.mxu1 %v1799_v53  ;;  %v1836_v53 = vld [vmem:[%s2625_s1 + $0xa4] ss:$8 sps:$4 sm:$0xff]  }
  0x2a   :  { %v185_v59 = vsel %vm133_vm0, %v180_v48, %v184_v49  ;;  %v1670_v48 = vcombine.low %v845_v45, %v1974_v11  ;;  %v1884_v11 = vld [vmem:[%s2625_s1 + $0x330] ss:$8 sps:$4 sm:$0xff]  }
  0x2b   :  { %420 = vmatpush2.bf16.msra.mxu0 %v1806_v57  ;;  %v1857_v57 = vld [vmem:[%s2625_s1 + $0x110] ss:$8 sps:$4 sm:$0xff]  }
  0x2c   :  { %737 = vmatpush1.bf16.msra.mxu1 %v1797_v56  ;;  %421 = vmatprep.subr.bf16.mxu0 %v1807_v58  ;;  %v174_v56 = vshll.u32 %v2190_v40, 16  ;;  %v1834_v58 = vld [vmem:[%s2625_s1 + $0xa0] ss:$8 sps:$4 sm:$0xff]  }
  0x2d   :  { %738 = vmatprep.subr.bf16.mxu1 %v1805_v60  ;;  %v1865_v60 = vld [vmem:[%s2625_s1 + $0x104] ss:$8 sps:$4 sm:$0xff]  }
  0x2e   :  { %v176_v63 = vrot.slane %v174_v56, 1 }
  0x2f   :  { %422 = vmatpush2.bf16.msra.mxu0 %v1812_v2  ;;  %v1863_v2 = vld [vmem:[%s2625_s1 + $0x100] ss:$8 sps:$4 sm:$0xff]  }
  0x30   :  { %739 = vmatpush2.bf16.msra.mxu1 %v1803_v61  ;;  %423 = vmatprep.subr.bf16.mxu0 %v1813_v3  ;;  %v1845_v61 = vld [vmem:[%s2625_s1 + $0x94] ss:$8 sps:$4 sm:$0xff]   ;;  %v1843_v3 = vld [vmem:[%s2625_s1 + $0x90] ss:$8 sps:$4 sm:$0xff]  }
  0x31   :  { %740 = vmatprep.subr.bf16.mxu1 %v1811_v0  ;;  %v197_v0 = vshrl.u32 %v2171_v29, 16 }
  0x33   :  { %424 = vmatpush2.bf16.msra.mxu0 %v1818_v10  ;;  %v199_v9 = vor.u32 %v197_v0, %v184_v49  ;;  %v1846_v10 = vld [vmem:[%s2625_s1 + $0x80] ss:$8 sps:$4 sm:$0xff]   ;;  %v1907_v0 = vld [vmem:[%s2625_s1 + $0x2e4] ss:$8 sps:$4 sm:$0xff]  }
  0x34   :  { %741 = vmatpush2.bf16.msra.mxu1 %v1809_v8  ;;  %425 = vmatprep.subr.bf16.mxu0 %v1820_v18  ;;  %v177_v8 = vsel %vm133_vm0, %v172_v62, %v176_v63  ;;  %v1856_v18 = vld [vmem:[%s2625_s1 + $0x2a4] ss:$8 sps:$4 sm:$0xff]   ;;  %v1880_v49 = vld [vmem:[%s2625_s1 + $0x240] ss:$8 sps:$4 sm:$0xff]  }
  0x35   :  { %742 = vmatprep.subr.bf16.mxu1 %v1817_v19  ;;  %v196_v19 = vor.u32 %v194_v15, %v176_v63  ;;  %v1896_v62 = vld [vmem:[%s2625_s1 + $0x300] ss:$8 sps:$4 sm:$0xff]   ;;  %v1899_v63 = vld [vmem:[%s2625_s1 + $0x2f0] ss:$8 sps:$4 sm:$0xff]  }
  0x37   :  { %426 = vmatpush2.bf16.msra.mxu0 %v1825_v23  ;;  %v1862_v23 = vld [vmem:[%s2625_s1 + $0x294] ss:$8 sps:$4 sm:$0xff]  }
  0x38   :  { %743 = vmatpush2.bf16.msra.mxu1 %v1815_v22  ;;  %427 = vmatprep.subr.bf16.mxu0 %v1826_v28  ;;  %v1668_v22 = vcombine.low %v844_v20, %v2127_v5  ;;  %v1873_v5 = vld [vmem:[%s2625_s1 + $0x274] ss:$8 sps:$4 sm:$0xff]  }
  0x39   :  { %744 = vmatprep.subr.bf16.mxu1 %v1824_v30  ;;  %v1868_v30 = vld [vmem:[%s2625_s1 + $0x284] ss:$8 sps:$4 sm:$0xff]  }
  0x3a   :  { %v892_v24 = vrot.slane %v1668_v22, 1 }
  0x3b   :  { %428 = vmatpush2.bf16.msra.mxu0 %v1831_v33  ;;  %v1866_v33 = vld [vmem:[%s2625_s1 + $0x280] ss:$8 sps:$4 sm:$0xff]  }
  0x3c   :  { %745 = vmatpush2.bf16.msra.mxu1 %v1822_v32  ;;  %429 = vmatprep.subr.bf16.mxu0 %v1832_v37  ;;  %v2281_v28 = vsel %vm891_vm2, %v892_v24, %v893_v42  ;;  %v1890_v32 = vld [vmem:[%s2625_s1 + $0x350] ss:$8 sps:$4 sm:$0xff]   ;;  %v1902_v37 = vld [vmem:[%s2625_s1 + $0x340] ss:$8 sps:$4 sm:$0xff]   ;;  %v1879_v42 = vld [vmem:[%s2625_s1 + $0x254] ss:$8 sps:$4 sm:$0xff]  }
  0x3d   :  { %746 = vmatprep.subr.bf16.mxu1 %v1830_v41  ;;  %v1874_v41 = vld [vmem:[%s2625_s1 + $0x260] ss:$8 sps:$4 sm:$0xff]  }
  0x3f   :  { %430 = vmatpush2.bf16.msra.mxu0 %v1837_v44  ;;  %v1877_v44 = vld [vmem:[%s2625_s1 + $0x250] ss:$8 sps:$4 sm:$0xff]  }
  0x40   :  { %747 = vmatpush2.bf16.msra.mxu1 %v1828_v47  ;;  %795 = vmatprep.subr.bf16.mxu0 %v1859_v50  ;;  %v1883_v47 = vld [vmem:[%s2626_s0 + $0x38] ss:$0 sps:$4 sm:$0x11]   ;;  %v1886_v50 = vld [vmem:[%s2625_s1 + $0x334] ss:$8 sps:$4 sm:$0xff]  }
  0x41   :  { %748 = vmatprep.subr.bf16.mxu1 %v1836_v53  ;;  %v898_v53 = vrot.slane %v1670_v48, 1 }
  0x42   :  { %432 = vmatmul.mubr.bf16.vlgmr.msra.gmra.mxu0 %v145_v54  ;;  %v899_v54 = vrot.slane %v1982_v13, 1 }
  0x43   :  { %441 = vmatprep.mubr.bf16.mxu0 %v185_v59  ;;  %796 = vmatpush1.bf16.msra.mxu0 %v1857_v57  ;;  %v1887_v57 = vld [vmem:[%s2625_s1 + $0x320] ss:$8 sps:$4 sm:$0xff]   ;;  %v1893_v59 = vld [vmem:[%s2625_s1 + $0x310] ss:$8 sps:$4 sm:$0xff]  }
  0x44   :  { %749 = vmatpush2.bf16.msra.mxu1 %v1834_v58  ;;  %797 = vmatprep.subr.bf16.mxu0 %v1865_v60  ;;  %v900_v56 = vsel %vm891_vm2, %v898_v53, %v899_v54  ;;  %v905_v58 = vrot.slane %v2087_v52, 1  ;;  %v1898_v60 = vld [vmem:[%s2625_s1 + $0x304] ss:$8 sps:$4 sm:$0xff]   ;;  %v1901_v52 = vld [vmem:[%s2625_s1 + $0x2f4] ss:$8 sps:$4 sm:$0xff]  }
  0x45   :  { %750 = vmatprep.subr.bf16.mxu1 %v1845_v61 }
  0x46   :  { %v906_v61 = vsel %vm891_vm2, %v899_v54, %v905_v58 }
  0x47   :  { %798 = vmatpush1.bf16.msra.mxu0 %v1863_v2  ;;  %v1905_v2 = vld [vmem:[%s2625_s1 + $0x2e0] ss:$8 sps:$4 sm:$0xff]  }
  0x48   :  { %751 = vmatpush2.bf16.msra.mxu1 %v1843_v3  ;;  %1175 = vmatprep.subr.bf16.mxu0 %v1892_v6  ;;  %v1910_v3 = vld [vmem:[%s2625_s1 + $0x2d4] ss:$8 sps:$4 sm:$0xff]   ;;  %v1914_v6 = vld [vmem:[%s2625_s1 + $0x2c4] ss:$8 sps:$4 sm:$0xff]  }
  0x49   :  { %752 = vmatprep.subr.bf16.mxu1 %v1848_v4  ;;  %v1908_v4 = vld [vmem:[%s2625_s1 + $0x2d0] ss:$8 sps:$4 sm:$0xff]  }
  0x4a   :  { %442 = vmatmul.mubr.bf16.gmra.mxu0 %v177_v8  ;;  %v1912_v8 = vld [vmem:[%s2625_s1 + $0x2c0] ss:$8 sps:$4 sm:$0xff]  }
  0x4b   :  { %451 = vmatprep.mubr.bf16.mxu0 %v199_v9  ;;  %v903_v9 = vrot.slane %v2171_v29, 1 }
  0x4c   :  { %753 = vmatpush2.bf16.msra.mxu1 %v1846_v10 }
  0x4d   :  { %1102 = vmatprep.subr.bf16.mxu1 %v1853_v14  ;;  %v904_v10 = vsel %vm891_vm2, %v896_v35, %v903_v9 }
  0x4f   :  { %755 = vmatmul.mubr.bf16.vlgmr.msra.gmra.mxu1 %v2144_v17  ;;  %v22_v17 = vld [vmem:[%s2626_s0 + $0x30] sm:$0x11] }
  0x50   :  { %1103 = vmatpush1.bf16.msra.mxu1 %v1851_v16  ;;  %764 = vmatprep.mubr.bf16.mxu1 %v2134_v7  ;;  %v1591_v27 = vcombine.high %v22_v17, %v22_v17  ;;  %v1590_v36 = vcombine.low %v22_v17, %v22_v17 }
  0x51   :  { %1104 = vmatprep.subr.bf16.mxu1 %v1856_v18 }
  0x52   :  { %452 = vmatmul.mubr.bf16.gmra.mxu0 %v196_v19 }
  0x53   :  { %815 = vmatprep.mubr.bf16.mxu0 %v1917_v1 }
  0x54   :  { %1105 = vmatpush1.bf16.msra.mxu1 %v1854_v21 }
  0x55   :  { %1106 = vmatprep.subr.bf16.mxu1 %v1862_v23 }
  0x57   :  { %765 = vmatmul.mubr.bf16.gmra.mxu1 %v2165_v26  ;;  %v895_v26 = vrot.slane %v1669_v31, 1 }
  0x58   :  { %1107 = vmatpush1.bf16.msra.mxu1 %v1860_v25  ;;  %774 = vmatprep.mubr.bf16.mxu1 %v1591_v27 }
  0x59   :  { %1108 = vmatprep.subr.bf16.mxu1 %v1868_v30 }
  0x5a   :  { %1629 = vmatmul.mubr.msk.bf16.vlgmr.msra.gmra.mxu0 %vm389_vm1, %v1977_v12  ;;  %v897_v12 = vsel %vm891_vm2, %v895_v26, %v896_v35 }
  0x5b   :  { %825 = vmatprep.mubr.bf16.mxu0 %v1917_v1  ;;  %1176 = vmatpush1.bf16.msra.mxu0 %v1890_v32 }
  0x5c   :  { %1109 = vmatpush1.bf16.msra.mxu1 %v1866_v33  ;;  %1177 = vmatprep.subr.bf16.mxu0 %v1904_v34 }
  0x5d   :  { %1110 = vmatprep.subr.bf16.mxu1 %v1873_v5 }
  0x5f   :  { %775 = vmatmul.mubr.bf16.gmra.mxu1 %v1590_v36  ;;  %1178 = vmatpush1.bf16.msra.mxu0 %v1902_v37 }
  0x60   :  { %1111 = vmatpush1.bf16.msra.mxu1 %v1871_v38  ;;  %1134 = vmatprep.mubr.bf16.mxu1 %v897_v12 }
  0x61   :  { %1112 = vmatprep.subr.bf16.mxu1 %v1876_v39 }
  0x62   :  { %1630 = vmatmul.mubr.msk.bf16.gmra.mxu0 %vm389_vm1, %v1982_v13  ;;  %v1895_v13 = vld [vmem:[%s2625_s1 + $0x314] ss:$8 sps:$4 sm:$0xff]  }
  0x63   :  { %835 = vmatprep.mubr.bf16.mxu0 %v1917_v1 }
  0x64   :  { %1113 = vmatpush1.bf16.msra.mxu1 %v1874_v41 }
  0x65   :  { %1114 = vmatprep.subr.bf16.mxu1 %v1879_v42 }
  0x68   :  { %1115 = vmatpush1.bf16.msra.mxu1 %v1877_v44 }
  0x69   :  { %1116 = vmatprep.subr.bf16.mxu1 %v1882_v46 }
  0x6a   :  { %1631 = vmatmul.mubr.msk.bf16.gmra.mxu0 %vm389_vm1, %v1883_v47 }
  0x6b   :  { %1195 = vmatprep.mubr.bf16.mxu0 %v1917_v1 }
  0x6c   :  { %1117 = vmatpush1.bf16.msra.mxu1 %v1880_v49 }
  0x6d   :  { %1118 = vmatprep.subr.bf16.mxu1 %v1886_v50 }
  0x70   :  { %1119 = vmatpush2.bf16.msra.mxu1 %v1884_v11 }
  0x71   :  { %1120 = vmatprep.subr.bf16.mxu1 %v1889_v55 }
  0x72   :  { %1707 = vmatmul.mubr.msk.bf16.vlgmr.msra.gmra.mxu0 %vm389_vm1, %v900_v56 }
  0x73   :  { %1205 = vmatprep.mubr.bf16.mxu0 %v1917_v1 }
  0x74   :  { %1121 = vmatpush2.bf16.msra.mxu1 %v1887_v57 }
  0x75   :  { %1122 = vmatprep.subr.bf16.mxu1 %v1895_v13 }
  0x78   :  { %1123 = vmatpush2.bf16.msra.mxu1 %v1893_v59 }
  0x79   :  { %1124 = vmatprep.subr.bf16.mxu1 %v1898_v60 }
  0x7a   :  { %1708 = vmatmul.mubr.msk.bf16.gmra.mxu0 %vm389_vm1, %v906_v61 }
  0x7b   :  { %1215 = vmatprep.mubr.bf16.mxu0 %v1917_v1 }
  0x7c   :  { %1125 = vmatpush2.bf16.msra.mxu1 %v1896_v62 }
  0x7d   :  { %1126 = vmatprep.subr.bf16.mxu1 %v1901_v52 }
  0x80   :  { %1127 = vmatpush2.bf16.msra.mxu1 %v1899_v63 }
  0x81   :  { %1128 = vmatprep.subr.bf16.mxu1 %v1907_v0 }
  0x82   :  { %1709 = vmatmul.mubr.msk.bf16.gmra.mxu0 %vm389_vm1, %v905_v58 }
  0x84   :  { %1129 = vmatpush2.bf16.msra.mxu1 %v1905_v2 }
  0x85   :  { %1130 = vmatprep.subr.bf16.mxu1 %v1910_v3 }
  0x88   :  { %1131 = vmatpush2.bf16.msra.mxu1 %v1908_v4  ;;  %v1272_v4 = vlaneseq }
  0x89   :  { %1132 = vmatprep.subr.bf16.mxu1 %v1914_v6 }
  0x8c   :  { %1133 = vmatpush2.bf16.msra.mxu1 %v1912_v8 }
  0x8f   :  { %1135 = vmatmul.mubr.bf16.vlgmr.msra.gmra.mxu1 %v2281_v28 }
  0x90   :  { %1144 = vmatprep.mubr.bf16.mxu1 %v904_v10 }
  0x97   :  { %1145 = vmatmul.mubr.bf16.gmra.mxu1 %v2211_v51 }
  0x98   :  { %1154 = vmatprep.mubr.bf16.mxu1 %v903_v9  ;;  %v2463_v9 = vshrl.u32 %v1272_v4, 7 }
  0x9f   :  { %1155 = vmatmul.mubr.bf16.gmra.mxu1 %v901_v43 }
  0xcf   :  { %v494_v29 = vpop.f32.mrf.mxu1 }
  0xd1   :  { %v496_v14 = vpop.f32.mrf.mxu1 }
  0xd3   :  { %v498_v15 = vpop.f32.mrf.mxu1 }
  0xd5   :  { %v500_v7 = vpop.f32.mrf.mxu1 }
  0xd7   :  { %v504_v16 = vpop.f32.mrf.mxu1 }
  0xd9   :  { %v506_v18 = vpop.f32.mrf.mxu1 }
  0xdb   :  { %v508_v19 = vpop.f32.mrf.mxu1 }
  0xdd   :  { %v510_v20 = vpop.f32.mrf.mxu1 }
  0xdf   :  { %v514_v21 = vpop.f32.mrf.mxu1 }
  0xe1   :  { %v516_v22 = vpop.f32.mrf.mxu1 }
  0xe3   :  { %v518_v51 = vpop.f32.mrf.mxu1 }
  0xe5   :  { %v519_v23 = vpop.f32.mrf.mxu1 }
 0x102   :  { %v433_v17 = vpop.f32.mrf.mxu0 }
 0x103   :  { %v495_v40 = vadd.f32 %v494_v29, %v433_v17  ;;  %v1274_v29 = vadd.s32 8, %v2463_v9 }
 0x104   :  { %v435_v43 = vpop.f32.mrf.mxu0 }
 0x105   :  { %v2412_v24 = vadd.f32 %v496_v14, %v435_v43 }
 0x106   :  { %v437_v25 = vpop.f32.mrf.mxu0 }
 0x107   :  { %v499_v27 = vadd.f32 %v498_v15, %v437_v25  ;;  %v2488_v25 = vadd.s32 32, %v2463_v9 }
 0x108   :  { %v439_v1 = vpop.f32.mrf.mxu0 }
 0x109   :  { %v2414_v28 = vadd.f32 %v500_v7, %v439_v1  ;;  %v2467_v15 = vmul.u32.u64.low 3817748708, %v2463_v9  ;;  %v2468_v7 = vmul.u32.u64.high 3817748708, %v2463_v9, %v2467_v15 }
 0x10a   :  { %v443_v30 = vpop.f32.mrf.mxu0 }
 0x10b   :  { %v505_v31 = vadd.f32 %v504_v16, %v443_v30  ;;  %v1275_v16 = vadd.s32 16, %v2463_v9 }
 0x10c   :  { %v445_v32 = vpop.f32.mrf.mxu0 }
 0x10d   :  { %v2416_v33 = vadd.f32 %v506_v18, %v445_v32  ;;  %v1276_v18 = vadd.s32 24, %v2463_v9  ;;  %v2479_v51 = vmul.u32.u64.low 3817748708, %v1275_v16  ;;  %v2480_v23 = vmul.u32.u64.high 3817748708, %v1275_v16, %v2479_v51 }
 0x10e   :  { %v447_v34 = vpop.f32.mrf.mxu0 }
 0x10f   :  { %v756_v5 = vpop.f32.mrf.mxu1  ;;  %v509_v26 = vadd.f32 %v508_v19, %v447_v34 }
 0x110   :  { %v2418_v35 = vadd.f32 %v756_v5, %v495_v40  ;;  %v449_v36 = vpop.f32.mrf.mxu0  ;;  %v2482_v17 = vmul.u32.u64.low 3817748708, %v1276_v18  ;;  %v2483_v40 = vmul.u32.u64.high 3817748708, %v1276_v18, %v2482_v17 }
 0x111   :  { %v2420_v37 = vpop.f32.mrf.mxu1  ;;  %v2422_v38 = vadd.f32 %v510_v20, %v449_v36  ;;  %v1306_v36 = vshrl.u32 %v2480_v23, 4 }
 0x112   :  { %v453_v39 = vpop.f32.mrf.mxu0 }
 0x113   :  { %v760_v12 = vpop.f32.mrf.mxu1  ;;  %v515_v41 = vadd.f32 %v514_v21, %v453_v39  ;;  %v2474_v20 = vmul.u32.u64.low 3817748708, %v1274_v29  ;;  %v2475_v21 = vmul.u32.u64.high 3817748708, %v1274_v29, %v2474_v20  ;;  %v1317_v39 = vshrl.u32 %v2483_v40, 4 }
 0x114   :  { %v2424_v42 = vadd.f32 %v760_v12, %v499_v27  ;;  %v455_v44 = vpop.f32.mrf.mxu0  ;;  %v1284_v27 = vshrl.u32 %v2468_v7, 4 }
 0x115   :  { %v2426_v45 = vpop.f32.mrf.mxu1  ;;  %v2428_v46 = vadd.f32 %v516_v22, %v455_v44  ;;  %v1295_v34 = vshrl.u32 %v2475_v21, 4 }
 0x116   :  { %v457_v47 = vpop.f32.mrf.mxu0  ;;  %v1285_v5 = vmul.u32 18, %v1284_v27 }
 0x117   :  { %v766_v48 = vpop.f32.mrf.mxu1  ;;  %v1307_v47 = vmul.u32 18, %v1306_v36 }
 0x118   :  { %v2430_v49 = vadd.f32 %v766_v48, %v505_v31  ;;  %v458_v50 = vpop.f32.mrf.mxu0  ;;  %v2496_v31 = vmul.u32.u64.low 3817748708, %v2488_v25  ;;  %v2497_v32 = vmul.u32.u64.high 3817748708, %v2488_v25, %v2496_v31  ;;  %v1286_v44 = vsub.s32 %v2463_v9, %v1285_v5 }
 0x119   :  { %v2432_v53 = vpop.f32.mrf.mxu1  ;;  %v1318_v50 = vmul.u32 18, %v1317_v39  ;;  %v759_v39 = vadd.f32 %v2420_v37, %v2412_v24 }
 0x11a   :  { %v2434_v54 = vpop.f32.mrf.mxu0  ;;  %vm1333_vm3 = vcmp.ne.s32.totalorder %v1286_v44, 0  ;;  %vm1338_vm4 = vcmp.lt.s32.totalorder %v1286_v44, 0  ;;  %v1348_v15 = vadd.s32 18, %v1286_v44 }
 0x11b   :  { %v770_v11 = vpop.f32.mrf.mxu1  ;;  %vm2514_vm5 = vmand %vm1338_vm4, %vm1333_vm3 }
 0x11c   :  { %v2436_v55 = vadd.f32 %v770_v11, %v509_v26  ;;  %v2438_v56 = vpop.f32.mrf.mxu0 }
 0x11d   :  { %v2440_v57 = vpop.f32.mrf.mxu1 }
 0x11e   :  { %v2442_v13 = vpop.f32.mrf.mxu0 }
 0x11f   :  { %v776_v58 = vpop.f32.mrf.mxu1 }
 0x120   :  { %v2444_v59 = vadd.f32 %v776_v58, %v515_v41  ;;  %v2446_v60 = vpop.f32.mrf.mxu0  ;;  %v1296_v41 = vmul.u32 18, %v1295_v34  ;;  %v1328_v58 = vshrl.u32 %v2497_v32, 4 }
 0x121   :  { %v2448_v61 = vpop.f32.mrf.mxu1 }
 0x122   :  { %v2450_v62 = vpop.f32.mrf.mxu0  ;;  %v1329_v20 = vmul.u32 18, %v1328_v58 }
 0x123   :  { %v780_v52 = vpop.f32.mrf.mxu1  ;;  %v828_v17 = vadd.f32 %v2450_v62, %v2430_v49  ;;  %v779_v49 = vadd.f32 %v2448_v61, %v2428_v46 }
 0x124   :  { %v2452_v63 = vpop.f32.mrf.mxu0  ;;  %v1297_v52 = vsub.s32 %v1274_v29, %v1296_v41  ;;  %v1353_v29 = vsel %vm2514_vm5, %v1348_v15, %v1286_v44  ;;  %v1330_v23 = vsub.s32 %v2488_v25, %v1329_v20  ;;  %v818_v41 = vadd.f32 %v2434_v54, %v2418_v35 }
 0x125   :  { %v781_v0 = vpop.f32.mrf.mxu1  ;;  %vm1358_vm15 = vcmp.lt.s32.totalorder %v1353_v29, 16  ;;  %v822_v35 = vadd.f32 %v2442_v13, %v2424_v42  ;;  %v763_v20 = vadd.f32 %v2426_v45, %v2414_v28  ;;  %v769_v42 = vadd.f32 %v2432_v53, %v2416_v33 }
 0x126   :  { %v2454_v2 = vpop.f32.mrf.mxu0  ;;  %v1308_v0 = vsub.s32 %v1275_v16, %v1307_v47  ;;  %vm1334_vm6 = vcmp.ne.s32.totalorder %v1297_v52, 0  ;;  %vm1339_vm7 = vcmp.lt.s32.totalorder %v1297_v52, 0  ;;  %vm1337_vm0 = vcmp.ne.s32.totalorder %v1330_v23, 0 }
 0x127   :  { %vm2520_vm12 = vmand %vm1339_vm7, %vm1334_vm6  ;;  %vm1342_vm1 = vcmp.lt.s32.totalorder %v1330_v23, 0  ;;  %v1352_v47 = vadd.s32 18, %v1330_v23  ;;  %vm1374_vm6 = vcmp.lt.s32.totalorder %v2488_v25, 36  ;;  %v824_v13 = vadd.f32 %v2446_v60, %v763_v20 }
 0x128   :  { %v2456_v3 = vpop.f32.mrf.mxu0  ;;  %vm1335_vm8 = vcmp.ne.s32.totalorder %v1308_v0, 0  ;;  %vm1340_vm9 = vcmp.lt.s32.totalorder %v1308_v0, 0  ;;  %v1350_v40 = vadd.s32 18, %v1308_v0  ;;  %vm2545_vm3 = vmand %vm1342_vm1, %vm1337_vm0  ;;  %v830_v60 = vadd.f32 %v2452_v63, %v769_v42 }
 0x129   :  { %vm2525_vm13 = vmand %vm1340_vm9, %vm1335_vm8  ;;  %vm1403_vm9 = vcmask 1041408  }
 0x12a   :  { %v2458_v6 = vpop.f32.mrf.mxu0  ;;  %v1355_v5 = vsel %vm2525_vm13, %v1350_v40, %v1308_v0  ;;  %v820_v0 = vadd.f32 %v2438_v56, %v759_v39 }
 0x12b   :  { %vm1360_vm4 = vcmp.lt.s32.totalorder %v1355_v5, 16 }
 0x12c   :  { %v2460_v8 = vpop.f32.mrf.mxu0 }
 0x12e   :  { %v841_v10 = vpop.f32.mrf.mxu0 }
 0x130   :  { %v842_v14 = vpop.f32.mrf.mxu0 }
 0x131   :  { %v1319_v14 = vsub.s32 %v1276_v18, %v1318_v50  ;;  %v1349_v18 = vadd.s32 18, %v1297_v52  ;;  %v1918_v50 = vmov 0.0  }
 0x132   :  { %v2472_v19 = vpop.f32.mrf.mxu0  ;;  %v1715_v58 = vsel %vm1358_vm15, 1.0, %v1918_v50 }
 0x133   :  { %vm1336_vm10 = vcmp.ne.s32.totalorder %v1319_v14, 0  ;;  %vm1341_vm11 = vcmp.lt.s32.totalorder %v1319_v14, 0  ;;  %v1351_v27 = vadd.s32 18, %v1319_v14  ;;  %v1354_v32 = vsel %vm2520_vm12, %v1349_v18, %v1297_v52 }
 0x134   :  { %v2477_v22 = vpop.f32.mrf.mxu0  ;;  %vm2529_vm14 = vmand %vm1341_vm11, %vm1336_vm10  ;;  %vm1359_vm2 = vcmp.lt.s32.totalorder %v1354_v32, 16  ;;  %vm1443_vm10 = vcmp.lt.s32.totalorder %v1272_v4, 256 }
 0x135   :  { %v1356_v36 = vsel %vm2529_vm14, %v1351_v27, %v1319_v14  ;;  %v1716_v56 = vsel %vm1359_vm2, 1.0, %v1918_v50 }
 0x136   :  { %v2485_v43 = vpop.f32.mrf.mxu0  ;;  %vm1361_vm5 = vcmp.lt.s32.totalorder %v1356_v36, 16 }
 0x137   :  { %v2561_v18 = vsel %vm1361_vm5, 1.0, %v1918_v50 }
 0x138   :  { %v2491_v1 = vpop.f32.mrf.mxu0 }
 0x13a   :  { %v2493_v30 = vpop.f32.mrf.mxu0 }
 0x13c   :  { %v2500_v26 = vpop.f32.mrf.mxu0 }
 0x13e   :  { %v2504_v12 = vpop.f32.mrf.mxu0 }
 0x140   :  { %v2507_v48 = vpop.f32.mrf.mxu0 }
 0x142   :  { %v2509_v11 = vpop.f32.mrf.mxu0 }
 0x144   :  { %v2512_v10 = vpop.f32.mrf.mxu0 }
 0x146   :  { %v1221_v7 = vpop.f32.mrf.mxu0 }
 0x147   :  { %v1357_v7 = vsel %vm2545_vm3, %v1352_v47, %v1330_v23  ;;  %v773_v23 = vadd.f32 %v2440_v57, %v2422_v38  ;;  %v832_v57 = vadd.f32 %v2454_v2, %v2436_v55 }
 0x148   :  { %v1222_v51 = vpop.f32.mrf.mxu0  ;;  %vm2568_vm7 = vcmp.lt.s32.totalorder %v1357_v7, 16 }
 0x149   :  { %v834_v47 = vadd.f32 %v2456_v3, %v773_v23  ;;  %vm1379_vm8 = vmand %vm2568_vm7, %vm1374_vm6  ;;  %v838_v3 = vadd.f32 %v2458_v6, %v2444_v59  ;;  %v840_v6 = vadd.f32 %v2460_v8, %v779_v49 }
 0x14a   :  { %v1719_v20 = vsel %vm1379_vm8, 1.0, %v1918_v50 }
 0x14f   :  { %v1136_v34 = vpop.f32.mrf.mxu1 }
 0x150   :  { %v1198_v44 = vadd.f32 %v2472_v19, %v1136_v34 }
 0x151   :  { %v1138_v52 = vpop.f32.mrf.mxu1 }
 0x152   :  { %v1224_v14 = vadd.f32 %v1198_v44, %v818_v41  ;;  %v1200_v24 = vadd.f32 %v2477_v22, %v1138_v52  ;;  %v1717_v22 = vsel %vm1360_vm4, 1.0, %v1918_v50 }
 0x153   :  { %v1140_v37 = vpop.f32.mrf.mxu1 }
 0x154   :  { %v1225_v54 = vadd.f32 %v1200_v24, %v820_v0  ;;  %v1202_v19 = vadd.f32 %v2485_v43, %v1140_v37  ;;  %v1390_v21 = vmul.f32 %v1715_v58, %v1224_v14 }
 0x155   :  { %v1142_v51 = vpop.f32.mrf.mxu1 }
 0x156   :  { %v1721_v29 = vpack.c.bf16 %v1225_v54, %v1224_v14  ;;  %v1226_v16 = vadd.f32 %v1202_v19, %v822_v35  ;;  %v1204_v28 = vadd.f32 %v2491_v1, %v1142_v51  ;;  %v1446_v1 = vmul.f32 %v1390_v21, %v1224_v14 }
 0x157   :  { %v1146_v45 = vpop.f32.mrf.mxu1  ;;  %v1391_v40 = vmul.f32 %v1715_v58, %v1225_v54 }
 0x158   :  { %1266 = vst [vmem:[%s2627_s2] sm:$0xff] %v1721_v29  ;;  %v1392_v33 = vmul.f32 %v1716_v56, %v1226_v16  ;;  %v1208_v53 = vadd.f32 %v2493_v30, %v1146_v45  ;;  %v1227_v27 = vadd.f32 %v1204_v28, %v824_v13 }
 0x159   :  { %v1148_v31 = vpop.f32.mrf.mxu1  ;;  %v1447_v58 = vmul.f32 %v1391_v40, %v1225_v54 }
 0x15a   :  { %v1400_v32 = vadd.f32 %v1392_v33, %v1390_v21  ;;  %v1448_v34 = vmul.f32 %v1392_v33, %v1226_v16  ;;  %v1228_v5 = vadd.f32 %v1208_v53, %v828_v17  ;;  %v1210_v38 = vadd.f32 %v2500_v26, %v1148_v31 }
 0x15b   :  { %v1722_v62 = vpack.c.bf16 %v1227_v27, %v1226_v16  ;;  %v1393_v36 = vmul.f32 %v1716_v56, %v1227_v27  ;;  %v1150_v30 = vpop.f32.mrf.mxu1 }
 0x15c   :  { %v1456_v39 = vadd.f32 %v1448_v34, %v1446_v1  ;;  %v1394_v63 = vmul.f32 %v1717_v22, %v1228_v5  ;;  %v1229_v41 = vadd.f32 %v1210_v38, %v830_v60  ;;  %v1212_v44 = vadd.f32 %v2504_v12, %v1150_v30 }
 0x15d   :  { %1267 = vst [vmem:[%s2627_s2 + $0x8] sm:$0xff] %v1722_v62  ;;  %v1412_v26 = vadd.f32 %v1393_v36, %v1391_v40  ;;  %v1449_v46 = vmul.f32 %v1393_v36, %v1227_v27  ;;  %v1152_v61 = vpop.f32.mrf.mxu1 }
 0x15e   :  { %v1401_v52 = vadd.f32 %v1400_v32, %v1394_v63  ;;  %v1450_v55 = vmul.f32 %v1394_v63, %v1228_v5  ;;  %v1723_v2 = vpack.c.bf16 %v1229_v41, %v1228_v5  ;;  %v1395_v15 = vmul.f32 %v1717_v22, %v1229_v41 }
 0x15f   :  { %v1467_v12 = vadd.f32 %v1449_v46, %v1447_v58  ;;  %v1230_v0 = vadd.f32 %v1212_v44, %v832_v57  ;;  %v1214_v14 = vadd.f32 %v2507_v48, %v1152_v61  ;;  %v1156_v24 = vpop.f32.mrf.mxu1  ;;  %v1919_v57 = vmov 1966171168  }
 0x160   :  { %v1457_v37 = vadd.f32 %v1456_v39, %v1450_v55  ;;  %1268 = vst [vmem:[%s2627_s2 + $0x10] sm:$0xff] %v1723_v2  ;;  %v1413_v35 = vadd.f32 %v1412_v26, %v1395_v15  ;;  %v1451_v54 = vmul.f32 %v1395_v15, %v1229_v41  ;;  %v1218_v25 = vadd.f32 %v2509_v11, %v1156_v24 }
 0x161   :  { %v1396_v19 = vmul.f32 %v2561_v18, %v1230_v0  ;;  %v1231_v7 = vadd.f32 %v1214_v14, %v834_v47  ;;  %v1158_v59 = vpop.f32.mrf.mxu1  ;;  %v1427_v62 = vunpack.c.l.s4 %v1919_v57 }
 0x162   :  { %v1468_v48 = vadd.f32 %v1467_v12, %v1451_v54  ;;  %v1232_v21 = vadd.f32 %v1218_v25, %v838_v3  ;;  %v1220_v56 = vadd.f32 %v2512_v10, %v1158_v59 }
 0x163   :  { %v1402_v51 = vadd.f32 %v1401_v52, %v1396_v19  ;;  %v1452_v22 = vmul.f32 %v1396_v19, %v1230_v0  ;;  %v1724_v29 = vpack.c.bf16 %v1231_v7, %v1230_v0  ;;  %v1397_v16 = vmul.f32 %v2561_v18, %v1231_v7  ;;  %v1160_v42 = vpop.f32.mrf.mxu1 }
 0x164   :  { %v1398_v11 = vmul.f32 %v1719_v20, %v1232_v21  ;;  %v1233_v13 = vadd.f32 %v1220_v56, %v840_v6  ;;  %v1428_v26 = vunpack.c.0.s8 %v1427_v62 }
 0x165   :  { %v1458_v28 = vadd.f32 %v1457_v37, %v1452_v22  ;;  %1269 = vst [vmem:[%s2627_s2 + $0x18] sm:$0xff] %v1724_v29  ;;  %v1414_v50 = vadd.f32 %v1413_v35, %v1397_v16  ;;  %v1453_v45 = vmul.f32 %v1397_v16, %v1231_v7  ;;  %v1161_v8 = vpop.f32.mrf.mxu1 }
 0x166   :  { %v1404_v43 = vsel %vm1403_vm9, %v1398_v11, 0.0  ;;  %v1454_v23 = vmul.f32 %v1398_v11, %v1232_v21  ;;  %v1725_v10 = vpack.c.bf16 %v1233_v13, %v1232_v21  ;;  %v1399_v17 = vmul.f32 %v1719_v20, %v1233_v13 }
 0x167   :  { %v1469_v33 = vadd.f32 %v1468_v48, %v1453_v45  ;;  %v1405_v53 = vadd.f32 %v1404_v43, %v1402_v51  ;;  %v1431_v14 = vsub.s32 %v1428_v26, %v2463_v9 }
 0x168   :  { %v1459_v18 = vsel %vm1403_vm9, %v1454_v23, 0.0  ;;  %1270 = vst [vmem:[%s2627_s2 + $0x20] sm:$0x11] %v1725_v10  ;;  %v1415_v60 = vsel %vm1403_vm9, %v1399_v17, 0.0  ;;  %v1455_v1 = vmul.f32 %v1399_v17, %v1233_v13 }
 0x169   :  { %v1406_v40 = vrot.slane %v1405_v53, 4  ;;  %v1460_v27 = vadd.f32 %v1459_v18, %v1458_v28  ;;  %v1416_v31 = vadd.f32 %v1415_v60, %v1414_v50 }
 0x16a   :  { %v1470_v32 = vsel %vm1403_vm9, %v1455_v1, 0.0 }
 0x16b   :  { %v1407_v34 = vadd.f32 %v1406_v40, %v1405_v53  ;;  %v1461_v5 = vrot.slane %v1460_v27, 4  ;;  %v1417_v38 = vrot.slane %v1416_v31, 4  ;;  %v1471_v49 = vadd.f32 %v1470_v32, %v1469_v33 }
 0x16d   :  { %v1408_v36 = vrot.slane %v1407_v34, 2  ;;  %v1462_v30 = vadd.f32 %v1461_v5, %v1460_v27  ;;  %v1418_v39 = vadd.f32 %v1417_v38, %v1416_v31  ;;  %v1472_v63 = vrot.slane %v1471_v49, 4 }
 0x16f   :  { %v1409_v41 = vadd.f32 %v1408_v36, %v1407_v34  ;;  %v1463_v44 = vrot.slane %v1462_v30, 2  ;;  %v1419_v47 = vrot.slane %v1418_v39, 2  ;;  %v1473_v58 = vadd.f32 %v1472_v63, %v1471_v49 }
 0x171   :  { %v1410_v46 = vrot.slane %v1409_v41, 1  ;;  %v1464_v61 = vadd.f32 %v1463_v44, %v1462_v30  ;;  %v1420_v52 = vadd.f32 %v1419_v47, %v1418_v39  ;;  %v1474_v55 = vrot.slane %v1473_v58, 2 }
 0x173   :  { %v1465_v2 = vrot.slane %v1464_v61, 1  ;;  %v1421_v15 = vrot.slane %v1420_v52, 1  ;;  %v1475_v3 = vadd.f32 %v1474_v55, %v1473_v58  ;;  %v1411_v12 = vadd.f32 %v1410_v46, %v1409_v41 }
 0x175   :  { %v1422_v0 = vadd.f32 %v1421_v15, %v1420_v52  ;;  %v1476_v24 = vrot.slane %v1475_v3, 1  ;;  %v1466_v37 = vadd.f32 %v1465_v2, %v1464_v61 }
 0x177   :  { %v1425_v35 = vcombine.low %v1411_v12, %v1422_v0  ;;  %v1477_v54 = vadd.f32 %v1476_v24, %v1475_v3 }
 0x179   :  { %v1432_v25 = vrot.slane %v1425_v35, %v1431_v14  ;;  %v1480_v19 = vcombine.low %v1466_v37, %v1477_v54 }
 0x17b   :  { %v1439_v7 = vrot.slane %v1432_v25, %v1431_v14  ;;  %v1487_v20 = vrot.slane %v1480_v19, %v1431_v14 }
 0x17d   :  { %1445 = vst.msk [vmem:[%s2628_s3] ss:$2 sm:$0x3] %vm1443_vm10, %v1439_v7  ;;  %v1494_v59 = vrot.slane %v1487_v20, %v1431_v14 }
 0x17f   :  { %1720 = vst.msk [vmem:[%s2628_s3 + $0x1] ss:$2 sm:$0x3] %vm1443_vm10, %v1494_v59 }

// kernel: image_classify_forward.9
= control target key start
LH: loop header
LB: loop body
LE: loop exit
PB: predicated region body
PF: predicated region fallthrough
CT: control target
= control target key end

     0   :  { %vm202_vm0 = vsmask.f32 7424  ;;  %vm641_vm1 = vcmask 523264   ;;  %vm1348_vm15 = vcmask 1040384   ;;  %s2694_s1 = inlined_call_operand.vmem [shape: bf16[2,576,256], index: 1, kind: input, shape index: {}]   ;;  %s2695_s0 = inlined_call_operand.vmem [shape: bf16[18,576], index: 0, kind: input, shape index: {}]   ;;  %s2696_s2 = inlined_call_operand.vmem [shape: bf16[18,256], index: 2, kind: output, shape index: {0}]   ;;  %s2697_s3 = inlined_call_operand.vmem [shape: f32[1,2,256], index: 3, kind: output, shape index: {1}]  }
   0x1   :  { %v1787_v0 = vld [vmem:[%s2694_s1 + $0x2b4] ss:$8 sps:$4 sm:$0xff]   ;;  %v1791_v2 = vld [vmem:[%s2694_s1 + $0x2b0] ss:$8 sps:$4 sm:$0xff]   ;;  %v1793_v4 = vld [vmem:[%s2694_s1 + $0x2a4] ss:$8 sps:$4 sm:$0xff]  }
   0x2   :  { %v1789_v1 = vld [vmem:[%s2694_s1 + $0x3b4] ss:$8 sps:$4 sm:$0xff]   ;;  %648 = vmatprep.subr.bf16.mxu0 %v1787_v0  ;;  %v1792_v3 = vld [vmem:[%s2694_s1 + $0x3b0] ss:$8 sps:$4 sm:$0xff]   ;;  %v1795_v5 = vld [vmem:[%s2694_s1 + $0x3a4] ss:$8 sps:$4 sm:$0xff]  }
   0x3   :  { %699 = vmatprep.subr.bf16.mxu1 %v1789_v1  ;;  %649 = vmatpush1.bf16.msra.mxu0 %v1791_v2  ;;  %v1797_v6 = vld [vmem:[%s2694_s1 + $0x2a0] ss:$8 sps:$4 sm:$0xff]   ;;  %v1799_v8 = vld [vmem:[%s2694_s1 + $0x294] ss:$8 sps:$4 sm:$0xff]   ;;  %v1803_v10 = vld [vmem:[%s2694_s1 + $0x290] ss:$8 sps:$4 sm:$0xff]  }
   0x4   :  { %700 = vmatpush1.bf16.msra.mxu1 %v1792_v3  ;;  %650 = vmatprep.subr.bf16.mxu0 %v1793_v4  ;;  %v1798_v7 = vld [vmem:[%s2694_s1 + $0x3a0] ss:$8 sps:$4 sm:$0xff]   ;;  %v1801_v9 = vld [vmem:[%s2694_s1 + $0x394] ss:$8 sps:$4 sm:$0xff]   ;;  %v1804_v11 = vld [vmem:[%s2694_s1 + $0x390] ss:$8 sps:$4 sm:$0xff]  }
   0x5   :  { %701 = vmatprep.subr.bf16.mxu1 %v1795_v5  ;;  %v1805_v12 = vld [vmem:[%s2694_s1 + $0x284] ss:$8 sps:$4 sm:$0xff]   ;;  %v1809_v14 = vld [vmem:[%s2694_s1 + $0x280] ss:$8 sps:$4 sm:$0xff]   ;;  %v1811_v16 = vld [vmem:[%s2694_s1 + $0x274] ss:$8 sps:$4 sm:$0xff]  }
   0x6   :  { %v1807_v13 = vld [vmem:[%s2694_s1 + $0x384] ss:$8 sps:$4 sm:$0xff]   ;;  %v1810_v15 = vld [vmem:[%s2694_s1 + $0x380] ss:$8 sps:$4 sm:$0xff]   ;;  %v1813_v17 = vld [vmem:[%s2694_s1 + $0x374] ss:$8 sps:$4 sm:$0xff]  }
   0x7   :  { %651 = vmatpush1.bf16.msra.mxu0 %v1797_v6  ;;  %v1815_v18 = vld [vmem:[%s2694_s1 + $0x270] ss:$8 sps:$4 sm:$0xff]   ;;  %v1817_v20 = vld [vmem:[%s2694_s1 + $0x264] ss:$8 sps:$4 sm:$0xff]   ;;  %v1821_v22 = vld [vmem:[%s2694_s1 + $0x260] ss:$8 sps:$4 sm:$0xff]  }
   0x8   :  { %702 = vmatpush1.bf16.msra.mxu1 %v1798_v7  ;;  %652 = vmatprep.subr.bf16.mxu0 %v1799_v8  ;;  %v1816_v19 = vld [vmem:[%s2694_s1 + $0x370] ss:$8 sps:$4 sm:$0xff]   ;;  %v1819_v21 = vld [vmem:[%s2694_s1 + $0x364] ss:$8 sps:$4 sm:$0xff]   ;;  %v1822_v23 = vld [vmem:[%s2694_s1 + $0x360] ss:$8 sps:$4 sm:$0xff]  }
   0x9   :  { %703 = vmatprep.subr.bf16.mxu1 %v1801_v9  ;;  %v1823_v24 = vld [vmem:[%s2694_s1 + $0x254] ss:$8 sps:$4 sm:$0xff]   ;;  %v1827_v26 = vld [vmem:[%s2694_s1 + $0x250] ss:$8 sps:$4 sm:$0xff]   ;;  %v1829_v28 = vld [vmem:[%s2694_s1 + $0x244] ss:$8 sps:$4 sm:$0xff]  }
   0xa   :  { %v1825_v25 = vld [vmem:[%s2694_s1 + $0x354] ss:$8 sps:$4 sm:$0xff]   ;;  %v1828_v27 = vld [vmem:[%s2694_s1 + $0x350] ss:$8 sps:$4 sm:$0xff]   ;;  %v1831_v29 = vld [vmem:[%s2694_s1 + $0x344] ss:$8 sps:$4 sm:$0xff]  }
   0xb   :  { %653 = vmatpush1.bf16.msra.mxu0 %v1803_v10  ;;  %v1833_v30 = vld [vmem:[%s2694_s1 + $0x240] ss:$8 sps:$4 sm:$0xff]   ;;  %v1835_v32 = vld [vmem:[%s2694_s1 + $0x334] ss:$8 sps:$4 sm:$0xff]   ;;  %v1839_v34 = vld [vmem:[%s2694_s1 + $0x330] ss:$8 sps:$4 sm:$0xff]  }
   0xc   :  { %704 = vmatpush1.bf16.msra.mxu1 %v1804_v11  ;;  %654 = vmatprep.subr.bf16.mxu0 %v1805_v12  ;;  %v1834_v31 = vld [vmem:[%s2694_s1 + $0x340] ss:$8 sps:$4 sm:$0xff]   ;;  %v1837_v33 = vld [vmem:[%s2694_s1 + $0x434] ss:$8 sps:$4 sm:$0xff]   ;;  %v1840_v35 = vld [vmem:[%s2694_s1 + $0x430] ss:$8 sps:$4 sm:$0xff]  }
   0xd   :  { %705 = vmatprep.subr.bf16.mxu1 %v1807_v13  ;;  %v1841_v36 = vld [vmem:[%s2694_s1 + $0x324] ss:$8 sps:$4 sm:$0xff]   ;;  %v1845_v38 = vld [vmem:[%s2694_s1 + $0x320] ss:$8 sps:$4 sm:$0xff]   ;;  %v1847_v40 = vld [vmem:[%s2694_s1 + $0x314] ss:$8 sps:$4 sm:$0xff]  }
   0xe   :  { %v1843_v37 = vld [vmem:[%s2694_s1 + $0x424] ss:$8 sps:$4 sm:$0xff]   ;;  %v1846_v39 = vld [vmem:[%s2694_s1 + $0x420] ss:$8 sps:$4 sm:$0xff]   ;;  %v1849_v41 = vld [vmem:[%s2694_s1 + $0x414] ss:$8 sps:$4 sm:$0xff]  }
   0xf   :  { %655 = vmatpush1.bf16.msra.mxu0 %v1809_v14  ;;  %v1851_v42 = vld [vmem:[%s2694_s1 + $0x310] ss:$8 sps:$4 sm:$0xff]   ;;  %v1853_v44 = vld [vmem:[%s2694_s1 + $0x304] ss:$8 sps:$4 sm:$0xff]   ;;  %v1857_v46 = vld [vmem:[%s2694_s1 + $0x300] ss:$8 sps:$4 sm:$0xff]  }
  0x10   :  { %706 = vmatpush1.bf16.msra.mxu1 %v1810_v15  ;;  %656 = vmatprep.subr.bf16.mxu0 %v1811_v16  ;;  %v1852_v43 = vld [vmem:[%s2694_s1 + $0x410] ss:$8 sps:$4 sm:$0xff]   ;;  %v1855_v45 = vld [vmem:[%s2694_s1 + $0x404] ss:$8 sps:$4 sm:$0xff]   ;;  %v1858_v47 = vld [vmem:[%s2694_s1 + $0x400] ss:$8 sps:$4 sm:$0xff]  }
  0x11   :  { %707 = vmatprep.subr.bf16.mxu1 %v1813_v17  ;;  %v1859_v48 = vld [vmem:[%s2694_s1 + $0x2f4] ss:$8 sps:$4 sm:$0xff]   ;;  %v20_v49 = vld [vmem:[%s2695_s0 + $0x28] sm:$0x11]  ;;  %v2191_v50 = vld [vmem:[%s2695_s0 + $0x4] ss:$20 sps:$4 sm:$0xff]  }
  0x12   :  { %v2193_v51 = vcombine.high %v20_v49, %v20_v49  ;;  %v21_v52 = vld [vmem:[%s2695_s0 + $0x30] sm:$0x11]  ;;  %v216_v54 = vshrl.u32 %v2191_v50, 16  ;;  %v218_v55 = vshll.u32 %v2191_v50, 16  ;;  %v2206_v56 = vld [vmem:[%s2695_s0 + $0xc] ss:$20 sps:$4 sm:$0xff]   ;;  %v2240_v12 = vcombine.low %v20_v49, %v20_v49 }
  0x13   :  { %657 = vmatpush1.bf16.msra.mxu0 %v1815_v18  ;;  %v1861_v53 = vld [vmem:[%s2694_s1 + $0x3f4] ss:$8 sps:$4 sm:$0xff]   ;;  %v2208_v57 = vcombine.high %v21_v52, %v21_v52  ;;  %v1863_v58 = vld [vmem:[%s2694_s1 + $0x2f0] ss:$8 sps:$4 sm:$0xff]   ;;  %v1865_v61 = vld [vmem:[%s2694_s1 + $0x2e4] ss:$8 sps:$4 sm:$0xff]   ;;  %v2246_v15 = vcombine.low %v21_v52, %v21_v52 }
  0x14   :  { %708 = vmatpush1.bf16.msra.mxu1 %v1816_v19  ;;  %658 = vmatprep.subr.bf16.mxu0 %v1817_v20  ;;  %v1864_v59 = vld [vmem:[%s2694_s1 + $0x3f0] ss:$8 sps:$4 sm:$0xff]   ;;  %v223_v60 = vshll.u32 %v2193_v51, 16  ;;  %v1867_v62 = vld [vmem:[%s2694_s1 + $0x3e4] ss:$8 sps:$4 sm:$0xff]   ;;  %v220_v63 = vrot.slane %v218_v55, 1 }
  0x15   :  { %709 = vmatprep.subr.bf16.mxu1 %v1819_v21  ;;  %v240_v0 = vshrl.u32 %v2206_v56, 16  ;;  %v242_v1 = vshll.u32 %v2206_v56, 16  ;;  %v247_v2 = vshll.u32 %v2208_v57, 16  ;;  %v2229_v4 = vld [vmem:[%s2695_s0] ss:$20 sps:$4 sm:$0xff]   ;;  %v263_v55 = vshrl.u32 %v2240_v12, 16 }
  0x16   :  { %v225_v3 = vrot.slane %v223_v60, 1  ;;  %v2234_v5 = vld [vmem:[%s2695_s0 + $0x8] ss:$20 sps:$4 sm:$0xff]   ;;  %v221_v6 = vor.u32 %v220_v63, %v216_v54  ;;  %v206_v14 = vshll.u32 %v2229_v4, 16  ;;  %v1875_v20 = vld [vmem:[%s2694_s1 + $0x2d0] ss:$8 sps:$4 sm:$0xff]  }
  0x17   :  { %659 = vmatpush1.bf16.msra.mxu0 %v1821_v22  ;;  %v244_v7 = vrot.slane %v242_v1, 1  ;;  %v249_v8 = vrot.slane %v247_v2, 1  ;;  %v1869_v9 = vld [vmem:[%s2694_s1 + $0x2e0] ss:$8 sps:$4 sm:$0xff]   ;;  %v230_v16 = vshll.u32 %v2234_v5, 16  ;;  %v204_v22 = vshrl.u32 %v2229_v4, 16 }
  0x18   :  { %710 = vmatpush1.bf16.msra.mxu1 %v1822_v23  ;;  %660 = vmatprep.subr.bf16.mxu0 %v1823_v24  ;;  %v226_v10 = vsel %vm202_vm0, %v221_v6, %v225_v3  ;;  %v1870_v13 = vld [vmem:[%s2694_s1 + $0x3e0] ss:$8 sps:$4 sm:$0xff]   ;;  %v1871_v17 = vld [vmem:[%s2694_s1 + $0x2d4] ss:$8 sps:$4 sm:$0xff]   ;;  %v1876_v21 = vld [vmem:[%s2694_s1 + $0x3d0] ss:$8 sps:$4 sm:$0xff]  }
  0x19   :  { %711 = vmatprep.subr.bf16.mxu1 %v1825_v25  ;;  %v245_v11 = vor.u32 %v244_v7, %v240_v0  ;;  %v1873_v18 = vld [vmem:[%s2694_s1 + $0x3d4] ss:$8 sps:$4 sm:$0xff]   ;;  %680 = vmatprep.mubr.bf16.mxu0 %v226_v10  ;;  %v211_v23 = vshll.u32 %v2240_v12, 16  ;;  %v208_v24 = vrot.slane %v206_v14, 1  ;;  %v228_v25 = vshrl.u32 %v2234_v5, 16 }
  0x1a   :  { %v1907_v49 = vld [vmem:[%s2694_s1 + $0x454] ss:$8 sps:$4 sm:$0xff]   ;;  %v2317_v52 = vld [vmem:[%s2695_s0 + $0x38] ss:$0 sps:$4 sm:$0x11]   ;;  %v2015_v10 = vmov 0  }
  0x1b   :  { %661 = vmatpush1.bf16.msra.mxu0 %v1827_v26  ;;  %v250_v19 = vsel %vm202_vm0, %v245_v11, %v249_v8  ;;  %v232_v26 = vrot.slane %v230_v16, 1  ;;  %v1910_v54 = vld [vmem:[%s2694_s1 + $0x54] ss:$8 sps:$4 sm:$0xff]   ;;  %v1908_v60 = vld [vmem:[%s2694_s1 + $0x50] ss:$8 sps:$4 sm:$0xff]   ;;  %v259_v0 = vshll.u32 %v2317_v52, 16 }
  0x1c   :  { %712 = vmatpush1.bf16.msra.mxu1 %v1828_v27  ;;  %662 = vmatprep.subr.bf16.mxu0 %v1829_v28  ;;  %v235_v27 = vshll.u32 %v2246_v15, 16  ;;  %v1877_v28 = vld [vmem:[%s2694_s1 + $0x2c4] ss:$8 sps:$4 sm:$0xff]   ;;  %v1911_v2 = vld [vmem:[%s2694_s1 + $0x440] ss:$8 sps:$4 sm:$0xff]  }
  0x1d   :  { %713 = vmatprep.subr.bf16.mxu1 %v1831_v29  ;;  %731 = vmatprep.mubr.bf16.mxu1 %v250_v19  ;;  %v1879_v29 = vld [vmem:[%s2694_s1 + $0x3c4] ss:$8 sps:$4 sm:$0xff]   ;;  %v1914_v3 = vld [vmem:[%s2694_s1 + $0x40] ss:$8 sps:$4 sm:$0xff]   ;;  %v261_v7 = vrot.slane %v259_v0, 1 }
  0x1e   :  { %v1916_v1 = vld [vmem:[%s2694_s1 + $0x44] ss:$8 sps:$4 sm:$0xff]   ;;  %v1921_v8 = vld [vmem:[%s2694_s1 + $0x34] ss:$8 sps:$4 sm:$0xff]   ;;  %v1919_v11 = vld [vmem:[%s2694_s1 + $0x30] ss:$8 sps:$4 sm:$0xff]  }
  0x1f   :  { %663 = vmatpush1.bf16.msra.mxu0 %v1833_v30  ;;  %v1881_v30 = vld [vmem:[%s2694_s1 + $0x2c0] ss:$8 sps:$4 sm:$0xff]   ;;  %v1922_v14 = vld [vmem:[%s2694_s1 + $0x170] ss:$8 sps:$4 sm:$0xff]   ;;  %v1927_v16 = vld [vmem:[%s2694_s1 + $0x24] ss:$8 sps:$4 sm:$0xff]  }
  0x20   :  { %714 = vmatpush1.bf16.msra.mxu1 %v1834_v31  ;;  %664 = vmatprep.subr.bf16.mxu0 %v1835_v32  ;;  %v1882_v31 = vld [vmem:[%s2694_s1 + $0x3c0] ss:$8 sps:$4 sm:$0xff]   ;;  %v209_v32 = vor.u32 %v208_v24, %v204_v22  ;;  %v1933_v19 = vld [vmem:[%s2694_s1 + $0x14] ss:$8 sps:$4 sm:$0xff]   ;;  %v1931_v22 = vld [vmem:[%s2694_s1 + $0x10] ss:$8 sps:$4 sm:$0xff]  }
  0x21   :  { %715 = vmatprep.subr.bf16.mxu1 %v1837_v33  ;;  %v213_v33 = vrot.slane %v211_v23, 1  ;;  %v1934_v23 = vld [vmem:[%s2694_s1 + $0x150] ss:$8 sps:$4 sm:$0xff]   ;;  %v1939_v24 = vld [vmem:[%s2694_s1 + $0x4] ss:$8 sps:$4 sm:$0xff]  }
  0x22   :  { %v1988_v0 = vld [vmem:[%s2694_s1 + $0x1c0] ss:$8 sps:$4 sm:$0xff]  }
  0x23   :  { %665 = vmatpush2.bf16.msra.mxu0 %v1839_v34  ;;  %v233_v34 = vor.u32 %v232_v26, %v228_v25  ;;  %v1942_v25 = vld [vmem:[%s2694_s1 + $0x144] ss:$8 sps:$4 sm:$0xff]   ;;  %v1937_v26 = vld [vmem:[%s2694_s1] ss:$8 sps:$4 sm:$0xff]  }
  0x24   :  { %716 = vmatpush2.bf16.msra.mxu1 %v1840_v35  ;;  %666 = vmatprep.subr.bf16.mxu0 %v1841_v36  ;;  %v237_v35 = vrot.slane %v235_v27, 1  ;;  %v1895_v36 = vld [vmem:[%s2694_s1 + $0x474] ss:$8 sps:$4 sm:$0xff]   ;;  %v1940_v27 = vld [vmem:[%s2694_s1 + $0x140] ss:$8 sps:$4 sm:$0xff]  }
  0x25   :  { %717 = vmatprep.subr.bf16.mxu1 %v1843_v37  ;;  %v1898_v37 = vld [vmem:[%s2694_s1 + $0x74] ss:$8 sps:$4 sm:$0xff]  }
  0x27   :  { %667 = vmatpush2.bf16.msra.mxu0 %v1845_v38  ;;  %v1893_v38 = vld [vmem:[%s2694_s1 + $0x470] ss:$8 sps:$4 sm:$0xff]  }
  0x28   :  { %718 = vmatpush2.bf16.msra.mxu1 %v1846_v39  ;;  %668 = vmatprep.subr.bf16.mxu0 %v1847_v40  ;;  %v214_v39 = vsel %vm202_vm0, %v209_v32, %v213_v33  ;;  %v238_v40 = vsel %vm202_vm0, %v233_v34, %v237_v35  ;;  %v1951_v32 = vld [vmem:[%s2694_s1 + $0xe4] ss:$8 sps:$4 sm:$0xff]   ;;  %v1949_v33 = vld [vmem:[%s2694_s1 + $0xe0] ss:$8 sps:$4 sm:$0xff]   ;;  %v1957_v35 = vld [vmem:[%s2694_s1 + $0xd4] ss:$8 sps:$4 sm:$0xff]  }
  0x29   :  { %719 = vmatprep.subr.bf16.mxu1 %v1849_v41  ;;  %v1896_v41 = vld [vmem:[%s2694_s1 + $0x70] ss:$8 sps:$4 sm:$0xff]   ;;  %v1952_v34 = vld [vmem:[%s2694_s1 + $0x120] ss:$8 sps:$4 sm:$0xff]  }
  0x2b   :  { %669 = vmatpush2.bf16.msra.mxu0 %v1851_v42  ;;  %v1901_v42 = vld [vmem:[%s2694_s1 + $0x464] ss:$8 sps:$4 sm:$0xff]  }
  0x2c   :  { %720 = vmatpush2.bf16.msra.mxu1 %v1852_v43  ;;  %670 = vmatprep.subr.bf16.mxu0 %v1853_v44  ;;  %v2298_v43 = vld [vmem:[%s2695_s0 + $0x10] ss:$20 sps:$4 sm:$0xff]  }
  0x2d   :  { %721 = vmatprep.subr.bf16.mxu1 %v1855_v45  ;;  %v1904_v44 = vld [vmem:[%s2694_s1 + $0x64] ss:$8 sps:$4 sm:$0xff]   ;;  %v1899_v45 = vld [vmem:[%s2694_s1 + $0x460] ss:$8 sps:$4 sm:$0xff]  }
  0x2f   :  { %671 = vmatpush2.bf16.msra.mxu0 %v1857_v46  ;;  %v265_v46 = vshrl.u32 %v2193_v51, 16 }
  0x30   :  { %722 = vmatpush2.bf16.msra.mxu1 %v1858_v47  ;;  %672 = vmatprep.subr.bf16.mxu0 %v1859_v48  ;;  %v269_v47 = vshrl.u32 %v2208_v57, 16  ;;  %v1902_v48 = vld [vmem:[%s2694_s1 + $0x60] ss:$8 sps:$4 sm:$0xff]  }
  0x31   :  { %723 = vmatprep.subr.bf16.mxu1 %v1861_v53  ;;  %v254_v53 = vshll.u32 %v2298_v43, 16 }
  0x33   :  { %673 = vmatpush2.bf16.msra.mxu0 %v1863_v58  ;;  %v267_v58 = vshrl.u32 %v2246_v15, 16  ;;  %v256_v63 = vrot.slane %v254_v53, 1  ;;  %v1973_v53 = vld [vmem:[%s2694_s1 + $0xa0] ss:$8 sps:$4 sm:$0xff]  }
  0x34   :  { %724 = vmatpush2.bf16.msra.mxu1 %v1864_v59  ;;  %674 = vmatprep.subr.bf16.mxu0 %v1865_v61  ;;  %v1905_v59 = vld [vmem:[%s2694_s1 + $0x450] ss:$8 sps:$4 sm:$0xff]   ;;  %v1913_v61 = vld [vmem:[%s2694_s1 + $0x444] ss:$8 sps:$4 sm:$0xff]  }
  0x35   :  { %725 = vmatprep.subr.bf16.mxu1 %v1867_v62  ;;  %v252_v62 = vshrl.u32 %v2298_v43, 16 }
  0x37   :  { %675 = vmatpush2.bf16.msra.mxu0 %v1869_v9  ;;  %v257_v6 = vor.u32 %v256_v63, %v252_v62  ;;  %v1924_v9 = vld [vmem:[%s2694_s1 + $0x174] ss:$8 sps:$4 sm:$0xff]   ;;  %v1990_v62 = vld [vmem:[%s2694_s1 + $0x1c4] ss:$8 sps:$4 sm:$0xff]   ;;  %v1985_v63 = vld [vmem:[%s2694_s1 + $0x80] ss:$8 sps:$4 sm:$0xff]  }
  0x38   :  { %726 = vmatpush2.bf16.msra.mxu1 %v1870_v13  ;;  %676 = vmatprep.subr.bf16.mxu0 %v1871_v17  ;;  %v1925_v17 = vld [vmem:[%s2694_s1 + $0x20] ss:$8 sps:$4 sm:$0xff]  }
  0x39   :  { %727 = vmatprep.subr.bf16.mxu1 %v1873_v18  ;;  %v262_v13 = vsel %vm202_vm0, %v257_v6, %v261_v7  ;;  %v1928_v18 = vld [vmem:[%s2694_s1 + $0x160] ss:$8 sps:$4 sm:$0xff]   ;;  %v1994_v6 = vld [vmem:[%s2694_s1 + $0x230] ss:$8 sps:$4 sm:$0xff]   ;;  %v1999_v7 = vld [vmem:[%s2694_s1 + $0x1a4] ss:$8 sps:$4 sm:$0xff]  }
  0x3a   :  { %vm1349_vm0 = vsmask.f32 256 }
  0x3b   :  { %677 = vmatpush2.bf16.msra.mxu0 %v1875_v20  ;;  %v1936_v20 = vld [vmem:[%s2694_s1 + $0x154] ss:$8 sps:$4 sm:$0xff]  }
  0x3c   :  { %728 = vmatpush2.bf16.msra.mxu1 %v1876_v21  ;;  %678 = vmatprep.subr.bf16.mxu0 %v1877_v28  ;;  %v271_v21 = vshrl.u32 %v2317_v52, 16  ;;  %v1945_v28 = vld [vmem:[%s2694_s1 + $0xf4] ss:$8 sps:$4 sm:$0xff]  }
  0x3d   :  { %729 = vmatprep.subr.bf16.mxu1 %v1879_v29  ;;  %v1948_v29 = vld [vmem:[%s2694_s1 + $0x134] ss:$8 sps:$4 sm:$0xff]  }
  0x3f   :  { %679 = vmatpush2.bf16.msra.mxu0 %v1881_v30  ;;  %v1943_v30 = vld [vmem:[%s2694_s1 + $0xf0] ss:$8 sps:$4 sm:$0xff]  }
  0x40   :  { %730 = vmatpush2.bf16.msra.mxu1 %v1882_v31  ;;  %758 = vmatprep.subr.bf16.mxu0 %v1895_v36  ;;  %v1946_v31 = vld [vmem:[%s2694_s1 + $0x130] ss:$8 sps:$4 sm:$0xff]   ;;  %v1960_v36 = vld [vmem:[%s2694_s1 + $0x114] ss:$8 sps:$4 sm:$0xff]  }
  0x41   :  { %1173 = vmatprep.subr.bf16.mxu1 %v1898_v37  ;;  %v1955_v37 = vld [vmem:[%s2694_s1 + $0xd0] ss:$8 sps:$4 sm:$0xff]  }
  0x42   :  { %681 = vmatmul.mubr.bf16.vlgmr.msra.gmra.mxu0 %v214_v39  ;;  %v1963_v39 = vld [vmem:[%s2694_s1 + $0xc4] ss:$8 sps:$4 sm:$0xff]  }
  0x43   :  { %732 = vmatmul.mubr.bf16.vlgmr.msra.gmra.mxu1 %v238_v40  ;;  %759 = vmatpush1.bf16.msra.mxu0 %v1893_v38  ;;  %v1958_v38 = vld [vmem:[%s2694_s1 + $0x110] ss:$8 sps:$4 sm:$0xff]   ;;  %v1966_v40 = vld [vmem:[%s2694_s1 + $0x104] ss:$8 sps:$4 sm:$0xff]  }
  0x44   :  { %1174 = vmatpush1.bf16.msra.mxu1 %v1896_v41  ;;  %760 = vmatprep.subr.bf16.mxu0 %v1901_v42  ;;  %v1961_v41 = vld [vmem:[%s2694_s1 + $0xc0] ss:$8 sps:$4 sm:$0xff]  }
  0x45   :  { %1175 = vmatprep.subr.bf16.mxu1 %v1904_v44  ;;  %690 = vmatprep.mubr.bf16.mxu0 %v265_v46  ;;  %v1964_v42 = vld [vmem:[%s2694_s1 + $0x100] ss:$8 sps:$4 sm:$0xff]   ;;  %v1969_v44 = vld [vmem:[%s2694_s1 + $0xb4] ss:$8 sps:$4 sm:$0xff]   ;;  %v1967_v46 = vld [vmem:[%s2694_s1 + $0xb0] ss:$8 sps:$4 sm:$0xff]  }
  0x46   :  { %741 = vmatprep.mubr.bf16.mxu1 %v269_v47  ;;  %v1970_v47 = vld [vmem:[%s2694_s1 + $0x1f0] ss:$8 sps:$4 sm:$0xff]  }
  0x47   :  { %761 = vmatpush1.bf16.msra.mxu0 %v1899_v45  ;;  %v1972_v45 = vld [vmem:[%s2694_s1 + $0x1f4] ss:$8 sps:$4 sm:$0xff]  }
  0x48   :  { %1176 = vmatpush1.bf16.msra.mxu1 %v1902_v48  ;;  %762 = vmatprep.subr.bf16.mxu0 %v1907_v49  ;;  %v1975_v48 = vld [vmem:[%s2694_s1 + $0xa4] ss:$8 sps:$4 sm:$0xff]  }
  0x49   :  { %1177 = vmatprep.subr.bf16.mxu1 %v1910_v54  ;;  %v1978_v49 = vld [vmem:[%s2694_s1 + $0x1e4] ss:$8 sps:$4 sm:$0xff]   ;;  %v1976_v54 = vld [vmem:[%s2694_s1 + $0x1e0] ss:$8 sps:$4 sm:$0xff]  }
  0x4a   :  { %691 = vmatmul.mubr.bf16.gmra.mxu0 %v263_v55  ;;  %v1981_v55 = vld [vmem:[%s2694_s1 + $0x94] ss:$8 sps:$4 sm:$0xff]  }
  0x4b   :  { %742 = vmatmul.mubr.bf16.gmra.mxu1 %v267_v58  ;;  %763 = vmatpush1.bf16.msra.mxu0 %v1905_v59  ;;  %v1984_v58 = vld [vmem:[%s2694_s1 + $0x1d4] ss:$8 sps:$4 sm:$0xff]   ;;  %v1979_v59 = vld [vmem:[%s2694_s1 + $0x90] ss:$8 sps:$4 sm:$0xff]  }
  0x4c   :  { %1178 = vmatpush1.bf16.msra.mxu1 %v1908_v60  ;;  %764 = vmatprep.subr.bf16.mxu0 %v1913_v61  ;;  %v1982_v60 = vld [vmem:[%s2694_s1 + $0x1d0] ss:$8 sps:$4 sm:$0xff]   ;;  %v1987_v61 = vld [vmem:[%s2694_s1 + $0x84] ss:$8 sps:$4 sm:$0xff]  }
  0x4d   :  { %1179 = vmatprep.subr.bf16.mxu1 %v1916_v1  ;;  %782 = vmatprep.mubr.bf16.mxu0 %v2015_v10  ;;  %v1993_v1 = vld [vmem:[%s2694_s1 + $0x1b4] ss:$8 sps:$4 sm:$0xff]  }
  0x4e   :  { %1205 = vmatprep.mubr.bf16.mxu1 %v2191_v50  ;;  %v1930_v50 = vld [vmem:[%s2694_s1 + $0x164] ss:$8 sps:$4 sm:$0xff]  }
  0x4f   :  { %765 = vmatpush1.bf16.msra.mxu0 %v1911_v2  ;;  %v1996_v2 = vld [vmem:[%s2694_s1 + $0x234] ss:$8 sps:$4 sm:$0xff]  }
  0x50   :  { %1180 = vmatpush1.bf16.msra.mxu1 %v1914_v3  ;;  %1224 = vmatprep.subr.bf16.mxu0 %v1924_v9  ;;  %v1991_v3 = vld [vmem:[%s2694_s1 + $0x1b0] ss:$8 sps:$4 sm:$0xff]   ;;  %v1997_v9 = vld [vmem:[%s2694_s1 + $0x1a0] ss:$8 sps:$4 sm:$0xff]  }
  0x51   :  { %1181 = vmatprep.subr.bf16.mxu1 %v1921_v8  ;;  %v2002_v8 = vld [vmem:[%s2694_s1 + $0x224] ss:$8 sps:$4 sm:$0xff]  }
  0x52   :  { %1692 = vmatmul.mubr.msk.bf16.vlgmr.msra.gmra.mxu0 %vm641_vm1, %v262_v13  ;;  %v2005_v13 = vld [vmem:[%s2694_s1 + $0x194] ss:$8 sps:$4 sm:$0xff]  }
  0x53   :  { %1225 = vmatpush1.bf16.msra.mxu0 %v1922_v14  ;;  %792 = vmatprep.mubr.bf16.mxu0 %v2015_v10  ;;  %v2003_v14 = vld [vmem:[%s2694_s1 + $0x190] ss:$8 sps:$4 sm:$0xff]  }
  0x54   :  { %1182 = vmatpush1.bf16.msra.mxu1 %v1919_v11  ;;  %1226 = vmatprep.subr.bf16.mxu0 %v1930_v50  ;;  %v2000_v11 = vld [vmem:[%s2694_s1 + $0x220] ss:$8 sps:$4 sm:$0xff]   ;;  %v2011_v50 = vld [vmem:[%s2694_s1 + $0x184] ss:$8 sps:$4 sm:$0xff]  }
  0x55   :  { %1183 = vmatprep.subr.bf16.mxu1 %v1927_v16  ;;  %v2006_v16 = vld [vmem:[%s2694_s1 + $0x210] ss:$8 sps:$4 sm:$0xff]  }
  0x57   :  { %1227 = vmatpush1.bf16.msra.mxu0 %v1928_v18  ;;  %v2012_v18 = vld [vmem:[%s2694_s1 + $0x200] ss:$8 sps:$4 sm:$0xff]  }
  0x58   :  { %1184 = vmatpush1.bf16.msra.mxu1 %v1925_v17  ;;  %1228 = vmatprep.subr.bf16.mxu0 %v1936_v20  ;;  %v2009_v17 = vld [vmem:[%s2694_s1 + $0x180] ss:$8 sps:$4 sm:$0xff]  }
  0x59   :  { %1185 = vmatprep.subr.bf16.mxu1 %v1933_v19 }
  0x5a   :  { %1693 = vmatmul.mubr.msk.bf16.gmra.mxu0 %vm641_vm1, %v271_v21 }
  0x5b   :  { %1229 = vmatpush1.bf16.msra.mxu0 %v1934_v23  ;;  %1256 = vmatprep.mubr.bf16.mxu0 %v2206_v56  ;;  %v1954_v56 = vld [vmem:[%s2694_s1 + $0x124] ss:$8 sps:$4 sm:$0xff]  }
  0x5c   :  { %1186 = vmatpush1.bf16.msra.mxu1 %v1931_v22  ;;  %1230 = vmatprep.subr.bf16.mxu0 %v1942_v25 }
  0x5d   :  { %1187 = vmatprep.subr.bf16.mxu1 %v1939_v24 }
  0x5f   :  { %1231 = vmatpush1.bf16.msra.mxu0 %v1940_v27 }
  0x60   :  { %1188 = vmatpush1.bf16.msra.mxu1 %v1937_v26  ;;  %1232 = vmatprep.subr.bf16.mxu0 %v1948_v29 }
  0x61   :  { %1189 = vmatprep.subr.bf16.mxu1 %v1945_v28 }
  0x63   :  { %1233 = vmatpush1.bf16.msra.mxu0 %v1946_v31 }
  0x64   :  { %1190 = vmatpush2.bf16.msra.mxu1 %v1943_v30  ;;  %1234 = vmatprep.subr.bf16.mxu0 %v1954_v56 }
  0x65   :  { %1191 = vmatprep.subr.bf16.mxu1 %v1951_v32 }
  0x67   :  { %1235 = vmatpush1.bf16.msra.mxu0 %v1952_v34 }
  0x68   :  { %1192 = vmatpush2.bf16.msra.mxu1 %v1949_v33  ;;  %1236 = vmatprep.subr.bf16.mxu0 %v1960_v36 }
  0x69   :  { %1193 = vmatprep.subr.bf16.mxu1 %v1957_v35 }
  0x6b   :  { %1237 = vmatpush1.bf16.msra.mxu0 %v1958_v38 }
  0x6c   :  { %1194 = vmatpush2.bf16.msra.mxu1 %v1955_v37  ;;  %1238 = vmatprep.subr.bf16.mxu0 %v1966_v40 }
  0x6d   :  { %1195 = vmatprep.subr.bf16.mxu1 %v1963_v39 }
  0x6f   :  { %1239 = vmatpush1.bf16.msra.mxu0 %v1964_v42 }
  0x70   :  { %1196 = vmatpush2.bf16.msra.mxu1 %v1961_v41  ;;  %1240 = vmatprep.subr.bf16.mxu0 %v1972_v45  ;;  %v1366_v41 = vlaneseq }
  0x71   :  { %1197 = vmatprep.subr.bf16.mxu1 %v1969_v44 }
  0x72   :  { %v2576_v42 = vshrl.u32 %v1366_v41, 7 }
  0x73   :  { %1241 = vmatpush2.bf16.msra.mxu0 %v1970_v47 }
  0x74   :  { %1198 = vmatpush2.bf16.msra.mxu1 %v1967_v46  ;;  %1242 = vmatprep.subr.bf16.mxu0 %v1978_v49  ;;  %v1368_v44 = vadd.s32 8, %v2576_v42  ;;  %v2580_v45 = vmul.u32.u64.low 3817748708, %v2576_v42  ;;  %v2581_v46 = vmul.u32.u64.high 3817748708, %v2576_v42, %v2580_v45  ;;  %v2584_v47 = vadd.s32 16, %v2576_v42 }
  0x75   :  { %1199 = vmatprep.subr.bf16.mxu1 %v1975_v48 }
  0x76   :  { %v2586_v48 = vmul.u32.u64.low 3817748708, %v1368_v44  ;;  %v2587_v49 = vmul.u32.u64.high 3817748708, %v1368_v44, %v2586_v48  ;;  %vm1428_vm14 = vcmp.lt.s32.totalorder %v2584_v47, 18 }
  0x77   :  { %1243 = vmatpush2.bf16.msra.mxu0 %v1976_v54 }
  0x78   :  { %1200 = vmatpush2.bf16.msra.mxu1 %v1973_v53  ;;  %1244 = vmatprep.subr.bf16.mxu0 %v1984_v58  ;;  %v2590_v53 = vmul.u32.u64.low 3817748708, %v2584_v47  ;;  %v2591_v54 = vmul.u32.u64.high 3817748708, %v2584_v47, %v2590_v53  ;;  %v1387_v58 = vshrl.u32 %v2587_v49, 3 }
  0x79   :  { %1201 = vmatprep.subr.bf16.mxu1 %v1981_v55  ;;  %v1376_v55 = vshrl.u32 %v2581_v46, 3 }
  0x7b   :  { %1245 = vmatpush2.bf16.msra.mxu0 %v1982_v60  ;;  %v1398_v60 = vshrl.u32 %v2591_v54, 3 }
  0x7c   :  { %1202 = vmatpush2.bf16.msra.mxu1 %v1979_v59  ;;  %1246 = vmatprep.subr.bf16.mxu0 %v1990_v62  ;;  %v1377_v59 = vmul.u32 9, %v1376_v55  ;;  %v1388_v62 = vmul.u32 9, %v1387_v58 }
  0x7d   :  { %1203 = vmatprep.subr.bf16.mxu1 %v1987_v61 }
  0x7f   :  { %1247 = vmatpush2.bf16.msra.mxu0 %v1988_v0  ;;  %v1378_v0 = vsub.s32 %v2576_v42, %v1377_v59 }
  0x80   :  { %1204 = vmatpush2.bf16.msra.mxu1 %v1985_v63  ;;  %1248 = vmatprep.subr.bf16.mxu0 %v1993_v1  ;;  %v1399_v1 = vmul.u32 9, %v1398_v60 }
  0x81   :  { %1283 = vmatprep.subr.bf16.mxu1 %v1996_v2  ;;  %vm1403_vm2 = vcmp.ne.s32.totalorder %v1378_v0, 0  ;;  %vm1406_vm3 = vcmp.lt.s32.totalorder %v1378_v0, 0 }
  0x82   :  { %vm2598_vm6 = vmand %vm1406_vm3, %vm1403_vm2  ;;  %vm1351_vm2 = vcmask 1044484   ;;  %vm1352_vm3 = vsmask.f32 4352 }
  0x83   :  { %1206 = vmatmul.mubr.bf16.vlgmr.msra.gmra.mxu1 %v2229_v4  ;;  %1249 = vmatpush2.bf16.msra.mxu0 %v1991_v3  ;;  %v2008_v4 = vld [vmem:[%s2694_s1 + $0x214] ss:$8 sps:$4 sm:$0xff]   ;;  %v1389_v3 = vsub.s32 %v1368_v44, %v1388_v62 }
  0x84   :  { %1284 = vmatpush1.bf16.msra.mxu1 %v1994_v6  ;;  %1250 = vmatprep.subr.bf16.mxu0 %v1999_v7  ;;  %v1400_v7 = vsub.s32 %v2584_v47, %v1399_v1 }
  0x85   :  { %1285 = vmatprep.subr.bf16.mxu1 %v2002_v8  ;;  %1215 = vmatprep.mubr.bf16.mxu1 %v2193_v51  ;;  %v2014_v51 = vld [vmem:[%s2694_s1 + $0x204] ss:$8 sps:$4 sm:$0xff]   ;;  %vm1404_vm4 = vcmp.ne.s32.totalorder %v1389_v3, 0  ;;  %vm1407_vm5 = vcmp.lt.s32.totalorder %v1389_v3, 0 }
  0x86   :  { %vm1405_vm7 = vcmp.ne.s32.totalorder %v1400_v7, 0  ;;  %vm1408_vm8 = vcmp.lt.s32.totalorder %v1400_v7, 0  ;;  %vm2602_vm9 = vmand %vm1407_vm5, %vm1404_vm4 }
  0x87   :  { %1251 = vmatpush2.bf16.msra.mxu0 %v1997_v9  ;;  %v1412_v9 = vadd.s32 9, %v1378_v0  ;;  %vm2609_vm10 = vmand %vm1408_vm8, %vm1405_vm7  ;;  %vm1358_vm7 = vsmask.f32 7938  ;;  %vm1360_vm8 = vsmask.f32 7954 }
  0x88   :  { %1286 = vmatpush1.bf16.msra.mxu1 %v2000_v11  ;;  %1252 = vmatprep.subr.bf16.mxu0 %v2005_v13  ;;  %vm2639_vm4 = vmand %vm1348_vm15, %vm1349_vm0 }
  0x89   :  { %1287 = vmatprep.subr.bf16.mxu1 %v2008_v4  ;;  %v1413_v4 = vadd.s32 9, %v1389_v3  ;;  %vm2645_vm5 = vmand %vm1351_vm2, %vm1352_vm3 }
  0x8b   :  { %1216 = vmatmul.mubr.bf16.gmra.mxu1 %v2240_v12  ;;  %1253 = vmatpush2.bf16.msra.mxu0 %v2003_v14 }
  0x8c   :  { %1288 = vmatpush1.bf16.msra.mxu1 %v2006_v16  ;;  %1254 = vmatprep.subr.bf16.mxu0 %v2011_v50 }
  0x8d   :  { %1289 = vmatprep.subr.bf16.mxu1 %v2014_v51  ;;  %1307 = vmatprep.mubr.bf16.mxu1 %v2015_v10  ;;  %v1415_v51 = vsel %vm2598_vm6, %v1412_v9, %v1378_v0  ;;  %vm1354_vm6 = vmor %vm2645_vm5, %vm2639_vm4 }
  0x8e   :  { %vm1418_vm11 = vcmp.lt.s32.totalorder %v1415_v51, 8 }
  0x8f   :  { %1255 = vmatpush2.bf16.msra.mxu0 %v2009_v17  ;;  %v1414_v17 = vadd.s32 9, %v1400_v7 }
  0x90   :  { %1290 = vmatpush1.bf16.msra.mxu1 %v2012_v18 }
  0x92   :  { %1257 = vmatmul.mubr.bf16.vlgmr.msra.gmra.mxu0 %v2234_v5 }
  0x93   :  { %1766 = vmatmul.mubr.msk.bf16.vlgmr.msra.gmra.mxu1 %vm641_vm1, %v2298_v43  ;;  %1266 = vmatprep.mubr.bf16.mxu0 %v2208_v57 }
  0x94   :  { %1317 = vmatprep.mubr.bf16.mxu1 %v2015_v10 }
  0x9a   :  { %1267 = vmatmul.mubr.bf16.gmra.mxu0 %v2246_v15 }
  0x9b   :  { %1767 = vmatmul.mubr.msk.bf16.gmra.mxu1 %vm641_vm1, %v2317_v52 }
 0x102   :  { %v682_v12 = vpop.f32.mrf.mxu0 }
 0x103   :  { %v733_v19 = vpop.f32.mrf.mxu1 }
 0x104   :  { %v2557_v20 = vadd.f32 %v733_v19, %v682_v12  ;;  %v684_v21 = vpop.f32.mrf.mxu0 }
 0x105   :  { %v735_v22 = vpop.f32.mrf.mxu1 }
 0x106   :  { %v2559_v23 = vadd.f32 %v735_v22, %v684_v21  ;;  %v686_v5 = vpop.f32.mrf.mxu0  ;;  %v1416_v22 = vsel %vm2602_vm9, %v1413_v4, %v1389_v3  ;;  %vm2666_vm9 = vmand %vm1348_vm15, %vm1358_vm7 }
 0x107   :  { %v737_v24 = vpop.f32.mrf.mxu1  ;;  %vm1419_vm12 = vcmp.lt.s32.totalorder %v1416_v22, 8 }
 0x108   :  { %v2561_v43 = vadd.f32 %v737_v24, %v686_v5  ;;  %v688_v57 = vpop.f32.mrf.mxu0 }
 0x109   :  { %v739_v25 = vpop.f32.mrf.mxu1 }
 0x10a   :  { %v2563_v10 = vadd.f32 %v739_v25, %v688_v57  ;;  %v692_v15 = vpop.f32.mrf.mxu0 }
 0x10b   :  { %v743_v26 = vpop.f32.mrf.mxu1 }
 0x10c   :  { %v2565_v27 = vadd.f32 %v743_v26, %v692_v15  ;;  %v694_v52 = vpop.f32.mrf.mxu0  ;;  %v1417_v15 = vsel %vm2609_vm10, %v1414_v17, %v1400_v7  ;;  %vm2672_vm10 = vmand %vm1351_vm2, %vm1360_vm8 }
 0x10d   :  { %v745_v28 = vpop.f32.mrf.mxu1  ;;  %vm2621_vm13 = vcmp.lt.s32.totalorder %v1417_v15, 8 }
 0x10e   :  { %v2567_v29 = vadd.f32 %v745_v28, %v694_v52  ;;  %v696_v30 = vpop.f32.mrf.mxu0  ;;  %vm1431_vm1 = vmand %vm2621_vm13, %vm1428_vm14 }
 0x10f   :  { %v747_v31 = vpop.f32.mrf.mxu1 }
 0x110   :  { %v697_v32 = vpop.f32.mrf.mxu0 }
 0x111   :  { %v748_v56 = vpop.f32.mrf.mxu1 }
 0x112   :  { %v784_v33 = vpop.f32.mrf.mxu0 }
 0x113   :  { %v785_v50 = vadd.f32 %v784_v33, %v2557_v20 }
 0x114   :  { %v786_v34 = vpop.f32.mrf.mxu0 }
 0x115   :  { %v787_v19 = vadd.f32 %v786_v34, %v2559_v23  ;;  %v2016_v23 = vmov 0.0  }
 0x116   :  { %v788_v35 = vpop.f32.mrf.mxu0  ;;  %v1771_v31 = vsel %vm1418_vm11, 1.0, %v2016_v23  ;;  %v1772_v44 = vsel %vm1419_vm12, 1.0, %v2016_v23  ;;  %v1773_v62 = vsel %vm1431_vm1, 1.0, %v2016_v23  ;;  %vm1362_vm11 = vmor %vm2672_vm10, %vm2666_vm9  ;;  %vm1483_vm12 = vcmp.lt.s32.totalorder %v1366_v41, 256 }
 0x117   :  { %v789_v20 = vadd.f32 %v788_v35, %v2561_v43 }
 0x118   :  { %v2569_v36 = vpop.f32.mrf.mxu0 }
 0x119   :  { %v791_v56 = vadd.f32 %v2569_v36, %v2563_v10 }
 0x11a   :  { %v2571_v37 = vpop.f32.mrf.mxu0 }
 0x11b   :  { %v795_v35 = vadd.f32 %v2571_v37, %v2565_v27 }
 0x11c   :  { %v2573_v38 = vpop.f32.mrf.mxu0 }
 0x11d   :  { %v797_v10 = vadd.f32 %v2573_v38, %v2567_v29 }
 0x11e   :  { %v798_v39 = vpop.f32.mrf.mxu0 }
 0x120   :  { %v799_v40 = vpop.f32.mrf.mxu0 }
 0x143   :  { %v1207_v61 = vpop.f32.mrf.mxu1 }
 0x144   :  { %v1208_v21 = vadd.f32 %v1207_v61, %v785_v50 }
 0x145   :  { %v1209_v63 = vpop.f32.mrf.mxu1 }
 0x146   :  { %v1210_v57 = vadd.f32 %v1209_v63, %v787_v19 }
 0x147   :  { %v1211_v2 = vpop.f32.mrf.mxu1 }
 0x148   :  { %v1212_v28 = vadd.f32 %v1211_v2, %v789_v20 }
 0x149   :  { %v1213_v6 = vpop.f32.mrf.mxu1 }
 0x14a   :  { %v1214_v45 = vadd.f32 %v1213_v6, %v791_v56 }
 0x14b   :  { %v1217_v8 = vpop.f32.mrf.mxu1 }
 0x14c   :  { %v1218_v36 = vadd.f32 %v1217_v8, %v795_v35 }
 0x14d   :  { %v1219_v11 = vpop.f32.mrf.mxu1 }
 0x14e   :  { %v1220_v58 = vadd.f32 %v1219_v11, %v797_v10 }
 0x14f   :  { %v1221_v14 = vpop.f32.mrf.mxu1 }
 0x151   :  { %v1222_v18 = vpop.f32.mrf.mxu1 }
 0x152   :  { %v1258_v5 = vpop.f32.mrf.mxu0  ;;  %v1355_v18 = vld [vmem:[%s2696_s2 + $0x10] sm:$0x11] }
 0x153   :  { %v1309_v24 = vpop.f32.mrf.mxu1  ;;  %v1259_v25 = vadd.f32 %v1258_v5, %v1208_v21 }
 0x154   :  { %v1260_v26 = vpop.f32.mrf.mxu0 }
 0x155   :  { %v1311_v52 = vpop.f32.mrf.mxu1  ;;  %v1310_v30 = vadd.f32 %v1309_v24, %v1259_v25  ;;  %v1261_v32 = vadd.f32 %v1260_v26, %v1210_v57 }
 0x156   :  { %v1262_v33 = vpop.f32.mrf.mxu0 }
 0x157   :  { %v1313_v34 = vpop.f32.mrf.mxu1  ;;  %v1312_v39 = vadd.f32 %v1311_v52, %v1261_v32  ;;  %v1263_v40 = vadd.f32 %v1262_v33, %v1212_v28  ;;  %v1438_v46 = vmul.f32 %v1771_v31, %v1310_v30 }
 0x158   :  { %v1264_v48 = vpop.f32.mrf.mxu0 }
 0x159   :  { %v1315_v49 = vpop.f32.mrf.mxu1  ;;  %v1775_v53 = vpack.c.bf16 %v1312_v39, %v1310_v30  ;;  %v1314_v54 = vadd.f32 %v1313_v34, %v1263_v40  ;;  %v1265_v27 = vadd.f32 %v1264_v48, %v1214_v45  ;;  %v1486_v38 = vmul.f32 %v1438_v46, %v1310_v30 }
 0x15a   :  { %v1268_v37 = vpop.f32.mrf.mxu0  ;;  %v1439_v60 = vmul.f32 %v1771_v31, %v1312_v39 }
 0x15b   :  { %v1319_v55 = vpop.f32.mrf.mxu1  ;;  %1346 = vst [vmem:[%s2696_s2] sm:$0xff] %v1775_v53  ;;  %v1440_v59 = vmul.f32 %v1772_v44, %v1314_v54  ;;  %v1269_v29 = vadd.f32 %v1268_v37, %v1218_v36  ;;  %v1316_v61 = vadd.f32 %v1315_v49, %v1265_v27 }
 0x15c   :  { %v1270_v47 = vpop.f32.mrf.mxu0  ;;  %v1487_v50 = vmul.f32 %v1439_v60, %v1312_v39  ;;  %v2017_v39 = vmov 1966171168  }
 0x15d   :  { %v1321_v63 = vpop.f32.mrf.mxu1  ;;  %v1444_v1 = vadd.f32 %v1440_v59, %v1438_v46  ;;  %v1488_v2 = vmul.f32 %v1440_v59, %v1314_v54  ;;  %v1320_v3 = vadd.f32 %v1319_v55, %v1269_v29  ;;  %v1271_v6 = vadd.f32 %v1270_v47, %v1220_v58 }
 0x15e   :  { %v1776_v8 = vpack.c.bf16 %v1316_v61, %v1314_v54  ;;  %v1441_v9 = vmul.f32 %v1772_v44, %v1316_v61  ;;  %v1272_v11 = vpop.f32.mrf.mxu0  ;;  %v1467_v40 = vunpack.c.l.s4 %v2017_v39 }
 0x15f   :  { %v1323_v13 = vpop.f32.mrf.mxu1  ;;  %v1492_v4 = vadd.f32 %v1488_v2, %v1486_v38  ;;  %v1442_v14 = vmul.f32 %v1773_v62, %v1320_v3  ;;  %v1322_v16 = vadd.f32 %v1321_v63, %v1271_v6 }
 0x160   :  { %1347 = vst [vmem:[%s2696_s2 + $0x8] sm:$0xff] %v1776_v8  ;;  %v1454_v51 = vadd.f32 %v1441_v9, %v1439_v60  ;;  %v1489_v17 = vmul.f32 %v1441_v9, %v1316_v61  ;;  %v1273_v12 = vpop.f32.mrf.mxu0  ;;  %v1468_v27 = vunpack.c.0.s8 %v1467_v40 }
 0x161   :  { %v1324_v19 = vpop.f32.mrf.mxu1  ;;  %v1446_v21 = vsel %vm1348_vm15, %v1442_v14, 0.0  ;;  %v1490_v22 = vmul.f32 %v1442_v14, %v1320_v3  ;;  %v1777_v5 = vpack.c.bf16 %v1322_v16, %v1320_v3  ;;  %v1443_v24 = vmul.f32 %v1773_v62, %v1322_v16 }
 0x162   :  { %v1501_v20 = vadd.f32 %v1489_v17, %v1487_v50  ;;  %v1447_v57 = vadd.f32 %v1446_v21, %v1444_v1  ;;  %v1471_v63 = vsub.s32 %v1468_v27, %v2576_v42 }
 0x163   :  { %v1493_v25 = vsel %vm1348_vm15, %v1490_v22, 0.0  ;;  %v1356_v15 = vsel %vm1354_vm6, %v1777_v5, %v1355_v18  ;;  %v1455_v26 = vsel %vm1348_vm15, %v1443_v24, 0.0  ;;  %v1491_v52 = vmul.f32 %v1443_v24, %v1322_v16 }
 0x164   :  { %v1448_v28 = vrot.slane %v1447_v57, 4  ;;  %v1494_v30 = vadd.f32 %v1493_v25, %v1492_v4  ;;  %1357 = vst [vmem:[%s2696_s2 + $0x10] sm:$0x11] %v1356_v15  ;;  %v1456_v23 = vadd.f32 %v1455_v26, %v1454_v51 }
 0x165   :  { %v1502_v32 = vsel %vm1348_vm15, %v1491_v52, 0.0 }
 0x166   :  { %v1449_v56 = vadd.f32 %v1448_v28, %v1447_v57  ;;  %v1495_v33 = vrot.slane %v1494_v30, 4  ;;  %v1457_v43 = vrot.slane %v1456_v23, 4  ;;  %v1503_v35 = vadd.f32 %v1502_v32, %v1501_v20 }
 0x168   :  { %v1450_v44 = vrot.slane %v1449_v56, 2  ;;  %v1496_v45 = vadd.f32 %v1495_v33, %v1494_v30  ;;  %v1458_v46 = vadd.f32 %v1457_v43, %v1456_v23  ;;  %v1504_v48 = vrot.slane %v1503_v35, 4 }
 0x16a   :  { %v1451_v49 = vadd.f32 %v1450_v44, %v1449_v56  ;;  %v1497_v10 = vrot.slane %v1496_v45, 2  ;;  %v1459_v36 = vrot.slane %v1458_v46, 2  ;;  %v1505_v53 = vadd.f32 %v1504_v48, %v1503_v35 }
 0x16b   :  { %v1363_v54 = vld [vmem:[%s2696_s2 + $0x10] sm:$0x11] }
 0x16c   :  { %v1452_v37 = vrot.slane %v1451_v49, 1  ;;  %v1498_v55 = vadd.f32 %v1497_v10, %v1496_v45  ;;  %v1364_v58 = vsel %vm1362_vm11, 0, %v1363_v54  ;;  %v1460_v59 = vadd.f32 %v1459_v36, %v1458_v46 }
 0x16d   :  { %1365 = vst [vmem:[%s2696_s2 + $0x10] sm:$0x11] %v1364_v58  ;;  %v1506_v29 = vrot.slane %v1505_v53, 2 }
 0x16e   :  { %v1461_v38 = vrot.slane %v1460_v59, 1  ;;  %v1499_v60 = vrot.slane %v1498_v55, 1  ;;  %v1453_v62 = vadd.f32 %v1452_v37, %v1451_v49 }
 0x16f   :  { %v1507_v61 = vadd.f32 %v1506_v29, %v1505_v53 }
 0x170   :  { %v1462_v47 = vadd.f32 %v1461_v38, %v1460_v59  ;;  %v1500_v2 = vadd.f32 %v1499_v60, %v1498_v55 }
 0x171   :  { %v1508_v0 = vrot.slane %v1507_v61, 1 }
 0x172   :  { %v1465_v1 = vcombine.low %v1453_v62, %v1462_v47 }
 0x173   :  { %v1509_v3 = vadd.f32 %v1508_v0, %v1507_v61 }
 0x174   :  { %v1472_v6 = vrot.slane %v1465_v1, %v1471_v63 }
 0x175   :  { %v1512_v7 = vcombine.low %v1500_v2, %v1509_v3 }
 0x176   :  { %v1479_v8 = vrot.slane %v1472_v6, %v1471_v63 }
 0x177   :  { %v1519_v9 = vrot.slane %v1512_v7, %v1471_v63 }
 0x178   :  { %1485 = vst.msk [vmem:[%s2697_s3] ss:$2 sm:$0x3] %vm1483_vm12, %v1479_v8 }
 0x179   :  { %v1526_v11 = vrot.slane %v1519_v9, %v1471_v63 }
 0x17b   :  { %1774 = vst.msk [vmem:[%s2697_s3 + $0x1] ss:$2 sm:$0x3] %vm1483_vm12, %v1526_v11 }

// kernel: image_classify_forward.10
= control target key start
LH: loop header
LB: loop body
LE: loop exit
PB: predicated region body
PF: predicated region fallthrough
CT: control target
= control target key end

     0   :  { %v1806_v1 = vmov 0   ;;  %vm124_vm0 = vsmask.f32 7424  ;;  %vm374_vm1 = vcmask 523264   ;;  %vm853_vm2 = vcmask 1046528   ;;  %s2415_s1 = inlined_call_operand.vmem [shape: bf16[3,320,256], index: 1, kind: input, shape index: {}]   ;;  %s2416_s0 = inlined_call_operand.vmem [shape: bf16[20,320], index: 0, kind: input, shape index: {}]   ;;  %s2417_s2 = inlined_call_operand.vmem [shape: bf16[20,256], index: 2, kind: output, shape index: {0}]   ;;  %s2418_s3 = inlined_call_operand.vmem [shape: f32[1,2,256], index: 3, kind: output, shape index: {1}]  }
   0x1   :  { %v1614_v0 = vld [vmem:[%s2415_s1 + $0x1b4] ss:$8 sps:$4 sm:$0xff]   ;;  %464 = vmatprep.mubr.bf16.mxu1 %v1806_v1  ;;  %v1618_v3 = vld [vmem:[%s2415_s1 + $0x1b0] ss:$8 sps:$4 sm:$0xff]   ;;  %v1620_v5 = vld [vmem:[%s2415_s1 + $0x1a4] ss:$8 sps:$4 sm:$0xff]  }
   0x2   :  { %v1616_v2 = vld [vmem:[%s2415_s1 + $0x274] ss:$8 sps:$4 sm:$0xff]   ;;  %381 = vmatprep.subr.bf16.mxu0 %v1614_v0  ;;  %v1619_v4 = vld [vmem:[%s2415_s1 + $0x270] ss:$8 sps:$4 sm:$0xff]   ;;  %v1622_v6 = vld [vmem:[%s2415_s1 + $0x264] ss:$8 sps:$4 sm:$0xff]  }
   0x3   :  { %440 = vmatprep.subr.bf16.mxu1 %v1616_v2  ;;  %382 = vmatpush1.bf16.msra.mxu0 %v1618_v3  ;;  %v1624_v7 = vld [vmem:[%s2415_s1 + $0x1a0] ss:$8 sps:$4 sm:$0xff]   ;;  %v1626_v9 = vld [vmem:[%s2415_s1 + $0x194] ss:$8 sps:$4 sm:$0xff]   ;;  %v1630_v11 = vld [vmem:[%s2415_s1 + $0x190] ss:$8 sps:$4 sm:$0xff]  }
   0x4   :  { %441 = vmatpush1.bf16.msra.mxu1 %v1619_v4  ;;  %383 = vmatprep.subr.bf16.mxu0 %v1620_v5  ;;  %v1625_v8 = vld [vmem:[%s2415_s1 + $0x260] ss:$8 sps:$4 sm:$0xff]   ;;  %v1628_v10 = vld [vmem:[%s2415_s1 + $0x254] ss:$8 sps:$4 sm:$0xff]   ;;  %v1631_v12 = vld [vmem:[%s2415_s1 + $0x250] ss:$8 sps:$4 sm:$0xff]  }
   0x5   :  { %442 = vmatprep.subr.bf16.mxu1 %v1622_v6  ;;  %v1632_v13 = vld [vmem:[%s2415_s1 + $0x184] ss:$8 sps:$4 sm:$0xff]   ;;  %v1636_v15 = vld [vmem:[%s2415_s1 + $0x180] ss:$8 sps:$4 sm:$0xff]   ;;  %v1638_v17 = vld [vmem:[%s2415_s1 + $0x174] ss:$8 sps:$4 sm:$0xff]  }
   0x6   :  { %v1634_v14 = vld [vmem:[%s2415_s1 + $0x244] ss:$8 sps:$4 sm:$0xff]   ;;  %v1637_v16 = vld [vmem:[%s2415_s1 + $0x240] ss:$8 sps:$4 sm:$0xff]   ;;  %v1642_v18 = vld [vmem:[%s2415_s1 + $0x74] ss:$8 sps:$4 sm:$0xff]  }
   0x7   :  { %384 = vmatpush1.bf16.msra.mxu0 %v1624_v7  ;;  %v15_v19 = vld [vmem:[%s2416_s0 + $0x8] sm:$0xf]  ;;  %v1890_v20 = vld [vmem:[%s2416_s0 + $0x14] sm:$0xf]  ;;  %v1643_v23 = vld [vmem:[%s2415_s1 + $0x170] ss:$8 sps:$4 sm:$0xff]  }
   0x8   :  { %443 = vmatpush1.bf16.msra.mxu1 %v1625_v8  ;;  %385 = vmatprep.subr.bf16.mxu0 %v1626_v9  ;;  %v1893_v21 = vcombine.low %v15_v19, %v1890_v20  ;;  %v1898_v22 = vld [vmem:[%s2416_s0 + $0x20] ss:$0 sps:$4 sm:$0x33]   ;;  %v1646_v27 = vld [vmem:[%s2415_s1 + $0x164] ss:$8 sps:$4 sm:$0xff]  }
   0x9   :  { %444 = vmatprep.subr.bf16.mxu1 %v1628_v10  ;;  %v157_v26 = vshll.u32 %v1898_v22, 16  ;;  %v1640_v30 = vld [vmem:[%s2415_s1 + $0x70] ss:$8 sps:$4 sm:$0xff]   ;;  %v1650_v31 = vld [vmem:[%s2415_s1 + $0x64] ss:$8 sps:$4 sm:$0xff]   ;;  %v167_v37 = vshrl.u32 %v1898_v22, 16 }
   0xa   :  { %v150_v24 = vshrl.u32 %v1893_v21, 16  ;;  %v152_v25 = vshll.u32 %v1893_v21, 16  ;;  %v1651_v33 = vld [vmem:[%s2415_s1 + $0x160] ss:$8 sps:$4 sm:$0xff]   ;;  %v1652_v34 = vld [vmem:[%s2415_s1 + $0x154] ss:$8 sps:$4 sm:$0xff]  }
   0xb   :  { %386 = vmatpush1.bf16.msra.mxu0 %v1630_v11  ;;  %v159_v29 = vrot.slane %v157_v26, 1  ;;  %v1648_v36 = vld [vmem:[%s2415_s1 + $0x60] ss:$8 sps:$4 sm:$0xff]   ;;  %v1657_v38 = vld [vmem:[%s2415_s1 + $0x150] ss:$8 sps:$4 sm:$0xff]  }
   0xc   :  { %445 = vmatpush1.bf16.msra.mxu1 %v1631_v12  ;;  %387 = vmatprep.subr.bf16.mxu0 %v1632_v13  ;;  %v154_v28 = vrot.slane %v152_v25, 1  ;;  %v1656_v39 = vld [vmem:[%s2415_s1 + $0x54] ss:$8 sps:$4 sm:$0xff]   ;;  %v1658_v40 = vld [vmem:[%s2415_s1 + $0x144] ss:$8 sps:$4 sm:$0xff]  }
   0xd   :  { %446 = vmatprep.subr.bf16.mxu1 %v1634_v14  ;;  %v1654_v41 = vld [vmem:[%s2415_s1 + $0x50] ss:$8 sps:$4 sm:$0xff]   ;;  %v1662_v42 = vld [vmem:[%s2415_s1 + $0x44] ss:$8 sps:$4 sm:$0xff]   ;;  %v169_v43 = vor.u32 %v167_v37, %v159_v29  ;;  %v1663_v44 = vld [vmem:[%s2415_s1 + $0x140] ss:$8 sps:$4 sm:$0xff]  }
   0xe   :  { %v155_v32 = vor.u32 %v154_v28, %v150_v24  ;;  %v1664_v45 = vld [vmem:[%s2415_s1 + $0x234] ss:$8 sps:$4 sm:$0xff]   ;;  %v1660_v46 = vld [vmem:[%s2415_s1 + $0x40] ss:$8 sps:$4 sm:$0xff]   ;;  %v1669_v47 = vld [vmem:[%s2415_s1 + $0x230] ss:$8 sps:$4 sm:$0xff]  }
   0xf   :  { %388 = vmatpush1.bf16.msra.mxu0 %v1636_v15  ;;  %v1668_v48 = vld [vmem:[%s2415_s1 + $0x34] ss:$8 sps:$4 sm:$0xff]   ;;  %v1670_v49 = vld [vmem:[%s2415_s1 + $0x224] ss:$8 sps:$4 sm:$0xff]   ;;  %v1666_v50 = vld [vmem:[%s2415_s1 + $0x30] ss:$8 sps:$4 sm:$0xff]  }
  0x10   :  { %447 = vmatpush1.bf16.msra.mxu1 %v1637_v16  ;;  %389 = vmatprep.subr.bf16.mxu0 %v1638_v17  ;;  %v160_v35 = vsel %vm124_vm0, %v155_v32, %v159_v29  ;;  %v1674_v51 = vld [vmem:[%s2415_s1 + $0x24] ss:$8 sps:$4 sm:$0xff]   ;;  %v1675_v52 = vld [vmem:[%s2415_s1 + $0x220] ss:$8 sps:$4 sm:$0xff]   ;;  %v1676_v53 = vld [vmem:[%s2415_s1 + $0x214] ss:$8 sps:$4 sm:$0xff]  }
  0x11   :  { %700 = vmatprep.subr.bf16.mxu1 %v1642_v18  ;;  %v1672_v54 = vld [vmem:[%s2415_s1 + $0x20] ss:$8 sps:$4 sm:$0xff]   ;;  %v1681_v55 = vld [vmem:[%s2415_s1 + $0x210] ss:$8 sps:$4 sm:$0xff]   ;;  %v1680_v56 = vld [vmem:[%s2415_s1 + $0x14] ss:$8 sps:$4 sm:$0xff]  }
  0x12   :  { %v1682_v57 = vld [vmem:[%s2415_s1 + $0x204] ss:$8 sps:$4 sm:$0xff]   ;;  %v1678_v58 = vld [vmem:[%s2415_s1 + $0x10] ss:$8 sps:$4 sm:$0xff]   ;;  %v1687_v60 = vld [vmem:[%s2415_s1 + $0x200] ss:$8 sps:$4 sm:$0xff]  }
  0x13   :  { %390 = vmatpush1.bf16.msra.mxu0 %v1643_v23  ;;  %1463 = vmatmul.mubr.msk.bf16.vlgmr.msra.gmra.mxu1 %vm374_vm1, %v160_v35  ;;  %v1686_v59 = vld [vmem:[%s2415_s1 + $0x4] ss:$8 sps:$4 sm:$0xff]   ;;  %v1688_v61 = vld [vmem:[%s2415_s1 + $0x1f4] ss:$8 sps:$4 sm:$0xff]   ;;  %v1684_v4 = vld [vmem:[%s2415_s1] ss:$8 sps:$4 sm:$0xff]  }
  0x14   :  { %391 = vmatprep.subr.bf16.mxu0 %v1646_v27  ;;  %701 = vmatpush1.bf16.msra.mxu1 %v1640_v30  ;;  %v14_v62 = vld [vmem:[%s2416_s0] sm:$0xff]  ;;  %v2004_v63 = vld [vmem:[%s2416_s0 + $0xc] sm:$0xff]  ;;  %v60_v0 = vld [vmem:[%s2416_s0 + $0x18] sm:$0x33]  ;;  %1204 = vst [vmem:[%s2417_s2 + $0x10] sm:$0x22] %v1806_v1 }
  0x15   :  { %702 = vmatprep.subr.bf16.mxu1 %v1650_v31  ;;  %474 = vmatprep.mubr.bf16.mxu1 %v1806_v1  ;;  %v1418_v2 = vcombine.high %v14_v62, %v2004_v63  ;;  %v2010_v3 = vcombine.high %v60_v0, %v60_v0  ;;  %v1692_v7 = vld [vmem:[%s2415_s1 + $0xf4] ss:$8 sps:$4 sm:$0xff]   ;;  %v1693_v8 = vld [vmem:[%s2415_s1 + $0x1f0] ss:$8 sps:$4 sm:$0xff]   ;;  %v2023_v10 = vcombine.low %v14_v62, %v2004_v63  ;;  %v1694_v11 = vld [vmem:[%s2415_s1 + $0x1e4] ss:$8 sps:$4 sm:$0xff]  }
  0x16   :  { %v1690_v15 = vld [vmem:[%s2415_s1 + $0xf0] ss:$8 sps:$4 sm:$0xff]   ;;  %v1699_v16 = vld [vmem:[%s2415_s1 + $0x1e0] ss:$8 sps:$4 sm:$0xff]   ;;  %v2034_v17 = vcombine.low %v60_v0, %v60_v0  ;;  %v1698_v19 = vld [vmem:[%s2415_s1 + $0xe4] ss:$8 sps:$4 sm:$0xff]  }
  0x17   :  { %392 = vmatpush1.bf16.msra.mxu0 %v1651_v33  ;;  %v138_v5 = vshrl.u32 %v1418_v2, 16  ;;  %v140_v6 = vshll.u32 %v1418_v2, 16  ;;  %v145_v9 = vshll.u32 %v2010_v3, 16  ;;  %v128_v18 = vshll.u32 %v2023_v10, 16  ;;  %v1700_v23 = vld [vmem:[%s2415_s1 + $0x1d4] ss:$8 sps:$4 sm:$0xff]  }
  0x18   :  { %393 = vmatprep.subr.bf16.mxu0 %v1652_v34  ;;  %703 = vmatpush1.bf16.msra.mxu1 %v1648_v36  ;;  %v1696_v25 = vld [vmem:[%s2415_s1 + $0xe0] ss:$8 sps:$4 sm:$0xff]   ;;  %v1705_v26 = vld [vmem:[%s2415_s1 + $0x1d0] ss:$8 sps:$4 sm:$0xff]   ;;  %v126_v27 = vshrl.u32 %v2023_v10, 16  ;;  %v133_v29 = vshll.u32 %v2034_v17, 16 }
  0x19   :  { %704 = vmatprep.subr.bf16.mxu1 %v1656_v39  ;;  %v142_v12 = vrot.slane %v140_v6, 1  ;;  %v147_v13 = vrot.slane %v145_v9, 1  ;;  %v130_v28 = vrot.slane %v128_v18, 1  ;;  %v1704_v30 = vld [vmem:[%s2415_s1 + $0xd4] ss:$8 sps:$4 sm:$0xff]  }
  0x1a   :  { %v1706_v31 = vld [vmem:[%s2415_s1 + $0x1c4] ss:$8 sps:$4 sm:$0xff]   ;;  %v1702_v32 = vld [vmem:[%s2415_s1 + $0xd0] ss:$8 sps:$4 sm:$0xff]   ;;  %v1711_v33 = vld [vmem:[%s2415_s1 + $0x1c0] ss:$8 sps:$4 sm:$0xff]  }
  0x1b   :  { %394 = vmatpush1.bf16.msra.mxu0 %v1657_v38  ;;  %1464 = vmatmul.mubr.msk.bf16.gmra.mxu1 %vm374_vm1, %v169_v43  ;;  %v143_v14 = vor.u32 %v142_v12, %v138_v5  ;;  %v131_v34 = vor.u32 %v130_v28, %v126_v27  ;;  %v135_v35 = vrot.slane %v133_v29, 1  ;;  %v1710_v36 = vld [vmem:[%s2415_s1 + $0xc4] ss:$8 sps:$4 sm:$0xff]   ;;  %v1721_v37 = vld [vmem:[%s2415_s1 + $0x2f4] ss:$8 sps:$4 sm:$0xff]   ;;  %v164_v38 = vshrl.u32 %v2010_v3, 16 }
  0x1c   :  { %395 = vmatprep.subr.bf16.mxu0 %v1658_v40  ;;  %705 = vmatpush1.bf16.msra.mxu1 %v1654_v41  ;;  %v1708_v39 = vld [vmem:[%s2415_s1 + $0xc0] ss:$8 sps:$4 sm:$0xff]   ;;  %v1718_v41 = vld [vmem:[%s2415_s1 + $0xb4] ss:$8 sps:$4 sm:$0xff]   ;;  %v1727_v43 = vld [vmem:[%s2415_s1 + $0x2e4] ss:$8 sps:$4 sm:$0xff]  }
  0x1d   :  { %706 = vmatprep.subr.bf16.mxu1 %v1662_v42  ;;  %732 = vmatprep.mubr.bf16.mxu1 %v1418_v2  ;;  %v148_v24 = vsel %vm124_vm0, %v143_v14, %v147_v13  ;;  %v136_v40 = vsel %vm124_vm0, %v131_v34, %v135_v35  ;;  %v1719_v42 = vld [vmem:[%s2415_s1 + $0x2f0] ss:$8 sps:$4 sm:$0xff]   ;;  %v1751_v62 = vld [vmem:[%s2415_s1 + $0x2a4] ss:$8 sps:$4 sm:$0xff]   ;;  %v858_v2 = vrot.slane %v2010_v3, 1  ;;  %v855_v12 = vrot.slane %v2034_v17, 1 }
  0x1e   :  { %413 = vmatprep.mubr.bf16.mxu0 %v148_v24  ;;  %v18_v0 = vld [vmem:[%s2416_s0 + $0x18] sm:$0x11]  ;;  %v1749_v5 = vld [vmem:[%s2415_s1 + $0x2a0] ss:$8 sps:$4 sm:$0xff]   ;;  %v1762_v27 = vld [vmem:[%s2415_s1 + $0x104] ss:$8 sps:$4 sm:$0xff]  }
  0x1f   :  { %396 = vmatpush1.bf16.msra.mxu0 %v1663_v44  ;;  %v166_v44 = vor.u32 %v164_v38, %v147_v13  ;;  %v802_v6 = vld [vmem:[%s2416_s0] sm:$0xee]  ;;  %v1759_v13 = vld [vmem:[%s2415_s1 + $0x294] ss:$8 sps:$4 sm:$0xff]   ;;  %v1465_v24 = vcombine.low %v18_v0, %v18_v0 }
  0x20   :  { %397 = vmatprep.subr.bf16.mxu0 %v1664_v45  ;;  %707 = vmatpush1.bf16.msra.mxu1 %v1660_v46  ;;  %v1716_v45 = vld [vmem:[%s2415_s1 + $0xb0] ss:$8 sps:$4 sm:$0xff]   ;;  %v161_v46 = vshrl.u32 %v2034_v17, 16  ;;  %v1550_v9 = vcombine.low %v802_v6, %v2004_v63  ;;  %v1756_v18 = vld [vmem:[%s2415_s1 + $0x114] ss:$8 sps:$4 sm:$0xff]  }
  0x21   :  { %708 = vmatprep.subr.bf16.mxu1 %v1668_v48  ;;  %v1725_v48 = vld [vmem:[%s2415_s1 + $0x2e0] ss:$8 sps:$4 sm:$0xff]   ;;  %v1768_v28 = vld [vmem:[%s2415_s1 + $0x374] ss:$8 sps:$4 sm:$0xff]   ;;  %v1781_v38 = vld [vmem:[%s2415_s1 + $0x344] ss:$8 sps:$4 sm:$0xff]  }
  0x22   :  { %v854_v14 = vrot.slane %v1550_v9, 1  ;;  %v1760_v29 = vld [vmem:[%s2415_s1 + $0x100] ss:$8 sps:$4 sm:$0xff]   ;;  %v1775_v34 = vld [vmem:[%s2415_s1 + $0x354] ss:$8 sps:$4 sm:$0xff]  }
  0x23   :  { %398 = vmatpush2.bf16.msra.mxu0 %v1669_v47  ;;  %v1724_v47 = vld [vmem:[%s2415_s1 + $0xa4] ss:$8 sps:$4 sm:$0xff]  }
  0x24   :  { %399 = vmatprep.subr.bf16.mxu0 %v1670_v49  ;;  %709 = vmatpush1.bf16.msra.mxu1 %v1666_v50  ;;  %v1733_v49 = vld [vmem:[%s2415_s1 + $0x2d4] ss:$8 sps:$4 sm:$0xff]   ;;  %v1722_v50 = vld [vmem:[%s2415_s1 + $0xa0] ss:$8 sps:$4 sm:$0xff]  }
  0x25   :  { %710 = vmatprep.subr.bf16.mxu1 %v1674_v51  ;;  %v163_v51 = vor.u32 %v161_v46, %v135_v35  ;;  %v1776_v35 = vld [vmem:[%s2415_s1 + $0x3b0] ss:$8 sps:$4 sm:$0xff]   ;;  %v1796_v46 = vld [vmem:[%s2415_s1 + $0x384] ss:$8 sps:$4 sm:$0xff]  }
  0x27   :  { %400 = vmatpush2.bf16.msra.mxu0 %v1675_v52  ;;  %v1731_v52 = vld [vmem:[%s2415_s1 + $0x2d0] ss:$8 sps:$4 sm:$0xff]  }
  0x28   :  { %401 = vmatprep.subr.bf16.mxu0 %v1676_v53  ;;  %711 = vmatpush1.bf16.msra.mxu1 %v1672_v54  ;;  %v1730_v53 = vld [vmem:[%s2415_s1 + $0x94] ss:$8 sps:$4 sm:$0xff]   ;;  %v1739_v54 = vld [vmem:[%s2415_s1 + $0x2c4] ss:$8 sps:$4 sm:$0xff]  }
  0x29   :  { %712 = vmatprep.subr.bf16.mxu1 %v1680_v56  ;;  %v1737_v56 = vld [vmem:[%s2415_s1 + $0x2c0] ss:$8 sps:$4 sm:$0xff]  }
  0x2b   :  { %402 = vmatpush2.bf16.msra.mxu0 %v1681_v55  ;;  %v1728_v55 = vld [vmem:[%s2415_s1 + $0x90] ss:$8 sps:$4 sm:$0xff]  }
  0x2c   :  { %403 = vmatprep.subr.bf16.mxu0 %v1682_v57  ;;  %713 = vmatpush1.bf16.msra.mxu1 %v1678_v58  ;;  %v1736_v57 = vld [vmem:[%s2415_s1 + $0x84] ss:$8 sps:$4 sm:$0xff]   ;;  %v1745_v58 = vld [vmem:[%s2415_s1 + $0x2b4] ss:$8 sps:$4 sm:$0xff]  }
  0x2d   :  { %714 = vmatprep.subr.bf16.mxu1 %v1686_v59  ;;  %v1734_v59 = vld [vmem:[%s2415_s1 + $0x80] ss:$8 sps:$4 sm:$0xff]  }
  0x2f   :  { %404 = vmatpush2.bf16.msra.mxu0 %v1687_v60  ;;  %v1743_v60 = vld [vmem:[%s2415_s1 + $0x2b0] ss:$8 sps:$4 sm:$0xff]  }
  0x30   :  { %405 = vmatprep.subr.bf16.mxu0 %v1688_v61  ;;  %715 = vmatpush1.bf16.msra.mxu1 %v1684_v4  ;;  %v1742_v61 = vld [vmem:[%s2415_s1 + $0x134] ss:$8 sps:$4 sm:$0xff]   ;;  %v1740_v4 = vld [vmem:[%s2415_s1 + $0x130] ss:$8 sps:$4 sm:$0xff]  }
  0x31   :  { %716 = vmatprep.subr.bf16.mxu1 %v1692_v7  ;;  %v1748_v7 = vld [vmem:[%s2415_s1 + $0x124] ss:$8 sps:$4 sm:$0xff]  }
  0x33   :  { %406 = vmatpush2.bf16.msra.mxu0 %v1693_v8  ;;  %v1466_v8 = vcombine.high %v18_v0, %v18_v0 }
  0x34   :  { %407 = vmatprep.subr.bf16.mxu0 %v1694_v11  ;;  %717 = vmatpush2.bf16.msra.mxu1 %v1690_v15  ;;  %v1551_v11 = vcombine.high %v802_v6, %v2004_v63  ;;  %v1757_v63 = vld [vmem:[%s2415_s1 + $0x290] ss:$8 sps:$4 sm:$0xff]  }
  0x35   :  { %718 = vmatprep.subr.bf16.mxu1 %v1698_v19 }
  0x36   :  { %v857_v15 = vrot.slane %v1551_v11, 1 }
  0x37   :  { %408 = vmatpush2.bf16.msra.mxu0 %v1699_v16  ;;  %v1746_v16 = vld [vmem:[%s2415_s1 + $0x120] ss:$8 sps:$4 sm:$0xff]  }
  0x38   :  { %409 = vmatprep.subr.bf16.mxu0 %v1700_v23  ;;  %719 = vmatpush2.bf16.msra.mxu1 %v1696_v25  ;;  %v859_v19 = vsel %vm853_vm2, %v857_v15, %v858_v2  ;;  %v2174_v23 = vsel %vm853_vm2, %v854_v14, %v855_v12  ;;  %v1754_v25 = vld [vmem:[%s2415_s1 + $0x110] ss:$8 sps:$4 sm:$0xff]  }
  0x39   :  { %720 = vmatprep.subr.bf16.mxu1 %v1704_v30  ;;  %v1766_v30 = vld [vmem:[%s2415_s1 + $0x370] ss:$8 sps:$4 sm:$0xff]  }
  0x3b   :  { %410 = vmatpush2.bf16.msra.mxu0 %v1705_v26  ;;  %v1763_v26 = vld [vmem:[%s2415_s1 + $0x280] ss:$8 sps:$4 sm:$0xff]  }
  0x3c   :  { %411 = vmatprep.subr.bf16.mxu0 %v1706_v31  ;;  %721 = vmatpush2.bf16.msra.mxu1 %v1702_v32  ;;  %v1771_v31 = vld [vmem:[%s2415_s1 + $0x364] ss:$8 sps:$4 sm:$0xff]   ;;  %v1778_v32 = vld [vmem:[%s2415_s1 + $0x3b4] ss:$8 sps:$4 sm:$0xff]  }
  0x3d   :  { %722 = vmatprep.subr.bf16.mxu1 %v1710_v36  ;;  %v1784_v36 = vld [vmem:[%s2415_s1 + $0x3a4] ss:$8 sps:$4 sm:$0xff]  }
  0x3f   :  { %412 = vmatpush2.bf16.msra.mxu0 %v1711_v33  ;;  %v1769_v33 = vld [vmem:[%s2415_s1 + $0x360] ss:$8 sps:$4 sm:$0xff]  }
  0x40   :  { %1073 = vmatprep.subr.bf16.mxu0 %v1721_v37  ;;  %723 = vmatpush2.bf16.msra.mxu1 %v1708_v39  ;;  %v1773_v37 = vld [vmem:[%s2415_s1 + $0x350] ss:$8 sps:$4 sm:$0xff]   ;;  %v1782_v39 = vld [vmem:[%s2415_s1 + $0x3a0] ss:$8 sps:$4 sm:$0xff]  }
  0x41   :  { %724 = vmatprep.subr.bf16.mxu1 %v1718_v41  ;;  %v1772_v41 = vld [vmem:[%s2416_s0 + $0x20] ss:$0 sps:$4 sm:$0x11]  }
  0x42   :  { %414 = vmatmul.mubr.bf16.vlgmr.msra.gmra.mxu0 %v136_v40  ;;  %v803_v40 = vld [vmem:[%s2416_s0 + $0x8] sm:$0xe] }
  0x43   :  { %1074 = vmatpush1.bf16.msra.mxu0 %v1719_v42  ;;  %423 = vmatprep.mubr.bf16.mxu0 %v166_v44  ;;  %v1779_v42 = vld [vmem:[%s2415_s1 + $0x340] ss:$8 sps:$4 sm:$0xff]   ;;  %v1788_v44 = vld [vmem:[%s2415_s1 + $0x390] ss:$8 sps:$4 sm:$0xff]  }
  0x44   :  { %1075 = vmatprep.subr.bf16.mxu0 %v1727_v43  ;;  %725 = vmatpush2.bf16.msra.mxu1 %v1716_v45  ;;  %v1787_v43 = vld [vmem:[%s2415_s1 + $0x334] ss:$8 sps:$4 sm:$0xff]   ;;  %v1552_v45 = vcombine.low %v803_v40, %v1890_v20  ;;  %v1793_v20 = vld [vmem:[%s2415_s1 + $0x324] ss:$8 sps:$4 sm:$0xff]  }
  0x45   :  { %726 = vmatprep.subr.bf16.mxu1 %v1724_v47  ;;  %v1785_v47 = vld [vmem:[%s2415_s1 + $0x330] ss:$8 sps:$4 sm:$0xff]  }
  0x47   :  { %1076 = vmatpush1.bf16.msra.mxu0 %v1725_v48  ;;  %v1794_v48 = vld [vmem:[%s2415_s1 + $0x380] ss:$8 sps:$4 sm:$0xff]  }
  0x48   :  { %1077 = vmatprep.subr.bf16.mxu0 %v1733_v49  ;;  %727 = vmatpush2.bf16.msra.mxu1 %v1722_v50  ;;  %v860_v49 = vrot.slane %v1552_v45, 1  ;;  %v861_v50 = vrot.slane %v1898_v22, 1  ;;  %v1803_v22 = vld [vmem:[%s2415_s1 + $0x304] ss:$8 sps:$4 sm:$0xff]  }
  0x49   :  { %728 = vmatprep.subr.bf16.mxu1 %v1730_v53 }
  0x4a   :  { %424 = vmatmul.mubr.bf16.gmra.mxu0 %v163_v51  ;;  %v1791_v51 = vld [vmem:[%s2415_s1 + $0x320] ss:$8 sps:$4 sm:$0xff]   ;;  %v862_v53 = vsel %vm853_vm2, %v860_v49, %v861_v50 }
  0x4b   :  { %1078 = vmatpush1.bf16.msra.mxu0 %v1731_v52  ;;  %1105 = vmatprep.mubr.bf16.mxu0 %v859_v19  ;;  %v1799_v52 = vld [vmem:[%s2415_s1 + $0x314] ss:$8 sps:$4 sm:$0xff]  }
  0x4c   :  { %1079 = vmatprep.subr.bf16.mxu0 %v1739_v54  ;;  %729 = vmatpush2.bf16.msra.mxu1 %v1728_v55  ;;  %v1797_v54 = vld [vmem:[%s2415_s1 + $0x310] ss:$8 sps:$4 sm:$0xff]   ;;  %v1801_v55 = vld [vmem:[%s2415_s1 + $0x300] ss:$8 sps:$4 sm:$0xff]  }
  0x4d   :  { %730 = vmatprep.subr.bf16.mxu1 %v1736_v57 }
  0x4f   :  { %1080 = vmatpush1.bf16.msra.mxu0 %v1737_v56 }
  0x50   :  { %1081 = vmatprep.subr.bf16.mxu0 %v1745_v58  ;;  %731 = vmatpush2.bf16.msra.mxu1 %v1734_v59 }
  0x51   :  { %759 = vmatprep.subr.bf16.mxu1 %v1742_v61 }
  0x53   :  { %1082 = vmatpush1.bf16.msra.mxu0 %v1743_v60  ;;  %733 = vmatmul.mubr.bf16.vlgmr.msra.gmra.mxu1 %v2023_v10  ;;  %v1765_v10 = vld [vmem:[%s2415_s1 + $0x284] ss:$8 sps:$4 sm:$0xff]  }
  0x54   :  { %1083 = vmatprep.subr.bf16.mxu0 %v1751_v62  ;;  %760 = vmatpush1.bf16.msra.mxu1 %v1740_v4 }
  0x55   :  { %761 = vmatprep.subr.bf16.mxu1 %v1748_v7  ;;  %742 = vmatprep.mubr.bf16.mxu1 %v1466_v8 }
  0x57   :  { %1084 = vmatpush1.bf16.msra.mxu0 %v1749_v5 }
  0x58   :  { %1085 = vmatprep.subr.bf16.mxu0 %v1759_v13  ;;  %762 = vmatpush1.bf16.msra.mxu1 %v1746_v16 }
  0x59   :  { %763 = vmatprep.subr.bf16.mxu1 %v1756_v18 }
  0x5b   :  { %1086 = vmatpush1.bf16.msra.mxu0 %v1757_v63  ;;  %743 = vmatmul.mubr.bf16.gmra.mxu1 %v1465_v24 }
  0x5c   :  { %1087 = vmatprep.subr.bf16.mxu0 %v1765_v10  ;;  %764 = vmatpush1.bf16.msra.mxu1 %v1754_v25 }
  0x5d   :  { %765 = vmatprep.subr.bf16.mxu1 %v1762_v27  ;;  %783 = vmatprep.mubr.bf16.mxu1 %v1806_v1 }
  0x5f   :  { %1088 = vmatpush1.bf16.msra.mxu0 %v1763_v26 }
  0x60   :  { %1089 = vmatprep.subr.bf16.mxu0 %v1768_v28  ;;  %766 = vmatpush1.bf16.msra.mxu1 %v1760_v29 }
  0x61   :  { %1132 = vmatprep.subr.bf16.mxu1 %v1778_v32 }
  0x63   :  { %1090 = vmatpush2.bf16.msra.mxu0 %v1766_v30  ;;  %1508 = vmatmul.mubr.msk.bf16.vlgmr.msra.gmra.mxu1 %vm374_vm1, %v1893_v21  ;;  %v1790_v21 = vld [vmem:[%s2415_s1 + $0x394] ss:$8 sps:$4 sm:$0xff]  }
  0x64   :  { %1091 = vmatprep.subr.bf16.mxu0 %v1771_v31  ;;  %793 = vmatprep.mubr.bf16.mxu1 %v1806_v1 }
  0x65   :  { %1133 = vmatpush1.bf16.msra.mxu1 %v1776_v35 }
  0x66   :  { %1134 = vmatprep.subr.bf16.mxu1 %v1784_v36 }
  0x67   :  { %1092 = vmatpush2.bf16.msra.mxu0 %v1769_v33 }
  0x68   :  { %1093 = vmatprep.subr.bf16.mxu0 %v1775_v34 }
  0x69   :  { %1135 = vmatpush1.bf16.msra.mxu1 %v1782_v39 }
  0x6a   :  { %1136 = vmatprep.subr.bf16.mxu1 %v1790_v21 }
  0x6b   :  { %1094 = vmatpush2.bf16.msra.mxu0 %v1773_v37  ;;  %1509 = vmatmul.mubr.msk.bf16.gmra.mxu1 %vm374_vm1, %v1772_v41 }
  0x6c   :  { %1095 = vmatprep.subr.bf16.mxu0 %v1781_v38  ;;  %1156 = vmatprep.mubr.bf16.mxu1 %v1806_v1 }
  0x6d   :  { %1137 = vmatpush1.bf16.msra.mxu1 %v1788_v44 }
  0x6e   :  { %1138 = vmatprep.subr.bf16.mxu1 %v1796_v46 }
  0x6f   :  { %1096 = vmatpush2.bf16.msra.mxu0 %v1779_v42 }
  0x70   :  { %1097 = vmatprep.subr.bf16.mxu0 %v1787_v43 }
  0x71   :  { %1139 = vmatpush1.bf16.msra.mxu1 %v1794_v48 }
  0x73   :  { %1098 = vmatpush2.bf16.msra.mxu0 %v1785_v47 }
  0x74   :  { %1099 = vmatprep.subr.bf16.mxu0 %v1793_v20  ;;  %1593 = vmatmul.mubr.msk.bf16.vlgmr.msra.gmra.mxu1 %vm374_vm1, %v862_v53 }
  0x75   :  { %1166 = vmatprep.mubr.bf16.mxu1 %v1806_v1 }
  0x77   :  { %1100 = vmatpush2.bf16.msra.mxu0 %v1791_v51 }
  0x78   :  { %1101 = vmatprep.subr.bf16.mxu0 %v1799_v52 }
  0x7b   :  { %1102 = vmatpush2.bf16.msra.mxu0 %v1797_v54 }
  0x7c   :  { %1103 = vmatprep.subr.bf16.mxu0 %v1803_v22  ;;  %1594 = vmatmul.mubr.msk.bf16.gmra.mxu1 %vm374_vm1, %v861_v50  ;;  %vm1284_vm1 = vcmask 1041408  }
  0x7f   :  { %1104 = vmatpush2.bf16.msra.mxu0 %v1801_v55 }
  0x82   :  { %1106 = vmatmul.mubr.bf16.vlgmr.msra.gmra.mxu0 %v2174_v23 }
  0x83   :  { %1115 = vmatprep.mubr.bf16.mxu0 %v858_v2 }
  0x8a   :  { %1116 = vmatmul.mubr.bf16.gmra.mxu0 %v855_v12  ;;  %v1205_v12 = vlaneseq }
  0x8c   :  { %v2316_v15 = vshrl.u32 %v1205_v12, 7  ;;  %vm1322_vm2 = vcmp.lt.s32.totalorder %v1205_v12, 256 }
  0x8e   :  { %v2321_v18 = vmul.u32.u64.low 3435973837, %v2316_v15  ;;  %v2322_v10 = vmul.u32.u64.high 3435973837, %v2316_v15, %v2321_v18  ;;  %v1207_v19 = vadd.s32 8, %v2316_v15  ;;  %v2326_v23 = vadd.s32 16, %v2316_v15 }
  0x8f   :  { %v1807_v18 = vmov 0.0  }
  0x90   :  { %v2328_v26 = vmul.u32.u64.low 3435973837, %v1207_v19  ;;  %v2329_v27 = vmul.u32.u64.high 3435973837, %v1207_v19, %v2328_v26  ;;  %v2332_v28 = vmul.u32.u64.low 3435973837, %v2326_v23  ;;  %v2333_v29 = vmul.u32.u64.high 3435973837, %v2326_v23, %v2332_v28 }
  0x91   :  { %v1215_v32 = vshrl.u32 %v2322_v10, 3  ;;  %vm1267_vm15 = vcmp.lt.s32.totalorder %v2326_v23, 20 }
  0x92   :  { %v1226_v36 = vshrl.u32 %v2329_v27, 3  ;;  %v1237_v37 = vshrl.u32 %v2333_v29, 3 }
  0x93   :  { %v1216_v35 = vmul.u32 10, %v1215_v32 }
  0x94   :  { %v1227_v40 = vmul.u32 10, %v1226_v36  ;;  %v1238_v41 = vmul.u32 10, %v1237_v37 }
  0x95   :  { %v1217_v21 = vsub.s32 %v2316_v15, %v1216_v35 }
  0x96   :  { %v1228_v43 = vsub.s32 %v1207_v19, %v1227_v40  ;;  %v1239_v45 = vsub.s32 %v2326_v23, %v1238_v41 }
  0x97   :  { %vm1242_vm3 = vcmp.ne.s32.totalorder %v1217_v21, 0  ;;  %vm1245_vm4 = vcmp.lt.s32.totalorder %v1217_v21, 0  ;;  %v1251_v46 = vadd.s32 10, %v1217_v21 }
  0x98   :  { %vm1248_vm5 = vmand %vm1245_vm4, %vm1242_vm3  ;;  %vm1243_vm6 = vcmp.ne.s32.totalorder %v1228_v43, 0  ;;  %vm1246_vm7 = vcmp.lt.s32.totalorder %v1228_v43, 0  ;;  %vm1244_vm8 = vcmp.ne.s32.totalorder %v1239_v45, 0  ;;  %vm1247_vm9 = vcmp.lt.s32.totalorder %v1239_v45, 0 }
  0x99   :  { %v1254_v48 = vsel %vm1248_vm5, %v1251_v46, %v1217_v21  ;;  %vm2348_vm10 = vmand %vm1246_vm7, %vm1243_vm6  ;;  %v1252_v51 = vadd.s32 10, %v1228_v43  ;;  %v1253_v52 = vadd.s32 10, %v1239_v45 }
  0x9a   :  { %vm2352_vm11 = vmand %vm1247_vm9, %vm1244_vm8  ;;  %vm1257_vm12 = vcmp.lt.s32.totalorder %v1254_v48, 8 }
  0x9b   :  { %v1598_v10 = vsel %vm1257_vm12, 1.0, %v1807_v18 }
  0xd3   :  { %v2287_v56 = vpop.f32.mrf.mxu1 }
  0xd5   :  { %v2289_v57 = vpop.f32.mrf.mxu1 }
  0xd7   :  { %v2291_v58 = vpop.f32.mrf.mxu1 }
  0xd9   :  { %v2293_v59 = vpop.f32.mrf.mxu1 }
  0xdb   :  { %v2295_v60 = vpop.f32.mrf.mxu1 }
  0xdd   :  { %v2297_v3 = vpop.f32.mrf.mxu1 }
  0xdf   :  { %v480_v61 = vpop.f32.mrf.mxu1 }
  0xe1   :  { %v481_v17 = vpop.f32.mrf.mxu1 }
  0xe2   :  { %v1255_v17 = vsel %vm2348_vm10, %v1252_v51, %v1228_v43 }
  0xe3   :  { %vm2367_vm13 = vcmp.lt.s32.totalorder %v1255_v17, 8 }
 0x102   :  { %v415_v62 = vpop.f32.mrf.mxu0 }
 0x103   :  { %v467_v54 = vadd.f32 %v2287_v56, %v415_v62 }
 0x104   :  { %v417_v0 = vpop.f32.mrf.mxu0 }
 0x105   :  { %v469_v55 = vadd.f32 %v2289_v57, %v417_v0 }
 0x106   :  { %v2299_v2 = vpop.f32.mrf.mxu0 }
 0x107   :  { %v471_v19 = vadd.f32 %v2291_v58, %v2299_v2 }
 0x108   :  { %v2301_v4 = vpop.f32.mrf.mxu0 }
 0x10a   :  { %v2303_v1 = vpop.f32.mrf.mxu0 }
 0x10b   :  { %v477_v57 = vadd.f32 %v2295_v60, %v2303_v1  ;;  %v473_v60 = vadd.f32 %v2293_v59, %v2301_v4 }
 0x10c   :  { %v2305_v5 = vpop.f32.mrf.mxu0 }
 0x10d   :  { %v479_v1 = vadd.f32 %v2297_v3, %v2305_v5 }
 0x10e   :  { %v429_v6 = vpop.f32.mrf.mxu0 }
 0x110   :  { %v430_v7 = vpop.f32.mrf.mxu0 }
 0x111   :  { %v1256_v7 = vsel %vm2352_vm11, %v1253_v52, %v1239_v45 }
 0x112   :  { %vm2371_vm14 = vcmp.lt.s32.totalorder %v1256_v7, 8 }
 0x113   :  { %v734_v8 = vpop.f32.mrf.mxu1  ;;  %vm1270_vm0 = vmand %vm2371_vm14, %vm1267_vm15 }
 0x114   :  { %v735_v61 = vadd.f32 %v734_v8, %v467_v54 }
 0x115   :  { %v2307_v9 = vpop.f32.mrf.mxu1 }
 0x116   :  { %v737_v56 = vadd.f32 %v2307_v9, %v469_v55 }
 0x117   :  { %v2309_v11 = vpop.f32.mrf.mxu1 }
 0x118   :  { %v739_v58 = vadd.f32 %v2309_v11, %v471_v19  ;;  %v1599_v11 = vsel %vm2367_vm13, 1.0, %v1807_v18 }
 0x119   :  { %v2311_v13 = vpop.f32.mrf.mxu1 }
 0x11a   :  { %v741_v37 = vadd.f32 %v2311_v13, %v473_v60 }
 0x11b   :  { %v2313_v14 = vpop.f32.mrf.mxu1 }
 0x11c   :  { %v745_v59 = vadd.f32 %v2313_v14, %v477_v57 }
 0x11d   :  { %v2318_v16 = vpop.f32.mrf.mxu1 }
 0x11e   :  { %v747_v5 = vadd.f32 %v2318_v16, %v479_v1 }
 0x11f   :  { %v748_v63 = vpop.f32.mrf.mxu1 }
 0x121   :  { %v749_v24 = vpop.f32.mrf.mxu1 }
 0x123   :  { %v785_v25 = vpop.f32.mrf.mxu1 }
 0x124   :  { %v786_v62 = vadd.f32 %v785_v25, %v735_v61 }
 0x125   :  { %v787_v30 = vpop.f32.mrf.mxu1 }
 0x126   :  { %v788_v2 = vadd.f32 %v787_v30, %v737_v56 }
 0x127   :  { %v2335_v31 = vpop.f32.mrf.mxu1 }
 0x128   :  { %v790_v32 = vadd.f32 %v2335_v31, %v739_v58  ;;  %v1808_v58 = vmov 1966171168  }
 0x129   :  { %v2338_v33 = vpop.f32.mrf.mxu1 }
 0x12a   :  { %v792_v31 = vadd.f32 %v2338_v33, %v741_v37 }
 0x12b   :  { %v2340_v34 = vpop.f32.mrf.mxu1 }
 0x12c   :  { %v796_v40 = vadd.f32 %v2340_v34, %v745_v59 }
 0x12d   :  { %v2344_v38 = vpop.f32.mrf.mxu1 }
 0x12e   :  { %v798_v43 = vadd.f32 %v2344_v38, %v747_v5 }
 0x12f   :  { %v799_v39 = vpop.f32.mrf.mxu1 }
 0x131   :  { %v800_v42 = vpop.f32.mrf.mxu1 }
 0x132   :  { %v1600_v42 = vsel %vm1270_vm0, 1.0, %v1807_v18 }
 0x134   :  { %v1158_v44 = vpop.f32.mrf.mxu1 }
 0x136   :  { %v1160_v47 = vpop.f32.mrf.mxu1 }
 0x138   :  { %v1162_v20 = vpop.f32.mrf.mxu1 }
 0x13a   :  { %v1164_v49 = vpop.f32.mrf.mxu1 }
 0x13c   :  { %v1168_v22 = vpop.f32.mrf.mxu1 }
 0x13e   :  { %v1170_v6 = vpop.f32.mrf.mxu1 }
 0x140   :  { %v1172_v26 = vpop.f32.mrf.mxu1 }
 0x142   :  { %v1107_v63 = vpop.f32.mrf.mxu0  ;;  %v1173_v28 = vpop.f32.mrf.mxu1 }
 0x143   :  { %v1159_v24 = vadd.f32 %v1158_v44, %v1107_v63 }
 0x144   :  { %v1109_v0 = vpop.f32.mrf.mxu0 }
 0x145   :  { %v1175_v9 = vadd.f32 %v1159_v24, %v786_v62  ;;  %v1161_v25 = vadd.f32 %v1160_v47, %v1109_v0 }
 0x146   :  { %v1111_v29 = vpop.f32.mrf.mxu0 }
 0x147   :  { %v1176_v35 = vadd.f32 %v1161_v25, %v788_v2  ;;  %v1163_v36 = vadd.f32 %v1162_v20, %v1111_v29  ;;  %v1277_v39 = vmul.f32 %v1598_v10, %v1175_v9  ;;  %v1306_v2 = vunpack.c.l.s4 %v1808_v58 }
 0x148   :  { %v1113_v30 = vpop.f32.mrf.mxu0 }
 0x149   :  { %v1602_v3 = vpack.c.bf16 %v1176_v35, %v1175_v9  ;;  %v1177_v4 = vadd.f32 %v1163_v36, %v790_v32  ;;  %v1165_v21 = vadd.f32 %v1164_v49, %v1113_v30  ;;  %v1325_v14 = vmul.f32 %v1277_v39, %v1175_v9 }
 0x14a   :  { %v1117_v13 = vpop.f32.mrf.mxu0  ;;  %v1278_v44 = vmul.f32 %v1598_v10, %v1176_v35  ;;  %v1307_v36 = vunpack.c.0.s8 %v1306_v2 }
 0x14b   :  { %1201 = vst [vmem:[%s2417_s2] sm:$0xff] %v1602_v3  ;;  %v1279_v23 = vmul.f32 %v1599_v11, %v1177_v4  ;;  %v1169_v41 = vadd.f32 %v1168_v22, %v1117_v13  ;;  %v1178_v45 = vadd.f32 %v1165_v21, %v792_v31 }
 0x14c   :  { %v1119_v46 = vpop.f32.mrf.mxu0  ;;  %v1326_v53 = vmul.f32 %v1278_v44, %v1176_v35  ;;  %v1310_v21 = vsub.s32 %v1307_v36, %v2316_v15 }
 0x14d   :  { %v1283_v16 = vadd.f32 %v1279_v23, %v1277_v39  ;;  %v1327_v47 = vmul.f32 %v1279_v23, %v1177_v4  ;;  %v1179_v33 = vadd.f32 %v1169_v41, %v796_v40  ;;  %v1171_v20 = vadd.f32 %v1170_v6, %v1119_v46 }
 0x14e   :  { %v1603_v48 = vpack.c.bf16 %v1178_v45, %v1177_v4  ;;  %v1280_v49 = vmul.f32 %v1599_v11, %v1178_v45  ;;  %v1121_v34 = vpop.f32.mrf.mxu0 }
 0x14f   :  { %v1331_v50 = vadd.f32 %v1327_v47, %v1325_v14  ;;  %v1281_v51 = vmul.f32 %v1600_v42, %v1179_v33  ;;  %v1180_v52 = vadd.f32 %v1171_v20, %v798_v43 }
 0x150   :  { %1202 = vst [vmem:[%s2417_s2 + $0x8] sm:$0xff] %v1603_v48  ;;  %v1293_v38 = vadd.f32 %v1280_v49, %v1278_v44  ;;  %v1328_v54 = vmul.f32 %v1280_v49, %v1178_v45  ;;  %v1122_v22 = vpop.f32.mrf.mxu0 }
 0x151   :  { %v1285_v55 = vsel %vm1284_vm1, %v1281_v51, 0.0  ;;  %v1329_v61 = vmul.f32 %v1281_v51, %v1179_v33  ;;  %v1604_v17 = vpack.c.bf16 %v1180_v52, %v1179_v33  ;;  %v1282_v6 = vmul.f32 %v1600_v42, %v1180_v52 }
 0x152   :  { %v1340_v7 = vadd.f32 %v1328_v54, %v1326_v53  ;;  %v1286_v63 = vadd.f32 %v1285_v55, %v1283_v16 }
 0x153   :  { %v1332_v18 = vsel %vm1284_vm1, %v1329_v61, 0.0  ;;  %1203 = vst [vmem:[%s2417_s2 + $0x10] sm:$0x11] %v1604_v17  ;;  %v1294_v10 = vsel %vm1284_vm1, %v1282_v6, 0.0  ;;  %v1330_v19 = vmul.f32 %v1282_v6, %v1180_v52 }
 0x154   :  { %v1287_v56 = vrot.slane %v1286_v63, 4  ;;  %v1333_v62 = vadd.f32 %v1332_v18, %v1331_v50  ;;  %v1295_v24 = vadd.f32 %v1294_v10, %v1293_v38 }
 0x155   :  { %v1341_v26 = vsel %vm1284_vm1, %v1330_v19, 0.0 }
 0x156   :  { %v1288_v57 = vadd.f32 %v1287_v56, %v1286_v63  ;;  %v1334_v0 = vrot.slane %v1333_v62, 4  ;;  %v1296_v8 = vrot.slane %v1295_v24, 4  ;;  %v1342_v27 = vadd.f32 %v1341_v26, %v1340_v7 }
 0x158   :  { %v1289_v9 = vrot.slane %v1288_v57, 2  ;;  %v1335_v25 = vadd.f32 %v1334_v0, %v1333_v62  ;;  %v1297_v28 = vadd.f32 %v1296_v8, %v1295_v24  ;;  %v1343_v60 = vrot.slane %v1342_v27, 4 }
 0x15a   :  { %v1290_v1 = vadd.f32 %v1289_v9, %v1288_v57  ;;  %v1336_v29 = vrot.slane %v1335_v25, 2  ;;  %v1298_v32 = vrot.slane %v1297_v28, 2  ;;  %v1344_v35 = vadd.f32 %v1343_v60, %v1342_v27 }
 0x15c   :  { %v1291_v37 = vrot.slane %v1290_v1, 1  ;;  %v1337_v39 = vadd.f32 %v1336_v29, %v1335_v25  ;;  %v1299_v11 = vadd.f32 %v1298_v32, %v1297_v28  ;;  %v1345_v30 = vrot.slane %v1344_v35, 2 }
 0x15e   :  { %v1338_v59 = vrot.slane %v1337_v39, 1  ;;  %v1300_v3 = vrot.slane %v1299_v11, 1  ;;  %v1346_v4 = vadd.f32 %v1345_v30, %v1344_v35  ;;  %v1292_v5 = vadd.f32 %v1291_v37, %v1290_v1 }
 0x160   :  { %v1301_v31 = vadd.f32 %v1300_v3, %v1299_v11  ;;  %v1347_v13 = vrot.slane %v1346_v4, 1  ;;  %v1339_v40 = vadd.f32 %v1338_v59, %v1337_v39 }
 0x162   :  { %v1304_v23 = vcombine.low %v1292_v5, %v1301_v31  ;;  %v1348_v41 = vadd.f32 %v1347_v13, %v1346_v4 }
 0x164   :  { %v1311_v42 = vrot.slane %v1304_v23, %v1310_v21  ;;  %v1351_v43 = vcombine.low %v1339_v40, %v1348_v41 }
 0x166   :  { %v1318_v14 = vrot.slane %v1311_v42, %v1310_v21  ;;  %v1358_v44 = vrot.slane %v1351_v43, %v1310_v21 }
 0x168   :  { %1324 = vst.msk [vmem:[%s2418_s3] ss:$2 sm:$0x3] %vm1322_vm2, %v1318_v14  ;;  %v1365_v45 = vrot.slane %v1358_v44, %v1310_v21 }
 0x16a   :  { %1601 = vst.msk [vmem:[%s2418_s3 + $0x1] ss:$2 sm:$0x3] %vm1322_vm2, %v1365_v45 }

// kernel: image_classify_forward.11
= control target key start
LH: loop header
LB: loop body
LE: loop exit
PB: predicated region body
PF: predicated region fallthrough
CT: control target
= control target key end

     0   :  { %vm1318_vm10 = vcmask 1040384   ;;  %vm1319_vm11 = vsmask.f32 256  ;;  %vm1321_vm12 = vcmask 1044484   ;;  %vm1322_vm13 = vsmask.f32 4352  ;;  %s2603_s1 = inlined_call_operand.vmem [shape: bf16[2,640,256], index: 1, kind: input, shape index: {}]   ;;  %s2604_s0 = inlined_call_operand.vmem [shape: bf16[10,640], index: 0, kind: input, shape index: {}]   ;;  %s2605_s2 = inlined_call_operand.vmem [shape: bf16[10,256], index: 2, kind: output, shape index: {0}]   ;;  %s2606_s3 = inlined_call_operand.vmem [shape: f32[1,2,256], index: 3, kind: output, shape index: {1}]  }
   0x1   :  { %v1736_v0 = vld [vmem:[%s2603_s1 + $0x2f4] ss:$8 sps:$4 sm:$0xff]   ;;  %v1740_v2 = vld [vmem:[%s2603_s1 + $0x2f0] ss:$8 sps:$4 sm:$0xff]   ;;  %v1742_v4 = vld [vmem:[%s2603_s1 + $0x2e4] ss:$8 sps:$4 sm:$0xff]  }
   0x2   :  { %v1738_v1 = vld [vmem:[%s2603_s1 + $0x3f4] ss:$8 sps:$4 sm:$0xff]   ;;  %642 = vmatprep.subr.bf16.mxu0 %v1736_v0  ;;  %v1741_v3 = vld [vmem:[%s2603_s1 + $0x3f0] ss:$8 sps:$4 sm:$0xff]   ;;  %v1744_v5 = vld [vmem:[%s2603_s1 + $0x3e4] ss:$8 sps:$4 sm:$0xff]  }
   0x3   :  { %685 = vmatprep.subr.bf16.mxu1 %v1738_v1  ;;  %643 = vmatpush1.bf16.msra.mxu0 %v1740_v2  ;;  %v1746_v6 = vld [vmem:[%s2603_s1 + $0x2e0] ss:$8 sps:$4 sm:$0xff]   ;;  %v1748_v8 = vld [vmem:[%s2603_s1 + $0x2d4] ss:$8 sps:$4 sm:$0xff]   ;;  %v1752_v10 = vld [vmem:[%s2603_s1 + $0x2d0] ss:$8 sps:$4 sm:$0xff]  }
   0x4   :  { %686 = vmatpush1.bf16.msra.mxu1 %v1741_v3  ;;  %644 = vmatprep.subr.bf16.mxu0 %v1742_v4  ;;  %v1747_v7 = vld [vmem:[%s2603_s1 + $0x3e0] ss:$8 sps:$4 sm:$0xff]   ;;  %v1750_v9 = vld [vmem:[%s2603_s1 + $0x3d4] ss:$8 sps:$4 sm:$0xff]   ;;  %v1753_v11 = vld [vmem:[%s2603_s1 + $0x3d0] ss:$8 sps:$4 sm:$0xff]  }
   0x5   :  { %687 = vmatprep.subr.bf16.mxu1 %v1744_v5  ;;  %v1754_v12 = vld [vmem:[%s2603_s1 + $0x2c4] ss:$8 sps:$4 sm:$0xff]   ;;  %v1758_v14 = vld [vmem:[%s2603_s1 + $0x2c0] ss:$8 sps:$4 sm:$0xff]   ;;  %v1760_v16 = vld [vmem:[%s2603_s1 + $0x2b4] ss:$8 sps:$4 sm:$0xff]  }
   0x6   :  { %v1756_v13 = vld [vmem:[%s2603_s1 + $0x3c4] ss:$8 sps:$4 sm:$0xff]   ;;  %v1759_v15 = vld [vmem:[%s2603_s1 + $0x3c0] ss:$8 sps:$4 sm:$0xff]   ;;  %v1762_v17 = vld [vmem:[%s2603_s1 + $0x3b4] ss:$8 sps:$4 sm:$0xff]  }
   0x7   :  { %645 = vmatpush1.bf16.msra.mxu0 %v1746_v6  ;;  %v1764_v18 = vld [vmem:[%s2603_s1 + $0x2b0] ss:$8 sps:$4 sm:$0xff]   ;;  %v1766_v20 = vld [vmem:[%s2603_s1 + $0x2a4] ss:$8 sps:$4 sm:$0xff]   ;;  %v1770_v22 = vld [vmem:[%s2603_s1 + $0x2a0] ss:$8 sps:$4 sm:$0xff]  }
   0x8   :  { %688 = vmatpush1.bf16.msra.mxu1 %v1747_v7  ;;  %646 = vmatprep.subr.bf16.mxu0 %v1748_v8  ;;  %v1765_v19 = vld [vmem:[%s2603_s1 + $0x3b0] ss:$8 sps:$4 sm:$0xff]   ;;  %v1768_v21 = vld [vmem:[%s2603_s1 + $0x3a4] ss:$8 sps:$4 sm:$0xff]   ;;  %v1771_v23 = vld [vmem:[%s2603_s1 + $0x3a0] ss:$8 sps:$4 sm:$0xff]  }
   0x9   :  { %689 = vmatprep.subr.bf16.mxu1 %v1750_v9  ;;  %v1772_v24 = vld [vmem:[%s2603_s1 + $0x294] ss:$8 sps:$4 sm:$0xff]   ;;  %v1776_v26 = vld [vmem:[%s2603_s1 + $0x290] ss:$8 sps:$4 sm:$0xff]   ;;  %v1778_v28 = vld [vmem:[%s2603_s1 + $0x284] ss:$8 sps:$4 sm:$0xff]  }
   0xa   :  { %v1774_v25 = vld [vmem:[%s2603_s1 + $0x394] ss:$8 sps:$4 sm:$0xff]   ;;  %v1777_v27 = vld [vmem:[%s2603_s1 + $0x390] ss:$8 sps:$4 sm:$0xff]   ;;  %v1780_v29 = vld [vmem:[%s2603_s1 + $0x384] ss:$8 sps:$4 sm:$0xff]  }
   0xb   :  { %647 = vmatpush1.bf16.msra.mxu0 %v1752_v10  ;;  %v1782_v30 = vld [vmem:[%s2603_s1 + $0x280] ss:$8 sps:$4 sm:$0xff]   ;;  %v1784_v32 = vld [vmem:[%s2603_s1 + $0x374] ss:$8 sps:$4 sm:$0xff]   ;;  %v1788_v34 = vld [vmem:[%s2603_s1 + $0x370] ss:$8 sps:$4 sm:$0xff]  }
   0xc   :  { %690 = vmatpush1.bf16.msra.mxu1 %v1753_v11  ;;  %648 = vmatprep.subr.bf16.mxu0 %v1754_v12  ;;  %v1783_v31 = vld [vmem:[%s2603_s1 + $0x380] ss:$8 sps:$4 sm:$0xff]   ;;  %v1786_v33 = vld [vmem:[%s2603_s1 + $0x474] ss:$8 sps:$4 sm:$0xff]   ;;  %v1789_v35 = vld [vmem:[%s2603_s1 + $0x470] ss:$8 sps:$4 sm:$0xff]  }
   0xd   :  { %691 = vmatprep.subr.bf16.mxu1 %v1756_v13  ;;  %v1790_v36 = vld [vmem:[%s2603_s1 + $0x364] ss:$8 sps:$4 sm:$0xff]   ;;  %v1794_v38 = vld [vmem:[%s2603_s1 + $0x360] ss:$8 sps:$4 sm:$0xff]   ;;  %v1796_v40 = vld [vmem:[%s2603_s1 + $0x354] ss:$8 sps:$4 sm:$0xff]  }
   0xe   :  { %v1792_v37 = vld [vmem:[%s2603_s1 + $0x464] ss:$8 sps:$4 sm:$0xff]   ;;  %v1795_v39 = vld [vmem:[%s2603_s1 + $0x460] ss:$8 sps:$4 sm:$0xff]   ;;  %v1798_v41 = vld [vmem:[%s2603_s1 + $0x454] ss:$8 sps:$4 sm:$0xff]  }
   0xf   :  { %649 = vmatpush1.bf16.msra.mxu0 %v1758_v14  ;;  %v1800_v42 = vld [vmem:[%s2603_s1 + $0x350] ss:$8 sps:$4 sm:$0xff]   ;;  %v1802_v44 = vld [vmem:[%s2603_s1 + $0x344] ss:$8 sps:$4 sm:$0xff]   ;;  %v1806_v46 = vld [vmem:[%s2603_s1 + $0x340] ss:$8 sps:$4 sm:$0xff]  }
  0x10   :  { %692 = vmatpush1.bf16.msra.mxu1 %v1759_v15  ;;  %650 = vmatprep.subr.bf16.mxu0 %v1760_v16  ;;  %v1801_v43 = vld [vmem:[%s2603_s1 + $0x450] ss:$8 sps:$4 sm:$0xff]   ;;  %v1804_v45 = vld [vmem:[%s2603_s1 + $0x444] ss:$8 sps:$4 sm:$0xff]   ;;  %v1807_v47 = vld [vmem:[%s2603_s1 + $0x440] ss:$8 sps:$4 sm:$0xff]  }
  0x11   :  { %693 = vmatprep.subr.bf16.mxu1 %v1762_v17  ;;  %v1808_v48 = vld [vmem:[%s2603_s1 + $0x334] ss:$8 sps:$4 sm:$0xff]   ;;  %v2156_v49 = vld [vmem:[%s2604_s0 + $0x4] ss:$20 sps:$4 sm:$0x1f]   ;;  %vm2549_vm14 = vmand %vm1318_vm10, %vm1319_vm11 }
  0x12   :  { %v1810_v50 = vld [vmem:[%s2603_s1 + $0x434] ss:$8 sps:$4 sm:$0xff]   ;;  %v2164_v51 = vld [vmem:[%s2604_s0 + $0xc] ss:$20 sps:$4 sm:$0x1f]   ;;  %v210_v52 = vshrl.u32 %v2156_v49, 16  ;;  %vm2554_vm15 = vmand %vm1321_vm12, %vm1322_vm13 }
  0x13   :  { %651 = vmatpush1.bf16.msra.mxu0 %v1764_v18  ;;  %v212_v53 = vshll.u32 %v2156_v49, 16  ;;  %v1812_v54 = vld [vmem:[%s2603_s1 + $0x330] ss:$8 sps:$4 sm:$0xff]   ;;  %v224_v55 = vshrl.u32 %v2164_v51, 16  ;;  %v226_v56 = vshll.u32 %v2164_v51, 16 }
  0x14   :  { %694 = vmatpush1.bf16.msra.mxu1 %v1765_v19  ;;  %652 = vmatprep.subr.bf16.mxu0 %v1766_v20  ;;  %v1813_v57 = vld [vmem:[%s2603_s1 + $0x430] ss:$8 sps:$4 sm:$0xff]   ;;  %v1814_v59 = vld [vmem:[%s2603_s1 + $0x324] ss:$8 sps:$4 sm:$0xff]   ;;  %v1818_v62 = vld [vmem:[%s2603_s1 + $0x320] ss:$8 sps:$4 sm:$0xff]  }
  0x15   :  { %695 = vmatprep.subr.bf16.mxu1 %v1768_v21  ;;  %v214_v58 = vrot.slane %v212_v53, 1  ;;  %v1816_v60 = vld [vmem:[%s2603_s1 + $0x424] ss:$8 sps:$4 sm:$0xff]   ;;  %v228_v61 = vrot.slane %v226_v56, 1  ;;  %v1819_v3 = vld [vmem:[%s2603_s1 + $0x420] ss:$8 sps:$4 sm:$0xff]  }
  0x16   :  { %v2188_v63 = vld [vmem:[%s2604_s0] ss:$20 sps:$4 sm:$0x1f]   ;;  %v2193_v1 = vld [vmem:[%s2604_s0 + $0x8] ss:$20 sps:$4 sm:$0x1f]  }
  0x17   :  { %653 = vmatpush1.bf16.msra.mxu0 %v1770_v22  ;;  %v215_v0 = vor.u32 %v214_v58, %v210_v52  ;;  %v229_v2 = vor.u32 %v228_v61, %v224_v55  ;;  %v1820_v4 = vld [vmem:[%s2603_s1 + $0x314] ss:$8 sps:$4 sm:$0xff]   ;;  %v1824_v6 = vld [vmem:[%s2603_s1 + $0x310] ss:$8 sps:$4 sm:$0xff]   ;;  %v205_v7 = vshll.u32 %v2188_v63, 16  ;;  %v219_v8 = vshll.u32 %v2193_v1, 16 }
  0x18   :  { %696 = vmatpush1.bf16.msra.mxu1 %v1771_v23  ;;  %654 = vmatprep.subr.bf16.mxu0 %v1772_v24  ;;  %v1822_v5 = vld [vmem:[%s2603_s1 + $0x414] ss:$8 sps:$4 sm:$0xff]   ;;  %v1825_v9 = vld [vmem:[%s2603_s1 + $0x410] ss:$8 sps:$4 sm:$0xff]   ;;  %v1826_v10 = vld [vmem:[%s2603_s1 + $0x304] ss:$8 sps:$4 sm:$0xff]  }
  0x19   :  { %697 = vmatprep.subr.bf16.mxu1 %v1774_v25  ;;  %674 = vmatprep.mubr.bf16.mxu0 %v215_v0  ;;  %v1828_v11 = vld [vmem:[%s2603_s1 + $0x404] ss:$8 sps:$4 sm:$0xff]   ;;  %v1830_v12 = vld [vmem:[%s2603_s1 + $0x300] ss:$8 sps:$4 sm:$0xff]   ;;  %v203_v13 = vshrl.u32 %v2188_v63, 16  ;;  %v207_v14 = vrot.slane %v205_v7, 1 }
  0x1a   :  { %717 = vmatprep.mubr.bf16.mxu1 %v229_v2  ;;  %v217_v15 = vshrl.u32 %v2193_v1, 16  ;;  %v221_v16 = vrot.slane %v219_v8, 1  ;;  %v1831_v17 = vld [vmem:[%s2603_s1 + $0x400] ss:$8 sps:$4 sm:$0xff]   ;;  %v1840_v18 = vld [vmem:[%s2603_s1 + $0x4f4] ss:$8 sps:$4 sm:$0xff]  }
  0x1b   :  { %655 = vmatpush1.bf16.msra.mxu0 %v1776_v26  ;;  %v1843_v19 = vld [vmem:[%s2603_s1 + $0x74] ss:$8 sps:$4 sm:$0xff]   ;;  %v208_v20 = vor.u32 %v207_v14, %v203_v13  ;;  %v1838_v22 = vld [vmem:[%s2603_s1 + $0x4f0] ss:$8 sps:$4 sm:$0xff]   ;;  %v1846_v24 = vld [vmem:[%s2603_s1 + $0x4e4] ss:$8 sps:$4 sm:$0xff]  }
  0x1c   :  { %698 = vmatpush1.bf16.msra.mxu1 %v1777_v27  ;;  %656 = vmatprep.subr.bf16.mxu0 %v1778_v28  ;;  %v222_v21 = vor.u32 %v221_v16, %v217_v15  ;;  %v1841_v23 = vld [vmem:[%s2603_s1 + $0x70] ss:$8 sps:$4 sm:$0xff]   ;;  %v1849_v25 = vld [vmem:[%s2603_s1 + $0x64] ss:$8 sps:$4 sm:$0xff]   ;;  %v1844_v26 = vld [vmem:[%s2603_s1 + $0x4e0] ss:$8 sps:$4 sm:$0xff]  }
  0x1d   :  { %699 = vmatprep.subr.bf16.mxu1 %v1780_v29  ;;  %v1847_v27 = vld [vmem:[%s2603_s1 + $0x60] ss:$8 sps:$4 sm:$0xff]   ;;  %v1852_v28 = vld [vmem:[%s2603_s1 + $0x4d4] ss:$8 sps:$4 sm:$0xff]   ;;  %v1882_v52 = vld [vmem:[%s2603_s1 + $0x484] ss:$8 sps:$4 sm:$0xff]  }
  0x1e   :  { %v1855_v29 = vld [vmem:[%s2603_s1 + $0x54] ss:$8 sps:$4 sm:$0xff]   ;;  %v1885_v53 = vld [vmem:[%s2603_s1 + $0x4] ss:$8 sps:$4 sm:$0xff]   ;;  %v1883_v55 = vld [vmem:[%s2603_s1] ss:$8 sps:$4 sm:$0xff]  }
  0x1f   :  { %657 = vmatpush1.bf16.msra.mxu0 %v1782_v30  ;;  %v1983_v30 = vmov 0   ;;  %v1889_v58 = vld [vmem:[%s2603_s1 + $0xf4] ss:$8 sps:$4 sm:$0xff]   ;;  %v1887_v61 = vld [vmem:[%s2603_s1 + $0xf0] ss:$8 sps:$4 sm:$0xff]  }
  0x20   :  { %700 = vmatpush1.bf16.msra.mxu1 %v1783_v31  ;;  %658 = vmatprep.subr.bf16.mxu0 %v1784_v32  ;;  %v1850_v31 = vld [vmem:[%s2603_s1 + $0x4d0] ss:$8 sps:$4 sm:$0xff]   ;;  %v1895_v0 = vld [vmem:[%s2603_s1 + $0xe4] ss:$8 sps:$4 sm:$0xff]   ;;  %v1916_v13 = vld [vmem:[%s2603_s1 + $0x134] ss:$8 sps:$4 sm:$0xff]  }
  0x21   :  { %701 = vmatprep.subr.bf16.mxu1 %v1786_v33  ;;  %v1853_v32 = vld [vmem:[%s2603_s1 + $0x50] ss:$8 sps:$4 sm:$0xff]   ;;  %v1858_v33 = vld [vmem:[%s2603_s1 + $0x4c4] ss:$8 sps:$4 sm:$0xff]  }
  0x22   :  { %v1898_v2 = vld [vmem:[%s2603_s1 + $0x164] ss:$8 sps:$4 sm:$0xff]   ;;  %v1899_v7 = vld [vmem:[%s2603_s1 + $0xd0] ss:$8 sps:$4 sm:$0xff]  }
  0x23   :  { %659 = vmatpush2.bf16.msra.mxu0 %v1788_v34  ;;  %v1861_v34 = vld [vmem:[%s2603_s1 + $0x44] ss:$8 sps:$4 sm:$0xff]   ;;  %v1902_v8 = vld [vmem:[%s2603_s1 + $0x150] ss:$8 sps:$4 sm:$0xff]  }
  0x24   :  { %702 = vmatpush2.bf16.msra.mxu1 %v1789_v35  ;;  %660 = vmatprep.subr.bf16.mxu0 %v1790_v36  ;;  %v1856_v35 = vld [vmem:[%s2603_s1 + $0x4c0] ss:$8 sps:$4 sm:$0xff]   ;;  %v1911_v14 = vld [vmem:[%s2603_s1 + $0xb0] ss:$8 sps:$4 sm:$0xff]   ;;  %v1919_v16 = vld [vmem:[%s2603_s1 + $0xa4] ss:$8 sps:$4 sm:$0xff]  }
  0x25   :  { %703 = vmatprep.subr.bf16.mxu1 %v1792_v37  ;;  %v1859_v36 = vld [vmem:[%s2603_s1 + $0x40] ss:$8 sps:$4 sm:$0xff]   ;;  %v1864_v37 = vld [vmem:[%s2603_s1 + $0x4b4] ss:$8 sps:$4 sm:$0xff]   ;;  %v1914_v15 = vld [vmem:[%s2603_s1 + $0x130] ss:$8 sps:$4 sm:$0xff]  }
  0x27   :  { %661 = vmatpush2.bf16.msra.mxu0 %v1794_v38  ;;  %v1867_v38 = vld [vmem:[%s2603_s1 + $0x34] ss:$8 sps:$4 sm:$0xff]  }
  0x28   :  { %704 = vmatpush2.bf16.msra.mxu1 %v1795_v39  ;;  %662 = vmatprep.subr.bf16.mxu0 %v1796_v40  ;;  %v1862_v39 = vld [vmem:[%s2603_s1 + $0x4b0] ss:$8 sps:$4 sm:$0xff]  }
  0x29   :  { %705 = vmatprep.subr.bf16.mxu1 %v1798_v41  ;;  %v1865_v40 = vld [vmem:[%s2603_s1 + $0x30] ss:$8 sps:$4 sm:$0xff]   ;;  %v1870_v41 = vld [vmem:[%s2603_s1 + $0x4a4] ss:$8 sps:$4 sm:$0xff]  }
  0x2b   :  { %663 = vmatpush2.bf16.msra.mxu0 %v1800_v42  ;;  %v1873_v42 = vld [vmem:[%s2603_s1 + $0x24] ss:$8 sps:$4 sm:$0xff]  }
  0x2c   :  { %706 = vmatpush2.bf16.msra.mxu1 %v1801_v43  ;;  %664 = vmatprep.subr.bf16.mxu0 %v1802_v44  ;;  %v1868_v43 = vld [vmem:[%s2603_s1 + $0x4a0] ss:$8 sps:$4 sm:$0xff]  }
  0x2d   :  { %707 = vmatprep.subr.bf16.mxu1 %v1804_v45  ;;  %v1871_v44 = vld [vmem:[%s2603_s1 + $0x20] ss:$8 sps:$4 sm:$0xff]   ;;  %v2303_v45 = vld [vmem:[%s2604_s0 + $0x10] ss:$20 sps:$4 sm:$0x1f]  }
  0x2e   :  { %v231_v56 = vshrl.u32 %v2303_v45, 16 }
  0x2f   :  { %665 = vmatpush2.bf16.msra.mxu0 %v1806_v46  ;;  %v1876_v46 = vld [vmem:[%s2603_s1 + $0x494] ss:$8 sps:$4 sm:$0xff]  }
  0x30   :  { %708 = vmatpush2.bf16.msra.mxu1 %v1807_v47  ;;  %666 = vmatprep.subr.bf16.mxu0 %v1808_v48  ;;  %v1879_v47 = vld [vmem:[%s2603_s1 + $0x14] ss:$8 sps:$4 sm:$0xff]   ;;  %v1874_v48 = vld [vmem:[%s2603_s1 + $0x490] ss:$8 sps:$4 sm:$0xff]  }
  0x31   :  { %709 = vmatprep.subr.bf16.mxu1 %v1810_v50  ;;  %v233_v50 = vshll.u32 %v2303_v45, 16 }
  0x33   :  { %667 = vmatpush2.bf16.msra.mxu0 %v1812_v54  ;;  %v1880_v54 = vld [vmem:[%s2603_s1 + $0x480] ss:$8 sps:$4 sm:$0xff]  }
  0x34   :  { %710 = vmatpush2.bf16.msra.mxu1 %v1813_v57  ;;  %668 = vmatprep.subr.bf16.mxu0 %v1814_v59  ;;  %v235_v57 = vrot.slane %v233_v50, 1  ;;  %v1892_v59 = vld [vmem:[%s2603_s1 + $0x174] ss:$8 sps:$4 sm:$0xff]   ;;  %v1965_v50 = vld [vmem:[%s2603_s1 + $0x1a0] ss:$8 sps:$4 sm:$0xff]  }
  0x35   :  { %711 = vmatprep.subr.bf16.mxu1 %v1816_v60 }
  0x36   :  { %v236_v60 = vor.u32 %v235_v57, %v231_v56  ;;  %v1974_v56 = vld [vmem:[%s2603_s1 + $0x210] ss:$8 sps:$4 sm:$0xff]   ;;  %v1979_v57 = vld [vmem:[%s2603_s1 + $0x184] ss:$8 sps:$4 sm:$0xff]  }
  0x37   :  { %669 = vmatpush2.bf16.msra.mxu0 %v1818_v62  ;;  %v1890_v62 = vld [vmem:[%s2603_s1 + $0x170] ss:$8 sps:$4 sm:$0xff]  }
  0x38   :  { %712 = vmatpush2.bf16.msra.mxu1 %v1819_v3  ;;  %670 = vmatprep.subr.bf16.mxu0 %v1820_v4  ;;  %v1893_v3 = vld [vmem:[%s2603_s1 + $0xe0] ss:$8 sps:$4 sm:$0xff]  }
  0x39   :  { %713 = vmatprep.subr.bf16.mxu1 %v1822_v5  ;;  %v1896_v4 = vld [vmem:[%s2603_s1 + $0x160] ss:$8 sps:$4 sm:$0xff]   ;;  %v1901_v5 = vld [vmem:[%s2603_s1 + $0xd4] ss:$8 sps:$4 sm:$0xff]  }
  0x3b   :  { %671 = vmatpush2.bf16.msra.mxu0 %v1824_v6  ;;  %v1904_v6 = vld [vmem:[%s2603_s1 + $0x154] ss:$8 sps:$4 sm:$0xff]  }
  0x3c   :  { %714 = vmatpush2.bf16.msra.mxu1 %v1825_v9  ;;  %672 = vmatprep.subr.bf16.mxu0 %v1826_v10  ;;  %v1907_v9 = vld [vmem:[%s2603_s1 + $0xc4] ss:$8 sps:$4 sm:$0xff]   ;;  %v1905_v10 = vld [vmem:[%s2603_s1 + $0xc0] ss:$8 sps:$4 sm:$0xff]  }
  0x3d   :  { %715 = vmatprep.subr.bf16.mxu1 %v1828_v11  ;;  %v1908_v11 = vld [vmem:[%s2603_s1 + $0x140] ss:$8 sps:$4 sm:$0xff]  }
  0x3f   :  { %673 = vmatpush2.bf16.msra.mxu0 %v1830_v12  ;;  %v1913_v12 = vld [vmem:[%s2603_s1 + $0xb4] ss:$8 sps:$4 sm:$0xff]  }
  0x40   :  { %716 = vmatpush2.bf16.msra.mxu1 %v1831_v17  ;;  %728 = vmatprep.subr.bf16.mxu0 %v1840_v18  ;;  %v1922_v17 = vld [vmem:[%s2603_s1 + $0x124] ss:$8 sps:$4 sm:$0xff]   ;;  %v1917_v18 = vld [vmem:[%s2603_s1 + $0xa0] ss:$8 sps:$4 sm:$0xff]  }
  0x41   :  { %1176 = vmatprep.subr.bf16.mxu1 %v1843_v19  ;;  %v1920_v19 = vld [vmem:[%s2603_s1 + $0x120] ss:$8 sps:$4 sm:$0xff]  }
  0x42   :  { %675 = vmatmul.mubr.bf16.vlgmr.msra.gmra.mxu0 %v208_v20  ;;  %v1925_v20 = vld [vmem:[%s2603_s1 + $0x94] ss:$8 sps:$4 sm:$0xff]  }
  0x43   :  { %718 = vmatmul.mubr.bf16.vlgmr.msra.gmra.mxu1 %v222_v21  ;;  %729 = vmatpush1.bf16.msra.mxu0 %v1838_v22  ;;  %v1928_v21 = vld [vmem:[%s2603_s1 + $0x114] ss:$8 sps:$4 sm:$0xff]   ;;  %v1923_v22 = vld [vmem:[%s2603_s1 + $0x90] ss:$8 sps:$4 sm:$0xff]  }
  0x44   :  { %1177 = vmatpush1.bf16.msra.mxu1 %v1841_v23  ;;  %730 = vmatprep.subr.bf16.mxu0 %v1846_v24  ;;  %v1926_v23 = vld [vmem:[%s2603_s1 + $0x110] ss:$8 sps:$4 sm:$0xff]   ;;  %v1931_v24 = vld [vmem:[%s2603_s1 + $0x84] ss:$8 sps:$4 sm:$0xff]  }
  0x45   :  { %1178 = vmatprep.subr.bf16.mxu1 %v1849_v25  ;;  %760 = vmatprep.mubr.bf16.mxu0 %v1983_v30  ;;  %v1934_v25 = vld [vmem:[%s2603_s1 + $0x104] ss:$8 sps:$4 sm:$0xff]  }
  0x46   :  { %1208 = vmatprep.mubr.bf16.mxu1 %v2156_v49  ;;  %v1877_v49 = vld [vmem:[%s2603_s1 + $0x10] ss:$8 sps:$4 sm:$0xff]  }
  0x47   :  { %731 = vmatpush1.bf16.msra.mxu0 %v1844_v26  ;;  %v1929_v26 = vld [vmem:[%s2603_s1 + $0x80] ss:$8 sps:$4 sm:$0xff]  }
  0x48   :  { %1179 = vmatpush1.bf16.msra.mxu1 %v1847_v27  ;;  %732 = vmatprep.subr.bf16.mxu0 %v1852_v28  ;;  %v1932_v27 = vld [vmem:[%s2603_s1 + $0x100] ss:$8 sps:$4 sm:$0xff]   ;;  %v1937_v28 = vld [vmem:[%s2603_s1 + $0x1f4] ss:$8 sps:$4 sm:$0xff]  }
  0x49   :  { %1180 = vmatprep.subr.bf16.mxu1 %v1855_v29  ;;  %v1940_v29 = vld [vmem:[%s2603_s1 + $0x274] ss:$8 sps:$4 sm:$0xff]  }
  0x4b   :  { %733 = vmatpush1.bf16.msra.mxu0 %v1850_v31  ;;  %v1935_v31 = vld [vmem:[%s2603_s1 + $0x1f0] ss:$8 sps:$4 sm:$0xff]  }
  0x4c   :  { %1181 = vmatpush1.bf16.msra.mxu1 %v1853_v32  ;;  %734 = vmatprep.subr.bf16.mxu0 %v1858_v33  ;;  %v1938_v32 = vld [vmem:[%s2603_s1 + $0x270] ss:$8 sps:$4 sm:$0xff]   ;;  %v1943_v33 = vld [vmem:[%s2603_s1 + $0x1e4] ss:$8 sps:$4 sm:$0xff]  }
  0x4d   :  { %1182 = vmatprep.subr.bf16.mxu1 %v1861_v34  ;;  %v1946_v34 = vld [vmem:[%s2603_s1 + $0x264] ss:$8 sps:$4 sm:$0xff]  }
  0x4f   :  { %735 = vmatpush1.bf16.msra.mxu0 %v1856_v35  ;;  %v1941_v35 = vld [vmem:[%s2603_s1 + $0x1e0] ss:$8 sps:$4 sm:$0xff]  }
  0x50   :  { %1183 = vmatpush1.bf16.msra.mxu1 %v1859_v36  ;;  %736 = vmatprep.subr.bf16.mxu0 %v1864_v37  ;;  %v1944_v36 = vld [vmem:[%s2603_s1 + $0x260] ss:$8 sps:$4 sm:$0xff]   ;;  %v1949_v37 = vld [vmem:[%s2603_s1 + $0x1d4] ss:$8 sps:$4 sm:$0xff]  }
  0x51   :  { %1184 = vmatprep.subr.bf16.mxu1 %v1867_v38  ;;  %v1947_v38 = vld [vmem:[%s2603_s1 + $0x1d0] ss:$8 sps:$4 sm:$0xff]  }
  0x53   :  { %737 = vmatpush1.bf16.msra.mxu0 %v1862_v39  ;;  %v1950_v39 = vld [vmem:[%s2603_s1 + $0x250] ss:$8 sps:$4 sm:$0xff]  }
  0x54   :  { %1185 = vmatpush1.bf16.msra.mxu1 %v1865_v40  ;;  %738 = vmatprep.subr.bf16.mxu0 %v1870_v41  ;;  %v1955_v40 = vld [vmem:[%s2603_s1 + $0x1c4] ss:$8 sps:$4 sm:$0xff]   ;;  %v1953_v41 = vld [vmem:[%s2603_s1 + $0x1c0] ss:$8 sps:$4 sm:$0xff]  }
  0x55   :  { %1186 = vmatprep.subr.bf16.mxu1 %v1873_v42  ;;  %v1956_v42 = vld [vmem:[%s2603_s1 + $0x240] ss:$8 sps:$4 sm:$0xff]  }
  0x57   :  { %739 = vmatpush1.bf16.msra.mxu0 %v1868_v43  ;;  %v1961_v43 = vld [vmem:[%s2603_s1 + $0x1b4] ss:$8 sps:$4 sm:$0xff]  }
  0x58   :  { %1187 = vmatpush1.bf16.msra.mxu1 %v1871_v44  ;;  %740 = vmatprep.subr.bf16.mxu0 %v1876_v46  ;;  %v1964_v44 = vld [vmem:[%s2603_s1 + $0x234] ss:$8 sps:$4 sm:$0xff]   ;;  %v1959_v46 = vld [vmem:[%s2603_s1 + $0x1b0] ss:$8 sps:$4 sm:$0xff]  }
  0x59   :  { %1188 = vmatprep.subr.bf16.mxu1 %v1879_v47  ;;  %v1962_v47 = vld [vmem:[%s2603_s1 + $0x230] ss:$8 sps:$4 sm:$0xff]  }
  0x5b   :  { %741 = vmatpush1.bf16.msra.mxu0 %v1874_v48  ;;  %v1967_v48 = vld [vmem:[%s2603_s1 + $0x1a4] ss:$8 sps:$4 sm:$0xff]  }
  0x5c   :  { %1189 = vmatpush1.bf16.msra.mxu1 %v1877_v49  ;;  %742 = vmatprep.subr.bf16.mxu0 %v1882_v52  ;;  %v1970_v49 = vld [vmem:[%s2603_s1 + $0x224] ss:$8 sps:$4 sm:$0xff]   ;;  %v1968_v52 = vld [vmem:[%s2603_s1 + $0x220] ss:$8 sps:$4 sm:$0xff]  }
  0x5d   :  { %1190 = vmatprep.subr.bf16.mxu1 %v1885_v53  ;;  %v1973_v53 = vld [vmem:[%s2603_s1 + $0x194] ss:$8 sps:$4 sm:$0xff]  }
  0x5f   :  { %743 = vmatpush1.bf16.msra.mxu0 %v1880_v54  ;;  %v1976_v54 = vld [vmem:[%s2603_s1 + $0x214] ss:$8 sps:$4 sm:$0xff]  }
  0x60   :  { %1191 = vmatpush1.bf16.msra.mxu1 %v1883_v55  ;;  %1219 = vmatprep.subr.bf16.mxu0 %v1892_v59  ;;  %v1971_v55 = vld [vmem:[%s2603_s1 + $0x190] ss:$8 sps:$4 sm:$0xff]   ;;  %v1977_v59 = vld [vmem:[%s2603_s1 + $0x180] ss:$8 sps:$4 sm:$0xff]  }
  0x61   :  { %1192 = vmatprep.subr.bf16.mxu1 %v1889_v58  ;;  %v1982_v58 = vld [vmem:[%s2603_s1 + $0x204] ss:$8 sps:$4 sm:$0xff]  }
  0x62   :  { %761 = vmatmul.mubr.bf16.vlgmr.msra.gmra.mxu0 %v236_v60  ;;  %v1980_v60 = vld [vmem:[%s2603_s1 + $0x200] ss:$8 sps:$4 sm:$0xff]  }
  0x63   :  { %1220 = vmatpush1.bf16.msra.mxu0 %v1890_v62  ;;  %1251 = vmatprep.mubr.bf16.mxu0 %v2164_v51  ;;  %v1910_v51 = vld [vmem:[%s2603_s1 + $0x144] ss:$8 sps:$4 sm:$0xff]  }
  0x64   :  { %1193 = vmatpush2.bf16.msra.mxu1 %v1887_v61  ;;  %1221 = vmatprep.subr.bf16.mxu0 %v1898_v2  ;;  %v1336_v61 = vlaneseq }
  0x65   :  { %1194 = vmatprep.subr.bf16.mxu1 %v1895_v0 }
  0x66   :  { %v2529_v62 = vshrl.u32 %v1336_v61, 7 }
  0x67   :  { %1222 = vmatpush1.bf16.msra.mxu0 %v1896_v4 }
  0x68   :  { %1195 = vmatpush2.bf16.msra.mxu1 %v1893_v3  ;;  %1223 = vmatprep.subr.bf16.mxu0 %v1904_v6  ;;  %v1338_v0 = vadd.s32 8, %v2529_v62  ;;  %v2533_v2 = vmul.u32.u64.low 3435973837, %v2529_v62  ;;  %v2534_v3 = vmul.u32.u64.high 3435973837, %v2529_v62, %v2533_v2 }
  0x69   :  { %1196 = vmatprep.subr.bf16.mxu1 %v1901_v5 }
  0x6a   :  { %v2536_v4 = vmul.u32.u64.low 3435973837, %v1338_v0  ;;  %v2537_v5 = vmul.u32.u64.high 3435973837, %v1338_v0, %v2536_v4  ;;  %vm1378_vm8 = vcmp.lt.s32.totalorder %v1338_v0, 10 }
  0x6b   :  { %1224 = vmatpush1.bf16.msra.mxu0 %v1902_v8 }
  0x6c   :  { %1197 = vmatpush2.bf16.msra.mxu1 %v1899_v7  ;;  %1225 = vmatprep.subr.bf16.mxu0 %v1910_v51 }
  0x6d   :  { %1198 = vmatprep.subr.bf16.mxu1 %v1907_v9 }
  0x6f   :  { %1226 = vmatpush1.bf16.msra.mxu0 %v1908_v11 }
  0x70   :  { %1199 = vmatpush2.bf16.msra.mxu1 %v1905_v10  ;;  %1227 = vmatprep.subr.bf16.mxu0 %v1916_v13 }
  0x71   :  { %1200 = vmatprep.subr.bf16.mxu1 %v1913_v12 }
  0x73   :  { %1228 = vmatpush1.bf16.msra.mxu0 %v1914_v15 }
  0x74   :  { %1201 = vmatpush2.bf16.msra.mxu1 %v1911_v14  ;;  %1229 = vmatprep.subr.bf16.mxu0 %v1922_v17 }
  0x75   :  { %1202 = vmatprep.subr.bf16.mxu1 %v1919_v16 }
  0x77   :  { %1230 = vmatpush1.bf16.msra.mxu0 %v1920_v19 }
  0x78   :  { %1203 = vmatpush2.bf16.msra.mxu1 %v1917_v18  ;;  %1231 = vmatprep.subr.bf16.mxu0 %v1928_v21 }
  0x79   :  { %1204 = vmatprep.subr.bf16.mxu1 %v1925_v20 }
  0x7b   :  { %1232 = vmatpush1.bf16.msra.mxu0 %v1926_v23 }
  0x7c   :  { %1205 = vmatpush2.bf16.msra.mxu1 %v1923_v22  ;;  %1233 = vmatprep.subr.bf16.mxu0 %v1934_v25 }
  0x7d   :  { %1206 = vmatprep.subr.bf16.mxu1 %v1931_v24 }
  0x7f   :  { %1234 = vmatpush1.bf16.msra.mxu0 %v1932_v27 }
  0x80   :  { %1207 = vmatpush2.bf16.msra.mxu1 %v1929_v26  ;;  %1235 = vmatprep.subr.bf16.mxu0 %v1937_v28 }
  0x81   :  { %1262 = vmatprep.subr.bf16.mxu1 %v1940_v29 }
  0x83   :  { %1209 = vmatmul.mubr.bf16.vlgmr.msra.gmra.mxu1 %v2188_v63  ;;  %1236 = vmatpush2.bf16.msra.mxu0 %v1935_v31  ;;  %v1952_v63 = vld [vmem:[%s2603_s1 + $0x254] ss:$8 sps:$4 sm:$0xff]  }
  0x84   :  { %1263 = vmatpush1.bf16.msra.mxu1 %v1938_v32  ;;  %1237 = vmatprep.subr.bf16.mxu0 %v1943_v33 }
  0x85   :  { %1264 = vmatprep.subr.bf16.mxu1 %v1946_v34  ;;  %1294 = vmatprep.mubr.bf16.mxu1 %v1983_v30  ;;  %v1958_v30 = vld [vmem:[%s2603_s1 + $0x244] ss:$8 sps:$4 sm:$0xff]  }
  0x87   :  { %1238 = vmatpush2.bf16.msra.mxu0 %v1941_v35 }
  0x88   :  { %1265 = vmatpush1.bf16.msra.mxu1 %v1944_v36  ;;  %1239 = vmatprep.subr.bf16.mxu0 %v1949_v37 }
  0x89   :  { %1266 = vmatprep.subr.bf16.mxu1 %v1952_v63 }
  0x8b   :  { %1240 = vmatpush2.bf16.msra.mxu0 %v1947_v38 }
  0x8c   :  { %1267 = vmatpush1.bf16.msra.mxu1 %v1950_v39  ;;  %1241 = vmatprep.subr.bf16.mxu0 %v1955_v40 }
  0x8d   :  { %1268 = vmatprep.subr.bf16.mxu1 %v1958_v30 }
  0x8f   :  { %1242 = vmatpush2.bf16.msra.mxu0 %v1953_v41 }
  0x90   :  { %1269 = vmatpush1.bf16.msra.mxu1 %v1956_v42  ;;  %1243 = vmatprep.subr.bf16.mxu0 %v1961_v43 }
  0x91   :  { %1270 = vmatprep.subr.bf16.mxu1 %v1964_v44 }
  0x93   :  { %1244 = vmatpush2.bf16.msra.mxu0 %v1959_v46 }
  0x94   :  { %1271 = vmatpush1.bf16.msra.mxu1 %v1962_v47  ;;  %1245 = vmatprep.subr.bf16.mxu0 %v1967_v48  ;;  %v1984_v48 = vmov 0.0  }
  0x95   :  { %1272 = vmatprep.subr.bf16.mxu1 %v1970_v49 }
  0x97   :  { %1246 = vmatpush2.bf16.msra.mxu0 %v1965_v50 }
  0x98   :  { %1273 = vmatpush1.bf16.msra.mxu1 %v1968_v52  ;;  %1247 = vmatprep.subr.bf16.mxu0 %v1973_v53 }
  0x99   :  { %1274 = vmatprep.subr.bf16.mxu1 %v1976_v54 }
  0x9b   :  { %1248 = vmatpush2.bf16.msra.mxu0 %v1971_v55 }
  0x9c   :  { %1275 = vmatpush1.bf16.msra.mxu1 %v1974_v56  ;;  %1249 = vmatprep.subr.bf16.mxu0 %v1979_v57 }
  0x9d   :  { %1276 = vmatprep.subr.bf16.mxu1 %v1982_v58 }
  0x9f   :  { %1250 = vmatpush2.bf16.msra.mxu0 %v1977_v59 }
  0xa0   :  { %1277 = vmatpush1.bf16.msra.mxu1 %v1980_v60 }
  0xa2   :  { %1252 = vmatmul.mubr.bf16.vlgmr.msra.gmra.mxu0 %v2193_v1  ;;  %v1345_v1 = vshrl.u32 %v2534_v3, 2 }
  0xa3   :  { %1295 = vmatmul.mubr.bf16.vlgmr.msra.gmra.mxu1 %v2303_v45  ;;  %v1356_v45 = vshrl.u32 %v2537_v5, 2 }
  0xa4   :  { %v1346_v11 = vmul.u32 5, %v1345_v1  ;;  %v1325_v1 = vld [vmem:[%s2605_s2 + $0x8] sm:$0x11] }
  0xa5   :  { %v1357_v12 = vmul.u32 5, %v1356_v45 }
  0xa6   :  { %v1347_v17 = vsub.s32 %v2529_v62, %v1346_v11 }
  0xa7   :  { %v1358_v18 = vsub.s32 %v1338_v0, %v1357_v12 }
  0xa8   :  { %vm1361_vm0 = vcmp.ne.s32.totalorder %v1347_v17, 0  ;;  %vm1363_vm1 = vcmp.lt.s32.totalorder %v1347_v17, 0  ;;  %v1367_v22 = vadd.s32 5, %v1347_v17 }
  0xa9   :  { %vm1362_vm2 = vcmp.ne.s32.totalorder %v1358_v18, 0  ;;  %vm1364_vm3 = vcmp.lt.s32.totalorder %v1358_v18, 0  ;;  %vm2542_vm4 = vmand %vm1363_vm1, %vm1361_vm0  ;;  %v1368_v23 = vadd.s32 5, %v1358_v18  ;;  %vm1328_vm1 = vsmask.f32 7938 }
  0xaa   :  { %vm1366_vm5 = vmand %vm1364_vm3, %vm1362_vm2  ;;  %v1369_v29 = vsel %vm2542_vm4, %v1367_v22, %v1347_v17  ;;  %vm1330_vm2 = vsmask.f32 7954 }
  0xab   :  { %v1370_v31 = vsel %vm1366_vm5, %v1368_v23, %v1358_v18  ;;  %vm1371_vm6 = vcmp.lt.s32.totalorder %v1369_v29, 4  ;;  %vm1324_vm0 = vmor %vm2554_vm15, %vm2549_vm14 }
  0xac   :  { %vm1372_vm7 = vcmp.lt.s32.totalorder %v1370_v31, 4  ;;  %v1724_v49 = vsel %vm1371_vm6, 1.0, %v1984_v48  ;;  %vm2575_vm3 = vmand %vm1318_vm10, %vm1328_vm1  ;;  %v1985_v31 = vmov 1966171168   ;;  %vm1426_vm6 = vcmp.lt.s32.totalorder %v1336_v61, 256 }
  0xad   :  { %vm1380_vm9 = vmand %vm1372_vm7, %vm1378_vm8 }
  0xae   :  { %v1725_v56 = vsel %vm1380_vm9, 1.0, %v1984_v48  ;;  %vm2580_vm4 = vmand %vm1321_vm12, %vm1330_vm2 }
  0xaf   :  { %vm1332_vm5 = vmor %vm2580_vm4, %vm2575_vm3 }
 0x102   :  { %v676_v6 = vpop.f32.mrf.mxu0 }
 0x103   :  { %v719_v7 = vpop.f32.mrf.mxu1 }
 0x104   :  { %v678_v8 = vpop.f32.mrf.mxu0  ;;  %v720_v26 = vadd.f32 %v719_v7, %v676_v6 }
 0x105   :  { %v721_v9 = vpop.f32.mrf.mxu1 }
 0x106   :  { %v680_v51 = vpop.f32.mrf.mxu0  ;;  %v722_v27 = vadd.f32 %v721_v9, %v678_v8 }
 0x107   :  { %v723_v10 = vpop.f32.mrf.mxu1 }
 0x108   :  { %v682_v13 = vpop.f32.mrf.mxu0  ;;  %v724_v34 = vadd.f32 %v723_v10, %v680_v51 }
 0x109   :  { %v725_v14 = vpop.f32.mrf.mxu1 }
 0x10a   :  { %v726_v30 = vadd.f32 %v725_v14, %v682_v13 }
 0x122   :  { %v762_v15 = vpop.f32.mrf.mxu0 }
 0x123   :  { %v763_v28 = vadd.f32 %v762_v15, %v720_v26 }
 0x124   :  { %v764_v19 = vpop.f32.mrf.mxu0 }
 0x125   :  { %v765_v35 = vadd.f32 %v764_v19, %v722_v27 }
 0x126   :  { %v766_v24 = vpop.f32.mrf.mxu0 }
 0x127   :  { %v767_v38 = vadd.f32 %v766_v24, %v724_v34 }
 0x128   :  { %v768_v32 = vpop.f32.mrf.mxu0 }
 0x129   :  { %v769_v47 = vadd.f32 %v768_v32, %v726_v30  ;;  %v1410_v32 = vunpack.c.l.s4 %v1985_v31 }
 0x143   :  { %v1210_v16 = vpop.f32.mrf.mxu1 }
 0x144   :  { %v1211_v36 = vadd.f32 %v1210_v16, %v763_v28 }
 0x145   :  { %v1212_v20 = vpop.f32.mrf.mxu1 }
 0x146   :  { %v1213_v39 = vadd.f32 %v1212_v20, %v765_v35 }
 0x147   :  { %v1214_v25 = vpop.f32.mrf.mxu1 }
 0x148   :  { %v1215_v43 = vadd.f32 %v1214_v25, %v767_v38 }
 0x149   :  { %v1216_v33 = vpop.f32.mrf.mxu1 }
 0x14a   :  { %v1217_v55 = vadd.f32 %v1216_v33, %v769_v47 }
 0x162   :  { %v1253_v37 = vpop.f32.mrf.mxu0 }
 0x163   :  { %v1296_v63 = vpop.f32.mrf.mxu1  ;;  %v1254_v40 = vadd.f32 %v1253_v37, %v1211_v36 }
 0x164   :  { %v1255_v41 = vpop.f32.mrf.mxu0 }
 0x165   :  { %v1298_v42 = vpop.f32.mrf.mxu1  ;;  %v1297_v44 = vadd.f32 %v1296_v63, %v1254_v40  ;;  %v1256_v46 = vadd.f32 %v1255_v41, %v1213_v39  ;;  %v1411_v41 = vunpack.c.0.s8 %v1410_v32 }
 0x166   :  { %v1257_v50 = vpop.f32.mrf.mxu0 }
 0x167   :  { %v1299_v52 = vadd.f32 %v1298_v42, %v1256_v46  ;;  %v1258_v53 = vadd.f32 %v1257_v50, %v1215_v43  ;;  %v1300_v54 = vpop.f32.mrf.mxu1  ;;  %v1385_v58 = vmul.f32 %v1724_v49, %v1297_v44 }
 0x168   :  { %v1259_v57 = vpop.f32.mrf.mxu0 }
 0x169   :  { %v1727_v59 = vpack.c.bf16 %v1299_v52, %v1297_v44  ;;  %v1301_v60 = vadd.f32 %v1300_v54, %v1258_v53  ;;  %v1260_v2 = vadd.f32 %v1259_v57, %v1217_v55  ;;  %v1302_v5 = vpop.f32.mrf.mxu1  ;;  %v1429_v7 = vmul.f32 %v1385_v58, %v1297_v44 }
 0x16a   :  { %v1386_v45 = vmul.f32 %v1724_v49, %v1299_v52  ;;  %v1414_v49 = vsub.s32 %v1411_v41, %v2529_v62 }
 0x16b   :  { %1317 = vst [vmem:[%s2605_s2] sm:$0xff] %v1727_v59  ;;  %v1387_v4 = vmul.f32 %v1725_v56, %v1301_v60  ;;  %v1303_v6 = vadd.f32 %v1302_v5, %v1260_v2 }
 0x16c   :  { %v1430_v19 = vmul.f32 %v1386_v45, %v1299_v52 }
 0x16d   :  { %v1390_v8 = vsel %vm1318_vm10, %v1387_v4, 0.0  ;;  %v1431_v9 = vmul.f32 %v1387_v4, %v1301_v60  ;;  %v1728_v10 = vpack.c.bf16 %v1303_v6, %v1301_v60  ;;  %v1388_v11 = vmul.f32 %v1725_v56, %v1303_v6 }
 0x16e   :  { %v1391_v51 = vadd.f32 %v1390_v8, %v1385_v58 }
 0x16f   :  { %v1433_v12 = vsel %vm1318_vm10, %v1431_v9, 0.0  ;;  %v1326_v15 = vsel %vm1324_vm0, %v1728_v10, %v1325_v1  ;;  %v1398_v16 = vsel %vm1318_vm10, %v1388_v11, 0.0  ;;  %v1432_v18 = vmul.f32 %v1388_v11, %v1303_v6 }
 0x170   :  { %v1392_v13 = vrot.slane %v1391_v51, 4  ;;  %v1434_v14 = vadd.f32 %v1433_v12, %v1429_v7  ;;  %1327 = vst [vmem:[%s2605_s2 + $0x8] sm:$0x11] %v1326_v15  ;;  %v1399_v17 = vadd.f32 %v1398_v16, %v1386_v45 }
 0x171   :  { %v1441_v25 = vsel %vm1318_vm10, %v1432_v18, 0.0 }
 0x172   :  { %v1393_v20 = vadd.f32 %v1392_v13, %v1391_v51  ;;  %v1435_v21 = vrot.slane %v1434_v14, 4  ;;  %v1400_v24 = vrot.slane %v1399_v17, 4  ;;  %v1442_v28 = vadd.f32 %v1441_v25, %v1430_v19 }
 0x174   :  { %v1394_v26 = vrot.slane %v1393_v20, 2  ;;  %v1436_v27 = vadd.f32 %v1435_v21, %v1434_v14  ;;  %v1401_v29 = vadd.f32 %v1400_v24, %v1399_v17  ;;  %v1443_v35 = vrot.slane %v1442_v28, 4 }
 0x176   :  { %v1395_v33 = vadd.f32 %v1394_v26, %v1393_v20  ;;  %v1437_v34 = vrot.slane %v1436_v27, 2  ;;  %v1402_v36 = vrot.slane %v1401_v29, 2  ;;  %v1444_v38 = vadd.f32 %v1443_v35, %v1442_v28 }
 0x177   :  { %v1333_v63 = vld [vmem:[%s2605_s2 + $0x8] sm:$0x11] }
 0x178   :  { %v1438_v37 = vadd.f32 %v1437_v34, %v1436_v27  ;;  %v1396_v39 = vrot.slane %v1395_v33, 1  ;;  %v1334_v40 = vsel %vm1332_vm5, 0, %v1333_v63  ;;  %v1403_v30 = vadd.f32 %v1402_v36, %v1401_v29 }
 0x179   :  { %1335 = vst [vmem:[%s2605_s2 + $0x8] sm:$0x11] %v1334_v40  ;;  %v1445_v42 = vrot.slane %v1444_v38, 2 }
 0x17a   :  { %v1404_v43 = vrot.slane %v1403_v30, 1  ;;  %v1439_v44 = vrot.slane %v1438_v37, 1  ;;  %v1397_v47 = vadd.f32 %v1396_v39, %v1395_v33 }
 0x17b   :  { %v1446_v46 = vadd.f32 %v1445_v42, %v1444_v38 }
 0x17c   :  { %v1405_v48 = vadd.f32 %v1404_v43, %v1403_v30  ;;  %v1440_v53 = vadd.f32 %v1439_v44, %v1438_v37 }
 0x17d   :  { %v1447_v50 = vrot.slane %v1446_v46, 1 }
 0x17e   :  { %v1408_v52 = vcombine.low %v1397_v47, %v1405_v48 }
 0x17f   :  { %v1448_v54 = vadd.f32 %v1447_v50, %v1446_v46 }
 0x180   :  { %v1415_v55 = vrot.slane %v1408_v52, %v1414_v49 }
 0x181   :  { %v1451_v56 = vcombine.low %v1440_v53, %v1448_v54 }
 0x182   :  { %v1422_v57 = vrot.slane %v1415_v55, %v1414_v49 }
 0x183   :  { %v1458_v58 = vrot.slane %v1451_v56, %v1414_v49 }
 0x184   :  { %1428 = vst.msk [vmem:[%s2606_s3] ss:$2 sm:$0x3] %vm1426_vm6, %v1422_v57 }
 0x185   :  { %v1465_v59 = vrot.slane %v1458_v58, %v1414_v49 }
 0x187   :  { %1726 = vst.msk [vmem:[%s2606_s3 + $0x1] ss:$2 sm:$0x3] %vm1426_vm6, %v1465_v59 }

// kernel: image_classify_forward.12
= control target key start
LH: loop header
LB: loop body
LE: loop exit
PB: predicated region body
PF: predicated region fallthrough
CT: control target
= control target key end

     0   :  { %v1856_v1 = vmov 0   ;;  %vm1280_vm10 = vcmask 1041408   ;;  %s2408_s1 = inlined_call_operand.vmem [shape: bf16[3,384,256], index: 1, kind: input, shape index: {}]   ;;  %s2409_s2 = inlined_call_operand.vmem [shape: bf16[12,256], index: 2, kind: output, shape index: {0}]   ;;  %s2410_s0 = inlined_call_operand.vmem [shape: bf16[12,384], index: 0, kind: input, shape index: {}]   ;;  %s2411_s3 = inlined_call_operand.vmem [shape: f32[1,2,256], index: 3, kind: output, shape index: {1}]  }
   0x1   :  { %v1631_v0 = vld [vmem:[%s2408_s1 + $0x1f4] ss:$8 sps:$4 sm:$0xff]   ;;  %469 = vmatprep.mubr.bf16.mxu1 %v1856_v1  ;;  %1226 = vst [vmem:[%s2409_s2 + $0x8] sm:$0x22] %v1856_v1  ;;  %v1635_v3 = vld [vmem:[%s2408_s1 + $0x1f0] ss:$8 sps:$4 sm:$0xff]  }
   0x2   :  { %v1633_v2 = vld [vmem:[%s2408_s1 + $0x2f4] ss:$8 sps:$4 sm:$0xff]   ;;  %394 = vmatprep.subr.bf16.mxu0 %v1631_v0  ;;  %v1636_v4 = vld [vmem:[%s2408_s1 + $0x2f0] ss:$8 sps:$4 sm:$0xff]   ;;  %v1637_v5 = vld [vmem:[%s2408_s1 + $0x1e4] ss:$8 sps:$4 sm:$0xff]  }
   0x3   :  { %437 = vmatprep.subr.bf16.mxu1 %v1633_v2  ;;  %395 = vmatpush1.bf16.msra.mxu0 %v1635_v3  ;;  %v1639_v6 = vld [vmem:[%s2408_s1 + $0x2e4] ss:$8 sps:$4 sm:$0xff]   ;;  %v1641_v7 = vld [vmem:[%s2408_s1 + $0x1e0] ss:$8 sps:$4 sm:$0xff]   ;;  %v1643_v9 = vld [vmem:[%s2408_s1 + $0x1d4] ss:$8 sps:$4 sm:$0xff]  }
   0x4   :  { %438 = vmatpush1.bf16.msra.mxu1 %v1636_v4  ;;  %396 = vmatprep.subr.bf16.mxu0 %v1637_v5  ;;  %v1642_v8 = vld [vmem:[%s2408_s1 + $0x2e0] ss:$8 sps:$4 sm:$0xff]   ;;  %v1645_v10 = vld [vmem:[%s2408_s1 + $0x2d4] ss:$8 sps:$4 sm:$0xff]   ;;  %v1647_v11 = vld [vmem:[%s2408_s1 + $0x1d0] ss:$8 sps:$4 sm:$0xff]  }
   0x5   :  { %439 = vmatprep.subr.bf16.mxu1 %v1639_v6  ;;  %v1648_v12 = vld [vmem:[%s2408_s1 + $0x2d0] ss:$8 sps:$4 sm:$0xff]   ;;  %v1649_v13 = vld [vmem:[%s2408_s1 + $0x1c4] ss:$8 sps:$4 sm:$0xff]   ;;  %v1653_v15 = vld [vmem:[%s2408_s1 + $0x1c0] ss:$8 sps:$4 sm:$0xff]  }
   0x6   :  { %v1651_v14 = vld [vmem:[%s2408_s1 + $0x2c4] ss:$8 sps:$4 sm:$0xff]   ;;  %v1654_v16 = vld [vmem:[%s2408_s1 + $0x2c0] ss:$8 sps:$4 sm:$0xff]   ;;  %v1655_v17 = vld [vmem:[%s2408_s1 + $0x1b4] ss:$8 sps:$4 sm:$0xff]  }
   0x7   :  { %397 = vmatpush1.bf16.msra.mxu0 %v1641_v7  ;;  %v1657_v18 = vld [vmem:[%s2408_s1 + $0x2b4] ss:$8 sps:$4 sm:$0xff]   ;;  %v1659_v19 = vld [vmem:[%s2408_s1 + $0x1b0] ss:$8 sps:$4 sm:$0xff]   ;;  %v1661_v21 = vld [vmem:[%s2408_s1 + $0x1a4] ss:$8 sps:$4 sm:$0xff]  }
   0x8   :  { %440 = vmatpush1.bf16.msra.mxu1 %v1642_v8  ;;  %398 = vmatprep.subr.bf16.mxu0 %v1643_v9  ;;  %v1660_v20 = vld [vmem:[%s2408_s1 + $0x2b0] ss:$8 sps:$4 sm:$0xff]   ;;  %v1663_v22 = vld [vmem:[%s2408_s1 + $0x2a4] ss:$8 sps:$4 sm:$0xff]   ;;  %v1665_v23 = vld [vmem:[%s2408_s1 + $0x1a0] ss:$8 sps:$4 sm:$0xff]  }
   0x9   :  { %441 = vmatprep.subr.bf16.mxu1 %v1645_v10  ;;  %v1666_v24 = vld [vmem:[%s2408_s1 + $0x2a0] ss:$8 sps:$4 sm:$0xff]   ;;  %v1667_v25 = vld [vmem:[%s2408_s1 + $0x194] ss:$8 sps:$4 sm:$0xff]   ;;  %v1671_v27 = vld [vmem:[%s2408_s1 + $0x190] ss:$8 sps:$4 sm:$0xff]  }
   0xa   :  { %v1669_v26 = vld [vmem:[%s2408_s1 + $0x294] ss:$8 sps:$4 sm:$0xff]   ;;  %v1672_v28 = vld [vmem:[%s2408_s1 + $0x290] ss:$8 sps:$4 sm:$0xff]   ;;  %v1673_v29 = vld [vmem:[%s2408_s1 + $0x184] ss:$8 sps:$4 sm:$0xff]  }
   0xb   :  { %399 = vmatpush1.bf16.msra.mxu0 %v1647_v11  ;;  %v1974_v30 = vld [vmem:[%s2410_s0 + $0x8] sm:$0xf]  ;;  %v1979_v31 = vld [vmem:[%s2410_s0 + $0x14] sm:$0x3]  ;;  %v1675_v32 = vld [vmem:[%s2408_s1 + $0x284] ss:$8 sps:$4 sm:$0xff]  }
   0xc   :  { %442 = vmatpush1.bf16.msra.mxu1 %v1648_v12  ;;  %400 = vmatprep.subr.bf16.mxu0 %v1649_v13  ;;  %v1418_v33 = vcombine.low %v1974_v30, %v1979_v31  ;;  %v1677_v34 = vld [vmem:[%s2408_s1 + $0x180] ss:$8 sps:$4 sm:$0xff]   ;;  %v1679_v38 = vld [vmem:[%s2408_s1 + $0x274] ss:$8 sps:$4 sm:$0xff]   ;;  %v1681_v41 = vld [vmem:[%s2408_s1 + $0x70] ss:$8 sps:$4 sm:$0xff]  }
   0xd   :  { %443 = vmatprep.subr.bf16.mxu1 %v1651_v14  ;;  %v1678_v37 = vld [vmem:[%s2408_s1 + $0x280] ss:$8 sps:$4 sm:$0xff]   ;;  %v1683_v39 = vld [vmem:[%s2408_s1 + $0x74] ss:$8 sps:$4 sm:$0xff]   ;;  %v1684_v43 = vld [vmem:[%s2408_s1 + $0x270] ss:$8 sps:$4 sm:$0xff]  }
   0xe   :  { %v145_v35 = vshrl.u32 %v1418_v33, 16  ;;  %v147_v36 = vshll.u32 %v1418_v33, 16  ;;  %v1686_v44 = vld [vmem:[%s2408_s1 + $0x264] ss:$8 sps:$4 sm:$0xff]   ;;  %v1688_v46 = vld [vmem:[%s2408_s1 + $0x60] ss:$8 sps:$4 sm:$0xff]  }
   0xf   :  { %401 = vmatpush1.bf16.msra.mxu0 %v1653_v15  ;;  %v1690_v45 = vld [vmem:[%s2408_s1 + $0x64] ss:$8 sps:$4 sm:$0xff]   ;;  %v1691_v47 = vld [vmem:[%s2408_s1 + $0x260] ss:$8 sps:$4 sm:$0xff]   ;;  %v1692_v48 = vld [vmem:[%s2408_s1 + $0x254] ss:$8 sps:$4 sm:$0xff]  }
  0x10   :  { %444 = vmatpush1.bf16.msra.mxu1 %v1654_v16  ;;  %402 = vmatprep.subr.bf16.mxu0 %v1655_v17  ;;  %v149_v40 = vrot.slane %v147_v36, 1  ;;  %v1696_v49 = vld [vmem:[%s2408_s1 + $0x54] ss:$8 sps:$4 sm:$0xff]   ;;  %v1694_v50 = vld [vmem:[%s2408_s1 + $0x50] ss:$8 sps:$4 sm:$0xff]   ;;  %v2043_v56 = vld [vmem:[%s2410_s0] sm:$0xff] }
  0x11   :  { %445 = vmatprep.subr.bf16.mxu1 %v1657_v18  ;;  %v1697_v51 = vld [vmem:[%s2408_s1 + $0x250] ss:$8 sps:$4 sm:$0xff]   ;;  %v1698_v52 = vld [vmem:[%s2408_s1 + $0x244] ss:$8 sps:$4 sm:$0xff]   ;;  %v1700_v54 = vld [vmem:[%s2408_s1 + $0x40] ss:$8 sps:$4 sm:$0xff]  }
  0x12   :  { %v150_v42 = vor.u32 %v149_v40, %v145_v35  ;;  %v1702_v53 = vld [vmem:[%s2408_s1 + $0x44] ss:$8 sps:$4 sm:$0xff]   ;;  %v1703_v55 = vld [vmem:[%s2408_s1 + $0x240] ss:$8 sps:$4 sm:$0xff]   ;;  %v1704_v58 = vld [vmem:[%s2408_s1 + $0x234] ss:$8 sps:$4 sm:$0xff]  }
  0x13   :  { %403 = vmatpush1.bf16.msra.mxu0 %v1659_v19  ;;  %v2048_v57 = vld [vmem:[%s2410_s0 + $0xc] sm:$0x33]  ;;  %v1708_v60 = vld [vmem:[%s2408_s1 + $0x34] ss:$8 sps:$4 sm:$0xff]   ;;  %v1712_v6 = vld [vmem:[%s2408_s1 + $0x20] ss:$8 sps:$4 sm:$0xff]  }
  0x14   :  { %446 = vmatpush1.bf16.msra.mxu1 %v1660_v20  ;;  %404 = vmatprep.subr.bf16.mxu0 %v1661_v21  ;;  %v1417_v59 = vcombine.high %v2043_v56, %v2048_v57  ;;  %v1706_v63 = vld [vmem:[%s2408_s1 + $0x30] ss:$8 sps:$4 sm:$0xff]   ;;  %v1710_v2 = vld [vmem:[%s2408_s1 + $0x224] ss:$8 sps:$4 sm:$0xff]   ;;  %v1416_v7 = vcombine.low %v2043_v56, %v2048_v57  ;;  %v1715_v8 = vld [vmem:[%s2408_s1 + $0x220] ss:$8 sps:$4 sm:$0xff]  }
  0x15   :  { %447 = vmatprep.subr.bf16.mxu1 %v1663_v22  ;;  %v1709_v0 = vld [vmem:[%s2408_s1 + $0x230] ss:$8 sps:$4 sm:$0xff]   ;;  %v1714_v4 = vld [vmem:[%s2408_s1 + $0x24] ss:$8 sps:$4 sm:$0xff]   ;;  %v1716_v9 = vld [vmem:[%s2408_s1 + $0x214] ss:$8 sps:$4 sm:$0xff]  }
  0x16   :  { %v138_v61 = vshrl.u32 %v1417_v59, 16  ;;  %v140_v62 = vshll.u32 %v1417_v59, 16  ;;  %v1720_v10 = vld [vmem:[%s2408_s1 + $0x14] ss:$8 sps:$4 sm:$0xff]   ;;  %v1718_v11 = vld [vmem:[%s2408_s1 + $0x10] ss:$8 sps:$4 sm:$0xff]  }
  0x17   :  { %405 = vmatpush1.bf16.msra.mxu0 %v1665_v23  ;;  %v133_v12 = vshll.u32 %v1416_v7, 16  ;;  %v1721_v13 = vld [vmem:[%s2408_s1 + $0x210] ss:$8 sps:$4 sm:$0xff]   ;;  %v1722_v14 = vld [vmem:[%s2408_s1 + $0x204] ss:$8 sps:$4 sm:$0xff]   ;;  %v131_v17 = vshrl.u32 %v1416_v7, 16 }
  0x18   :  { %448 = vmatpush1.bf16.msra.mxu1 %v1666_v24  ;;  %406 = vmatprep.subr.bf16.mxu0 %v1667_v25  ;;  %v142_v3 = vrot.slane %v140_v62, 1  ;;  %v1726_v15 = vld [vmem:[%s2408_s1 + $0x4] ss:$8 sps:$4 sm:$0xff]   ;;  %v1724_v16 = vld [vmem:[%s2408_s1] ss:$8 sps:$4 sm:$0xff]  }
  0x19   :  { %449 = vmatprep.subr.bf16.mxu1 %v1669_v26  ;;  %v135_v18 = vrot.slane %v133_v12, 1  ;;  %v1727_v19 = vld [vmem:[%s2408_s1 + $0x200] ss:$8 sps:$4 sm:$0xff]   ;;  %v1732_v20 = vld [vmem:[%s2408_s1 + $0xf4] ss:$8 sps:$4 sm:$0xff]  }
  0x1a   :  { %v143_v5 = vor.u32 %v142_v3, %v138_v61  ;;  %v1735_v21 = vld [vmem:[%s2408_s1 + $0x174] ss:$8 sps:$4 sm:$0xff]   ;;  %v1730_v23 = vld [vmem:[%s2408_s1 + $0xf0] ss:$8 sps:$4 sm:$0xff]   ;;  %v1738_v25 = vld [vmem:[%s2408_s1 + $0xe4] ss:$8 sps:$4 sm:$0xff]  }
  0x1b   :  { %407 = vmatpush1.bf16.msra.mxu0 %v1671_v27  ;;  %v136_v22 = vor.u32 %v135_v18, %v131_v17  ;;  %v1733_v24 = vld [vmem:[%s2408_s1 + $0x170] ss:$8 sps:$4 sm:$0xff]   ;;  %v1741_v26 = vld [vmem:[%s2408_s1 + $0x164] ss:$8 sps:$4 sm:$0xff]   ;;  %v1744_v33 = vld [vmem:[%s2408_s1 + $0xd4] ss:$8 sps:$4 sm:$0xff]  }
  0x1c   :  { %450 = vmatpush1.bf16.msra.mxu1 %v1672_v28  ;;  %408 = vmatprep.subr.bf16.mxu0 %v1673_v29  ;;  %v2123_v27 = vld [vmem:[%s2410_s0 + $0xc] sm:$0x11]  ;;  %v1736_v28 = vld [vmem:[%s2408_s1 + $0xe0] ss:$8 sps:$4 sm:$0xff]   ;;  %v17_v59 = vld [vmem:[%s2410_s0 + $0x14] sm:$0x1] }
  0x1d   :  { %451 = vmatprep.subr.bf16.mxu1 %v1675_v32  ;;  %426 = vmatprep.mubr.bf16.mxu0 %v143_v5  ;;  %v1468_v29 = vcombine.high %v2043_v56, %v2123_v27  ;;  %v1739_v32 = vld [vmem:[%s2408_s1 + $0x160] ss:$8 sps:$4 sm:$0xff]   ;;  %v1742_v35 = vld [vmem:[%s2408_s1 + $0xd0] ss:$8 sps:$4 sm:$0xff]   ;;  %v1804_v61 = vld [vmem:[%s2408_s1 + $0x474] ss:$8 sps:$4 sm:$0xff]   ;;  %v1467_v62 = vcombine.low %v2043_v56, %v2123_v27 }
  0x1e   :  { %v1745_v36 = vld [vmem:[%s2408_s1 + $0x150] ss:$8 sps:$4 sm:$0xff]   ;;  %v1751_v40 = vld [vmem:[%s2408_s1 + $0x140] ss:$8 sps:$4 sm:$0xff]   ;;  %v1786_v3 = vld [vmem:[%s2408_s1 + $0x364] ss:$8 sps:$4 sm:$0xff]  }
  0x1f   :  { %409 = vmatpush1.bf16.msra.mxu0 %v1677_v34  ;;  %v1747_v34 = vld [vmem:[%s2408_s1 + $0x154] ss:$8 sps:$4 sm:$0xff]   ;;  %v2233_v56 = vld [vmem:[%s2410_s0] sm:$0xee]  ;;  %v1793_v17 = vld [vmem:[%s2408_s1 + $0x330] ss:$8 sps:$4 sm:$0xff]  }
  0x20   :  { %452 = vmatpush1.bf16.msra.mxu1 %v1678_v37  ;;  %410 = vmatprep.subr.bf16.mxu0 %v1679_v38  ;;  %v1750_v37 = vld [vmem:[%s2408_s1 + $0xc4] ss:$8 sps:$4 sm:$0xff]   ;;  %v1808_v5 = vld [vmem:[%s2408_s1 + $0x460] ss:$8 sps:$4 sm:$0xff]   ;;  %v1789_v7 = vld [vmem:[%s2408_s1 + $0x354] ss:$8 sps:$4 sm:$0xff]  }
  0x21   :  { %731 = vmatprep.subr.bf16.mxu1 %v1683_v39  ;;  %v1753_v38 = vld [vmem:[%s2408_s1 + $0x144] ss:$8 sps:$4 sm:$0xff]   ;;  %v1748_v39 = vld [vmem:[%s2408_s1 + $0xc0] ss:$8 sps:$4 sm:$0xff]   ;;  %v1826_v18 = vld [vmem:[%s2408_s1 + $0x430] ss:$8 sps:$4 sm:$0xff]  }
  0x22   :  { %v1792_v12 = vld [vmem:[%s2408_s1 + $0x344] ss:$8 sps:$4 sm:$0xff]   ;;  %v818_v27 = vld [vmem:[%s2410_s0 + $0x8] sm:$0xe] }
  0x23   :  { %470 = vmatmul.mubr.bf16.vlgmr.msra.gmra.mxu1 %v150_v42  ;;  %411 = vmatpush2.bf16.msra.mxu0 %v1684_v43  ;;  %v1759_v42 = vld [vmem:[%s2408_s1 + $0x134] ss:$8 sps:$4 sm:$0xff]   ;;  %v1754_v43 = vld [vmem:[%s2408_s1 + $0xb0] ss:$8 sps:$4 sm:$0xff]  }
  0x24   :  { %732 = vmatpush1.bf16.msra.mxu1 %v1681_v41  ;;  %412 = vmatprep.subr.bf16.mxu0 %v1686_v44  ;;  %v1756_v41 = vld [vmem:[%s2408_s1 + $0xb4] ss:$8 sps:$4 sm:$0xff]   ;;  %v1757_v44 = vld [vmem:[%s2408_s1 + $0x130] ss:$8 sps:$4 sm:$0xff]  }
  0x25   :  { %733 = vmatprep.subr.bf16.mxu1 %v1690_v45  ;;  %763 = vmatprep.mubr.bf16.mxu1 %v1468_v29  ;;  %v1762_v45 = vld [vmem:[%s2408_s1 + $0xa4] ss:$8 sps:$4 sm:$0xff]  }
  0x26   :  { %v1846_v29 = vld [vmem:[%s2408_s1 + $0x404] ss:$8 sps:$4 sm:$0xff]  }
  0x27   :  { %413 = vmatpush2.bf16.msra.mxu0 %v1691_v47  ;;  %v1760_v47 = vld [vmem:[%s2408_s1 + $0xa0] ss:$8 sps:$4 sm:$0xff]  }
  0x28   :  { %734 = vmatpush1.bf16.msra.mxu1 %v1688_v46  ;;  %414 = vmatprep.subr.bf16.mxu0 %v1692_v48  ;;  %v1765_v46 = vld [vmem:[%s2408_s1 + $0x124] ss:$8 sps:$4 sm:$0xff]   ;;  %v1763_v48 = vld [vmem:[%s2408_s1 + $0x120] ss:$8 sps:$4 sm:$0xff]  }
  0x29   :  { %735 = vmatprep.subr.bf16.mxu1 %v1696_v49  ;;  %v1768_v49 = vld [vmem:[%s2408_s1 + $0x94] ss:$8 sps:$4 sm:$0xff]  }
  0x2b   :  { %415 = vmatpush2.bf16.msra.mxu0 %v1697_v51  ;;  %v1766_v51 = vld [vmem:[%s2408_s1 + $0x90] ss:$8 sps:$4 sm:$0xff]  }
  0x2c   :  { %736 = vmatpush1.bf16.msra.mxu1 %v1694_v50  ;;  %416 = vmatprep.subr.bf16.mxu0 %v1698_v52  ;;  %v1771_v50 = vld [vmem:[%s2408_s1 + $0x114] ss:$8 sps:$4 sm:$0xff]   ;;  %v1769_v52 = vld [vmem:[%s2408_s1 + $0x110] ss:$8 sps:$4 sm:$0xff]  }
  0x2d   :  { %737 = vmatprep.subr.bf16.mxu1 %v1702_v53  ;;  %v1774_v53 = vld [vmem:[%s2408_s1 + $0x84] ss:$8 sps:$4 sm:$0xff]  }
  0x2f   :  { %417 = vmatpush2.bf16.msra.mxu0 %v1703_v55  ;;  %v1772_v55 = vld [vmem:[%s2408_s1 + $0x80] ss:$8 sps:$4 sm:$0xff]  }
  0x30   :  { %738 = vmatpush1.bf16.msra.mxu1 %v1700_v54  ;;  %418 = vmatprep.subr.bf16.mxu0 %v1704_v58  ;;  %v1777_v54 = vld [vmem:[%s2408_s1 + $0x104] ss:$8 sps:$4 sm:$0xff]   ;;  %v1775_v58 = vld [vmem:[%s2408_s1 + $0x100] ss:$8 sps:$4 sm:$0xff]  }
  0x31   :  { %739 = vmatprep.subr.bf16.mxu1 %v1708_v60  ;;  %v1783_v60 = vld [vmem:[%s2408_s1 + $0x374] ss:$8 sps:$4 sm:$0xff]  }
  0x33   :  { %419 = vmatpush2.bf16.msra.mxu0 %v1709_v0  ;;  %v1781_v0 = vld [vmem:[%s2408_s1 + $0x370] ss:$8 sps:$4 sm:$0xff]  }
  0x34   :  { %740 = vmatpush1.bf16.msra.mxu1 %v1706_v63  ;;  %420 = vmatprep.subr.bf16.mxu0 %v1710_v2  ;;  %v1469_v63 = vcombine.low %v1974_v30, %v17_v59  ;;  %v1802_v2 = vld [vmem:[%s2408_s1 + $0x470] ss:$8 sps:$4 sm:$0xff]   ;;  %v1810_v30 = vld [vmem:[%s2408_s1 + $0x464] ss:$8 sps:$4 sm:$0xff]  }
  0x35   :  { %741 = vmatprep.subr.bf16.mxu1 %v1714_v4  ;;  %v1784_v4 = vld [vmem:[%s2408_s1 + $0x360] ss:$8 sps:$4 sm:$0xff]  }
  0x37   :  { %421 = vmatpush2.bf16.msra.mxu0 %v1715_v8  ;;  %v1816_v8 = vld [vmem:[%s2408_s1 + $0x454] ss:$8 sps:$4 sm:$0xff]  }
  0x38   :  { %742 = vmatpush1.bf16.msra.mxu1 %v1712_v6  ;;  %422 = vmatprep.subr.bf16.mxu0 %v1716_v9  ;;  %v1567_v6 = vcombine.high %v2233_v56, %v2048_v57 }
  0x39   :  { %743 = vmatprep.subr.bf16.mxu1 %v1720_v10  ;;  %v1787_v10 = vld [vmem:[%s2408_s1 + $0x350] ss:$8 sps:$4 sm:$0xff]  }
  0x3a   :  { %v877_v9 = vrot.slane %v1567_v6, 1 }
  0x3b   :  { %423 = vmatpush2.bf16.msra.mxu0 %v1721_v13  ;;  %v1790_v13 = vld [vmem:[%s2408_s1 + $0x340] ss:$8 sps:$4 sm:$0xff]  }
  0x3c   :  { %744 = vmatpush1.bf16.msra.mxu1 %v1718_v11  ;;  %424 = vmatprep.subr.bf16.mxu0 %v1722_v14  ;;  %v1814_v11 = vld [vmem:[%s2408_s1 + $0x450] ss:$8 sps:$4 sm:$0xff]   ;;  %v1820_v14 = vld [vmem:[%s2408_s1 + $0x440] ss:$8 sps:$4 sm:$0xff]  }
  0x3d   :  { %745 = vmatprep.subr.bf16.mxu1 %v1726_v15  ;;  %v1795_v15 = vld [vmem:[%s2408_s1 + $0x334] ss:$8 sps:$4 sm:$0xff]  }
  0x3f   :  { %425 = vmatpush2.bf16.msra.mxu0 %v1727_v19  ;;  %v1798_v19 = vld [vmem:[%s2408_s1 + $0x324] ss:$8 sps:$4 sm:$0xff]  }
  0x40   :  { %746 = vmatpush1.bf16.msra.mxu1 %v1724_v16  ;;  %774 = vmatprep.subr.bf16.mxu0 %v1735_v21  ;;  %v1828_v16 = vld [vmem:[%s2408_s1 + $0x434] ss:$8 sps:$4 sm:$0xff]   ;;  %v1796_v21 = vld [vmem:[%s2408_s1 + $0x320] ss:$8 sps:$4 sm:$0xff]  }
  0x41   :  { %747 = vmatprep.subr.bf16.mxu1 %v1732_v20  ;;  %v1834_v20 = vld [vmem:[%s2408_s1 + $0x424] ss:$8 sps:$4 sm:$0xff]  }
  0x42   :  { %427 = vmatmul.mubr.bf16.vlgmr.msra.gmra.mxu0 %v136_v22  ;;  %v1832_v22 = vld [vmem:[%s2408_s1 + $0x420] ss:$8 sps:$4 sm:$0xff]  }
  0x43   :  { %775 = vmatpush1.bf16.msra.mxu0 %v1733_v24  ;;  %806 = vmatprep.mubr.bf16.mxu0 %v1856_v1  ;;  %v1840_v24 = vld [vmem:[%s2408_s1 + $0x414] ss:$8 sps:$4 sm:$0xff]  }
  0x44   :  { %748 = vmatpush2.bf16.msra.mxu1 %v1730_v23  ;;  %776 = vmatprep.subr.bf16.mxu0 %v1741_v26  ;;  %v1801_v23 = vld [vmem:[%s2408_s1 + $0x314] ss:$8 sps:$4 sm:$0xff]   ;;  %v1838_v26 = vld [vmem:[%s2408_s1 + $0x410] ss:$8 sps:$4 sm:$0xff]  }
  0x45   :  { %749 = vmatprep.subr.bf16.mxu1 %v1738_v25  ;;  %v1799_v25 = vld [vmem:[%s2408_s1 + $0x310] ss:$8 sps:$4 sm:$0xff]  }
  0x47   :  { %777 = vmatpush1.bf16.msra.mxu0 %v1739_v32  ;;  %v1568_v32 = vcombine.low %v818_v27, %v1979_v31  ;;  %v1811_v31 = vld [vmem:[%s2408_s1 + $0x3f0] ss:$8 sps:$4 sm:$0xff]  }
  0x48   :  { %750 = vmatpush2.bf16.msra.mxu1 %v1736_v28  ;;  %778 = vmatprep.subr.bf16.mxu0 %v1747_v34  ;;  %v1807_v28 = vld [vmem:[%s2408_s1 + $0x304] ss:$8 sps:$4 sm:$0xff]   ;;  %v1844_v34 = vld [vmem:[%s2408_s1 + $0x400] ss:$8 sps:$4 sm:$0xff]  }
  0x49   :  { %751 = vmatprep.subr.bf16.mxu1 %v1744_v33  ;;  %v1805_v33 = vld [vmem:[%s2408_s1 + $0x300] ss:$8 sps:$4 sm:$0xff]  }
  0x4b   :  { %779 = vmatpush1.bf16.msra.mxu0 %v1745_v36  ;;  %v878_v36 = vrot.slane %v1568_v32, 1 }
  0x4c   :  { %752 = vmatpush2.bf16.msra.mxu1 %v1742_v35  ;;  %780 = vmatprep.subr.bf16.mxu0 %v1753_v38  ;;  %v1813_v35 = vld [vmem:[%s2408_s1 + $0x3f4] ss:$8 sps:$4 sm:$0xff]   ;;  %v1817_v38 = vld [vmem:[%s2408_s1 + $0x3e0] ss:$8 sps:$4 sm:$0xff]  }
  0x4d   :  { %753 = vmatprep.subr.bf16.mxu1 %v1750_v37  ;;  %v1819_v37 = vld [vmem:[%s2408_s1 + $0x3e4] ss:$8 sps:$4 sm:$0xff]  }
  0x4f   :  { %781 = vmatpush1.bf16.msra.mxu0 %v1751_v40  ;;  %v1823_v40 = vld [vmem:[%s2408_s1 + $0x3d0] ss:$8 sps:$4 sm:$0xff]  }
  0x50   :  { %754 = vmatpush2.bf16.msra.mxu1 %v1748_v39  ;;  %782 = vmatprep.subr.bf16.mxu0 %v1759_v42  ;;  %v1825_v39 = vld [vmem:[%s2408_s1 + $0x3d4] ss:$8 sps:$4 sm:$0xff]   ;;  %v1829_v42 = vld [vmem:[%s2408_s1 + $0x3c0] ss:$8 sps:$4 sm:$0xff]  }
  0x51   :  { %755 = vmatprep.subr.bf16.mxu1 %v1756_v41  ;;  %v1831_v41 = vld [vmem:[%s2408_s1 + $0x3c4] ss:$8 sps:$4 sm:$0xff]  }
  0x53   :  { %783 = vmatpush1.bf16.msra.mxu0 %v1757_v44  ;;  %v1835_v44 = vld [vmem:[%s2408_s1 + $0x3b0] ss:$8 sps:$4 sm:$0xff]  }
  0x54   :  { %756 = vmatpush2.bf16.msra.mxu1 %v1754_v43  ;;  %784 = vmatprep.subr.bf16.mxu0 %v1765_v46  ;;  %v1837_v43 = vld [vmem:[%s2408_s1 + $0x3b4] ss:$8 sps:$4 sm:$0xff]   ;;  %v1841_v46 = vld [vmem:[%s2408_s1 + $0x3a0] ss:$8 sps:$4 sm:$0xff]  }
  0x55   :  { %757 = vmatprep.subr.bf16.mxu1 %v1762_v45  ;;  %v1843_v45 = vld [vmem:[%s2408_s1 + $0x3a4] ss:$8 sps:$4 sm:$0xff]  }
  0x57   :  { %785 = vmatpush1.bf16.msra.mxu0 %v1763_v48  ;;  %v1847_v48 = vld [vmem:[%s2408_s1 + $0x390] ss:$8 sps:$4 sm:$0xff]  }
  0x58   :  { %758 = vmatpush2.bf16.msra.mxu1 %v1760_v47  ;;  %786 = vmatprep.subr.bf16.mxu0 %v1771_v50  ;;  %v1849_v47 = vld [vmem:[%s2408_s1 + $0x394] ss:$8 sps:$4 sm:$0xff]   ;;  %v1566_v50 = vcombine.low %v2233_v56, %v2048_v57 }
  0x59   :  { %759 = vmatprep.subr.bf16.mxu1 %v1768_v49  ;;  %v1853_v49 = vld [vmem:[%s2408_s1 + $0x384] ss:$8 sps:$4 sm:$0xff]  }
  0x5b   :  { %787 = vmatpush1.bf16.msra.mxu0 %v1769_v52  ;;  %v876_v52 = vrot.slane %v1566_v50, 1 }
  0x5c   :  { %760 = vmatpush2.bf16.msra.mxu1 %v1766_v51  ;;  %788 = vmatprep.subr.bf16.mxu0 %v1777_v54  ;;  %v1851_v51 = vld [vmem:[%s2408_s1 + $0x380] ss:$8 sps:$4 sm:$0xff]  }
  0x5d   :  { %761 = vmatprep.subr.bf16.mxu1 %v1774_v53  ;;  %v1227_v53 = vlaneseq }
  0x5f   :  { %789 = vmatpush1.bf16.msra.mxu0 %v1775_v58  ;;  %v2371_v54 = vshrl.u32 %v1227_v53, 7  ;;  %vm1317_vm11 = vcmp.lt.s32.totalorder %v1227_v53, 256 }
  0x60   :  { %762 = vmatpush2.bf16.msra.mxu1 %v1772_v55  ;;  %1122 = vmatprep.subr.bf16.mxu0 %v1783_v60 }
  0x61   :  { %1165 = vmatprep.subr.bf16.mxu1 %v1804_v61  ;;  %v1229_v58 = vadd.s32 8, %v2371_v54 }
  0x62   :  { %807 = vmatmul.mubr.bf16.vlgmr.msra.gmra.mxu0 %v1469_v63 }
  0x63   :  { %764 = vmatmul.mubr.bf16.vlgmr.msra.gmra.mxu1 %v1467_v62  ;;  %1123 = vmatpush1.bf16.msra.mxu0 %v1781_v0  ;;  %v2374_v60 = vmul.u32.u64.low 2863311531, %v1229_v58  ;;  %v2375_v61 = vmul.u32.u64.high 2863311531, %v1229_v58, %v2374_v60  ;;  %v2378_v62 = vmul.u32.u64.low 2863311531, %v2371_v54  ;;  %v2379_v63 = vmul.u32.u64.high 2863311531, %v2371_v54, %v2378_v62 }
  0x64   :  { %1166 = vmatpush1.bf16.msra.mxu1 %v1802_v2  ;;  %1124 = vmatprep.subr.bf16.mxu0 %v1786_v3  ;;  %vm1269_vm7 = vcmp.lt.s32.totalorder %v1229_v58, 12 }
  0x65   :  { %1167 = vmatprep.subr.bf16.mxu1 %v1810_v30  ;;  %1197 = vmatprep.mubr.bf16.mxu1 %v1856_v1  ;;  %v1822_v1 = vld [vmem:[%s2408_s1 + $0x444] ss:$8 sps:$4 sm:$0xff]   ;;  %v1247_v30 = vshrl.u32 %v2375_v61, 2 }
  0x66   :  { %1154 = vmatprep.mubr.bf16.mxu0 %v877_v9 }
  0x67   :  { %1125 = vmatpush1.bf16.msra.mxu0 %v1784_v4  ;;  %v1248_v6 = vmul.u32 6, %v1247_v30 }
  0x68   :  { %1168 = vmatpush1.bf16.msra.mxu1 %v1808_v5  ;;  %1126 = vmatprep.subr.bf16.mxu0 %v1789_v7  ;;  %v1236_v5 = vshrl.u32 %v2379_v63, 2 }
  0x69   :  { %1169 = vmatprep.subr.bf16.mxu1 %v1816_v8 }
  0x6a   :  { %v1237_v9 = vmul.u32 6, %v1236_v5 }
  0x6b   :  { %1127 = vmatpush1.bf16.msra.mxu0 %v1787_v10 }
  0x6c   :  { %1170 = vmatpush1.bf16.msra.mxu1 %v1814_v11  ;;  %1128 = vmatprep.subr.bf16.mxu0 %v1792_v12  ;;  %v1249_v11 = vsub.s32 %v1229_v58, %v1248_v6 }
  0x6d   :  { %1171 = vmatprep.subr.bf16.mxu1 %v1822_v1  ;;  %v1238_v1 = vsub.s32 %v2371_v54, %v1237_v9 }
  0x6e   :  { %vm1253_vm0 = vcmp.ne.s32.totalorder %v1249_v11, 0  ;;  %vm1255_vm1 = vcmp.lt.s32.totalorder %v1249_v11, 0 }
  0x6f   :  { %1129 = vmatpush1.bf16.msra.mxu0 %v1790_v13  ;;  %vm1252_vm2 = vcmp.ne.s32.totalorder %v1238_v1, 0  ;;  %vm1254_vm3 = vcmp.lt.s32.totalorder %v1238_v1, 0  ;;  %vm1257_vm4 = vmand %vm1255_vm1, %vm1253_vm0 }
  0x70   :  { %1172 = vmatpush1.bf16.msra.mxu1 %v1820_v14  ;;  %1130 = vmatprep.subr.bf16.mxu0 %v1795_v15  ;;  %v1259_v15 = vadd.s32 6, %v1249_v11  ;;  %vm2384_vm5 = vmand %vm1254_vm3, %vm1252_vm2 }
  0x71   :  { %1173 = vmatprep.subr.bf16.mxu1 %v1828_v16 }
  0x73   :  { %1131 = vmatpush1.bf16.msra.mxu0 %v1793_v17 }
  0x74   :  { %1174 = vmatpush1.bf16.msra.mxu1 %v1826_v18  ;;  %1132 = vmatprep.subr.bf16.mxu0 %v1798_v19  ;;  %v1258_v18 = vadd.s32 6, %v1238_v1 }
  0x75   :  { %1175 = vmatprep.subr.bf16.mxu1 %v1834_v20 }
  0x77   :  { %1133 = vmatpush1.bf16.msra.mxu0 %v1796_v21 }
  0x78   :  { %1176 = vmatpush1.bf16.msra.mxu1 %v1832_v22  ;;  %1134 = vmatprep.subr.bf16.mxu0 %v1801_v23  ;;  %v1261_v22 = vsel %vm1257_vm4, %v1259_v15, %v1249_v11 }
  0x79   :  { %1177 = vmatprep.subr.bf16.mxu1 %v1840_v24  ;;  %vm1263_vm6 = vcmp.lt.s32.totalorder %v1261_v22, 4 }
  0x7a   :  { %vm1271_vm9 = vmand %vm1263_vm6, %vm1269_vm7 }
  0x7b   :  { %1135 = vmatpush1.bf16.msra.mxu0 %v1799_v25 }
  0x7c   :  { %1178 = vmatpush1.bf16.msra.mxu1 %v1838_v26  ;;  %1136 = vmatprep.subr.bf16.mxu0 %v1807_v28  ;;  %v1260_v28 = vsel %vm2384_vm5, %v1258_v18, %v1238_v1 }
  0x7d   :  { %1179 = vmatprep.subr.bf16.mxu1 %v1846_v29  ;;  %vm1262_vm8 = vcmp.lt.s32.totalorder %v1260_v28, 4 }
  0x7f   :  { %1137 = vmatpush1.bf16.msra.mxu0 %v1805_v33 }
  0x80   :  { %1180 = vmatpush1.bf16.msra.mxu1 %v1844_v34  ;;  %1138 = vmatprep.subr.bf16.mxu0 %v1813_v35 }
  0x83   :  { %1198 = vmatmul.mubr.bf16.vlgmr.msra.gmra.mxu1 %v878_v36  ;;  %1139 = vmatpush2.bf16.msra.mxu0 %v1811_v31 }
  0x84   :  { %1140 = vmatprep.subr.bf16.mxu0 %v1819_v37 }
  0x87   :  { %1141 = vmatpush2.bf16.msra.mxu0 %v1817_v38 }
  0x88   :  { %1142 = vmatprep.subr.bf16.mxu0 %v1825_v39 }
  0x8b   :  { %1143 = vmatpush2.bf16.msra.mxu0 %v1823_v40 }
  0x8c   :  { %1144 = vmatprep.subr.bf16.mxu0 %v1831_v41 }
  0x8f   :  { %1145 = vmatpush2.bf16.msra.mxu0 %v1829_v42 }
  0x90   :  { %1146 = vmatprep.subr.bf16.mxu0 %v1837_v43  ;;  %v1857_v43 = vmov 0.0  }
  0x93   :  { %1147 = vmatpush2.bf16.msra.mxu0 %v1835_v44  ;;  %v1619_v44 = vsel %vm1262_vm8, 1.0, %v1857_v43 }
  0x94   :  { %1148 = vmatprep.subr.bf16.mxu0 %v1843_v45 }
  0x97   :  { %1149 = vmatpush2.bf16.msra.mxu0 %v1841_v46 }
  0x98   :  { %1150 = vmatprep.subr.bf16.mxu0 %v1849_v47  ;;  %v1620_v47 = vsel %vm1271_vm9, 1.0, %v1857_v43 }
  0x9b   :  { %1151 = vmatpush2.bf16.msra.mxu0 %v1847_v48 }
  0x9c   :  { %1152 = vmatprep.subr.bf16.mxu0 %v1853_v49 }
  0x9f   :  { %1153 = vmatpush2.bf16.msra.mxu0 %v1851_v51 }
  0xa2   :  { %1155 = vmatmul.mubr.bf16.vlgmr.msra.gmra.mxu0 %v876_v52 }
  0xe3   :  { %v471_v55 = vpop.f32.mrf.mxu1 }
  0xe5   :  { %v473_v59 = vpop.f32.mrf.mxu1 }
  0xe7   :  { %v475_v0 = vpop.f32.mrf.mxu1 }
  0xe9   :  { %v477_v3 = vpop.f32.mrf.mxu1 }
 0x102   :  { %v428_v57 = vpop.f32.mrf.mxu0 }
 0x103   :  { %v472_v19 = vadd.f32 %v471_v55, %v428_v57 }
 0x104   :  { %v430_v2 = vpop.f32.mrf.mxu0 }
 0x105   :  { %v474_v21 = vadd.f32 %v473_v59, %v430_v2 }
 0x106   :  { %v432_v56 = vpop.f32.mrf.mxu0 }
 0x107   :  { %v476_v25 = vadd.f32 %v475_v0, %v432_v56 }
 0x108   :  { %v434_v7 = vpop.f32.mrf.mxu0 }
 0x109   :  { %v478_v34 = vadd.f32 %v477_v3, %v434_v7 }
 0x122   :  { %v808_v10 = vpop.f32.mrf.mxu0 }
 0x123   :  { %v765_v4 = vpop.f32.mrf.mxu1 }
 0x124   :  { %v810_v13 = vpop.f32.mrf.mxu0  ;;  %v766_v23 = vadd.f32 %v765_v4, %v472_v19 }
 0x125   :  { %v767_v8 = vpop.f32.mrf.mxu1 }
 0x126   :  { %v812_v16 = vpop.f32.mrf.mxu0  ;;  %v768_v26 = vadd.f32 %v767_v8, %v474_v21  ;;  %v809_v35 = vadd.f32 %v808_v10, %v766_v23 }
 0x127   :  { %v769_v12 = vpop.f32.mrf.mxu1 }
 0x128   :  { %v814_v24 = vpop.f32.mrf.mxu0  ;;  %v770_v32 = vadd.f32 %v769_v12, %v476_v25  ;;  %v811_v31 = vadd.f32 %v810_v13, %v768_v26 }
 0x129   :  { %v771_v14 = vpop.f32.mrf.mxu1 }
 0x12a   :  { %v772_v39 = vadd.f32 %v771_v14, %v478_v34  ;;  %v813_v42 = vadd.f32 %v812_v16, %v770_v32  ;;  %v1858_v16 = vmov 1966171168  }
 0x12c   :  { %v815_v52 = vadd.f32 %v814_v24, %v772_v39 }
 0x143   :  { %v1199_v17 = vpop.f32.mrf.mxu1 }
 0x145   :  { %v1201_v27 = vpop.f32.mrf.mxu1 }
 0x147   :  { %v1203_v37 = vpop.f32.mrf.mxu1 }
 0x149   :  { %v1205_v49 = vpop.f32.mrf.mxu1 }
 0x162   :  { %v1156_v29 = vpop.f32.mrf.mxu0 }
 0x163   :  { %v1200_v33 = vadd.f32 %v1199_v17, %v1156_v29  ;;  %v1301_v17 = vunpack.c.l.s4 %v1858_v16 }
 0x164   :  { %v1158_v36 = vpop.f32.mrf.mxu0 }
 0x165   :  { %v1202_v38 = vadd.f32 %v1201_v27, %v1158_v36  ;;  %v1208_v40 = vadd.f32 %v1200_v33, %v809_v35  ;;  %v1302_v26 = vunpack.c.0.s8 %v1301_v17 }
 0x166   :  { %v1160_v41 = vpop.f32.mrf.mxu0 }
 0x167   :  { %v1209_v45 = vadd.f32 %v1202_v38, %v811_v31  ;;  %v1204_v46 = vadd.f32 %v1203_v37, %v1160_v41  ;;  %v1276_v55 = vmul.f32 %v1619_v44, %v1208_v40  ;;  %v1305_v35 = vsub.s32 %v1302_v26, %v2371_v54 }
 0x168   :  { %v1162_v48 = vpop.f32.mrf.mxu0 }
 0x169   :  { %v1622_v50 = vpack.c.bf16 %v1209_v45, %v1208_v40  ;;  %v1210_v51 = vadd.f32 %v1204_v46, %v813_v42  ;;  %v1206_v58 = vadd.f32 %v1205_v49, %v1162_v48  ;;  %v1277_v61 = vmul.f32 %v1619_v44, %v1209_v45 }
 0x16a   :  { %v1320_v63 = vmul.f32 %v1276_v55, %v1208_v40 }
 0x16b   :  { %1224 = vst [vmem:[%s2409_s2] sm:$0xff] %v1622_v50  ;;  %v1278_v59 = vmul.f32 %v1620_v47, %v1210_v51  ;;  %v1211_v60 = vadd.f32 %v1206_v58, %v815_v52  ;;  %v1321_v7 = vmul.f32 %v1277_v61, %v1209_v45 }
 0x16d   :  { %v1281_v57 = vsel %vm1280_vm10, %v1278_v59, 0.0  ;;  %v1322_v62 = vmul.f32 %v1278_v59, %v1210_v51  ;;  %v1623_v2 = vpack.c.bf16 %v1211_v60, %v1210_v51  ;;  %v1279_v3 = vmul.f32 %v1620_v47, %v1211_v60 }
 0x16e   :  { %v1282_v0 = vadd.f32 %v1281_v57, %v1276_v55 }
 0x16f   :  { %v1324_v30 = vsel %vm1280_vm10, %v1322_v62, 0.0  ;;  %1225 = vst [vmem:[%s2409_s2 + $0x8] sm:$0x11] %v1623_v2  ;;  %v1289_v5 = vsel %vm1280_vm10, %v1279_v3, 0.0  ;;  %v1323_v6 = vmul.f32 %v1279_v3, %v1211_v60 }
 0x170   :  { %v1283_v56 = vrot.slane %v1282_v0, 4  ;;  %v1325_v4 = vadd.f32 %v1324_v30, %v1320_v63  ;;  %v1290_v8 = vadd.f32 %v1289_v5, %v1277_v61 }
 0x171   :  { %v1332_v11 = vsel %vm1280_vm10, %v1323_v6, 0.0 }
 0x172   :  { %v1284_v9 = vadd.f32 %v1283_v56, %v1282_v0  ;;  %v1326_v10 = vrot.slane %v1325_v4, 4  ;;  %v1291_v12 = vrot.slane %v1290_v8, 4  ;;  %v1333_v1 = vadd.f32 %v1332_v11, %v1321_v7 }
 0x174   :  { %v1285_v13 = vrot.slane %v1284_v9, 2  ;;  %v1327_v14 = vadd.f32 %v1326_v10, %v1325_v4  ;;  %v1292_v15 = vadd.f32 %v1291_v12, %v1290_v8  ;;  %v1334_v18 = vrot.slane %v1333_v1, 4 }
 0x176   :  { %v1286_v19 = vadd.f32 %v1285_v13, %v1284_v9  ;;  %v1328_v20 = vrot.slane %v1327_v14, 2  ;;  %v1293_v21 = vrot.slane %v1292_v15, 2  ;;  %v1335_v22 = vadd.f32 %v1334_v18, %v1333_v1 }
 0x178   :  { %v1329_v23 = vadd.f32 %v1328_v20, %v1327_v14  ;;  %v1287_v24 = vrot.slane %v1286_v19, 1  ;;  %v1294_v25 = vadd.f32 %v1293_v21, %v1292_v15  ;;  %v1336_v27 = vrot.slane %v1335_v22, 2 }
 0x17a   :  { %v1330_v28 = vrot.slane %v1329_v23, 1  ;;  %v1295_v29 = vrot.slane %v1294_v25, 1  ;;  %v1337_v32 = vadd.f32 %v1336_v27, %v1335_v22  ;;  %v1288_v33 = vadd.f32 %v1287_v24, %v1286_v19 }
 0x17c   :  { %v1296_v34 = vadd.f32 %v1295_v29, %v1294_v25  ;;  %v1338_v36 = vrot.slane %v1337_v32, 1  ;;  %v1331_v31 = vadd.f32 %v1330_v28, %v1329_v23 }
 0x17e   :  { %v1299_v37 = vcombine.low %v1288_v33, %v1296_v34  ;;  %v1339_v38 = vadd.f32 %v1338_v36, %v1337_v32 }
 0x180   :  { %v1306_v39 = vrot.slane %v1299_v37, %v1305_v35  ;;  %v1342_v40 = vcombine.low %v1331_v31, %v1339_v38 }
 0x182   :  { %v1313_v41 = vrot.slane %v1306_v39, %v1305_v35  ;;  %v1349_v42 = vrot.slane %v1342_v40, %v1305_v35 }
 0x184   :  { %1319 = vst.msk [vmem:[%s2411_s3] ss:$2 sm:$0x3] %vm1317_vm11, %v1313_v41  ;;  %v1356_v43 = vrot.slane %v1349_v42, %v1305_v35 }
 0x186   :  { %1621 = vst.msk [vmem:[%s2411_s3 + $0x1] ss:$2 sm:$0x3] %vm1317_vm11, %v1356_v43 }

// kernel: image_classify_forward.13
= control target key start
LH: loop header
LB: loop body
LE: loop exit
PB: predicated region body
PF: predicated region fallthrough
CT: control target
= control target key end

     0   :  { %s1194_s1 = inlined_call_operand.vmem [shape: bf16[1024,128], index: 1, kind: input, shape index: {}]   ;;  %s1195_s0 = inlined_call_operand.vmem [shape: bf16[8,1024], index: 0, kind: input, shape index: {}]   ;;  %s1196_s2 = inlined_call_operand.vmem [shape: f32[1,128], index: 2, kind: input, shape index: {}]   ;;  %s1197_s3 = inlined_call_operand.vmem [shape: f32[8,128], index: 3, kind: output, shape index: {}]  }
   0x1   :  { %v892_v0 = vld [vmem:[%s1194_s1 + $0x78] sm:$0xff]   ;;  %v896_v4 = vld [vmem:[%s1194_s1 + $0x70] sm:$0xff]   ;;  %v900_v8 = vld [vmem:[%s1194_s1 + $0x68] sm:$0xff]  }
   0x2   :  { %v893_v1 = vld [vmem:[%s1194_s1 + $0xf8] sm:$0xff]   ;;  %804 = vmatprep.subr.bf16.mxu0 %v892_v0  ;;  %v897_v5 = vld [vmem:[%s1194_s1 + $0xf0] sm:$0xff]   ;;  %v901_v9 = vld [vmem:[%s1194_s1 + $0xe8] sm:$0xff]  }
   0x3   :  { %v894_v2 = vld [vmem:[%s1194_s1 + $0x38] sm:$0xff]   ;;  %826 = vmatprep.subr.bf16.mxu1 %v893_v1  ;;  %v898_v6 = vld [vmem:[%s1194_s1 + $0x30] sm:$0xff]   ;;  %v902_v10 = vld [vmem:[%s1194_s1 + $0x28] sm:$0xff]  }
   0x4   :  { %v895_v3 = vld [vmem:[%s1194_s1 + $0xb8] sm:$0xff]   ;;  %805 = vmatpush3.bf16.msra.mxu0 %v894_v2  ;;  %v899_v7 = vld [vmem:[%s1194_s1 + $0xb0] sm:$0xff]   ;;  %v903_v11 = vld [vmem:[%s1194_s1 + $0xa8] sm:$0xff]  }
   0x5   :  { %827 = vmatpush3.bf16.msra.mxu1 %v895_v3  ;;  %806 = vmatprep.subr.bf16.mxu0 %v896_v4  ;;  %v904_v12 = vld [vmem:[%s1194_s1 + $0x60] sm:$0xff]   ;;  %v908_v16 = vld [vmem:[%s1194_s1 + $0x58] sm:$0xff]   ;;  %v912_v20 = vld [vmem:[%s1194_s1 + $0x50] sm:$0xff]  }
   0x6   :  { %828 = vmatprep.subr.bf16.mxu1 %v897_v5  ;;  %v905_v13 = vld [vmem:[%s1194_s1 + $0xe0] sm:$0xff]   ;;  %v909_v17 = vld [vmem:[%s1194_s1 + $0xd8] sm:$0xff]   ;;  %v913_v21 = vld [vmem:[%s1194_s1 + $0xd0] sm:$0xff]  }
   0x7   :  { %v906_v14 = vld [vmem:[%s1194_s1 + $0x20] sm:$0xff]   ;;  %v910_v18 = vld [vmem:[%s1194_s1 + $0x18] sm:$0xff]   ;;  %v914_v22 = vld [vmem:[%s1194_s1 + $0x10] sm:$0xff]  }
   0x8   :  { %807 = vmatpush3.bf16.msra.mxu0 %v898_v6  ;;  %v907_v15 = vld [vmem:[%s1194_s1 + $0xa0] sm:$0xff]   ;;  %v911_v19 = vld [vmem:[%s1194_s1 + $0x98] sm:$0xff]   ;;  %v915_v23 = vld [vmem:[%s1194_s1 + $0x90] sm:$0xff]  }
   0x9   :  { %829 = vmatpush3.bf16.msra.mxu1 %v899_v7  ;;  %808 = vmatprep.subr.bf16.mxu0 %v900_v8  ;;  %v916_v24 = vld [vmem:[%s1194_s1 + $0x48] sm:$0xff]   ;;  %v920_v28 = vld [vmem:[%s1194_s1 + $0x40] sm:$0xff]   ;;  %v928_v38 = vld [vmem:[%s1194_s1 + $0x178] sm:$0xff]  }
   0xa   :  { %830 = vmatprep.subr.bf16.mxu1 %v901_v9  ;;  %v917_v25 = vld [vmem:[%s1194_s1 + $0xc8] sm:$0xff]   ;;  %v921_v29 = vld [vmem:[%s1194_s1 + $0xc0] sm:$0xff]   ;;  %v929_v39 = vld [vmem:[%s1194_s1 + $0x1f8] sm:$0xff]  }
   0xb   :  { %v918_v26 = vld [vmem:[%s1194_s1 + $0x8] sm:$0xff]   ;;  %v922_v30 = vld [vmem:[%s1194_s1] sm:$0xff]   ;;  %v930_v40 = vld [vmem:[%s1194_s1 + $0x138] sm:$0xff]  }
   0xc   :  { %809 = vmatpush3.bf16.msra.mxu0 %v902_v10  ;;  %v919_v27 = vld [vmem:[%s1194_s1 + $0x88] sm:$0xff]   ;;  %v923_v31 = vld [vmem:[%s1194_s1 + $0x80] sm:$0xff]   ;;  %v931_v41 = vld [vmem:[%s1194_s1 + $0x1b8] sm:$0xff]  }
   0xd   :  { %831 = vmatpush3.bf16.msra.mxu1 %v903_v11  ;;  %810 = vmatprep.subr.bf16.mxu0 %v904_v12  ;;  %v15_v32 = vld [vmem:[%s1195_s0] sm:$0xff]  ;;  %v16_v33 = vld [vmem:[%s1195_s0 + $0x8] sm:$0xff]  ;;  %v932_v42 = vld [vmem:[%s1194_s1 + $0x170] sm:$0xff]  }
   0xe   :  { %832 = vmatprep.subr.bf16.mxu1 %v905_v13  ;;  %v732_v34 = vcombine.low %v15_v32, %v15_v32  ;;  %v733_v35 = vcombine.high %v15_v32, %v15_v32  ;;  %v734_v36 = vcombine.low %v16_v33, %v16_v33  ;;  %v735_v37 = vcombine.high %v16_v33, %v16_v33  ;;  %v933_v43 = vld [vmem:[%s1194_s1 + $0x1f0] sm:$0xff]   ;;  %v936_v46 = vld [vmem:[%s1194_s1 + $0x168] sm:$0xff]   ;;  %v940_v50 = vld [vmem:[%s1194_s1 + $0x160] sm:$0xff]  }
   0xf   :  { %v934_v44 = vld [vmem:[%s1194_s1 + $0x130] sm:$0xff]   ;;  %v937_v47 = vld [vmem:[%s1194_s1 + $0x1e8] sm:$0xff]   ;;  %v941_v51 = vld [vmem:[%s1194_s1 + $0x1e0] sm:$0xff]  }
  0x10   :  { %811 = vmatpush3.bf16.msra.mxu0 %v906_v14  ;;  %598 = vmatprep.mubr.bf16.mxu0 %v733_v35  ;;  %v935_v45 = vld [vmem:[%s1194_s1 + $0x1b0] sm:$0xff]   ;;  %v938_v48 = vld [vmem:[%s1194_s1 + $0x128] sm:$0xff]   ;;  %v942_v52 = vld [vmem:[%s1194_s1 + $0x120] sm:$0xff]  }
  0x11   :  { %833 = vmatpush3.bf16.msra.mxu1 %v907_v15  ;;  %812 = vmatprep.subr.bf16.mxu0 %v908_v16  ;;  %v939_v49 = vld [vmem:[%s1194_s1 + $0x1a8] sm:$0xff]   ;;  %v943_v53 = vld [vmem:[%s1194_s1 + $0x1a0] sm:$0xff]   ;;  %v944_v54 = vld [vmem:[%s1194_s1 + $0x158] sm:$0xff]  }
  0x12   :  { %834 = vmatprep.subr.bf16.mxu1 %v909_v17  ;;  %638 = vmatprep.mubr.bf16.mxu1 %v735_v37  ;;  %v945_v55 = vld [vmem:[%s1194_s1 + $0x1d8] sm:$0xff]   ;;  %v948_v58 = vld [vmem:[%s1194_s1 + $0x150] sm:$0xff]   ;;  %v952_v62 = vld [vmem:[%s1194_s1 + $0x148] sm:$0xff]  }
  0x13   :  { %v946_v56 = vld [vmem:[%s1194_s1 + $0x118] sm:$0xff]   ;;  %v949_v59 = vld [vmem:[%s1194_s1 + $0x1d0] sm:$0xff]   ;;  %v953_v63 = vld [vmem:[%s1194_s1 + $0x1c8] sm:$0xff]  }
  0x14   :  { %813 = vmatpush3.bf16.msra.mxu0 %v910_v18  ;;  %v947_v57 = vld [vmem:[%s1194_s1 + $0x198] sm:$0xff]   ;;  %v950_v60 = vld [vmem:[%s1194_s1 + $0x110] sm:$0xff]   ;;  %v954_v0 = vld [vmem:[%s1194_s1 + $0x108] sm:$0xff]  }
  0x15   :  { %835 = vmatpush3.bf16.msra.mxu1 %v911_v19  ;;  %814 = vmatprep.subr.bf16.mxu0 %v912_v20  ;;  %v951_v61 = vld [vmem:[%s1194_s1 + $0x190] sm:$0xff]   ;;  %v955_v1 = vld [vmem:[%s1194_s1 + $0x188] sm:$0xff]   ;;  %v956_v2 = vld [vmem:[%s1194_s1 + $0x140] sm:$0xff]  }
  0x16   :  { %836 = vmatprep.subr.bf16.mxu1 %v913_v21  ;;  %v957_v3 = vld [vmem:[%s1194_s1 + $0x1c0] sm:$0xff]   ;;  %v17_v6 = vld [vmem:[%s1195_s0 + $0x10] sm:$0xff]  ;;  %v18_v9 = vld [vmem:[%s1195_s0 + $0x18] sm:$0xff] }
  0x17   :  { %v958_v4 = vld [vmem:[%s1194_s1 + $0x100] sm:$0xff]   ;;  %v736_v7 = vcombine.low %v17_v6, %v17_v6  ;;  %v737_v8 = vcombine.high %v17_v6, %v17_v6  ;;  %v738_v10 = vcombine.low %v18_v9, %v18_v9  ;;  %v739_v11 = vcombine.high %v18_v9, %v18_v9 }
  0x18   :  { %815 = vmatpush3.bf16.msra.mxu0 %v914_v22  ;;  %v959_v5 = vld [vmem:[%s1194_s1 + $0x180] sm:$0xff]  }
  0x19   :  { %837 = vmatpush3.bf16.msra.mxu1 %v915_v23  ;;  %816 = vmatprep.subr.bf16.mxu0 %v916_v24  ;;  %v731_v21 = vld [vmem:[%s1196_s2] ss:$0 sm:$0xff] }
  0x1a   :  { %838 = vmatprep.subr.bf16.mxu1 %v917_v25 }
  0x1c   :  { %817 = vmatpush3.bf16.msra.mxu0 %v918_v26 }
  0x1d   :  { %839 = vmatpush3.bf16.msra.mxu1 %v919_v27  ;;  %818 = vmatprep.subr.bf16.mxu0 %v920_v28 }
  0x1e   :  { %840 = vmatprep.subr.bf16.mxu1 %v921_v29 }
  0x20   :  { %819 = vmatpush3.bf16.msra.mxu0 %v922_v30 }
  0x21   :  { %841 = vmatpush3.bf16.msra.mxu1 %v923_v31  ;;  %848 = vmatprep.subr.bf16.mxu0 %v928_v38 }
  0x22   :  { %870 = vmatprep.subr.bf16.mxu1 %v929_v39 }
  0x23   :  { %599 = vmatmul.mubr.bf16.vlgmr.msra.gmra.mxu0 %v732_v34 }
  0x24   :  { %639 = vmatmul.mubr.bf16.vlgmr.msra.gmra.mxu1 %v734_v36  ;;  %849 = vmatpush3.bf16.msra.mxu0 %v930_v40 }
  0x25   :  { %871 = vmatpush3.bf16.msra.mxu1 %v931_v41  ;;  %850 = vmatprep.subr.bf16.mxu0 %v932_v42 }
  0x26   :  { %872 = vmatprep.subr.bf16.mxu1 %v933_v43  ;;  %678 = vmatprep.mubr.bf16.mxu0 %v737_v8 }
  0x27   :  { %718 = vmatprep.mubr.bf16.mxu1 %v739_v11 }
  0x28   :  { %851 = vmatpush3.bf16.msra.mxu0 %v934_v44 }
  0x29   :  { %873 = vmatpush3.bf16.msra.mxu1 %v935_v45  ;;  %852 = vmatprep.subr.bf16.mxu0 %v936_v46 }
  0x2a   :  { %874 = vmatprep.subr.bf16.mxu1 %v937_v47 }
  0x2c   :  { %853 = vmatpush3.bf16.msra.mxu0 %v938_v48 }
  0x2d   :  { %875 = vmatpush3.bf16.msra.mxu1 %v939_v49  ;;  %854 = vmatprep.subr.bf16.mxu0 %v940_v50 }
  0x2e   :  { %876 = vmatprep.subr.bf16.mxu1 %v941_v51 }
  0x30   :  { %855 = vmatpush3.bf16.msra.mxu0 %v942_v52 }
  0x31   :  { %877 = vmatpush3.bf16.msra.mxu1 %v943_v53  ;;  %856 = vmatprep.subr.bf16.mxu0 %v944_v54 }
  0x32   :  { %878 = vmatprep.subr.bf16.mxu1 %v945_v55 }
  0x34   :  { %857 = vmatpush3.bf16.msra.mxu0 %v946_v56 }
  0x35   :  { %879 = vmatpush3.bf16.msra.mxu1 %v947_v57  ;;  %858 = vmatprep.subr.bf16.mxu0 %v948_v58 }
  0x36   :  { %880 = vmatprep.subr.bf16.mxu1 %v949_v59 }
  0x38   :  { %859 = vmatpush3.bf16.msra.mxu0 %v950_v60 }
  0x39   :  { %881 = vmatpush3.bf16.msra.mxu1 %v951_v61  ;;  %860 = vmatprep.subr.bf16.mxu0 %v952_v62 }
  0x3a   :  { %882 = vmatprep.subr.bf16.mxu1 %v953_v63 }
  0x3c   :  { %861 = vmatpush3.bf16.msra.mxu0 %v954_v0 }
  0x3d   :  { %883 = vmatpush3.bf16.msra.mxu1 %v955_v1  ;;  %862 = vmatprep.subr.bf16.mxu0 %v956_v2 }
  0x3e   :  { %884 = vmatprep.subr.bf16.mxu1 %v957_v3 }
  0x40   :  { %863 = vmatpush3.bf16.msra.mxu0 %v958_v4 }
  0x41   :  { %885 = vmatpush3.bf16.msra.mxu1 %v959_v5 }
  0x43   :  { %679 = vmatmul.mubr.bf16.vlgmr.msra.gmra.mxu0 %v736_v7 }
  0x44   :  { %719 = vmatmul.mubr.bf16.vlgmr.msra.gmra.mxu1 %v738_v10 }
  0xe3   :  { %v820_v12 = vpop.f32.mrf.mxu0 }
  0xe4   :  { %v842_v13 = vpop.f32.mrf.mxu1 }
  0xe5   :  { %v821_v14 = vpop.f32.mrf.mxu0 }
  0xe6   :  { %v843_v15 = vpop.f32.mrf.mxu1  ;;  %v822_v20 = vadd.f32 %v821_v14, %v820_v12 }
  0xe7   :  { %v823_v16 = vpop.f32.mrf.mxu0  ;;  %v844_v23 = vadd.f32 %v843_v15, %v842_v13 }
  0xe8   :  { %v845_v17 = vpop.f32.mrf.mxu1  ;;  %v601_v22 = vadd.f32 %v822_v20, %v731_v21 }
  0xe9   :  { %v824_v18 = vpop.f32.mrf.mxu0 }
  0xea   :  { %v846_v19 = vpop.f32.mrf.mxu1  ;;  %v641_v28 = vadd.f32 %v844_v23, %v601_v22 }
 0x103   :  { %v864_v24 = vpop.f32.mrf.mxu0 }
 0x104   :  { %v886_v25 = vpop.f32.mrf.mxu1 }
 0x105   :  { %v865_v26 = vpop.f32.mrf.mxu0 }
 0x106   :  { %v887_v27 = vpop.f32.mrf.mxu1  ;;  %v866_v29 = vadd.f32 %v865_v26, %v864_v24 }
 0x107   :  { %v867_v30 = vpop.f32.mrf.mxu0  ;;  %v888_v33 = vadd.f32 %v887_v27, %v886_v25 }
 0x108   :  { %v889_v31 = vpop.f32.mrf.mxu1  ;;  %v681_v32 = vadd.f32 %v866_v29, %v641_v28 }
 0x109   :  { %v868_v34 = vpop.f32.mrf.mxu0 }
 0x10a   :  { %v890_v35 = vpop.f32.mrf.mxu1  ;;  %v721_v36 = vadd.f32 %v888_v33, %v681_v32 }
 0x10c   :  { %726 = vst [vmem:[%s1197_s3] sm:$0xff] %v721_v36 }

</bundles_post_ra>
